<compile_context>
chip_gen: v5e
topology: v5e:2x2
jax: 0.10.0
libtpu: 0.0.40
codegen_flags: <defaults>
</compile_context>

<pallas_src>
import functools

import jax
import jax.numpy as jnp
import numpy as np
from jax.experimental import pallas as pl
from jax.experimental.pallas import tpu as pltpu


def _rope_half_cache_kernel(invf_ref, segoff_ref, cos_ref, sin_ref, *, fold):
    """One tile of the folded, half-width rotary cos/sin cache.

    invf_ref   : (1, L) f32 constant, inv_freq[l % half]
    segoff_ref : (1, L) f32 constant, (l // half) * inv_freq[l % half]
    cos_ref/sin_ref : (rows_per_tile, L) f32 outputs.

    Row r of grid tile i, lane l holds cos/sin(p * inv_freq[j]) with
      p = (i*rows_per_tile + r)*fold + (l // half),  j = l % half.
    """
    rows = cos_ref.shape[0]
    # Integer row index (exact), then to f32. Only a (rows, 1) iota is built;
    # the (rows, L) `freqs` temporary is the single full-tile intermediate.
    row = pl.program_id(0) * rows + jax.lax.broadcasted_iota(
        jnp.int32, (rows, 1), 0
    )
    pos_base = (row * fold).astype(jnp.float32)             # (rows, 1)
    freqs = pos_base * invf_ref[...] + segoff_ref[...]      # (rows, L)
    cos_ref[...] = jnp.cos(freqs).astype(cos_ref.dtype)
    sin_ref[...] = jnp.sin(freqs).astype(sin_ref.dtype)


def _round_up(x, m):
    return (x + m - 1) // m * m


class LlamaRotaryEmbeddingPallas:
    def __init__(self, dim, max_position_embeddings=2048, base=10000):
        assert dim % 2 == 0, "rotary dim must be even"
        self.dim = dim
        self.max_position_embeddings = max_position_embeddings
        self.base = base
        self.half = dim // 2
        # Lane folding: pack `fold` consecutive positions into one 128-lane row
        # (lane-dense output) whenever dim/2 tiles 128 evenly.
        if self.half < 128 and 128 % self.half == 0:
            self.fold = 128 // self.half
        else:
            self.fold = 1
        self.lanes = self.fold * self.half

        # inv_freq = 1 / base ** (arange(0, dim, 2) / dim)
        exponent = np.arange(0, dim, 2, dtype=np.float32) / np.float32(dim)
        inv_freq = (1.0 / (np.float32(base) ** exponent)).astype(np.float32)
        self.inv_freq = jnp.asarray(inv_freq)

        # Per-lane constants for the folded layout.
        lane = np.arange(self.lanes)
        j = lane % self.half            # frequency index
        f = lane // self.half           # sub-position within a folded row
        self._invf_row = jnp.asarray(inv_freq[j][None, :], dtype=jnp.float32)
        self._segoff_row = jnp.asarray(
            (f.astype(np.float32) * inv_freq[j])[None, :], dtype=jnp.float32
        )

        # Build the cache once, like the PyTorch module.
        self._set_cos_sin_cache(max_position_embeddings)

    def _set_cos_sin_cache(self, seq_len):
        self.max_seq_len_cached = seq_len
        n_rows_needed = -(-seq_len // self.fold)             # ceil div
        rows_per_tile = min(512, _round_up(n_rows_needed, 8))
        n_rows = _round_up(n_rows_needed, rows_per_tile)
        grid = (n_rows // rows_per_tile,)
        L = self.lanes

        cos_half, sin_half = pl.pallas_call(
            functools.partial(_rope_half_cache_kernel, fold=self.fold),
            out_shape=(
                jax.ShapeDtypeStruct((n_rows, L), jnp.float32),
                jax.ShapeDtypeStruct((n_rows, L), jnp.float32),
            ),
            grid=grid,
            in_specs=[
                pl.BlockSpec((1, L), lambda i: (0, 0)),
                pl.BlockSpec((1, L), lambda i: (0, 0)),
            ],
            out_specs=(
                pl.BlockSpec((rows_per_tile, L), lambda i: (i, 0)),
                pl.BlockSpec((rows_per_tile, L), lambda i: (i, 0)),
            ),
            compiler_params=pltpu.CompilerParams(
                dimension_semantics=("parallel",)
            ),
        )(self._invf_row, self._segoff_row)

        # Un-fold to (positions, dim/2), drop row padding, duplicate the halves
        # (emb = concat(freqs, freqs)).  One-time cache-build glue in XLA.
        cos_h = cos_half.reshape(n_rows * self.fold, self.half)[:seq_len]
        sin_h = sin_half.reshape(n_rows * self.fold, self.half)[:seq_len]
        self.cos_cached = jnp.concatenate([cos_h, cos_h], axis=-1)[None, None, :, :]
        self.sin_cached = jnp.concatenate([sin_h, sin_h], axis=-1)[None, None, :, :]

    def __call__(self, x, seq_len=None):
        if seq_len is None:
            seq_len = x.shape[-2]          # fixes the broken default-arg path
        if seq_len > self.max_seq_len_cached:
            self._set_cos_sin_cache(seq_len)
        return (
            self.cos_cached[:, :, :seq_len, :].astype(x.dtype),
            self.sin_cached[:, :, :seq_len, :].astype(x.dtype),
        )


if __name__ == "__main__":
    key = jax.random.PRNGKey(0)
    batch, n_heads, seq, head_dim = 2, 4, 8, 32
    x = jax.random.normal(key, (batch, n_heads, seq, head_dim), dtype=jnp.float32)

    rope = LlamaRotaryEmbeddingPallas(dim=head_dim, max_position_embeddings=2048, base=10000)
    cos, sin = rope(x, seq_len=seq)
    cos = jax.block_until_ready(cos)
    sin = jax.block_until_ready(sin)

    # numpy (float64) reference of the exact forward semantics
    inv_freq_np = 1.0 / (10000.0 ** (np.arange(0, head_dim, 2, dtype=np.float64) / head_dim))

    def ref(s):
        t = np.arange(s, dtype=np.float64)
        fr = np.einsum("i,j->ij", t, inv_freq_np)
        emb = np.concatenate([fr, fr], axis=-1)
        return (np.cos(emb)[None, None].astype(np.float32),
                np.sin(emb)[None, None].astype(np.float32))

    cos_ref, sin_ref = ref(seq)
    assert cos.shape == (1, 1, seq, head_dim) and sin.shape == (1, 1, seq, head_dim)
    assert cos.dtype == x.dtype and sin.dtype == x.dtype
    np.testing.assert_allclose(np.asarray(cos), cos_ref, rtol=1e-5, atol=1e-5)
    np.testing.assert_allclose(np.asarray(sin), sin_ref, rtol=1e-5, atol=1e-5)

    # previously-broken default seq_len path (uses x.shape[-2])
    cos_d, sin_d = rope(x)
    np.testing.assert_allclose(np.asarray(cos_d), cos_ref, rtol=1e-5, atol=1e-5)
    np.testing.assert_allclose(np.asarray(sin_d), sin_ref, rtol=1e-5, atol=1e-5)

    # dtype-follows-x path
    cos_b, sin_b = rope(x.astype(jnp.bfloat16), seq_len=seq)
    assert cos_b.dtype == jnp.bfloat16 and sin_b.dtype == jnp.bfloat16

    # deeper slice of the 2048-long cache (larger angles -> f32-appropriate tol)
    cos128 = np.asarray(rope.cos_cached[0, 0, :128, :])
    sin128 = np.asarray(rope.sin_cached[0, 0, :128, :])
    cr, sr = ref(128)
    np.testing.assert_allclose(cos128, cr[0, 0], rtol=5e-4, atol=5e-4)
    np.testing.assert_allclose(sin128, sr[0, 0], rtol=5e-4, atol=5e-4)

    print("KERNEL_OK")
</pallas_src>

<mosaic_0001>
module attributes {stable_mosaic.version = 11 : i64} {
  func.func @_rope_half_cache_kernel(%arg0: i32, %arg1: memref<1x128xf32, #tpu.memory_space<vmem>>, %arg2: memref<1x128xf32, #tpu.memory_space<vmem>>, %arg3: memref<256x128xf32, #tpu.memory_space<vmem>>, %arg4: memref<256x128xf32, #tpu.memory_space<vmem>>) attributes {dimension_semantics = [#tpu.dimension_semantics<parallel>], iteration_bounds = array<i64: 1>, scalar_prefetch = 0 : i64, scratch_operands = 0 : i64, tpu.core_type = #tpu.core_type<tc>, window_params = [{pipeline_mode = #tpu.pipeline_mode<synchronous>, transform_indices = @transform_0, window_bounds = array<i64: 1, 128>}, {pipeline_mode = #tpu.pipeline_mode<synchronous>, transform_indices = @transform_1, window_bounds = array<i64: 1, 128>}, {transform_indices = @transform_2, window_bounds = array<i64: 256, 128>}, {transform_indices = @transform_3, window_bounds = array<i64: 256, 128>}]} {
    %c256_i32 = arith.constant 256 : i32
    %0 = arith.muli %arg0, %c256_i32 : i32
    %1 = tpu.iota {dimensions = array<i32: 0>} : vector<256x1xi32>
    %2 = vector.broadcast %0 : i32 to vector<256x1xi32>
    %3 = arith.addi %2, %1 : vector<256x1xi32>
    %c8_i32 = arith.constant 8 : i32
    %4 = vector.broadcast %c8_i32 : i32 to vector<256x1xi32>
    %5 = arith.muli %3, %4 : vector<256x1xi32>
    %6 = arith.sitofp %5 : vector<256x1xi32> to vector<256x1xf32>
    %c0 = arith.constant 0 : index
    %c0_0 = arith.constant 0 : index
    %7 = vector.load %arg1[%c0, %c0_0] : memref<1x128xf32, #tpu.memory_space<vmem>>, vector<1x128xf32>
    %8 = vector.broadcast %6 : vector<256x1xf32> to vector<256x128xf32>
    %9 = vector.broadcast %7 : vector<1x128xf32> to vector<256x128xf32>
    %10 = arith.mulf %8, %9 : vector<256x128xf32>
    %c0_1 = arith.constant 0 : index
    %c0_2 = arith.constant 0 : index
    %11 = vector.load %arg2[%c0_1, %c0_2] : memref<1x128xf32, #tpu.memory_space<vmem>>, vector<1x128xf32>
    %12 = vector.broadcast %11 : vector<1x128xf32> to vector<256x128xf32>
    %13 = arith.addf %10, %12 : vector<256x128xf32>
    %14 = math.cos %13 : vector<256x128xf32>
    %c0_3 = arith.constant 0 : index
    %c0_4 = arith.constant 0 : index
    %15 = vector.load %arg3[%c0_3, %c0_4] : memref<256x128xf32, #tpu.memory_space<vmem>>, vector<256x128xf32>
    tpu.vector_store %arg3[%c0_3, %c0_4], %14 {strides = array<i32>} : memref<256x128xf32, #tpu.memory_space<vmem>>, vector<256x128xf32>,
    %16 = math.sin %13 : vector<256x128xf32>
    %c0_5 = arith.constant 0 : index
    %c0_6 = arith.constant 0 : index
    %17 = vector.load %arg4[%c0_5, %c0_6] : memref<256x128xf32, #tpu.memory_space<vmem>>, vector<256x128xf32>
    tpu.vector_store %arg4[%c0_5, %c0_6], %16 {strides = array<i32>} : memref<256x128xf32, #tpu.memory_space<vmem>>, vector<256x128xf32>,
    return
  }
  func.func @transform_0(%arg0: i32) -> (i32, i32) {
    %c0_i32 = arith.constant 0 : i32
    %c0_i32_0 = arith.constant 0 : i32
    %c0_i32_1 = arith.constant 0 : i32
    return %c0_i32, %c0_i32_0 : i32, i32
  }
  func.func @transform_1(%arg0: i32) -> (i32, i32) {
    %c0_i32 = arith.constant 0 : i32
    %c0_i32_0 = arith.constant 0 : i32
    %c0_i32_1 = arith.constant 0 : i32
    return %c0_i32, %c0_i32_0 : i32, i32
  }
  func.func @transform_2(%arg0: i32) -> (i32, i32) {
    %c0_i32 = arith.constant 0 : i32
    %c0_i32_0 = arith.constant 0 : i32
    return %arg0, %c0_i32 : i32, i32
  }
  func.func @transform_3(%arg0: i32) -> (i32, i32) {
    %c0_i32 = arith.constant 0 : i32
    %c0_i32_0 = arith.constant 0 : i32
    return %arg0, %c0_i32 : i32, i32
  }
}

</mosaic_0001>

<bundles_post_ra>
// kernel: tpu_custom_call.1
= control target key start
LH: loop header
LB: loop body
LE: loop exit
PB: predicated region body
PF: predicated region fallthrough
CT: control target
= control target key end

     0   :  { %9 = vsyncpa [#allocation3], 0  ;;  %s15014_s0 = inlined_call_operand.hbm [shape: f32[1,128], index: 0, kind: input, shape index: {}]   ;;  %s15015_s1 = inlined_call_operand.hbm [shape: f32[1,128], index: 1, kind: input, shape index: {}]   ;;  %s15016_s2 = inlined_call_operand.hbm [shape: f32[256,128], index: 2, kind: output, shape index: {0}]   ;;  %s15017_s3 = inlined_call_operand.hbm [shape: f32[256,128], index: 3, kind: output, shape index: {1}]  }
   0x1   :  { %10 = vsyncpa [#allocation6], 0 }
   0x2   :  { %11 = vsyncpa [#allocation4], 0 }
   0x3   :  { %12 = vsyncpa [#allocation9], 0  ;;  %s18_s14 = sshll.u32 %s15014_s0, 4  ;;  %s10547_s15 = smov [#allocation2]   ;;  %s19_s14 = int_to_ptr.hbm [resolvable:$true] %s18_s14 }
   0x4   :  { %s20_s16 = sshll.u32 %s10547_s15, 4  ;;  %s29_s19 = sshll.u32 %s15015_s1, 4  ;;  %s21_s16 = int_to_ptr.vmem [resolvable:$true] %s20_s16  ;;  %s30_s19 = int_to_ptr.hbm [resolvable:$true] %s29_s19 }
   0x5   :  { %23 = dma.hbm_to_vmem [thread:$0]  %s19_s14, 16, %s21_s16, [#allocation3]  }
   0x6   :  { %s10548_s20 = smov [#allocation5]  }
   0x7   :  { %s31_s21 = sshll.u32 %s10548_s20, 4  ;;  %s32_s21 = int_to_ptr.vmem [resolvable:$true] %s31_s21 }
   0x8   :  { %34 = dma.hbm_to_vmem [thread:$0]  %s30_s19, 16, %s32_s21, [#allocation6]  }
   0x9   :  { %10539 = dma.done.wait [#allocation3], 16  }
   0xa   :  { %10540 = vsyncadd [#allocation3], 4294967280 }
   0xb   :  { %10541 = dma.done.wait [#allocation6], 16  }
   0xc   :  { %10542 = vsyncadd [#allocation6], 4294967280  ;;  %v44_v0 = vlaneseq  ;;  %s10556_s0 = smov [#allocation7]   ;;  %s10204_s24 = sshll.u32 %s15016_s2, 4  ;;  %s10205_s24 = int_to_ptr.hbm [resolvable:$true] %s10204_s24 }
   0xd   :  { %s14790_s1 = sshll.u32 %s10556_s0, 4  ;;  %s10557_s2 = smov 128   ;;  %s10203_s1 = int_to_ptr.vmem [resolvable:$true] %s14790_s1 }
   0xe   :  { %v10586_v1 = vshrl.u32 %v44_v0, 7  ;;  %s10558_s25 = smov 8   ;;  %s10559_s26 = smov [#allocation8]  }
   0xf   :  { %s10215_s27 = sshll.u32 %s10559_s26, 4  ;;  %s10217_s30 = sshll.u32 %s15017_s3, 4  ;;  %s10216_s27 = int_to_ptr.vmem [resolvable:$true] %s10215_s27  ;;  %s10218_s30 = int_to_ptr.hbm [resolvable:$true] %s10217_s30 }
  0x10   :  { %v10589_v2 = vadd.s32 8, %v10586_v1  ;;  %v10592_v3 = vadd.s32 16, %v10586_v1  ;;  %v10595_v4 = vadd.s32 24, %v10586_v1  ;;  %v10598_v5 = vadd.s32 32, %v10586_v1 }
  0x11   :  { %v10601_v6 = vadd.s32 40, %v10586_v1  ;;  %v10604_v7 = vadd.s32 48, %v10586_v1  ;;  %v10607_v8 = vadd.s32 56, %v10586_v1  ;;  %v10610_v9 = vadd.s32 64, %v10586_v1 }
  0x12   :  { %v10613_v10 = vadd.s32 72, %v10586_v1  ;;  %v10616_v11 = vadd.s32 80, %v10586_v1  ;;  %v10619_v12 = vadd.s32 88, %v10586_v1  ;;  %v10622_v13 = vadd.s32 96, %v10586_v1 }
  0x13   :  { %v10625_v14 = vadd.s32 104, %v10586_v1  ;;  %v10628_v15 = vadd.s32 112, %v10586_v1  ;;  %v10631_v16 = vadd.s32 120, %v10586_v1  ;;  %v10634_v17 = vadd.s32 128, %v10586_v1 }
  0x14   :  { %v10637_v18 = vadd.s32 136, %v10586_v1  ;;  %v10640_v19 = vadd.s32 144, %v10586_v1  ;;  %v10643_v20 = vadd.s32 152, %v10586_v1  ;;  %v10646_v21 = vadd.s32 160, %v10586_v1 }
  0x15   :  { %v10649_v22 = vadd.s32 168, %v10586_v1  ;;  %v10652_v23 = vadd.s32 176, %v10586_v1  ;;  %v10655_v24 = vadd.s32 184, %v10586_v1  ;;  %v10658_v25 = vadd.s32 192, %v10586_v1 }
  0x16   :  { %v10661_v26 = vadd.s32 200, %v10586_v1  ;;  %v10664_v27 = vadd.s32 208, %v10586_v1  ;;  %v10667_v28 = vadd.s32 216, %v10586_v1  ;;  %v10670_v29 = vadd.s32 224, %v10586_v1 }
  0x17   :  { %v10673_v30 = vadd.s32 232, %v10586_v1  ;;  %v10676_v31 = vadd.s32 240, %v10586_v1  ;;  %v10679_v32 = vadd.s32 248, %v10586_v1  ;;  %v110_v33 = vmul.u32 8, %v10586_v1 }
  0x18   :  { %v111_v34 = vmul.u32 8, %v10589_v2  ;;  %v112_v35 = vmul.u32 8, %v10592_v3  ;;  %v113_v36 = vmul.u32 8, %v10595_v4  ;;  %v114_v37 = vmul.u32 8, %v10598_v5 }
  0x19   :  { %v115_v38 = vmul.u32 8, %v10601_v6  ;;  %v116_v39 = vmul.u32 8, %v10604_v7  ;;  %v117_v40 = vmul.u32 8, %v10607_v8  ;;  %v118_v41 = vmul.u32 8, %v10610_v9 }
  0x1a   :  { %v119_v42 = vmul.u32 8, %v10613_v10  ;;  %v120_v43 = vmul.u32 8, %v10616_v11  ;;  %v121_v44 = vmul.u32 8, %v10619_v12  ;;  %v122_v45 = vmul.u32 8, %v10622_v13 }
  0x1b   :  { %v123_v46 = vmul.u32 8, %v10625_v14  ;;  %v124_v47 = vmul.u32 8, %v10628_v15  ;;  %v125_v48 = vmul.u32 8, %v10631_v16  ;;  %v126_v49 = vmul.u32 8, %v10634_v17 }
  0x1c   :  { %v127_v50 = vmul.u32 8, %v10637_v18  ;;  %v128_v51 = vmul.u32 8, %v10640_v19  ;;  %v129_v52 = vmul.u32 8, %v10643_v20  ;;  %v130_v53 = vmul.u32 8, %v10646_v21  ;;  %v10441_v21 = vld [vmem:[#allocation2] ss:$0 sm:$0xff] }
  0x1d   :  { %v131_v54 = vmul.u32 8, %v10649_v22  ;;  %v132_v55 = vmul.u32 8, %v10652_v23  ;;  %v133_v56 = vmul.u32 8, %v10655_v24  ;;  %v134_v57 = vmul.u32 8, %v10658_v25 }
  0x1e   :  { %v135_v58 = vmul.u32 8, %v10661_v26  ;;  %v136_v59 = vmul.u32 8, %v10664_v27  ;;  %v137_v60 = vmul.u32 8, %v10667_v28  ;;  %v138_v61 = vmul.u32 8, %v10670_v29 }
  0x1f   :  { %v139_v62 = vmul.u32 8, %v10673_v30  ;;  %v140_v63 = vmul.u32 8, %v10676_v31  ;;  %v141_v0 = vmul.u32 8, %v10679_v32  ;;  %v142_v1 = vcvt.s32.f32 %v110_v33 }
  0x20   :  { %v143_v2 = vcvt.s32.f32 %v111_v34  ;;  %v144_v3 = vcvt.s32.f32 %v112_v35  ;;  %v145_v4 = vcvt.s32.f32 %v113_v36  ;;  %v146_v5 = vcvt.s32.f32 %v114_v37 }
  0x21   :  { %v147_v6 = vcvt.s32.f32 %v115_v38  ;;  %v148_v7 = vcvt.s32.f32 %v116_v39  ;;  %v149_v8 = vcvt.s32.f32 %v117_v40  ;;  %v150_v9 = vcvt.s32.f32 %v118_v41 }
  0x22   :  { %v151_v10 = vcvt.s32.f32 %v119_v42  ;;  %v152_v11 = vcvt.s32.f32 %v120_v43  ;;  %v153_v12 = vcvt.s32.f32 %v121_v44  ;;  %v154_v13 = vcvt.s32.f32 %v122_v45 }
  0x23   :  { %v155_v14 = vcvt.s32.f32 %v123_v46  ;;  %v156_v15 = vcvt.s32.f32 %v124_v47  ;;  %v157_v16 = vcvt.s32.f32 %v125_v48  ;;  %v158_v17 = vcvt.s32.f32 %v126_v49 }
  0x24   :  { %v159_v18 = vcvt.s32.f32 %v127_v50  ;;  %v160_v19 = vcvt.s32.f32 %v128_v51  ;;  %v161_v20 = vcvt.s32.f32 %v129_v52  ;;  %v162_v22 = vcvt.s32.f32 %v130_v53 }
  0x25   :  { %v163_v23 = vcvt.s32.f32 %v131_v54  ;;  %v164_v24 = vcvt.s32.f32 %v132_v55  ;;  %v165_v25 = vcvt.s32.f32 %v133_v56  ;;  %v166_v26 = vcvt.s32.f32 %v134_v57  ;;  %v10442_v54 = vld [vmem:[#allocation5] ss:$0 sm:$0xff] }
  0x26   :  { %v167_v27 = vcvt.s32.f32 %v135_v58  ;;  %v168_v28 = vcvt.s32.f32 %v136_v59  ;;  %v169_v29 = vcvt.s32.f32 %v137_v60  ;;  %v170_v30 = vcvt.s32.f32 %v138_v61 }
  0x27   :  { %v171_v31 = vcvt.s32.f32 %v139_v62  ;;  %v172_v32 = vcvt.s32.f32 %v140_v63  ;;  %v173_v33 = vcvt.s32.f32 %v141_v0  ;;  %v178_v34 = vmul.f32 %v10441_v21, %v142_v1 }
  0x28   :  { %v179_v35 = vmul.f32 %v10441_v21, %v143_v2  ;;  %v181_v36 = vmul.f32 %v10441_v21, %v145_v4  ;;  %v182_v37 = vmul.f32 %v10441_v21, %v146_v5  ;;  %v183_v38 = vmul.f32 %v10441_v21, %v147_v6 }
  0x29   :  { %v184_v39 = vmul.f32 %v10441_v21, %v148_v7  ;;  %v185_v40 = vmul.f32 %v10441_v21, %v149_v8  ;;  %v186_v41 = vmul.f32 %v10441_v21, %v150_v9  ;;  %v187_v42 = vmul.f32 %v10441_v21, %v151_v10 }
  0x2a   :  { %v188_v43 = vmul.f32 %v10441_v21, %v152_v11  ;;  %v189_v44 = vmul.f32 %v10441_v21, %v153_v12  ;;  %v190_v45 = vmul.f32 %v10441_v21, %v154_v13  ;;  %v191_v46 = vmul.f32 %v10441_v21, %v155_v14 }
  0x2b   :  { %v192_v47 = vmul.f32 %v10441_v21, %v156_v15  ;;  %v193_v48 = vmul.f32 %v10441_v21, %v157_v16  ;;  %v194_v49 = vmul.f32 %v10441_v21, %v158_v17  ;;  %v195_v50 = vmul.f32 %v10441_v21, %v159_v18 }
  0x2c   :  { %v196_v51 = vmul.f32 %v10441_v21, %v160_v19  ;;  %v197_v52 = vmul.f32 %v10441_v21, %v161_v20  ;;  %v198_v53 = vmul.f32 %v10441_v21, %v162_v22  ;;  %v199_v55 = vmul.f32 %v10441_v21, %v163_v23 }
  0x2d   :  { %v200_v56 = vmul.f32 %v10441_v21, %v164_v24  ;;  %v201_v57 = vmul.f32 %v10441_v21, %v165_v25  ;;  %v202_v58 = vmul.f32 %v10441_v21, %v166_v26  ;;  %v203_v59 = vmul.f32 %v10441_v21, %v167_v27 }
  0x2e   :  { %v204_v60 = vmul.f32 %v10441_v21, %v168_v28  ;;  %v205_v61 = vmul.f32 %v10441_v21, %v169_v29  ;;  %v206_v62 = vmul.f32 %v10441_v21, %v170_v30  ;;  %v180_v63 = vmul.f32 %v10441_v21, %v144_v3 }
  0x2f   :  { %v207_v0 = vmul.f32 %v10441_v21, %v171_v31  ;;  %v208_v1 = vmul.f32 %v10441_v21, %v172_v32  ;;  %v209_v2 = vmul.f32 %v10441_v21, %v173_v33  ;;  %v10713_v4 = vadd.f32 %v10442_v54, %v178_v34 }
  0x30   :  { %v10715_v5 = vadd.f32 %v10442_v54, %v179_v35  ;;  %v10717_v6 = vadd.f32 %v10442_v54, %v181_v36  ;;  %v10719_v7 = vadd.f32 %v10442_v54, %v182_v37  ;;  %v10721_v8 = vadd.f32 %v10442_v54, %v183_v38 }
  0x31   :  { %15299 = vst [vmem:[#allocation14_spill] sm:$0xff] %v10713_v4  ;;  %v10723_v9 = vadd.f32 %v10442_v54, %v184_v39  ;;  %v10725_v10 = vadd.f32 %v10442_v54, %v185_v40  ;;  %v10727_v11 = vadd.f32 %v10442_v54, %v186_v41  ;;  %v10729_v3 = vadd.f32 %v10442_v54, %v187_v42 }
  0x32   :  { %15300 = vst [vmem:[#allocation15_spill] sm:$0xff] %v10715_v5  ;;  %v10731_v12 = vadd.f32 %v10442_v54, %v188_v43  ;;  %v10733_v13 = vadd.f32 %v10442_v54, %v189_v44  ;;  %v10735_v14 = vadd.f32 %v10442_v54, %v190_v45  ;;  %v10737_v15 = vadd.f32 %v10442_v54, %v191_v46 }
  0x33   :  { %15301 = vst [vmem:[#allocation16_spill] sm:$0xff] %v10717_v6  ;;  %v10739_v16 = vadd.f32 %v10442_v54, %v192_v47  ;;  %v10741_v17 = vadd.f32 %v10442_v54, %v193_v48  ;;  %v10743_v18 = vadd.f32 %v10442_v54, %v194_v49  ;;  %v10745_v19 = vadd.f32 %v10442_v54, %v195_v50 }
  0x34   :  { %15302 = vst [vmem:[#allocation17_spill] sm:$0xff] %v10719_v7  ;;  %v10747_v20 = vadd.f32 %v10442_v54, %v196_v51  ;;  %v10749_v21 = vadd.f32 %v10442_v54, %v197_v52  ;;  %v10751_v22 = vadd.f32 %v10442_v54, %v198_v53  ;;  %v10753_v23 = vadd.f32 %v10442_v54, %v199_v55 }
  0x35   :  { %15303 = vst [vmem:[#allocation18_spill] sm:$0xff] %v10723_v9  ;;  %v10755_v24 = vadd.f32 %v10442_v54, %v200_v56  ;;  %v10757_v25 = vadd.f32 %v10442_v54, %v201_v57  ;;  %v10759_v26 = vadd.f32 %v10442_v54, %v202_v58  ;;  %v10761_v27 = vadd.f32 %v10442_v54, %v203_v59 }
  0x36   :  { %15304 = vst [vmem:[#allocation19_spill] sm:$0xff] %v10725_v10  ;;  %v10763_v28 = vadd.f32 %v10442_v54, %v204_v60  ;;  %v10765_v29 = vadd.f32 %v10442_v54, %v205_v61  ;;  %v10767_v30 = vadd.f32 %v10442_v54, %v206_v62  ;;  %v10769_v31 = vadd.f32 %v10442_v54, %v207_v0 }
  0x37   :  { %15305 = vst [vmem:[#allocation20_spill] sm:$0xff] %v10727_v11  ;;  %v10771_v32 = vadd.f32 %v10442_v54, %v208_v1  ;;  %v10773_v33 = vadd.f32 %v10442_v54, %v209_v2  ;;  %v15019_v34 = vand.u32 2147483647, %v10713_v4  ;;  %v249_v35 = vand.u32 2139095040, %v10713_v4 }
  0x38   :  { %15306 = vst [vmem:[#allocation21_spill] sm:$0xff] %v10729_v3  ;;  %v10779_v38 = vadd.f32 %v10442_v54, %v180_v63  ;;  %v15018_v40 = vand.u32 2147483647, %v10715_v5  ;;  %v403_v41 = vand.u32 2139095040, %v10715_v5  ;;  %v15030_v57 = vmov 683565275  }
  0x39   :  { %15307 = vst [vmem:[#allocation22_spill] sm:$0xff] %v10731_v12  ;;  %v253_v36 = vand.u32 8388607, %v15019_v34  ;;  %v250_v37 = vshrl.u32 %v249_v35, 23  ;;  %v15026_v59 = vmov 2475754826  }
  0x3a   :  { %15308 = vst [vmem:[#allocation23_spill] sm:$0xff] %v10733_v13  ;;  %v404_v43 = vshrl.u32 %v403_v41, 23  ;;  %v407_v47 = vand.u32 8388607, %v15018_v40  ;;  %v557_v48 = vand.u32 2139095040, %v10779_v38 }
  0x3b   :  { %15309 = vst [vmem:[#allocation24_spill] sm:$0xff] %v10735_v14  ;;  %v254_v39 = vor.u32 8388608, %v253_v36  ;;  %v10236_v42 = vadd.s32 4294967169, %v250_v37  ;;  %v15020_v61 = vmov 2131351028  }
  0x3c   :  { %15310 = vst [vmem:[#allocation25_spill] sm:$0xff] %v10737_v15  ;;  %v10239_v46 = vadd.s32 4294967169, %v404_v43  ;;  %v408_v54 = vor.u32 8388608, %v407_v47  ;;  %v10791_v55 = vshrl.u32 %v557_v48, 23  ;;  %v15022_v63 = vmov 2102212464  }
  0x3d   :  { %15311 = vst [vmem:[#allocation26_spill] sm:$0xff] %v10739_v16  ;;  %v256_v44 = vadd.s32 1, %v10236_v42  ;;  %v10783_v45 = vshll.u32 %v254_v39, 8  ;;  %v15024_v1 = vmov 920167782  }
  0x3e   :  { %15312 = vst [vmem:[#allocation27_spill] sm:$0xff] %v10741_v17  ;;  %v410_v50 = vadd.s32 1, %v10239_v46  ;;  %v15028_v42 = vmov 1326507024  }
  0x3f   :  { %15313 = vst [vmem:[#allocation28_spill] sm:$0xff] %v10743_v18  ;;  %vm257_vm0 = vcmp.gt.s32.totalorder %v256_v44, 0  ;;  %v10789_v53 = vand.u32 65535, %v10783_v45 }
  0x40   :  { %15314 = vst [vmem:[#allocation29_spill] sm:$0xff] %v10745_v19  ;;  %v258_v49 = vsel %vm257_vm0, %v256_v44, 0  ;;  %vm411_vm2 = vcmp.gt.s32.totalorder %v410_v50, 0 }
  0x41   :  { %15315 = vst [vmem:[#allocation30_spill] sm:$0xff] %v10747_v20  ;;  %v259_v51 = vshrl.u32 %v258_v49, 5  ;;  %v260_v52 = vand.u32 31, %v258_v49  ;;  %v412_v48 = vsel %vm411_vm2, %v410_v50, 0 }
  0x42   :  { %15316 = vst [vmem:[#allocation31_spill] sm:$0xff] %v10749_v21  ;;  %v10804_v40 = vand.u32 31, %v412_v48 }
  0x43   :  { %15317 = vst [vmem:[#allocation32_spill] sm:$0xff] %v10751_v22  ;;  %v261_v56 = vsub.s32 32, %v260_v52  ;;  %v263_v58 = vshll.u32 %v15030_v57, %v260_v52  ;;  %v266_v60 = vshll.u32 %v15026_v59, %v260_v52  ;;  %v269_v62 = vshll.u32 %v15020_v61, %v260_v52 }
  0x44   :  { %15318 = vst [vmem:[#allocation33_spill] sm:$0xff] %v10753_v23  ;;  %v272_v0 = vshll.u32 %v15022_v63, %v260_v52  ;;  %v275_v2 = vshll.u32 %v15024_v1, %v260_v52  ;;  %vm278_vm1 = vcmp.lt.s32.totalorder %v259_v51, 1  ;;  %vm279_vm3 = vcmp.lt.s32.totalorder %v259_v51, 2 }
  0x45   :  { %15319 = vst [vmem:[#allocation34_spill] sm:$0xff] %v10755_v24  ;;  %v262_v35 = vshrl.u32 %v15030_v57, %v261_v56  ;;  %v264_v36 = vshrl.u32 %v15026_v59, %v261_v56  ;;  %v267_v37 = vshrl.u32 %v15020_v61, %v261_v56  ;;  %v270_v39 = vshrl.u32 %v15022_v63, %v261_v56 }
  0x46   :  { %15320 = vst [vmem:[#allocation35_spill] sm:$0xff] %v10757_v25  ;;  %v273_v41 = vshrl.u32 %v15024_v1, %v261_v56  ;;  %v276_v43 = vshrl.u32 %v15028_v42, %v261_v56  ;;  %vm281_vm4 = vcmp.lt.s32.totalorder %v259_v51, 4  ;;  %vm280_vm5 = vcmp.lt.s32.totalorder %v259_v51, 3 }
  0x47   :  { %15321 = vst [vmem:[#allocation36_spill] sm:$0xff] %v10759_v26  ;;  %v265_v44 = vor.u32 %v264_v36, %v263_v58  ;;  %v268_v46 = vor.u32 %v267_v37, %v266_v60  ;;  %v271_v47 = vor.u32 %v270_v39, %v269_v62  ;;  %v10810_v58 = vsub.s32 32, %v10804_v40 }
  0x48   :  { %15322 = vst [vmem:[#allocation37_spill] sm:$0xff] %v10761_v27  ;;  %v274_v49 = vor.u32 %v273_v41, %v272_v0  ;;  %v277_v52 = vor.u32 %v276_v43, %v275_v2  ;;  %v296_v62 = vshrl.u32 %v10783_v45, 16  ;;  %v10813_v0 = vshll.u32 %v408_v54, 8 }
  0x49   :  { %15323 = vst [vmem:[#allocation38_spill] sm:$0xff] %v10763_v28  ;;  %v282_v34 = vsel %vm278_vm1, %v262_v35, %v265_v44  ;;  %v283_v61 = vsel %vm281_vm4, %v271_v47, 2102212464  ;;  %v286_v63 = vsel %vm278_vm1, %v265_v44, %v268_v46  ;;  %v290_v1 = vsel %vm278_vm1, %v268_v46, %v271_v47 }
  0x4a   :  { %15324 = vst [vmem:[#allocation39_spill] sm:$0xff] %v10765_v29  ;;  %v284_v59 = vsel %vm280_vm5, %v268_v46, %v283_v61  ;;  %v287_v56 = vsel %vm281_vm4, %v274_v49, 920167782  ;;  %v291_v42 = vsel %vm281_vm4, %v277_v52, 1326507024  ;;  %v10820_v37 = vshrl.u32 %v412_v48, 5 }
  0x4b   :  { %15325 = vst [vmem:[#allocation40_spill] sm:$0xff] %v10767_v30  ;;  %v288_v60 = vsel %vm280_vm5, %v271_v47, %v287_v56  ;;  %v292_v50 = vsel %vm280_vm5, %v274_v49, %v291_v42  ;;  %v10816_v2 = vsel %vm279_vm3, %v282_v34, %v284_v59  ;;  %v417_v42 = vshll.u32 %v15030_v57, %v10804_v40 }
  0x4c   :  { %15326 = vst [vmem:[#allocation41_spill] sm:$0xff] %v10769_v31  ;;  %v289_v35 = vsel %vm279_vm3, %v286_v63, %v288_v60  ;;  %v293_v36 = vsel %vm279_vm3, %v290_v1, %v292_v50  ;;  %v15330_v44 = vmov 2475754826   ;;  %v15331_v59 = vmov 2131351028  }
  0x4d   :  { %15327 = vst [vmem:[#allocation42_spill] sm:$0xff] %v10771_v32  ;;  %v297_v61 = vand.u32 65535, %v293_v36  ;;  %v298_v39 = vshrl.u32 %v293_v36, 16  ;;  %v319_v41 = vand.u32 65535, %v289_v35  ;;  %v320_v43 = vshrl.u32 %v289_v35, 16 }
  0x4e   :  { %15328 = vst [vmem:[#allocation43_spill] sm:$0xff] %v10773_v33  ;;  %v418_v54 = vshrl.u32 %v15330_v44, %v10810_v58  ;;  %v420_v34 = vshll.u32 %v15330_v44, %v10804_v40  ;;  %v421_v63 = vshrl.u32 %v15331_v59, %v10810_v58  ;;  %v423_v47 = vshll.u32 %v15331_v59, %v10804_v40 }
  0x4f   :  { %15329 = vst [vmem:[#allocation44_spill] sm:$0xff] %v10779_v38  ;;  %v299_v51 = vmul.u32 %v297_v61, %v10789_v53  ;;  %v300_v1 = vmul.u32 %v298_v39, %v10789_v53  ;;  %v301_v46 = vmul.u32 %v297_v61, %v296_v62  ;;  %v302_v48 = vmul.u32 %v298_v39, %v296_v62 }
  0x50   :  { %v321_v49 = vmul.u32 %v319_v41, %v10789_v53  ;;  %v322_v52 = vmul.u32 %v320_v43, %v10789_v53  ;;  %v323_v56 = vmul.u32 %v319_v41, %v296_v62  ;;  %v324_v36 = vmul.u32 %v320_v43, %v296_v62 }
  0x51   :  { %v303_v60 = vshll.u32 %v300_v1, 16  ;;  %v304_v50 = vshrl.u32 %v300_v1, 16  ;;  %v305_v35 = vshll.u32 %v301_v46, 16  ;;  %v306_v57 = vshrl.u32 %v301_v46, 16 }
  0x52   :  { %v325_v33 = vshll.u32 %v322_v52, 16  ;;  %v326_v32 = vshrl.u32 %v322_v52, 16  ;;  %v327_v31 = vshll.u32 %v323_v56, 16  ;;  %v328_v61 = vshrl.u32 %v323_v56, 16 }
  0x53   :  { %vm307_vm6 = vc.u32 %v299_v51, %v303_v60  ;;  %v309_v30 = vadd.s32 %v303_v60, %v299_v51  ;;  %v10836_v29 = vor.u32 %v418_v54, %v417_v42  ;;  %v15039_v28 = vmov 0  }
  0x54   :  { %v308_v39 = vsel %vm307_vm6, 1, %v15039_v28  ;;  %vm329_vm7 = vc.u32 %v321_v49, %v325_v33  ;;  %v331_v27 = vadd.s32 %v325_v33, %v321_v49  ;;  %v15332_v53 = vmov 2102212464  }
  0x55   :  { %v424_v41 = vshrl.u32 %v15332_v53, %v10810_v58  ;;  %v310_v1 = vadd.s32 %v308_v39, %v302_v48  ;;  %vm311_vm8 = vc.u32 %v309_v30, %v305_v35  ;;  %v330_v62 = vsel %vm329_vm7, 1, %v15039_v28 }
  0x56   :  { %v426_v43 = vshll.u32 %v15332_v53, %v10804_v40  ;;  %v312_v51 = vsel %vm311_vm8, 1, %v15039_v28  ;;  %v332_v46 = vadd.s32 %v330_v62, %v324_v36  ;;  %vm333_vm9 = vc.u32 %v331_v27, %v327_v31 }
  0x57   :  { %v10845_v42 = vor.u32 %v421_v63, %v420_v34  ;;  %v314_v54 = vadd.s32 %v312_v51, %v310_v1  ;;  %v334_v52 = vsel %vm333_vm9, 1, %v15039_v28  ;;  %v425_v33 = vor.u32 %v424_v41, %v423_v47 }
  0x58   :  { %v15333_v49 = vmov 920167782   ;;  %v336_v48 = vadd.s32 %v334_v52, %v332_v46  ;;  %v15334_v60 = vmov 1326507024   ;;  %vm432_vm10 = vcmp.lt.s32.totalorder %v10820_v37, 1 }
  0x59   :  { %v427_v56 = vshrl.u32 %v15333_v49, %v10810_v58  ;;  %v429_v30 = vshll.u32 %v15333_v49, %v10804_v40  ;;  %v430_v35 = vshrl.u32 %v15334_v60, %v10810_v58  ;;  %v315_v36 = vadd.s32 %v314_v54, %v304_v50 }
  0x5a   :  { %v10855_v39 = vadd.s32 %v331_v27, %v327_v31  ;;  %vm434_vm11 = vcmp.lt.s32.totalorder %v10820_v37, 3  ;;  %v337_v63 = vadd.s32 %v336_v48, %v326_v32  ;;  %vm433_vm12 = vcmp.lt.s32.totalorder %v10820_v37, 2 }
  0x5b   :  { %v428_v34 = vor.u32 %v427_v56, %v426_v43  ;;  %v431_v47 = vor.u32 %v430_v35, %v429_v30  ;;  %vm435_vm13 = vcmp.lt.s32.totalorder %v10820_v37, 4  ;;  %v10860_v41 = vadd.s32 %v315_v36, %v306_v57 }
  0x5c   :  { %v440_v40 = vsel %vm432_vm10, %v10836_v29, %v10845_v42  ;;  %v10242_v31 = vadd.s32 4294967169, %v10791_v55  ;;  %v338_v50 = vadd.s32 %v337_v63, %v328_v61  ;;  %v449_v1 = vand.u32 65535, %v10813_v0 }
  0x5d   :  { %v441_v27 = vsel %vm435_vm13, %v428_v34, 920167782  ;;  %v450_v62 = vshrl.u32 %v10813_v0, 16  ;;  %v339_v57 = vmul.u32 %v10783_v45, %v10816_v2  ;;  %vm341_vm14 = vc.u32 %v10860_v41, %v10855_v39 }
  0x5e   :  { %v442_v32 = vsel %vm434_vm11, %v425_v33, %v441_v27  ;;  %v444_v55 = vsel %vm432_vm10, %v10845_v42, %v425_v33  ;;  %v342_v61 = vadd.s32 1, %v338_v50  ;;  %v445_v51 = vsel %vm435_vm13, %v431_v47, 1326507024 }
  0x5f   :  { %v443_v43 = vsel %vm433_vm12, %v440_v40, %v442_v32  ;;  %v446_v52 = vsel %vm434_vm11, %v428_v34, %v445_v51  ;;  %v15335_v2 = vmov 683565275   ;;  %v564_v47 = vadd.s32 1, %v10242_v31 }
  0x60   :  { %v473_v46 = vand.u32 65535, %v443_v43  ;;  %v474_v54 = vshrl.u32 %v443_v43, 16  ;;  %v343_v45 = vsel %vm341_vm14, %v342_v61, %v338_v50  ;;  %v416_v56 = vshrl.u32 %v15335_v2, %v10810_v58 }
  0x61   :  { %v447_v48 = vsel %vm433_vm12, %v444_v55, %v446_v52  ;;  %v344_v35 = vadd.s32 %v343_v45, %v339_v57  ;;  %v437_v58 = vsel %vm435_vm13, %v425_v33, 2102212464  ;;  %vm565_vm0 = vcmp.gt.s32.totalorder %v564_v47, 0 }
  0x62   :  { %v476_v30 = vmul.u32 %v474_v54, %v449_v1  ;;  %v451_v36 = vand.u32 65535, %v447_v48  ;;  %v452_v63 = vshrl.u32 %v447_v48, 16  ;;  %v475_v40 = vmul.u32 %v473_v46, %v449_v1 }
  0x63   :  { %v477_v27 = vmul.u32 %v473_v46, %v450_v62  ;;  %v345_v28 = vadd.s32 536870912, %v344_v35  ;;  %v436_v34 = vsel %vm432_vm10, %v416_v56, %v10836_v29  ;;  %v478_v31 = vmul.u32 %v474_v54, %v450_v62 }
  0x64   :  { %v479_v32 = vshll.u32 %v476_v30, 16  ;;  %v453_v43 = vmul.u32 %v451_v36, %v449_v1  ;;  %v454_v26 = vmul.u32 %v452_v63, %v449_v1  ;;  %v455_v25 = vmul.u32 %v451_v36, %v450_v62 }
  0x65   :  { %v481_v50 = vshll.u32 %v477_v27, 16  ;;  %v10896_v55 = vshrl.u32 %v345_v28, 30  ;;  %v456_v61 = vmul.u32 %v452_v63, %v450_v62  ;;  %v438_v29 = vsel %vm434_vm11, %v10845_v42, %v437_v58 }
  0x66   :  { %v457_v51 = vshll.u32 %v454_v26, 16  ;;  %v459_v46 = vshll.u32 %v455_v25, 16  ;;  %vm483_vm15 = vc.u32 %v475_v40, %v479_v32  ;;  %v485_v52 = vadd.s32 %v479_v32, %v475_v40 }
  0x67   :  { %v347_v1 = vshll.u32 %v10896_v55, 30  ;;  %v458_v45 = vshrl.u32 %v454_v26, 16  ;;  %v15336_v56 = vmov 0   ;;  %v566_v62 = vsel %vm565_vm0, %v564_v47, 0 }
  0x68   :  { %vm461_vm1 = vc.u32 %v453_v43, %v457_v51  ;;  %v463_v33 = vadd.s32 %v457_v51, %v453_v43  ;;  %v484_v28 = vsel %vm483_vm15, 1, %v15336_v56  ;;  %vm487_vm2 = vc.u32 %v485_v52, %v481_v50 }
  0x69   :  { %v462_v48 = vsel %vm461_vm1, 1, %v15336_v56  ;;  %v348_v36 = vsub.s32 %v344_v35, %v347_v1  ;;  %v480_v40 = vshrl.u32 %v476_v30, 16  ;;  %v486_v32 = vadd.s32 %v484_v28, %v478_v31 }
  0x6a   :  { %v464_v63 = vadd.s32 %v462_v48, %v456_v61  ;;  %vm465_vm3 = vc.u32 %v463_v33, %v459_v46  ;;  %v488_v57 = vsel %vm487_vm2, 1, %v15336_v56  ;;  %v460_v58 = vshrl.u32 %v455_v25, 16 }
  0x6b   :  { %v466_v54 = vsel %vm465_vm3, 1, %v15336_v56  ;;  %vm349_vm4 = vcmp.lt.s32.totalorder %v348_v36, 0  ;;  %v350_v42 = vsub.s32 0, %v348_v36  ;;  %v482_v26 = vshrl.u32 %v477_v27, 16 }
  0x6c   :  { %v468_v43 = vadd.s32 %v466_v54, %v464_v63  ;;  %v490_v51 = vadd.s32 %v488_v57, %v486_v32  ;;  %v15337_v24 = vand.u32 2147483647, %v10779_v38  ;;  %v568_v22 = vand.u32 31, %v566_v62 }
  0x6d   :  { %v351_v35 = vsel %vm349_vm4, %v350_v42, %v348_v36  ;;  %v439_v47 = vsel %vm433_vm12, %v436_v34, %v438_v29  ;;  %v10910_v30 = vadd.s32 %v485_v52, %v481_v50  ;;  %vm248_vm5 = vcmp.lt.s32.totalorder %v10713_v4, 0 }
  0x6e   :  { %v561_v23 = vand.u32 8388607, %v15337_v24  ;;  %v469_v61 = vadd.s32 %v468_v43, %v458_v45  ;;  %v352_v46 = vclz %v351_v35  ;;  %v491_v31 = vadd.s32 %v490_v51, %v480_v40 }
  0x6f   :  { %v569_v1 = vsub.s32 32, %v568_v22  ;;  %v340_v25 = vadd.s32 %v10855_v39, %v10860_v41  ;;  %v493_v48 = vmul.u32 %v10813_v0, %v439_v47  ;;  %v10918_v37 = vshrl.u32 %v566_v62, 5 }
  0x70   :  { %v10912_v33 = vadd.s32 %v469_v61, %v460_v58  ;;  %v10237_v27 = vadd.s32 4294967294, %v352_v46  ;;  %v492_v24 = vadd.s32 %v491_v31, %v482_v26  ;;  %v562_v57 = vor.u32 8388608, %v561_v23 }
  0x71   :  { %v571_v34 = vshll.u32 %v15335_v2, %v568_v22  ;;  %v574_v50 = vshll.u32 %v15330_v44, %v568_v22  ;;  %v572_v29 = vshrl.u32 %v15330_v44, %v569_v1  ;;  %v15338_v39 = vand.u32 2147483647, %v10713_v4 }
  0x72   :  { %vm10238_vm6 = vcmp.lt.s32.totalorder %v10237_v27, 0  ;;  %vm495_vm7 = vc.u32 %v10912_v33, %v10910_v30  ;;  %v496_v52 = vadd.s32 1, %v492_v24  ;;  %v575_v0 = vshrl.u32 %v15331_v59, %v569_v1 }
  0x73   :  { %vm10927_vm8 = vcmp.le.f32.partialorder %v15338_v39, 0.7853982  ;;  %v355_v23 = vsel %vm10238_vm6, 0, %v10237_v27  ;;  %v577_v45 = vshll.u32 %v15331_v59, %v568_v22  ;;  %v580_v28 = vshll.u32 %v15332_v53, %v568_v22 }
  0x74   :  { %v356_v63 = vsub.s32 32, %v355_v23  ;;  %v357_v62 = vshll.u32 %v348_v36, %v355_v23  ;;  %v360_v54 = vsub.s32 4294967266, %v355_v23  ;;  %v578_v40 = vshrl.u32 %v15332_v53, %v569_v1 }
  0x75   :  { %v370_v32 = vsub.s32 4, %v10896_v55  ;;  %v497_v42 = vsel %vm495_vm7, %v496_v52, %v492_v24  ;;  %v581_v58 = vshrl.u32 %v15333_v49, %v569_v1  ;;  %vm586_vm9 = vcmp.lt.s32.totalorder %v10918_v37, 1 }
  0x76   :  { %v358_v43 = vshrl.u32 %v340_v25, %v356_v63  ;;  %v361_v26 = vadd.s32 127, %v360_v54  ;;  %v498_v51 = vadd.s32 %v497_v42, %v493_v48  ;;  %v573_v35 = vor.u32 %v572_v29, %v571_v34 }
  0x77   :  { %v576_v47 = vor.u32 %v575_v0, %v574_v50  ;;  %v582_v61 = vor.u32 %v581_v58, %v580_v28  ;;  %v583_v46 = vshll.u32 %v15333_v49, %v568_v22  ;;  %v584_v36 = vshrl.u32 %v15334_v60, %v569_v1 }
  0x78   :  { %v359_v31 = vor.u32 %v358_v43, %v357_v62  ;;  %v362_v27 = vshll.u32 %v361_v26, 23  ;;  %v499_v39 = vadd.s32 536870912, %v498_v51  ;;  %v579_v23 = vor.u32 %v578_v40, %v577_v45 }
  0x79   :  { %v371_v24 = vsel %vm248_vm5, %v370_v32, %v10896_v55  ;;  %v585_v52 = vor.u32 %v584_v36, %v583_v46  ;;  %vm589_vm10 = vcmp.lt.s32.totalorder %v10918_v37, 4  ;;  %v10944_v25 = vshll.u32 %v562_v57, 8 }
  0x7a   :  { %v363_v48 = vor.u32 4788187, %v362_v27  ;;  %v366_v34 = vcvt.s32.f32 %v359_v31  ;;  %v10946_v50 = vshrl.u32 %v499_v39, 30  ;;  %vm588_vm11 = vcmp.lt.s32.totalorder %v10918_v37, 3 }
  0x7b   :  { %vm587_vm12 = vcmp.lt.s32.totalorder %v10918_v37, 2  ;;  %v594_v22 = vsel %vm586_vm9, %v573_v35, %v576_v47  ;;  %v595_v29 = vsel %vm589_vm10, %v582_v61, 920167782  ;;  %v599_v55 = vsel %vm589_vm10, %v585_v52, 1326507024 }
  0x7c   :  { %v364_v0 = vand.u32 2147483647, %v363_v48  ;;  %v10958_v57 = vsel %vm10927_vm8, 0, %v371_v24  ;;  %v501_v45 = vshll.u32 %v10946_v50, 30  ;;  %v598_v28 = vsel %vm586_vm9, %v576_v47, %v579_v23 }
  0x7d   :  { %15341 = vst [vmem:[#allocation45_spill] sm:$0xff] %v10958_v57  ;;  %v570_v63 = vshrl.u32 %v15335_v2, %v569_v1  ;;  %v596_v62 = vsel %vm588_vm11, %v579_v23, %v595_v29  ;;  %v600_v54 = vsel %vm588_vm11, %v582_v61, %v599_v55  ;;  %v603_v40 = vand.u32 65535, %v10944_v25 }
  0x7e   :  { %v367_v32 = vmul.f32 %v366_v34, %v364_v0  ;;  %v10969_v42 = vsub.s32 %v498_v51, %v501_v45  ;;  %v591_v58 = vsel %vm589_vm10, %v579_v23, 2102212464  ;;  %v597_v43 = vsel %vm587_vm12, %v594_v22, %v596_v62 }
  0x7f   :  { %v494_v1 = vadd.s32 %v10910_v30, %v10912_v33  ;;  %v601_v26 = vsel %vm587_vm12, %v598_v28, %v600_v54  ;;  %v604_v46 = vshrl.u32 %v10944_v25, 16  ;;  %v628_v61 = vshrl.u32 %v597_v43, 16 }
  0x80   :  { %v368_v36 = vxor.u32 2147483648, %v367_v32  ;;  %vm503_vm13 = vcmp.lt.s32.totalorder %v10969_v42, 0  ;;  %v504_v51 = vsub.s32 0, %v10969_v42  ;;  %v605_v31 = vand.u32 65535, %v601_v26 }
  0x81   :  { %v590_v27 = vsel %vm586_vm9, %v570_v63, %v573_v35  ;;  %v592_v39 = vsel %vm588_vm11, %v576_v47, %v591_v58  ;;  %v606_v23 = vshrl.u32 %v601_v26, 16  ;;  %v627_v30 = vand.u32 65535, %v597_v43 }
  0x82   :  { %v369_v33 = vsel %vm248_vm5, %v368_v36, %v367_v32  ;;  %v505_v24 = vsel %vm503_vm13, %v504_v51, %v10969_v42  ;;  %v607_v52 = vmul.u32 %v605_v31, %v603_v40  ;;  %v10989_v48 = vmul.u32 %v628_v61, %v603_v40 }
  0x83   :  { %v10994_v34 = vsel %vm10927_vm8, %v10713_v4, %v369_v33  ;;  %v506_v22 = vclz %v505_v24  ;;  %v608_v35 = vmul.u32 %v606_v23, %v603_v40  ;;  %v10996_v29 = vmul.u32 %v605_v31, %v604_v46 }
  0x84   :  { %v374_v47 = vmul.f32 %v10994_v34, %v10994_v34  ;;  %v11001_v55 = vand.u32 3, %v10958_v57  ;;  %v11006_v45 = vsel %vm587_vm12, %v590_v27, %v592_v39  ;;  %v629_v63 = vmul.u32 %v627_v30, %v603_v40 }
  0x85   :  { %v10240_v28 = vadd.s32 4294967294, %v506_v22  ;;  %v611_v41 = vshll.u32 %v608_v35, 16  ;;  %v610_v58 = vmul.u32 %v606_v23, %v604_v46  ;;  %v11009_v43 = vmul.u32 %v627_v30, %v604_v46 }
  0x86   :  { %v375_v54 = vmul.f32 -0.001358992, %v374_v47  ;;  %v382_v32 = vmul.f32 -0.00019511016, %v374_v47  ;;  %v613_v26 = vshll.u32 %v10996_v29, 16  ;;  %v633_v36 = vshll.u32 %v10989_v48, 16 }
  0x87   :  { %vm10241_vm14 = vcmp.lt.s32.totalorder %v10240_v28, 0  ;;  %vm615_vm15 = vc.u32 %v607_v52, %v611_v41  ;;  %vm395_vm0 = vcmp.eq.s32.totalorder %v11001_v55, 2  ;;  %v614_v23 = vshrl.u32 %v10996_v29, 16 }
  0x88   :  { %v376_v51 = vadd.f32 0.041655596, %v375_v54  ;;  %v383_v37 = vadd.f32 0.008332121, %v382_v32  ;;  %v509_v31 = vsel %vm10241_vm14, 0, %v10240_v28  ;;  %v616_v27 = vsel %vm615_vm15, 1, %v15336_v56 }
  0x89   :  { %v510_v40 = vsub.s32 32, %v509_v31  ;;  %v511_v39 = vshll.u32 %v10969_v42, %v509_v31  ;;  %v514_v33 = vsub.s32 4294967266, %v509_v31  ;;  %v612_v22 = vshrl.u32 %v608_v35, 16 }
  0x8a   :  { %v377_v30 = vmul.f32 %v376_v51, %v374_v47  ;;  %v384_v24 = vmul.f32 %v383_v37, %v374_v47  ;;  %v632_v62 = vmul.u32 %v628_v61, %v604_v46  ;;  %vm392_vm1 = vcmp.eq.s32.totalorder %v11001_v55, 0 }
  0x8b   :  { %v512_v0 = vshrl.u32 %v494_v1, %v510_v40  ;;  %v515_v54 = vadd.s32 127, %v514_v33  ;;  %v617_v32 = vadd.s32 %v611_v41, %v607_v52  ;;  %v618_v28 = vadd.s32 %v616_v27, %v610_v58 }
  0x8c   :  { %v378_v57 = vadd.f32 -0.4999988, %v377_v30  ;;  %v385_v21 = vadd.f32 -0.16666654, %v384_v24  ;;  %vm402_vm2 = vcmp.lt.s32.totalorder %v10715_v5, 0  ;;  %v635_v20 = vshll.u32 %v11009_v43, 16 }
  0x8d   :  { %vm637_vm3 = vc.u32 %v629_v63, %v633_v36  ;;  %v15342_v42 = vand.u32 2147483647, %v10715_v5  ;;  %v513_v46 = vor.u32 %v512_v0, %v511_v39  ;;  %v516_v61 = vshll.u32 %v515_v54, 23 }
  0x8e   :  { %vm619_vm5 = vc.u32 %v617_v32, %v613_v26  ;;  %v638_v1 = vsel %vm637_vm3, 1, %v15336_v56  ;;  %v379_v52 = vmul.f32 %v378_v57, %v374_v47  ;;  %v386_v35 = vmul.f32 %v385_v21, %v374_v47 }
  0x8f   :  { %vm11022_vm4 = vcmp.le.f32.partialorder %v15342_v42, 0.7853982  ;;  %v620_v41 = vsel %vm619_vm5, 1, %v15336_v56  ;;  %v639_v58 = vadd.s32 %v633_v36, %v629_v63  ;;  %v517_v51 = vor.u32 4788187, %v516_v61 }
  0x90   :  { %v520_v37 = vcvt.s32.f32 %v513_v46  ;;  %v622_v31 = vadd.s32 %v620_v41, %v618_v28  ;;  %v640_v27 = vadd.s32 %v638_v1, %v632_v62  ;;  %v11028_v40 = vadd.f32 1.0, %v379_v52 }
  0x91   :  { %v387_v33 = vadd.f32 1.0, %v386_v35  ;;  %v634_v30 = vshrl.u32 %v10989_v48, 16  ;;  %vm641_vm6 = vc.u32 %v639_v58, %v635_v20  ;;  %v518_v0 = vand.u32 2147483647, %v517_v51 }
  0x92   :  { %v623_v39 = vadd.s32 %v622_v31, %v612_v22  ;;  %v642_v26 = vsel %vm641_vm6, 1, %v15336_v56  ;;  %v711_v57 = vand.u32 2139095040, %v10717_v6  ;;  %v15049_v47 = vxor.u32 2147483648, %v11028_v40 }
  0x93   :  { %v11034_v21 = vmul.f32 %v387_v33, %v10994_v34  ;;  %v636_v63 = vshrl.u32 %v11009_v43, 16  ;;  %v644_v62 = vadd.s32 %v642_v26, %v640_v27  ;;  %v521_v36 = vmul.f32 %v520_v37, %v518_v0 }
  0x94   :  { %v11038_v24 = vadd.s32 %v623_v39, %v614_v23  ;;  %v11040_v54 = vadd.s32 %v639_v58, %v635_v20  ;;  %v712_v48 = vshrl.u32 %v711_v57, 23  ;;  %vm391_vm7 = vcmp.lt.s32.totalorder %v11001_v55, 2 }
  0x95   :  { %v15050_v22 = vxor.u32 2147483648, %v11034_v21  ;;  %v397_v34 = vsel %vm395_vm0, %v15049_v47, %v11034_v21  ;;  %v645_v32 = vadd.s32 %v644_v62, %v634_v30  ;;  %vm389_vm8 = vweird.f32 %v10713_v4 }
  0x96   :  { %v522_v43 = vxor.u32 2147483648, %v521_v36  ;;  %v647_v23 = vmul.u32 %v10944_v25, %v11006_v45  ;;  %v10245_v20 = vadd.s32 4294967169, %v712_v48  ;;  %v15345_v42 = vsub.s32 4, %v10946_v50 }
  0x97   :  { %v394_v28 = vsel %vm392_vm1, %v11028_v40, %v15050_v22  ;;  %v646_v61 = vadd.s32 %v645_v32, %v636_v63  ;;  %v15346_v1 = vand.u32 2147483647, %v10717_v6  ;;  %vm649_vm9 = vc.u32 %v11038_v24, %v11040_v54 }
  0x98   :  { %v525_v46 = vsel %vm402_vm2, %v15345_v42, %v10946_v50  ;;  %v398_v35 = vsel %vm391_vm7, %v394_v28, %v397_v34  ;;  %v523_v25 = vsel %vm402_vm2, %v522_v43, %v521_v36  ;;  %v718_v45 = vadd.s32 1, %v10245_v20 }
  0x99   :  { %v715_v52 = vand.u32 8388607, %v15346_v1  ;;  %v399_v55 = vsel %vm389_vm8, nan, %v398_v35  ;;  %v526_v41 = vsel %vm11022_vm4, %v10715_v5, %v523_v25  ;;  %v650_v50 = vadd.s32 1, %v646_v61 }
  0x9a   :  { %v11075_v58 = vsel %vm11022_vm4, 0, %v525_v46  ;;  %v528_v51 = vmul.f32 %v526_v41, %v526_v41  ;;  %vm719_vm10 = vcmp.gt.s32.totalorder %v718_v45, 0  ;;  %5174 = vst [vmem:[#allocation7] sm:$0xff] %v399_v55  ;;  %v865_v35 = vand.u32 2139095040, %v10719_v7 }
  0x9b   :  { %v11078_v37 = vand.u32 3, %v11075_v58  ;;  %v651_v31 = vsel %vm649_vm9, %v650_v50, %v646_v61  ;;  %v716_v27 = vor.u32 8388608, %v715_v52  ;;  %v720_v33 = vsel %vm719_vm10, %v718_v45, 0 }
  0x9c   :  { %v529_v30 = vmul.f32 -0.001358992, %v528_v51  ;;  %v536_v0 = vmul.f32 -0.00019511016, %v528_v51  ;;  %v652_v39 = vadd.s32 %v651_v31, %v647_v23  ;;  %v722_v26 = vand.u32 31, %v720_v33 }
  0x9d   :  { %vm549_vm11 = vcmp.eq.s32.totalorder %v11078_v37, 2  ;;  %v11081_v36 = vshll.u32 %v716_v27, 8  ;;  %vm546_vm12 = vcmp.eq.s32.totalorder %v11078_v37, 0  ;;  %vm545_vm13 = vcmp.lt.s32.totalorder %v11078_v37, 2 }
  0x9e   :  { %v530_v57 = vadd.f32 0.041655596, %v529_v30  ;;  %v537_v63 = vadd.f32 0.008332121, %v536_v0  ;;  %v653_v62 = vadd.s32 536870912, %v652_v39  ;;  %v723_v29 = vsub.s32 32, %v722_v26 }
  0x9f   :  { %v725_v20 = vshll.u32 %v15335_v2, %v722_v26  ;;  %v728_v28 = vshll.u32 %v15330_v44, %v722_v26  ;;  %v734_v46 = vshll.u32 %v15332_v53, %v722_v26  ;;  %vm543_vm14 = vweird.f32 %v10715_v5 }
  0xa0   :  { %v531_v34 = vmul.f32 %v530_v57, %v528_v51  ;;  %v538_v32 = vmul.f32 %v537_v63, %v528_v51  ;;  %v11084_v43 = vshrl.u32 %v653_v62, 30  ;;  %v726_v23 = vshrl.u32 %v15330_v44, %v723_v29 }
  0xa1   :  { %v729_v42 = vshrl.u32 %v15331_v59, %v723_v29  ;;  %v11096_v25 = vshrl.u32 %v720_v33, 5  ;;  %v731_v45 = vshll.u32 %v15331_v59, %v722_v26  ;;  %v732_v55 = vshrl.u32 %v15332_v53, %v723_v29 }
  0xa2   :  { %v532_v61 = vadd.f32 -0.4999988, %v531_v34  ;;  %v539_v1 = vadd.f32 -0.16666654, %v538_v32  ;;  %v655_v52 = vshll.u32 %v11084_v43, 30  ;;  %v735_v50 = vshrl.u32 %v15333_v49, %v723_v29 }
  0xa3   :  { %v727_v0 = vor.u32 %v726_v23, %v725_v20  ;;  %v11101_v57 = vor.u32 %v729_v42, %v728_v28  ;;  %v737_v62 = vshll.u32 %v15333_v49, %v722_v26  ;;  %v738_v34 = vshrl.u32 %v15334_v60, %v723_v29 }
  0xa4   :  { %v533_v31 = vmul.f32 %v532_v61, %v528_v51  ;;  %v540_v27 = vmul.f32 %v539_v1, %v528_v51  ;;  %v656_v30 = vsub.s32 %v652_v39, %v655_v52  ;;  %v736_v63 = vor.u32 %v735_v50, %v734_v46 }
  0xa5   :  { %v733_v22 = vor.u32 %v732_v55, %v731_v45  ;;  %v739_v48 = vor.u32 %v738_v34, %v737_v62  ;;  %vm740_vm0 = vcmp.lt.s32.totalorder %v11096_v25, 1  ;;  %vm742_vm1 = vcmp.lt.s32.totalorder %v11096_v25, 3 }
  0xa6   :  { %v11105_v32 = vadd.f32 1.0, %v533_v31  ;;  %v541_v33 = vadd.f32 1.0, %v540_v27  ;;  %vm657_vm15 = vcmp.lt.s32.totalorder %v656_v30, 0  ;;  %v658_v47 = vsub.s32 0, %v656_v30 }
  0xa7   :  { %vm743_vm2 = vcmp.lt.s32.totalorder %v11096_v25, 4  ;;  %v648_v26 = vadd.s32 %v11040_v54, %v11038_v24  ;;  %vm741_vm3 = vcmp.lt.s32.totalorder %v11096_v25, 2  ;;  %v15349_v28 = vand.u32 2147483647, %v10719_v7 }
  0xa8   :  { %15347 = vst [vmem:[#allocation46_spill] sm:$0xff] %v11105_v32  ;;  %v11109_v51 = vmul.f32 %v541_v33, %v526_v41  ;;  %v15051_v39 = vxor.u32 2147483648, %v11105_v32  ;;  %v659_v20 = vsel %vm657_vm15, %v658_v47, %v656_v30  ;;  %v748_v41 = vsel %vm740_vm0, %v727_v0, %v11101_v57 }
  0xa9   :  { %v660_v23 = vclz %v659_v20  ;;  %v11118_v42 = vand.u32 8388607, %v15349_v28  ;;  %v749_v24 = vsel %vm743_vm2, %v736_v63, 920167782  ;;  %v757_v1 = vand.u32 65535, %v11081_v36 }
  0xaa   :  { %15348 = vst [vmem:[#allocation47_spill] sm:$0xff] %v11109_v51  ;;  %v15052_v46 = vxor.u32 2147483648, %v11109_v51  ;;  %v551_v47 = vsel %vm549_vm11, %v15051_v39, %v11109_v51  ;;  %v750_v61 = vsel %vm742_vm1, %v733_v22, %v749_v24  ;;  %v866_v52 = vshrl.u32 %v865_v35, 23 }
  0xab   :  { %v10243_v54 = vadd.s32 4294967294, %v660_v23  ;;  %v724_v55 = vshrl.u32 %v15335_v2, %v723_v29  ;;  %v753_v50 = vsel %vm743_vm2, %v739_v48, 1326507024  ;;  %v758_v31 = vshrl.u32 %v11081_v36, 16 }
  0xac   :  { %v548_v45 = vsel %vm546_vm12, %v11105_v32, %v15052_v46  ;;  %v751_v35 = vsel %vm741_vm3, %v748_v41, %v750_v61  ;;  %v752_v62 = vsel %vm740_vm0, %v11101_v57, %v733_v22  ;;  %v754_v48 = vsel %vm742_vm1, %v736_v63, %v753_v50 }
  0xad   :  { %v552_v27 = vsel %vm545_vm13, %v548_v45, %v551_v47  ;;  %vm10244_vm4 = vcmp.lt.s32.totalorder %v10243_v54, 0  ;;  %v781_v33 = vand.u32 65535, %v751_v35  ;;  %v10248_v28 = vadd.s32 4294967169, %v866_v52 }
  0xae   :  { %v553_v34 = vsel %vm543_vm14, nan, %v552_v27  ;;  %v663_v29 = vsel %vm10244_vm4, 0, %v10243_v54  ;;  %v678_v47 = vsub.s32 4, %v11084_v43  ;;  %v745_v41 = vsel %vm743_vm2, %v733_v22, 2102212464 }
  0xaf   :  { %v664_v20 = vsub.s32 32, %v663_v29  ;;  %v665_v23 = vshll.u32 %v656_v30, %v663_v29  ;;  %v668_v37 = vsub.s32 4294967266, %v663_v29  ;;  %5175 = vst [vmem:[#allocation7 + $0x8] sm:$0xff] %v553_v34  ;;  %v755_v24 = vsel %vm741_vm3, %v752_v62, %v754_v48 }
  0xb0   :  { %v782_v61 = vshrl.u32 %v751_v35, 16  ;;  %v759_v27 = vand.u32 65535, %v755_v24  ;;  %v760_v39 = vshrl.u32 %v755_v24, 16  ;;  %vm556_vm5 = vcmp.lt.s32.totalorder %v10779_v38, 0 }
  0xb1   :  { %v666_v45 = vshrl.u32 %v648_v26, %v664_v20  ;;  %v669_v54 = vadd.s32 127, %v668_v37  ;;  %v744_v30 = vsel %vm740_vm0, %v724_v55, %v727_v0  ;;  %v783_v63 = vmul.u32 %v781_v33, %v757_v1 }
  0xb2   :  { %v784_v52 = vmul.u32 %v782_v61, %v757_v1  ;;  %v785_v50 = vmul.u32 %v781_v33, %v758_v31  ;;  %v15350_v34 = vand.u32 2147483647, %v10779_v38  ;;  %v761_v26 = vmul.u32 %v759_v27, %v757_v1 }
  0xb3   :  { %v667_v62 = vor.u32 %v666_v45, %v665_v23  ;;  %v670_v35 = vshll.u32 %v669_v54, 23  ;;  %v762_v29 = vmul.u32 %v760_v39, %v757_v1  ;;  %v746_v48 = vsel %vm742_vm1, %v11101_v57, %v745_v41 }
  0xb4   :  { %vm11164_vm6 = vcmp.le.f32.partialorder %v15350_v34, 0.7853982  ;;  %v763_v20 = vmul.u32 %v759_v27, %v758_v31  ;;  %v786_v37 = vmul.u32 %v782_v61, %v758_v31  ;;  %v787_v0 = vshll.u32 %v784_v52, 16 }
  0xb5   :  { %v671_v55 = vor.u32 4788187, %v670_v35  ;;  %v674_v24 = vcvt.s32.f32 %v667_v62  ;;  %v764_v33 = vmul.u32 %v760_v39, %v758_v31  ;;  %v765_v46 = vshll.u32 %v762_v29, 16 }
  0xb6   :  { %v766_v5 = vshrl.u32 %v762_v29, 16  ;;  %v767_v34 = vshll.u32 %v763_v20, 16  ;;  %v788_v4 = vshrl.u32 %v784_v52, 16  ;;  %v789_v32 = vshll.u32 %v785_v50, 16 }
  0xb7   :  { %v672_v51 = vand.u32 2147483647, %v671_v55  ;;  %vm769_vm7 = vc.u32 %v761_v26, %v765_v46  ;;  %v771_v23 = vadd.s32 %v765_v46, %v761_v26  ;;  %vm791_vm9 = vc.u32 %v783_v63, %v787_v0 }
  0xb8   :  { %v770_v1 = vsel %vm769_vm7, 1, %v15336_v56  ;;  %v792_v45 = vsel %vm791_vm9, 1, %v15336_v56  ;;  %v793_v57 = vadd.s32 %v787_v0, %v783_v63  ;;  %v872_v41 = vadd.s32 1, %v10248_v28 }
  0xb9   :  { %v675_v61 = vmul.f32 %v674_v24, %v672_v51  ;;  %v772_v54 = vadd.s32 %v770_v1, %v764_v33  ;;  %vm773_vm10 = vc.u32 %v771_v23, %v767_v34  ;;  %v794_v27 = vadd.s32 %v792_v45, %v786_v37 }
  0xba   :  { %v768_v39 = vshrl.u32 %v763_v20, 16  ;;  %v774_v31 = vsel %vm773_vm10, 1, %v15336_v56  ;;  %vm795_vm11 = vc.u32 %v793_v57, %v789_v32  ;;  %vm873_vm12 = vcmp.gt.s32.totalorder %v872_v41, 0 }
  0xbb   :  { %v676_v52 = vxor.u32 2147483648, %v675_v61  ;;  %v776_v62 = vadd.s32 %v774_v31, %v772_v54  ;;  %v796_v46 = vsel %vm795_vm11, 1, %v15336_v56  ;;  %v874_v35 = vsel %vm873_vm12, %v872_v41, 0 }
  0xbc   :  { %v747_v26 = vsel %vm741_vm3, %v744_v30, %v746_v48  ;;  %v790_v29 = vshrl.u32 %v785_v50, 16  ;;  %v798_v63 = vadd.s32 %v796_v46, %v794_v27  ;;  %v876_v28 = vand.u32 31, %v874_v35 }
  0xbd   :  { %v677_v51 = vsel %vm556_vm5, %v676_v52, %v675_v61  ;;  %v777_v37 = vadd.s32 %v776_v62, %v766_v5  ;;  %v11179_v20 = vadd.s32 %v793_v57, %v789_v32  ;;  %v870_v24 = vor.u32 8388608, %v11118_v42 }
  0xbe   :  { %v680_v0 = vsel %vm11164_vm6, %v10779_v38, %v677_v51  ;;  %v799_v55 = vadd.s32 %v798_v63, %v788_v4  ;;  %v11185_v33 = vsub.s32 32, %v876_v28  ;;  %v679_v25 = vsel %vm556_vm5, %v678_v47, %v11084_v43 }
  0xbf   :  { %v682_v30 = vmul.f32 %v680_v0, %v680_v0  ;;  %v11190_v50 = vadd.s32 %v777_v37, %v768_v39  ;;  %v801_v5 = vmul.u32 %v11081_v36, %v747_v26  ;;  %v11193_v48 = vshrl.u32 %v874_v35, 5 }
  0xc0   :  { %v800_v32 = vadd.s32 %v799_v55, %v790_v29  ;;  %v879_v34 = vshll.u32 %v15335_v2, %v876_v28  ;;  %v882_v4 = vshll.u32 %v15330_v44, %v876_v28  ;;  %v880_v43 = vshrl.u32 %v15330_v44, %v11185_v33 }
  0xc1   :  { %v683_v23 = vmul.f32 -0.001358992, %v682_v30  ;;  %v690_v42 = vmul.f32 -0.00019511016, %v682_v30  ;;  %vm803_vm13 = vc.u32 %v11190_v50, %v11179_v20  ;;  %v883_v1 = vshrl.u32 %v15331_v59, %v11185_v33 }
  0xc2   :  { %v804_v47 = vadd.s32 1, %v800_v32  ;;  %v885_v36 = vshll.u32 %v15331_v59, %v876_v28  ;;  %v886_v45 = vshrl.u32 %v15332_v53, %v11185_v33  ;;  %v888_v61 = vshll.u32 %v15332_v53, %v876_v28 }
  0xc3   :  { %v684_v57 = vadd.f32 0.041655596, %v683_v23  ;;  %v691_v41 = vadd.f32 0.008332121, %v690_v42  ;;  %v889_v54 = vshrl.u32 %v15333_v49, %v11185_v33  ;;  %v11211_v27 = vsel %vm11164_vm6, 0, %v679_v25 }
  0xc4   :  { %v805_v39 = vsel %vm803_vm13, %v804_v47, %v800_v32  ;;  %v891_v31 = vshll.u32 %v15333_v49, %v876_v28  ;;  %v892_v52 = vshrl.u32 %v15334_v60, %v11185_v33  ;;  %v881_v26 = vor.u32 %v880_v43, %v879_v34 }
  0xc5   :  { %v685_v62 = vmul.f32 %v684_v57, %v682_v30  ;;  %v692_v46 = vmul.f32 %v691_v41, %v682_v30  ;;  %v806_v35 = vadd.s32 %v805_v39, %v801_v5  ;;  %v11216_v29 = vor.u32 %v883_v1, %v882_v4 }
  0xc6   :  { %v887_v63 = vor.u32 %v886_v45, %v885_v36  ;;  %v890_v51 = vor.u32 %v889_v54, %v888_v61  ;;  %v893_v37 = vor.u32 %v892_v52, %v891_v31  ;;  %vm894_vm15 = vcmp.lt.s32.totalorder %v11193_v48, 1 }
  0xc7   :  { %v686_v55 = vadd.f32 -0.4999988, %v685_v62  ;;  %v693_v23 = vadd.f32 -0.16666654, %v692_v46  ;;  %v807_v22 = vadd.s32 536870912, %v806_v35  ;;  %v698_v25 = vand.u32 3, %v11211_v27 }
  0xc8   :  { %vm897_vm0 = vcmp.lt.s32.totalorder %v11193_v48, 4  ;;  %v11221_v28 = vshll.u32 %v870_v24, 8  ;;  %vm896_vm1 = vcmp.lt.s32.totalorder %v11193_v48, 3  ;;  %vm895_vm2 = vcmp.lt.s32.totalorder %v11193_v48, 2 }
  0xc9   :  { %v687_v32 = vmul.f32 %v686_v55, %v682_v30  ;;  %v694_v42 = vmul.f32 %v693_v23, %v682_v30  ;;  %v11223_v5 = vshrl.u32 %v807_v22, 30  ;;  %v902_v34 = vsel %vm894_vm15, %v881_v26, %v11216_v29 }
  0xca   :  { %v903_v4 = vsel %vm897_vm0, %v890_v51, 920167782  ;;  %v907_v43 = vsel %vm897_vm0, %v893_v37, 1326507024  ;;  %v906_v1 = vsel %vm894_vm15, %v11216_v29, %v887_v63  ;;  %vm699_vm3 = vcmp.lt.s32.totalorder %v698_v25, 2 }
  0xcb   :  { %v11234_v24 = vadd.f32 1.0, %v687_v32  ;;  %v695_v47 = vadd.f32 1.0, %v694_v42  ;;  %v809_v30 = vshll.u32 %v11223_v5, 30  ;;  %vm703_vm4 = vcmp.eq.s32.totalorder %v698_v25, 2 }
  0xcc   :  { %v904_v36 = vsel %vm896_vm1, %v887_v63, %v903_v4  ;;  %v908_v45 = vsel %vm896_vm1, %v890_v51, %v907_v43  ;;  %vm700_vm5 = vcmp.eq.s32.totalorder %v698_v25, 0  ;;  %v911_v31 = vand.u32 65535, %v11221_v28 }
  0xcd   :  { %15353 = vst [vmem:[#allocation48_spill] sm:$0xff] %v11234_v24  ;;  %v11244_v57 = vmul.f32 %v695_v47, %v680_v0  ;;  %v15059_v41 = vxor.u32 2147483648, %v11234_v24  ;;  %v810_v61 = vsub.s32 %v806_v35, %v809_v30  ;;  %v905_v54 = vsel %vm895_vm2, %v902_v34, %v904_v36 }
  0xce   :  { %v909_v39 = vsel %vm895_vm2, %v906_v1, %v908_v45  ;;  %v912_v52 = vshrl.u32 %v11221_v28, 16  ;;  %vm697_vm7 = vweird.f32 %v10779_v38  ;;  %v936_v37 = vshrl.u32 %v905_v54, 16 }
  0xcf   :  { %15354 = vst [vmem:[#allocation49_spill] sm:$0xff] %v11244_v57  ;;  %v15060_v62 = vxor.u32 2147483648, %v11244_v57  ;;  %v705_v0 = vsel %vm703_vm4, %v15059_v41, %v11244_v57  ;;  %vm811_vm6 = vcmp.lt.s32.totalorder %v810_v61, 0  ;;  %v812_v46 = vsub.s32 0, %v810_v61 }
  0xd0   :  { %v913_v35 = vand.u32 65535, %v909_v39  ;;  %v914_v51 = vshrl.u32 %v909_v39, 16  ;;  %v878_v22 = vshrl.u32 %v15335_v2, %v11185_v33  ;;  %v935_v32 = vand.u32 65535, %v905_v54 }
  0xd1   :  { %v702_v55 = vsel %vm700_vm5, %v11234_v24, %v15060_v62  ;;  %v813_v23 = vsel %vm811_vm6, %v812_v46, %v810_v61  ;;  %v1019_v1 = vand.u32 2139095040, %v10721_v8  ;;  %v802_v36 = vadd.s32 %v11179_v20, %v11190_v50 }
  0xd2   :  { %v706_v42 = vsel %vm699_vm3, %v702_v55, %v705_v0  ;;  %v814_v34 = vclz %v813_v23  ;;  %v915_v4 = vmul.u32 %v913_v35, %v911_v31  ;;  %v916_v43 = vmul.u32 %v914_v51, %v911_v31 }
  0xd3   :  { %v707_v47 = vsel %vm697_vm7, nan, %v706_v42  ;;  %v917_v30 = vmul.u32 %v913_v35, %v912_v52  ;;  %v938_v46 = vmul.u32 %v936_v37, %v911_v31  ;;  %v898_v33 = vsel %vm894_vm15, %v878_v22, %v881_v26 }
  0xd4   :  { %v10246_v45 = vadd.s32 4294967294, %v814_v34  ;;  %v919_v39 = vshll.u32 %v916_v43, 16  ;;  %5176 = vst [vmem:[#allocation7 + $0x10] sm:$0xff] %v707_v47  ;;  %v899_v25 = vsel %vm897_vm0, %v887_v63, 2102212464  ;;  %v918_v54 = vmul.u32 %v914_v51, %v912_v52 }
  0xd5   :  { %v921_v0 = vshll.u32 %v917_v30, 16  ;;  %v937_v35 = vmul.u32 %v935_v32, %v911_v31  ;;  %v939_v55 = vmul.u32 %v935_v32, %v912_v52  ;;  %v941_v50 = vshll.u32 %v938_v46, 16 }
  0xd6   :  { %vm10247_vm9 = vcmp.lt.s32.totalorder %v10246_v45, 0  ;;  %vm923_vm10 = vc.u32 %v915_v4, %v919_v39  ;;  %v925_v20 = vadd.s32 %v919_v39, %v915_v4  ;;  %v1020_v62 = vshrl.u32 %v1019_v1, 23 }
  0xd7   :  { %v817_v23 = vsel %vm10247_vm9, 0, %v10246_v45  ;;  %v924_v42 = vsel %vm923_vm10, 1, %v15336_v56  ;;  %v920_v38 = vshrl.u32 %v916_v43, 16  ;;  %v940_v22 = vmul.u32 %v936_v37, %v912_v52 }
  0xd8   :  { %v818_v34 = vsub.s32 32, %v817_v23  ;;  %v819_v41 = vshll.u32 %v810_v61, %v817_v23  ;;  %v822_v47 = vsub.s32 4294967266, %v817_v23  ;;  %v926_v26 = vadd.s32 %v924_v42, %v918_v54 }
  0xd9   :  { %vm927_vm11 = vc.u32 %v925_v20, %v921_v0  ;;  %v900_v31 = vsel %vm896_vm1, %v11216_v29, %v899_v25  ;;  %v832_v45 = vsub.s32 4, %v11223_v5  ;;  %v943_v39 = vshll.u32 %v939_v55, 16 }
  0xda   :  { %v820_v63 = vshrl.u32 %v802_v36, %v818_v34  ;;  %v823_v51 = vadd.s32 127, %v822_v47  ;;  %v928_v32 = vsel %vm927_vm11, 1, %v15336_v56  ;;  %vm945_vm12 = vc.u32 %v937_v35, %v941_v50 }
  0xdb   :  { %v930_v4 = vadd.s32 %v928_v32, %v926_v26  ;;  %v946_v43 = vsel %vm945_vm12, 1, %v15336_v56  ;;  %v947_v1 = vadd.s32 %v941_v50, %v937_v35  ;;  %v922_v54 = vshrl.u32 %v917_v30, 16 }
  0xdc   :  { %v821_v61 = vor.u32 %v820_v63, %v819_v41  ;;  %v824_v23 = vshll.u32 %v823_v51, 23  ;;  %v948_v37 = vadd.s32 %v946_v43, %v940_v22  ;;  %v10251_v36 = vadd.s32 4294967169, %v1020_v62 }
  0xdd   :  { %v931_v52 = vadd.s32 %v930_v4, %v920_v38  ;;  %v942_v20 = vshrl.u32 %v938_v46, 16  ;;  %vm949_vm13 = vc.u32 %v947_v1, %v943_v39  ;;  %vm710_vm15 = vcmp.lt.s32.totalorder %v10717_v6, 0 }
  0xde   :  { %v825_v0 = vor.u32 4788187, %v824_v23  ;;  %v828_v42 = vcvt.s32.f32 %v821_v61  ;;  %v950_v29 = vsel %vm949_vm13, 1, %v15336_v56  ;;  %v15062_v25 = vand.u32 2147483647, %v10721_v8 }
  0xdf   :  { %v1026_v34 = vadd.s32 1, %v10251_v36  ;;  %v833_v35 = vsel %vm710_vm15, %v832_v45, %v11223_v5  ;;  %v944_v30 = vshrl.u32 %v939_v55, 16  ;;  %v952_v38 = vadd.s32 %v950_v29, %v948_v37 }
  0xe0   :  { %v826_v41 = vand.u32 2147483647, %v825_v0  ;;  %v901_v62 = vsel %vm895_vm2, %v898_v33, %v900_v31  ;;  %v11288_v50 = vadd.s32 %v931_v52, %v922_v54  ;;  %v11290_v46 = vadd.s32 %v947_v1, %v943_v39 }
  0xe1   :  { %vm1027_vm0 = vcmp.gt.s32.totalorder %v1026_v34, 0  ;;  %v15355_v47 = vand.u32 2147483647, %v10717_v6  ;;  %v953_v63 = vadd.s32 %v952_v38, %v942_v20  ;;  %v955_v31 = vmul.u32 %v11221_v28, %v901_v62 }
  0xe2   :  { %v829_v22 = vmul.f32 %v828_v42, %v826_v41  ;;  %v1028_v51 = vsel %vm1027_vm0, %v1026_v34, 0  ;;  %v1023_v32 = vand.u32 8388607, %v15062_v25  ;;  %vm957_vm2 = vc.u32 %v11288_v50, %v11290_v46 }
  0xe3   :  { %vm11294_vm1 = vcmp.le.f32.partialorder %v15355_v47, 0.7853982  ;;  %v1030_v48 = vand.u32 31, %v1028_v51  ;;  %v954_v55 = vadd.s32 %v953_v63, %v944_v30  ;;  %v11307_v45 = vshrl.u32 %v1028_v51, 5 }
  0xe4   :  { %v11300_v5 = vsel %vm11294_vm1, 0, %v833_v35  ;;  %v830_v33 = vxor.u32 2147483648, %v829_v22  ;;  %v1024_v41 = vor.u32 8388608, %v1023_v32  ;;  %vm851_vm11 = vweird.f32 %v10717_v6 }
  0xe5   :  { %v11309_v4 = vsub.s32 32, %v1030_v48  ;;  %v1033_v39 = vshll.u32 %v15335_v2, %v1030_v48  ;;  %v958_v23 = vadd.s32 1, %v954_v55  ;;  %v1036_v43 = vshll.u32 %v15330_v44, %v1030_v48 }
  0xe6   :  { %v831_v61 = vsel %vm710_vm15, %v830_v33, %v829_v22  ;;  %v1039_v28 = vshll.u32 %v15331_v59, %v1030_v48  ;;  %v1042_v37 = vshll.u32 %v15332_v53, %v1030_v48  ;;  %v11329_v29 = vand.u32 3, %v11300_v5 }
  0xe7   :  { %v834_v1 = vsel %vm11294_vm1, %v10717_v6, %v831_v61  ;;  %v1034_v54 = vshrl.u32 %v15330_v44, %v11309_v4  ;;  %v1037_v52 = vshrl.u32 %v15331_v59, %v11309_v4  ;;  %v959_v0 = vsel %vm957_vm2, %v958_v23, %v954_v55 }
  0xe8   :  { %v836_v36 = vmul.f32 %v834_v1, %v834_v1  ;;  %v1040_v42 = vshrl.u32 %v15332_v53, %v11309_v4  ;;  %v1043_v20 = vshrl.u32 %v15333_v49, %v11309_v4  ;;  %v960_v34 = vadd.s32 %v959_v0, %v955_v31 }
  0xe9   :  { %v11331_v38 = vor.u32 %v1034_v54, %v1033_v39  ;;  %v1045_v62 = vshll.u32 %v15333_v49, %v1030_v48  ;;  %v11334_v26 = vor.u32 %v1037_v52, %v1036_v43  ;;  %v1046_v63 = vshrl.u32 %v15334_v60, %v11309_v4 }
  0xea   :  { %v837_v35 = vmul.f32 -0.001358992, %v836_v36  ;;  %v844_v30 = vmul.f32 -0.00019511016, %v836_v36  ;;  %v961_v47 = vadd.s32 536870912, %v960_v34  ;;  %v1044_v22 = vor.u32 %v1043_v20, %v1042_v37 }
  0xeb   :  { %v11338_v55 = vor.u32 %v1040_v42, %v1039_v28  ;;  %vm1048_vm3 = vcmp.lt.s32.totalorder %v11307_v45, 1  ;;  %vm1050_vm4 = vcmp.lt.s32.totalorder %v11307_v45, 3  ;;  %vm1051_vm5 = vcmp.lt.s32.totalorder %v11307_v45, 4 }
  0xec   :  { %v838_v51 = vadd.f32 0.041655596, %v837_v35  ;;  %v845_v33 = vadd.f32 0.008332121, %v844_v30  ;;  %v11341_v31 = vshrl.u32 %v961_v47, 30  ;;  %v11345_v48 = vshll.u32 %v1024_v41, 8 }
  0xed   :  { %v1047_v61 = vor.u32 %v1046_v63, %v1045_v62  ;;  %vm854_vm6 = vcmp.eq.s32.totalorder %v11329_v29, 0  ;;  %vm1049_vm9 = vcmp.lt.s32.totalorder %v11307_v45, 2  ;;  %v1056_v43 = vsel %vm1048_vm3, %v11331_v38, %v11334_v26 }
  0xee   :  { %v839_v32 = vmul.f32 %v838_v51, %v836_v36  ;;  %v846_v39 = vmul.f32 %v845_v33, %v836_v36  ;;  %v963_v23 = vshll.u32 %v11341_v31, 30  ;;  %v1057_v28 = vsel %vm1051_vm5, %v1044_v22, 920167782 }
  0xef   :  { %vm853_vm10 = vcmp.lt.s32.totalorder %v11329_v29, 2  ;;  %v1058_v37 = vsel %vm1050_vm4, %v11338_v55, %v1057_v28  ;;  %v1173_v0 = vand.u32 2139095040, %v10723_v9  ;;  %vm857_vm12 = vcmp.eq.s32.totalorder %v11329_v29, 2 }
  0xf0   :  { %v840_v54 = vadd.f32 -0.4999988, %v839_v32  ;;  %v847_v52 = vadd.f32 -0.16666654, %v846_v39  ;;  %v964_v42 = vsub.s32 %v960_v34, %v963_v23  ;;  %v1060_v20 = vsel %vm1048_vm3, %v11334_v26, %v11338_v55 }
  0xf1   :  { %v1065_v41 = vand.u32 65535, %v11345_v48  ;;  %v1059_v62 = vsel %vm1049_vm9, %v1056_v43, %v1058_v37  ;;  %v1061_v47 = vsel %vm1051_vm5, %v1047_v61, 1326507024  ;;  %v1066_v51 = vshrl.u32 %v11345_v48, 16 }
  0xf2   :  { %v841_v35 = vmul.f32 %v840_v54, %v836_v36  ;;  %v848_v30 = vmul.f32 %v847_v52, %v836_v36  ;;  %vm965_vm13 = vcmp.lt.s32.totalorder %v964_v42, 0  ;;  %v966_v63 = vsub.s32 0, %v964_v42 }
  0xf3   :  { %v1062_v34 = vsel %vm1050_vm4, %v1044_v22, %v1061_v47  ;;  %v1174_v36 = vshrl.u32 %v1173_v0, 23  ;;  %v1090_v54 = vshrl.u32 %v1059_v62, 16  ;;  %v1089_v25 = vand.u32 65535, %v1059_v62 }
  0xf4   :  { %v11375_v33 = vadd.f32 1.0, %v841_v35  ;;  %v849_v32 = vadd.f32 1.0, %v848_v30  ;;  %v1063_v39 = vsel %vm1049_vm9, %v1060_v20, %v1062_v34  ;;  %v967_v23 = vsel %vm965_vm13, %v966_v63, %v964_v42 }
  0xf5   :  { %v1067_v28 = vand.u32 65535, %v1063_v39  ;;  %v1068_v43 = vshrl.u32 %v1063_v39, 16  ;;  %v968_v37 = vclz %v967_v23  ;;  %v956_v22 = vadd.s32 %v11290_v46, %v11288_v50 }
  0xf6   :  { %15358 = vst [vmem:[#allocation50_spill] sm:$0xff] %v11375_v33  ;;  %v11379_v52 = vmul.f32 %v849_v32, %v834_v1  ;;  %v15065_v61 = vxor.u32 2147483648, %v11375_v33  ;;  %v10254_v20 = vadd.s32 4294967169, %v1174_v36  ;;  %v1032_v63 = vshrl.u32 %v15335_v2, %v11309_v4 }
  0xf7   :  { %v1069_v35 = vmul.u32 %v1067_v28, %v1065_v41  ;;  %v1070_v47 = vmul.u32 %v1068_v43, %v1065_v41  ;;  %v1071_v30 = vmul.u32 %v1067_v28, %v1066_v51  ;;  %v10249_v1 = vadd.s32 4294967294, %v968_v37 }
  0xf8   :  { %15359 = vst [vmem:[#allocation51_spill] sm:$0xff] %v11379_v52  ;;  %v15068_v24 = vxor.u32 2147483648, %v11379_v52  ;;  %v859_v0 = vsel %vm857_vm12, %v15065_v61, %v11379_v52  ;;  %v1072_v62 = vmul.u32 %v1068_v43, %v1066_v51  ;;  %v1092_v32 = vmul.u32 %v1090_v54, %v1065_v41 }
  0xf9   :  { %v1073_v34 = vshll.u32 %v1070_v47, 16  ;;  %vm10250_vm15 = vcmp.lt.s32.totalorder %v10249_v1, 0  ;;  %v1075_v46 = vshll.u32 %v1071_v30, 16  ;;  %v1093_v39 = vmul.u32 %v1089_v25, %v1066_v51 }
  0xfa   :  { %v856_v50 = vsel %vm854_vm6, %v11375_v33, %v15068_v24  ;;  %v971_v28 = vsel %vm10250_vm15, 0, %v10249_v1  ;;  %v1053_v52 = vsel %vm1051_vm5, %v11338_v55, 2102212464  ;;  %v1074_v24 = vshrl.u32 %v1070_v47, 16 }
  0xfb   :  { %v860_v23 = vsel %vm853_vm10, %v856_v50, %v859_v0  ;;  %vm1077_vm0 = vc.u32 %v1069_v35, %v1073_v34  ;;  %v1079_v36 = vadd.s32 %v1073_v34, %v1069_v35  ;;  %v972_v43 = vsub.s32 32, %v971_v28 }
  0xfc   :  { %v861_v4 = vsel %vm851_vm11, nan, %v860_v23  ;;  %v973_v37 = vshll.u32 %v964_v42, %v971_v28  ;;  %v976_v61 = vsub.s32 4294967266, %v971_v28  ;;  %v1078_v33 = vsel %vm1077_vm0, 1, %v15336_v56 }
  0xfd   :  { %v1091_v57 = vmul.u32 %v1089_v25, %v1065_v41  ;;  %5177 = vst [vmem:[#allocation7 + $0x18] sm:$0xff] %v861_v4  ;;  %v974_v29 = vshrl.u32 %v956_v22, %v972_v43  ;;  %v1080_v1 = vadd.s32 %v1078_v33, %v1072_v62  ;;  %vm1081_vm1 = vc.u32 %v1079_v36, %v1075_v46 }
  0xfe   :  { %v977_v0 = vadd.s32 127, %v976_v61  ;;  %v1052_v35 = vsel %vm1048_vm3, %v1032_v63, %v11331_v38  ;;  %v1082_v42 = vsel %vm1081_vm1, 1, %v15336_v56  ;;  %v1094_v34 = vmul.u32 %v1090_v54, %v1066_v51 }
  0xff   :  { %v1095_v50 = vshll.u32 %v1092_v32, 16  ;;  %v975_v23 = vor.u32 %v974_v29, %v973_v37  ;;  %v1084_v55 = vadd.s32 %v1082_v42, %v1080_v1  ;;  %v1097_v47 = vshll.u32 %v1093_v39, 16 }
 0x100   :  { %v978_v28 = vshll.u32 %v977_v0, 23  ;;  %v1054_v25 = vsel %vm1050_vm4, %v11334_v26, %v1053_v52  ;;  %v1076_v41 = vshrl.u32 %v1071_v30, 16  ;;  %v1096_v63 = vshrl.u32 %v1092_v32, 16 }
 0x101   :  { %vm1099_vm2 = vc.u32 %v1091_v57, %v1095_v50  ;;  %v1101_v33 = vadd.s32 %v1095_v50, %v1091_v57  ;;  %v982_v22 = vcvt.s32.f32 %v975_v23  ;;  %v1085_v62 = vadd.s32 %v1084_v55, %v1074_v24 }
 0x102   :  { %v979_v61 = vor.u32 4788187, %v978_v28  ;;  %v1100_v38 = vsel %vm1099_vm2, 1, %v15336_v56  ;;  %v15074_v36 = vand.u32 2147483647, %v10723_v9  ;;  %v1180_v4 = vadd.s32 1, %v10254_v20 }
 0x103   :  { %v1102_v46 = vadd.s32 %v1100_v38, %v1094_v34  ;;  %vm1103_vm3 = vc.u32 %v1101_v33, %v1097_v47  ;;  %v986_v43 = vsub.s32 4, %v11341_v31  ;;  %v1055_v26 = vsel %vm1049_vm9, %v1052_v35, %v1054_v25 }
 0x104   :  { %v980_v51 = vand.u32 2147483647, %v979_v61  ;;  %v1104_v54 = vsel %vm1103_vm3, 1, %v15336_v56  ;;  %v1098_v57 = vshrl.u32 %v1093_v39, 16  ;;  %v11418_v24 = vadd.s32 %v1085_v62, %v1076_v41 }
 0x105   :  { %v1106_v52 = vadd.s32 %v1104_v54, %v1102_v46  ;;  %v11420_v37 = vadd.s32 %v1101_v33, %v1097_v47  ;;  %vm1181_vm4 = vcmp.gt.s32.totalorder %v1180_v4, 0  ;;  %vm864_vm5 = vcmp.lt.s32.totalorder %v10719_v7, 0 }
 0x106   :  { %v983_v30 = vmul.f32 %v982_v22, %v980_v51  ;;  %v1182_v29 = vsel %vm1181_vm4, %v1180_v4, 0  ;;  %v15360_v0 = vand.u32 2147483647, %v10719_v7  ;;  %v987_v39 = vsel %vm864_vm5, %v986_v43, %v11341_v31 }
 0x107   :  { %v1107_v32 = vadd.s32 %v1106_v52, %v1096_v63  ;;  %v1184_v1 = vand.u32 31, %v1182_v29  ;;  %v1109_v42 = vmul.u32 %v11345_v48, %v1055_v26  ;;  %v1177_v34 = vand.u32 8388607, %v15074_v36 }
 0x108   :  { %vm11425_vm6 = vcmp.le.f32.partialorder %v15360_v0, 0.7853982  ;;  %v984_v45 = vxor.u32 2147483648, %v983_v30  ;;  %vm1111_vm9 = vc.u32 %v11418_v24, %v11420_v37  ;;  %v11435_v23 = vshrl.u32 %v1182_v29, 5 }
 0x109   :  { %v1108_v35 = vadd.s32 %v1107_v32, %v1098_v57  ;;  %v1185_v28 = vsub.s32 32, %v1184_v1  ;;  %v1187_v31 = vshll.u32 %v15335_v2, %v1184_v1  ;;  %v1190_v25 = vshll.u32 %v15330_v44, %v1184_v1 }
 0x10a   :  { %v985_v50 = vsel %vm864_vm5, %v984_v45, %v983_v30  ;;  %v1193_v61 = vshll.u32 %v15331_v59, %v1184_v1  ;;  %v1196_v38 = vshll.u32 %v15332_v53, %v1184_v1  ;;  %v11450_v46 = vsel %vm11425_vm6, 0, %v987_v39 }
 0x10b   :  { %v988_v55 = vsel %vm11425_vm6, %v10719_v7, %v985_v50  ;;  %v1112_v47 = vadd.s32 1, %v1108_v35  ;;  %v1188_v41 = vshrl.u32 %v15330_v44, %v1185_v28  ;;  %v1191_v33 = vshrl.u32 %v15331_v59, %v1185_v28  ;;  %15363 = vst [vmem:[#allocation52_spill] sm:$0xff] %v11450_v46 }
 0x10c   :  { %v990_v48 = vmul.f32 %v988_v55, %v988_v55  ;;  %v1194_v62 = vshrl.u32 %v15332_v53, %v1185_v28  ;;  %v1197_v63 = vshrl.u32 %v15333_v49, %v1185_v28  ;;  %v11453_v43 = vand.u32 3, %v11450_v46 }
 0x10d   :  { %v1113_v22 = vsel %vm1111_vm9, %v1112_v47, %v1108_v35  ;;  %v1178_v26 = vor.u32 8388608, %v1177_v34  ;;  %v1189_v57 = vor.u32 %v1188_v41, %v1187_v31  ;;  %v1199_v52 = vshll.u32 %v15333_v49, %v1184_v1 }
 0x10e   :  { %v991_v51 = vmul.f32 -0.001358992, %v990_v48  ;;  %v998_v54 = vmul.f32 -0.00019511016, %v990_v48  ;;  %v1114_v4 = vadd.s32 %v1113_v22, %v1109_v42  ;;  %v11456_v0 = vor.u32 %v1191_v33, %v1190_v25 }
 0x10f   :  { %v1195_v45 = vor.u32 %v1194_v62, %v1193_v61  ;;  %v1198_v35 = vor.u32 %v1197_v63, %v1196_v38  ;;  %v1200_v20 = vshrl.u32 %v15334_v60, %v1185_v28  ;;  %vm1202_vm10 = vcmp.lt.s32.totalorder %v11435_v23, 1 }
 0x110   :  { %v992_v30 = vadd.f32 0.041655596, %v991_v51  ;;  %v999_v32 = vadd.f32 0.008332121, %v998_v54  ;;  %v1115_v29 = vadd.s32 536870912, %v1114_v4  ;;  %vm1205_vm12 = vcmp.lt.s32.totalorder %v11435_v23, 4 }
 0x111   :  { %vm1011_vm13 = vcmp.eq.s32.totalorder %v11453_v43, 2  ;;  %v1201_v1 = vor.u32 %v1200_v20, %v1199_v52  ;;  %v11464_v34 = vshll.u32 %v1178_v26, 8  ;;  %vm1007_vm15 = vcmp.lt.s32.totalorder %v11453_v43, 2 }
 0x112   :  { %v993_v39 = vmul.f32 %v992_v30, %v990_v48  ;;  %v1000_v42 = vmul.f32 %v999_v32, %v990_v48  ;;  %v11460_v50 = vshrl.u32 %v1115_v29, 30  ;;  %vm1204_vm0 = vcmp.lt.s32.totalorder %v11435_v23, 3 }
 0x113   :  { %vm1005_vm1 = vweird.f32 %v10719_v7  ;;  %vm1203_vm2 = vcmp.lt.s32.totalorder %v11435_v23, 2  ;;  %v1210_v41 = vsel %vm1202_vm10, %v1189_v57, %v11456_v0  ;;  %v1211_v33 = vsel %vm1205_vm12, %v1198_v35, 920167782 }
 0x114   :  { %v994_v47 = vadd.f32 -0.4999988, %v993_v39  ;;  %v1001_v31 = vadd.f32 -0.16666654, %v1000_v42  ;;  %v1117_v25 = vshll.u32 %v11460_v50, 30  ;;  %v1214_v63 = vsel %vm1202_vm10, %v11456_v0, %v1195_v45 }
 0x115   :  { %v1215_v61 = vsel %vm1205_vm12, %v1201_v1, 1326507024  ;;  %v1212_v51 = vsel %vm1204_vm0, %v1195_v45, %v1211_v33  ;;  %v1220_v26 = vshrl.u32 %v11464_v34, 16  ;;  %v1327_v52 = vand.u32 2139095040, %v10725_v10 }
 0x116   :  { %v995_v22 = vmul.f32 %v994_v47, %v990_v48  ;;  %v1002_v62 = vmul.f32 %v1001_v31, %v990_v48  ;;  %v1118_v38 = vsub.s32 %v1114_v4, %v1117_v25  ;;  %v1216_v54 = vsel %vm1204_vm0, %v1198_v35, %v1215_v61 }
 0x117   :  { %v1186_v4 = vshrl.u32 %v15335_v2, %v1185_v28  ;;  %v1213_v29 = vsel %vm1203_vm2, %v1210_v41, %v1212_v51  ;;  %v1217_v20 = vsel %vm1203_vm2, %v1214_v63, %v1216_v54  ;;  %v1219_v39 = vand.u32 65535, %v11464_v34 }
 0x118   :  { %v11487_v30 = vadd.f32 1.0, %v995_v22  ;;  %v1003_v32 = vadd.f32 1.0, %v1002_v62  ;;  %vm1119_vm3 = vcmp.lt.s32.totalorder %v1118_v38, 0  ;;  %v1120_v48 = vsub.s32 0, %v1118_v38 }
 0x119   :  { %v1221_v47 = vand.u32 65535, %v1217_v20  ;;  %vm1008_vm4 = vcmp.eq.s32.totalorder %v11453_v43, 0  ;;  %v1110_v31 = vadd.s32 %v11420_v37, %v11418_v24  ;;  %v1222_v25 = vshrl.u32 %v1217_v20, 16 }
 0x11a   :  { %15364 = vst [vmem:[#allocation53_spill] sm:$0xff] %v11487_v30  ;;  %v11495_v35 = vmul.f32 %v1003_v32, %v988_v55  ;;  %v15073_v42 = vxor.u32 2147483648, %v11487_v30  ;;  %v1121_v1 = vsel %vm1119_vm3, %v1120_v48, %v1118_v38  ;;  %v1244_v61 = vshrl.u32 %v1213_v29, 16 }
 0x11b   :  { %v1122_v28 = vclz %v1121_v1  ;;  %v1225_v33 = vmul.u32 %v1221_v47, %v1220_v26  ;;  %v1206_v62 = vsel %vm1202_vm10, %v1186_v4, %v1189_v57  ;;  %v1224_v63 = vmul.u32 %v1222_v25, %v1219_v39 }
 0x11c   :  { %15365 = vst [vmem:[#allocation54_spill] sm:$0xff] %v11495_v35  ;;  %v15075_v41 = vxor.u32 2147483648, %v11495_v35  ;;  %v1013_v55 = vsel %vm1011_vm13, %v15073_v42, %v11495_v35  ;;  %v1328_v51 = vshrl.u32 %v1327_v52, 23  ;;  %v1207_v37 = vsel %vm1205_vm12, %v1195_v45, 2102212464 }
 0x11d   :  { %v10252_v22 = vadd.s32 4294967294, %v1122_v28  ;;  %v1223_v54 = vmul.u32 %v1221_v47, %v1219_v39  ;;  %v1243_v32 = vand.u32 65535, %v1213_v29  ;;  %v1226_v20 = vmul.u32 %v1222_v25, %v1220_v26 }
 0x11e   :  { %v1010_v24 = vsel %vm1008_vm4, %v11487_v30, %v15075_v41  ;;  %v1229_v1 = vshll.u32 %v1225_v33, 16  ;;  %v1227_v52 = vshll.u32 %v1224_v63, 16  ;;  %v1246_v28 = vmul.u32 %v1244_v61, %v1219_v39 }
 0x11f   :  { %v1014_v48 = vsel %vm1007_vm15, %v1010_v24, %v1013_v55  ;;  %vm10253_vm5 = vcmp.lt.s32.totalorder %v10252_v22, 0  ;;  %v10257_v30 = vadd.s32 4294967169, %v1328_v51  ;;  %v1228_v45 = vshrl.u32 %v1224_v63, 16 }
 0x120   :  { %v1015_v57 = vsel %vm1005_vm1, nan, %v1014_v48  ;;  %v1125_v4 = vsel %vm10253_vm5, 0, %v10252_v22  ;;  %vm1231_vm6 = vc.u32 %v1223_v54, %v1227_v52  ;;  %v1233_v29 = vadd.s32 %v1227_v52, %v1223_v54 }
 0x121   :  { %v1126_v42 = vsub.s32 32, %v1125_v4  ;;  %v1127_v36 = vshll.u32 %v1118_v38, %v1125_v4  ;;  %v1130_v41 = vsub.s32 4294967266, %v1125_v4  ;;  %5178 = vst [vmem:[#allocation7 + $0x20] sm:$0xff] %v1015_v57  ;;  %v1245_v47 = vmul.u32 %v1243_v32, %v1219_v39 }
 0x122   :  { %v1232_v25 = vsel %vm1231_vm6, 1, %v15336_v56  ;;  %v1247_v24 = vmul.u32 %v1243_v32, %v1220_v26  ;;  %vm1235_vm9 = vc.u32 %v1233_v29, %v1229_v1  ;;  %v1248_v48 = vmul.u32 %v1244_v61, %v1220_v26 }
 0x123   :  { %v1128_v43 = vshrl.u32 %v1110_v31, %v1126_v42  ;;  %v1131_v55 = vadd.s32 127, %v1130_v41  ;;  %v1234_v35 = vadd.s32 %v1232_v25, %v1226_v20  ;;  %v1249_v22 = vshll.u32 %v1246_v28, 16 }
 0x124   :  { %v1208_v38 = vsel %vm1204_vm0, %v11456_v0, %v1207_v37  ;;  %v1236_v63 = vsel %vm1235_vm9, 1, %v15336_v56  ;;  %v1230_v51 = vshrl.u32 %v1225_v33, 16  ;;  %v1251_v39 = vshll.u32 %v1247_v24, 16 }
 0x125   :  { %v1129_v7 = vor.u32 %v1128_v43, %v1127_v36  ;;  %v1132_v6 = vshll.u32 %v1131_v55, 23  ;;  %v1238_v54 = vadd.s32 %v1236_v63, %v1234_v35  ;;  %vm1253_vm10 = vc.u32 %v1245_v47, %v1249_v22 }
 0x126   :  { %v1254_v41 = vsel %vm1253_vm10, 1, %v15336_v56  ;;  %v1255_v32 = vadd.s32 %v1249_v22, %v1245_v47  ;;  %v15083_v36 = vand.u32 2147483647, %v10725_v10  ;;  %v1334_v61 = vadd.s32 1, %v10257_v30 }
 0x127   :  { %v1133_v42 = vor.u32 4788187, %v1132_v6  ;;  %v1136_v31 = vcvt.s32.f32 %v1129_v7  ;;  %v1239_v20 = vadd.s32 %v1238_v54, %v1228_v45  ;;  %v1256_v26 = vadd.s32 %v1254_v41, %v1248_v48 }
 0x128   :  { %v1209_v0 = vsel %vm1203_vm2, %v1206_v62, %v1208_v38  ;;  %v1250_v37 = vshrl.u32 %v1246_v28, 16  ;;  %vm1257_vm12 = vc.u32 %v1255_v32, %v1251_v39  ;;  %v11530_v6 = vadd.s32 %v1255_v32, %v1251_v39 }
 0x129   :  { %v1134_v1 = vand.u32 2147483647, %v1133_v42  ;;  %v11527_v33 = vadd.s32 %v1239_v20, %v1230_v51  ;;  %v1258_v35 = vsel %vm1257_vm12, 1, %v15336_v56  ;;  %vm1335_vm13 = vcmp.gt.s32.totalorder %v1334_v61, 0 }
 0x12a   :  { %v1252_v57 = vshrl.u32 %v1247_v24, 16  ;;  %v1260_v4 = vadd.s32 %v1258_v35, %v1256_v26  ;;  %v1336_v52 = vsel %vm1335_vm13, %v1334_v61, 0  ;;  %v15366_v45 = vand.u32 2147483647, %v10721_v8 }
 0x12b   :  { %v1137_v7 = vmul.f32 %v1136_v31, %v1134_v1  ;;  %vm1018_vm0 = vcmp.lt.s32.totalorder %v10721_v8, 0  ;;  %v1331_v23 = vand.u32 8388607, %v15083_v36  ;;  %v1338_v62 = vand.u32 31, %v1336_v52 }
 0x12c   :  { %vm11534_vm15 = vcmp.le.f32.partialorder %v15366_v45, 0.7853982  ;;  %v1140_v29 = vsub.s32 4, %v11460_v50  ;;  %v1261_v47 = vadd.s32 %v1260_v4, %v1250_v37  ;;  %v1263_v43 = vmul.u32 %v11464_v34, %v1209_v0 }
 0x12d   :  { %v1138_v28 = vxor.u32 2147483648, %v1137_v7  ;;  %vm1265_vm2 = vc.u32 %v11527_v33, %v11530_v6  ;;  %v11545_v55 = vshrl.u32 %v1336_v52, 5  ;;  %v11547_v25 = vsub.s32 32, %v1338_v62 }
 0x12e   :  { %v1341_v24 = vshll.u32 %v15335_v2, %v1338_v62  ;;  %v1262_v22 = vadd.s32 %v1261_v47, %v1252_v57  ;;  %v1344_v38 = vshll.u32 %v15330_v44, %v1338_v62  ;;  %v1347_v63 = vshll.u32 %v15331_v59, %v1338_v62 }
 0x12f   :  { %v1139_v48 = vsel %vm1018_vm0, %v1138_v28, %v1137_v7  ;;  %v1342_v51 = vshrl.u32 %v15330_v44, %v11547_v25  ;;  %v1345_v54 = vshrl.u32 %v15331_v59, %v11547_v25  ;;  %v1350_v39 = vshll.u32 %v15332_v53, %v1338_v62 }
 0x130   :  { %v1142_v34 = vsel %vm11534_vm15, %v10721_v8, %v1139_v48  ;;  %v1266_v31 = vadd.s32 1, %v1262_v22  ;;  %v1348_v41 = vshrl.u32 %v15332_v53, %v11547_v25  ;;  %v1351_v32 = vshrl.u32 %v15333_v49, %v11547_v25 }
 0x131   :  { %v1144_v42 = vmul.f32 %v1142_v34, %v1142_v34  ;;  %v1141_v20 = vsel %vm1018_vm0, %v1140_v29, %v11460_v50  ;;  %v11569_v26 = vor.u32 %v1342_v51, %v1341_v24  ;;  %v1353_v61 = vshll.u32 %v15333_v49, %v1338_v62 }
 0x132   :  { %v1354_v1 = vshrl.u32 %v15334_v60, %v11547_v25  ;;  %v1267_v35 = vsel %vm1265_vm2, %v1266_v31, %v1262_v22  ;;  %v11577_v7 = vor.u32 %v1345_v54, %v1344_v38  ;;  %v1332_v4 = vor.u32 8388608, %v1331_v23 }
 0x133   :  { %v1145_v0 = vmul.f32 -0.001358992, %v1144_v42  ;;  %v1152_v37 = vmul.f32 -0.00019511016, %v1144_v42  ;;  %v1268_v57 = vadd.s32 %v1267_v35, %v1263_v43  ;;  %v1352_v52 = vor.u32 %v1351_v32, %v1350_v39 }
 0x134   :  { %vm1356_vm3 = vcmp.lt.s32.totalorder %v11545_v55, 1  ;;  %v11582_v50 = vsel %vm11534_vm15, 0, %v1141_v20  ;;  %v11584_v28 = vor.u32 %v1348_v41, %v1347_v63  ;;  %v1355_v47 = vor.u32 %v1354_v1, %v1353_v61 }
 0x135   :  { %15369 = vst [vmem:[#allocation55_spill] sm:$0xff] %v11582_v50  ;;  %v1146_v45 = vadd.f32 0.041655596, %v1145_v0  ;;  %v1153_v62 = vadd.f32 0.008332121, %v1152_v37  ;;  %v1269_v29 = vadd.s32 536870912, %v1268_v57  ;;  %v1364_v30 = vsel %vm1356_vm3, %v11569_v26, %v11577_v7 }
 0x136   :  { %vm1358_vm4 = vcmp.lt.s32.totalorder %v11545_v55, 3  ;;  %vm1359_vm5 = vcmp.lt.s32.totalorder %v11545_v55, 4  ;;  %vm1357_vm6 = vcmp.lt.s32.totalorder %v11545_v55, 2  ;;  %v1160_v23 = vand.u32 3, %v11582_v50 }
 0x137   :  { %v1147_v24 = vmul.f32 %v1146_v45, %v1144_v42  ;;  %v1154_v43 = vmul.f32 %v1153_v62, %v1144_v42  ;;  %v11594_v48 = vshrl.u32 %v1269_v29, 30  ;;  %v1365_v22 = vsel %vm1359_vm5, %v1352_v52, 920167782 }
 0x138   :  { %v11598_v38 = vshll.u32 %v1332_v4, 8  ;;  %v1366_v54 = vsel %vm1358_vm4, %v11584_v28, %v1365_v22  ;;  %v1368_v39 = vsel %vm1356_vm3, %v11577_v7, %v11584_v28  ;;  %vm1159_vm9 = vweird.f32 %v10721_v8 }
 0x139   :  { %v1148_v63 = vadd.f32 -0.4999988, %v1147_v24  ;;  %v1155_v51 = vadd.f32 -0.16666654, %v1154_v43  ;;  %v1271_v31 = vshll.u32 %v11594_v48, 30  ;;  %v1367_v41 = vsel %vm1357_vm6, %v1364_v30, %v1366_v54 }
 0x13a   :  { %v1369_v32 = vsel %vm1359_vm5, %v1355_v47, 1326507024  ;;  %v1374_v0 = vshrl.u32 %v11598_v38, 16  ;;  %vm1161_vm10 = vcmp.lt.s32.totalorder %v1160_v23, 2  ;;  %v1373_v4 = vand.u32 65535, %v11598_v38 }
 0x13b   :  { %v1149_v20 = vmul.f32 %v1148_v63, %v1144_v42  ;;  %v1156_v61 = vmul.f32 %v1155_v51, %v1144_v42  ;;  %v1370_v1 = vsel %vm1358_vm4, %v1352_v52, %v1369_v32  ;;  %v1272_v37 = vsub.s32 %v1268_v57, %v1271_v31 }
 0x13c   :  { %v1371_v35 = vsel %vm1357_vm6, %v1368_v39, %v1370_v1  ;;  %v1398_v24 = vshrl.u32 %v1367_v41, 16  ;;  %vm1165_vm12 = vcmp.eq.s32.totalorder %v1160_v23, 2  ;;  %vm1162_vm15 = vcmp.eq.s32.totalorder %v1160_v23, 0 }
 0x13d   :  { %v11619_v45 = vadd.f32 1.0, %v1149_v20  ;;  %v1157_v62 = vadd.f32 1.0, %v1156_v61  ;;  %v1375_v29 = vand.u32 65535, %v1371_v35  ;;  %vm1273_vm13 = vcmp.lt.s32.totalorder %v1272_v37, 0 }
 0x13e   :  { %v1274_v42 = vsub.s32 0, %v1272_v37  ;;  %v1376_v47 = vshrl.u32 %v1371_v35, 16  ;;  %v1397_v51 = vand.u32 65535, %v1367_v41  ;;  %v1400_v32 = vmul.u32 %v1398_v24, %v1373_v4 }
 0x13f   :  { %v11621_v43 = vmul.f32 %v1157_v62, %v1142_v34  ;;  %v15082_v52 = vxor.u32 2147483648, %v11619_v45  ;;  %v11624_v57 = vmul.u32 %v1375_v29, %v1374_v0  ;;  %v1377_v22 = vmul.u32 %v1375_v29, %v1373_v4 }
 0x140   :  { %v1275_v30 = vsel %vm1273_vm13, %v1274_v42, %v1272_v37  ;;  %v1378_v63 = vmul.u32 %v1376_v47, %v1373_v4  ;;  %v1340_v34 = vshrl.u32 %v15335_v2, %v11547_v25  ;;  %v1481_v1 = vand.u32 2139095040, %v10727_v11 }
 0x141   :  { %v15086_v54 = vxor.u32 2147483648, %v11621_v43  ;;  %v1167_v39 = vsel %vm1165_vm12, %v15082_v52, %v11621_v43  ;;  %v1276_v31 = vclz %v1275_v30  ;;  %v1383_v61 = vshll.u32 %v11624_v57, 16 }
 0x142   :  { %v1381_v20 = vshll.u32 %v1378_v63, 16  ;;  %v1264_v35 = vadd.s32 %v11530_v6, %v11527_v33  ;;  %v1380_v29 = vmul.u32 %v1376_v47, %v1374_v0  ;;  %v1401_v52 = vmul.u32 %v1397_v51, %v1374_v0 }
 0x143   :  { %v1164_v41 = vsel %vm1162_vm15, %v11619_v45, %v15086_v54  ;;  %v10255_v62 = vadd.s32 4294967294, %v1276_v31  ;;  %v1399_v36 = vmul.u32 %v1397_v51, %v1373_v4  ;;  %v1403_v50 = vshll.u32 %v1400_v32, 16 }
 0x144   :  { %v1168_v42 = vsel %vm1161_vm10, %v1164_v41, %v1167_v39  ;;  %vm1385_vm0 = vc.u32 %v1377_v22, %v1381_v20  ;;  %v1387_v30 = vadd.s32 %v1381_v20, %v1377_v22  ;;  %v1360_v54 = vsel %vm1356_vm3, %v1340_v34, %v11569_v26 }
 0x145   :  { %v1169_v25 = vsel %vm1159_vm9, nan, %v1168_v42  ;;  %vm10256_vm2 = vcmp.lt.s32.totalorder %v10255_v62, 0  ;;  %v1386_v33 = vsel %vm1385_vm0, 1, %v15336_v56  ;;  %v1402_v22 = vmul.u32 %v1398_v24, %v1374_v0 }
 0x146   :  { %v1279_v46 = vsel %vm10256_vm2, 0, %v10255_v62  ;;  %vm1389_vm12 = vc.u32 %v1387_v30, %v1383_v61  ;;  %5179 = vst [vmem:[#allocation7 + $0x28] sm:$0xff] %v1169_v25  ;;  %v1382_v39 = vshrl.u32 %v1378_v63, 16  ;;  %v1388_v31 = vadd.s32 %v1386_v33, %v1380_v29 }
 0x147   :  { %v1280_v6 = vsub.s32 32, %v1279_v46  ;;  %v1281_v23 = vshll.u32 %v1272_v37, %v1279_v46  ;;  %v1284_v47 = vsub.s32 4294967266, %v1279_v46  ;;  %v1390_v20 = vsel %vm1389_vm12, 1, %v15336_v56 }
 0x148   :  { %v1405_v41 = vshll.u32 %v1401_v52, 16  ;;  %v1361_v62 = vsel %vm1359_vm5, %v11584_v28, 2102212464  ;;  %vm1407_vm3 = vc.u32 %v1399_v36, %v1403_v50  ;;  %v1384_v26 = vshrl.u32 %v11624_v57, 16 }
 0x149   :  { %v1282_v4 = vshrl.u32 %v1264_v35, %v1280_v6  ;;  %v1285_v51 = vadd.s32 127, %v1284_v47  ;;  %v1392_v34 = vadd.s32 %v1390_v20, %v1388_v31  ;;  %v1408_v61 = vsel %vm1407_vm3, 1, %v15336_v56 }
 0x14a   :  { %v1409_v37 = vadd.s32 %v1403_v50, %v1399_v36  ;;  %v1410_v24 = vadd.s32 %v1408_v61, %v1402_v22  ;;  %v1482_v63 = vshrl.u32 %v1481_v1, 23  ;;  %v1362_v35 = vsel %vm1358_vm4, %v11577_v7, %v1361_v62 }
 0x14b   :  { %v1283_v46 = vor.u32 %v1282_v4, %v1281_v23  ;;  %v1286_v0 = vshll.u32 %v1285_v51, 23  ;;  %v1393_v29 = vadd.s32 %v1392_v34, %v1382_v39  ;;  %v1404_v42 = vshrl.u32 %v1400_v32, 16 }
 0x14c   :  { %vm1411_vm10 = vc.u32 %v1409_v37, %v1405_v41  ;;  %v10260_v57 = vadd.s32 4294967169, %v1482_v63  ;;  %v1294_v33 = vsub.s32 4, %v11594_v48  ;;  %v1406_v6 = vshrl.u32 %v1401_v52, 16 }
 0x14d   :  { %v1287_v30 = vor.u32 4788187, %v1286_v0  ;;  %v1290_v28 = vcvt.s32.f32 %v1283_v46  ;;  %v1412_v25 = vsel %vm1411_vm10, 1, %v15336_v56  ;;  %v11657_v23 = vadd.s32 %v1393_v29, %v1384_v26 }
 0x14e   :  { %v1414_v36 = vadd.s32 %v1412_v25, %v1410_v24  ;;  %v11659_v1 = vadd.s32 %v1409_v37, %v1405_v41  ;;  %v1488_v47 = vadd.s32 1, %v10260_v57  ;;  %v1363_v7 = vsel %vm1357_vm6, %v1360_v54, %v1362_v35 }
 0x14f   :  { %v1288_v50 = vand.u32 2147483647, %v1287_v30  ;;  %v15370_v22 = vand.u32 2147483647, %v10723_v9  ;;  %vm1172_vm5 = vcmp.lt.s32.totalorder %v10723_v9, 0  ;;  %v1417_v55 = vmul.u32 %v11598_v38, %v1363_v7 }
 0x150   :  { %v1415_v32 = vadd.s32 %v1414_v36, %v1404_v42  ;;  %vm1489_vm13 = vcmp.gt.s32.totalorder %v1488_v47, 0  ;;  %v1295_v31 = vsel %vm1172_vm5, %v1294_v33, %v11594_v48  ;;  %v15089_v41 = vand.u32 2147483647, %v10727_v11 }
 0x151   :  { %vm11665_vm4 = vcmp.le.f32.partialorder %v15370_v22, 0.7853982  ;;  %v1291_v52 = vmul.f32 %v1290_v28, %v1288_v50  ;;  %v1490_v4 = vsel %vm1489_vm13, %v1488_v47, 0  ;;  %vm1419_vm6 = vc.u32 %v11657_v23, %v11659_v1 }
 0x152   :  { %v1416_v20 = vadd.s32 %v1415_v32, %v1406_v6  ;;  %v1492_v54 = vand.u32 31, %v1490_v4  ;;  %v11677_v34 = vsel %vm11665_vm4, 0, %v1295_v31  ;;  %v1485_v24 = vand.u32 8388607, %v15089_v41 }
 0x153   :  { %v1292_v51 = vxor.u32 2147483648, %v1291_v52  ;;  %v11687_v37 = vand.u32 3, %v11677_v34  ;;  %v11702_v6 = vshrl.u32 %v1490_v4, 5  ;;  %v1635_v4 = vand.u32 2139095040, %v10729_v3 }
 0x154   :  { %v1420_v62 = vadd.s32 1, %v1416_v20  ;;  %v11679_v61 = vsub.s32 32, %v1492_v54  ;;  %v1495_v63 = vshll.u32 %v15335_v2, %v1492_v54  ;;  %v1498_v29 = vshll.u32 %v15330_v44, %v1492_v54 }
 0x155   :  { %v1293_v26 = vsel %vm1172_vm5, %v1292_v51, %v1291_v52  ;;  %v1504_v30 = vshll.u32 %v15332_v53, %v1492_v54  ;;  %v1501_v36 = vshll.u32 %v15331_v59, %v1492_v54  ;;  %v1507_v47 = vshll.u32 %v15333_v49, %v1492_v54 }
 0x156   :  { %v11684_v48 = vsel %vm11665_vm4, %v10723_v9, %v1293_v26  ;;  %v1421_v38 = vsel %vm1419_vm6, %v1420_v62, %v1416_v20  ;;  %v1496_v35 = vshrl.u32 %v15330_v44, %v11679_v61  ;;  %v1499_v42 = vshrl.u32 %v15331_v59, %v11679_v61 }
 0x157   :  { %v1298_v46 = vmul.f32 %v11684_v48, %v11684_v48  ;;  %v1422_v0 = vadd.s32 %v1421_v38, %v1417_v55  ;;  %v1505_v33 = vshrl.u32 %v15333_v49, %v11679_v61  ;;  %v1502_v50 = vshrl.u32 %v15332_v53, %v11679_v61 }
 0x158   :  { %v1486_v39 = vor.u32 8388608, %v1485_v24  ;;  %vm1319_vm15 = vcmp.eq.s32.totalorder %v11687_v37, 2  ;;  %v11711_v52 = vor.u32 %v1496_v35, %v1495_v63  ;;  %v1508_v20 = vshrl.u32 %v15334_v60, %v11679_v61 }
 0x159   :  { %v1299_v28 = vmul.f32 -0.001358992, %v1298_v46  ;;  %v1306_v25 = vmul.f32 -0.00019511016, %v1298_v46  ;;  %v1423_v57 = vadd.s32 536870912, %v1422_v0  ;;  %v1506_v31 = vor.u32 %v1505_v33, %v1504_v30 }
 0x15a   :  { %v1500_v54 = vor.u32 %v1499_v42, %v1498_v29  ;;  %vm1316_vm0 = vcmp.eq.s32.totalorder %v11687_v37, 0  ;;  %v1503_v26 = vor.u32 %v1502_v50, %v1501_v36  ;;  %v1509_v38 = vor.u32 %v1508_v20, %v1507_v47 }
 0x15b   :  { %v1300_v7 = vadd.f32 0.041655596, %v1299_v28  ;;  %v1307_v32 = vadd.f32 0.008332121, %v1306_v25  ;;  %v11708_v22 = vshrl.u32 %v1423_v57, 30  ;;  %vm1510_vm2 = vcmp.lt.s32.totalorder %v11702_v6, 1 }
 0x15c   :  { %vm1513_vm12 = vcmp.lt.s32.totalorder %v11702_v6, 4  ;;  %vm1315_vm3 = vcmp.lt.s32.totalorder %v11687_v37, 2  ;;  %vm1512_vm10 = vcmp.lt.s32.totalorder %v11702_v6, 3  ;;  %vm15296_vm4 = vweird.f32 %v10723_v9 }
 0x15d   :  { %v1301_v51 = vmul.f32 %v1300_v7, %v1298_v46  ;;  %v1308_v55 = vmul.f32 %v1307_v32, %v1298_v46  ;;  %v1425_v62 = vshll.u32 %v11708_v22, 30  ;;  %vm1511_vm5 = vcmp.lt.s32.totalorder %v11702_v6, 2 }
 0x15e   :  { %v1519_v29 = vsel %vm1513_vm12, %v1506_v31, 920167782  ;;  %v11728_v42 = vshll.u32 %v1486_v39, 8  ;;  %v1636_v30 = vshrl.u32 %v1635_v4, 23  ;;  %v1522_v36 = vsel %vm1510_vm2, %v1500_v54, %v1503_v26 }
 0x15f   :  { %v1302_v24 = vadd.f32 -0.4999988, %v1301_v51  ;;  %v1309_v63 = vadd.f32 -0.16666654, %v1308_v55  ;;  %v11721_v35 = vsub.s32 %v1422_v0, %v1425_v62  ;;  %v1518_v0 = vsel %vm1510_vm2, %v11711_v52, %v1500_v54 }
 0x160   :  { %v1520_v33 = vsel %vm1512_vm10, %v1503_v26, %v1519_v29  ;;  %v1523_v50 = vsel %vm1513_vm12, %v1509_v38, 1326507024  ;;  %v1418_v7 = vadd.s32 %v11659_v1, %v11657_v23  ;;  %v1527_v4 = vand.u32 65535, %v11728_v42 }
 0x161   :  { %v1303_v28 = vmul.f32 %v1302_v24, %v1298_v46  ;;  %v1310_v25 = vmul.f32 %v1309_v63, %v1298_v46  ;;  %vm1427_vm13 = vcmp.lt.s32.totalorder %v11721_v35, 0  ;;  %v1428_v57 = vsub.s32 0, %v11721_v35 }
 0x162   :  { %v1524_v20 = vsel %vm1512_vm10, %v1506_v31, %v1523_v50  ;;  %v1528_v51 = vshrl.u32 %v11728_v42, 16  ;;  %v1521_v38 = vsel %vm1511_vm5, %v1518_v0, %v1520_v33  ;;  %v10263_v29 = vadd.s32 4294967169, %v1636_v30 }
 0x163   :  { %v11741_v47 = vadd.f32 1.0, %v1303_v28  ;;  %v1311_v46 = vadd.f32 1.0, %v1310_v25  ;;  %v1429_v32 = vsel %vm1427_vm13, %v1428_v57, %v11721_v35  ;;  %v1525_v23 = vsel %vm1511_vm5, %v1522_v36, %v1524_v20 }
 0x164   :  { %v1430_v39 = vclz %v1429_v32  ;;  %v1529_v24 = vand.u32 65535, %v1525_v23  ;;  %v1530_v63 = vshrl.u32 %v1525_v23, 16  ;;  %v1494_v28 = vshrl.u32 %v15335_v2, %v11679_v61 }
 0x165   :  { %15373 = vst [vmem:[#allocation56_spill] sm:$0xff] %v11741_v47  ;;  %v11751_v55 = vmul.f32 %v1311_v46, %v11684_v48  ;;  %v15087_v62 = vxor.u32 2147483648, %v11741_v47  ;;  %v1515_v25 = vsel %vm1513_vm12, %v1503_v26, 2102212464  ;;  %v1551_v0 = vand.u32 65535, %v1521_v38 }
 0x166   :  { %v10258_v1 = vadd.s32 4294967294, %v1430_v39  ;;  %v1531_v57 = vmul.u32 %v1529_v24, %v1527_v4  ;;  %v1552_v33 = vshrl.u32 %v1521_v38, 16  ;;  %v1532_v50 = vmul.u32 %v1530_v63, %v1527_v4 }
 0x167   :  { %15374 = vst [vmem:[#allocation57_spill] sm:$0xff] %v11751_v55  ;;  %v15088_v31 = vxor.u32 2147483648, %v11751_v55  ;;  %v1321_v48 = vsel %vm1319_vm15, %v15087_v62, %v11751_v55  ;;  %v1533_v46 = vmul.u32 %v1529_v24, %v1528_v51  ;;  %v1514_v38 = vsel %vm1510_vm2, %v1494_v28, %v11711_v52 }
 0x168   :  { %vm10259_vm6 = vcmp.lt.s32.totalorder %v10258_v1, 0  ;;  %v1516_v23 = vsel %vm1512_vm10, %v1500_v54, %v1515_v25  ;;  %v1535_v37 = vshll.u32 %v1532_v50, 16  ;;  %vm1326_vm15 = vcmp.lt.s32.totalorder %v10725_v10, 0 }
 0x169   :  { %v1318_v30 = vsel %vm1316_vm0, %v11741_v47, %v15088_v31  ;;  %v1433_v36 = vsel %vm10259_vm6, 0, %v10258_v1  ;;  %v1642_v1 = vadd.s32 1, %v10263_v29  ;;  %v1534_v31 = vmul.u32 %v1530_v63, %v1528_v51 }
 0x16a   :  { %v1322_v32 = vsel %vm1315_vm3, %v1318_v30, %v1321_v48  ;;  %v1434_v61 = vsub.s32 32, %v1433_v36  ;;  %v1435_v39 = vshll.u32 %v11721_v35, %v1433_v36  ;;  %v1438_v26 = vsub.s32 4294967266, %v1433_v36 }
 0x16b   :  { %v1323_v20 = vsel %vm15296_vm4, nan, %v1322_v32  ;;  %v1537_v35 = vshll.u32 %v1533_v46, 16  ;;  %v1553_v48 = vmul.u32 %v1551_v0, %v1527_v4  ;;  %v1554_v30 = vmul.u32 %v1552_v33, %v1527_v4 }
 0x16c   :  { %v1436_v62 = vshrl.u32 %v1418_v7, %v1434_v61  ;;  %v1439_v24 = vadd.s32 127, %v1438_v26  ;;  %5180 = vst [vmem:[#allocation7 + $0x30] sm:$0xff] %v1323_v20  ;;  %v1555_v36 = vmul.u32 %v1551_v0, %v1528_v51  ;;  %v15375_v32 = vand.u32 2147483647, %v10725_v10 }
 0x16d   :  { %vm1539_vm2 = vc.u32 %v1531_v57, %v1535_v37  ;;  %v1541_v7 = vadd.s32 %v1535_v37, %v1531_v57  ;;  %v1536_v29 = vshrl.u32 %v1532_v50, 16  ;;  %v1556_v28 = vmul.u32 %v1552_v33, %v1528_v51 }
 0x16e   :  { %vm11786_vm0 = vcmp.le.f32.partialorder %v15375_v32, 0.7853982  ;;  %v1437_v52 = vor.u32 %v1436_v62, %v1435_v39  ;;  %v1440_v54 = vshll.u32 %v1439_v24, 23  ;;  %v1540_v63 = vsel %vm1539_vm2, 1, %v15336_v56 }
 0x16f   :  { %v1557_v25 = vshll.u32 %v1554_v30, 16  ;;  %v1542_v20 = vadd.s32 %v1540_v63, %v1534_v31  ;;  %vm1543_vm12 = vc.u32 %v1541_v7, %v1537_v35  ;;  %v1538_v4 = vshrl.u32 %v1533_v46, 16 }
 0x170   :  { %v1441_v61 = vor.u32 4788187, %v1440_v54  ;;  %v1444_v26 = vcvt.s32.f32 %v1437_v52  ;;  %v1544_v0 = vsel %vm1543_vm12, 1, %v15336_v56  ;;  %v1559_v32 = vshll.u32 %v1555_v36, 16 }
 0x171   :  { %vm1561_vm3 = vc.u32 %v1553_v48, %v1557_v25  ;;  %v1546_v47 = vadd.s32 %v1544_v0, %v1542_v20  ;;  %v1563_v39 = vadd.s32 %v1557_v25, %v1553_v48  ;;  %v1448_v57 = vsub.s32 4, %v11708_v22 }
 0x172   :  { %v1442_v9 = vand.u32 2147483647, %v1441_v61  ;;  %v1562_v62 = vsel %vm1561_vm3, 1, %v15336_v56  ;;  %v15093_v51 = vand.u32 2147483647, %v10729_v3  ;;  %vm1643_vm10 = vcmp.gt.s32.totalorder %v1642_v1, 0 }
 0x173   :  { %v1564_v50 = vadd.s32 %v1562_v62, %v1556_v28  ;;  %v1547_v24 = vadd.s32 %v1546_v47, %v1536_v29  ;;  %v1558_v31 = vshrl.u32 %v1554_v30, 16  ;;  %vm1565_vm13 = vc.u32 %v1563_v39, %v1559_v32 }
 0x174   :  { %v1445_v33 = vmul.f32 %v1444_v26, %v1442_v9  ;;  %v1517_v46 = vsel %vm1511_vm5, %v1514_v38, %v1516_v23  ;;  %v1566_v37 = vsel %vm1565_vm13, 1, %v15336_v56  ;;  %v11798_v35 = vadd.s32 %v1563_v39, %v1559_v32 }
 0x175   :  { %v1644_v52 = vsel %vm1643_vm10, %v1642_v1, 0  ;;  %v11800_v48 = vadd.s32 %v1547_v24, %v1538_v4  ;;  %v1560_v7 = vshrl.u32 %v1555_v36, 16  ;;  %v1568_v63 = vadd.s32 %v1566_v37, %v1564_v50 }
 0x176   :  { %v1446_v54 = vxor.u32 2147483648, %v1445_v33  ;;  %v1449_v9 = vsel %vm1326_vm15, %v1448_v57, %v11708_v22  ;;  %v1639_v47 = vand.u32 8388607, %v15093_v51  ;;  %v1646_v30 = vand.u32 31, %v1644_v52 }
 0x177   :  { %v1569_v38 = vadd.s32 %v1568_v63, %v1558_v31  ;;  %v1571_v23 = vmul.u32 %v11728_v42, %v1517_v46  ;;  %v11810_v1 = vshrl.u32 %v1644_v52, 5  ;;  %vm1573_vm5 = vc.u32 %v11800_v48, %v11798_v35 }
 0x178   :  { %v1447_v6 = vsel %vm1326_vm15, %v1446_v54, %v1445_v33  ;;  %v11817_v22 = vsub.s32 32, %v1646_v30  ;;  %v1649_v29 = vshll.u32 %v15335_v2, %v1646_v30  ;;  %v1652_v61 = vshll.u32 %v15330_v44, %v1646_v30 }
 0x179   :  { %v1450_v36 = vsel %vm11786_vm0, %v10725_v10, %v1447_v6  ;;  %v1570_v25 = vadd.s32 %v1569_v38, %v1560_v7  ;;  %v1655_v26 = vshll.u32 %v15331_v59, %v1646_v30  ;;  %v1658_v0 = vshll.u32 %v15332_v53, %v1646_v30 }
 0x17a   :  { %v1452_v28 = vmul.f32 %v1450_v36, %v1450_v36  ;;  %v1650_v42 = vshrl.u32 %v15330_v44, %v11817_v22  ;;  %v1653_v20 = vshrl.u32 %v15331_v59, %v11817_v22  ;;  %v1656_v4 = vshrl.u32 %v15332_v53, %v11817_v22 }
 0x17b   :  { %v1574_v39 = vadd.s32 1, %v1570_v25  ;;  %v1659_v57 = vshrl.u32 %v15333_v49, %v11817_v22  ;;  %v11833_v50 = vsel %vm11786_vm0, 0, %v1449_v9  ;;  %v1640_v33 = vor.u32 8388608, %v1639_v47 }
 0x17c   :  { %v1453_v32 = vmul.f32 -0.001358992, %v1452_v28  ;;  %v1460_v62 = vmul.f32 -0.00019511016, %v1452_v28  ;;  %v11835_v24 = vor.u32 %v1650_v42, %v1649_v29  ;;  %v1661_v52 = vshll.u32 %v15333_v49, %v1646_v30 }
 0x17d   :  { %v1575_v37 = vsel %vm1573_vm5, %v1574_v39, %v1570_v25  ;;  %v11841_v7 = vor.u32 %v1653_v20, %v1652_v61  ;;  %v1660_v63 = vor.u32 %v1659_v57, %v1658_v0  ;;  %v1662_v41 = vshrl.u32 %v15334_v60, %v11817_v22 }
 0x17e   :  { %v1454_v31 = vadd.f32 0.041655596, %v1453_v32  ;;  %v1461_v46 = vadd.f32 0.008332121, %v1460_v62  ;;  %v1576_v54 = vadd.s32 %v1575_v37, %v1571_v23  ;;  %v11845_v47 = vor.u32 %v1656_v4, %v1655_v26 }
 0x17f   :  { %vm1664_vm6 = vcmp.lt.s32.totalorder %v11810_v1, 1  ;;  %v1468_v38 = vand.u32 3, %v11833_v50  ;;  %vm1666_vm15 = vcmp.lt.s32.totalorder %v11810_v1, 3  ;;  %vm1667_vm0 = vcmp.lt.s32.totalorder %v11810_v1, 4 }
 0x180   :  { %v1455_v9 = vmul.f32 %v1454_v31, %v1452_v28  ;;  %v1462_v6 = vmul.f32 %v1461_v46, %v1452_v28  ;;  %v1577_v29 = vadd.s32 536870912, %v1576_v54  ;;  %v1663_v25 = vor.u32 %v1662_v41, %v1661_v52 }
 0x181   :  { %vm1665_vm2 = vcmp.lt.s32.totalorder %v11810_v1, 2  ;;  %v1672_v26 = vsel %vm1664_vm6, %v11835_v24, %v11841_v7  ;;  %v1673_v42 = vsel %vm1667_vm0, %v1660_v63, 920167782  ;;  %v11860_v20 = vshll.u32 %v1640_v33, 8 }
 0x182   :  { %v1456_v30 = vadd.f32 -0.4999988, %v1455_v9  ;;  %v1463_v23 = vadd.f32 -0.16666654, %v1462_v6  ;;  %v11852_v61 = vshrl.u32 %v1577_v29, 30  ;;  %vm15101_vm12 = vweird.f32 %v10725_v10 }
 0x183   :  { %v1674_v32 = vsel %vm1666_vm15, %v11845_v47, %v1673_v42  ;;  %vm1470_vm3 = vcmp.eq.s32.totalorder %v1468_v38, 0  ;;  %v1676_v57 = vsel %vm1664_vm6, %v11841_v7, %v11845_v47  ;;  %vm1473_vm10 = vcmp.eq.s32.totalorder %v1468_v38, 2 }
 0x184   :  { %v1457_v4 = vmul.f32 %v1456_v30, %v1452_v28  ;;  %v1464_v0 = vmul.f32 %v1463_v23, %v1452_v28  ;;  %v1579_v62 = vshll.u32 %v11852_v61, 30  ;;  %v1675_v39 = vsel %vm1665_vm2, %v1672_v26, %v1674_v32 }
 0x185   :  { %v1677_v31 = vsel %vm1667_vm0, %v1663_v25, 1326507024  ;;  %v1681_v52 = vand.u32 65535, %v11860_v20  ;;  %v1682_v41 = vshrl.u32 %v11860_v20, 16  ;;  %v1706_v30 = vshrl.u32 %v1675_v39, 16 }
 0x186   :  { %v11873_v33 = vadd.f32 1.0, %v1457_v4  ;;  %v1465_v28 = vadd.f32 1.0, %v1464_v0  ;;  %v1580_v46 = vsub.s32 %v1576_v54, %v1579_v62  ;;  %v1678_v37 = vsel %vm1666_vm15, %v1660_v63, %v1677_v31 }
 0x187   :  { %v1679_v29 = vsel %vm1665_vm2, %v1676_v57, %v1678_v37  ;;  %vm1469_vm5 = vcmp.lt.s32.totalorder %v1468_v38, 2  ;;  %v1648_v38 = vshrl.u32 %v15335_v2, %v11817_v22 }
 0x188   :  { %15378 = vst [vmem:[#allocation58_spill] sm:$0xff] %v11873_v33  ;;  %v11881_v9 = vmul.f32 %v1465_v28, %v1450_v36  ;;  %v15096_v6 = vxor.u32 2147483648, %v11873_v33  ;;  %vm1581_vm13 = vcmp.lt.s32.totalorder %v1580_v46, 0  ;;  %v1582_v23 = vsub.s32 0, %v1580_v46 }
 0x189   :  { %v1683_v26 = vand.u32 65535, %v1679_v29  ;;  %v1684_v25 = vshrl.u32 %v1679_v29, 16  ;;  %v1705_v36 = vand.u32 65535, %v1675_v39  ;;  %v1708_v28 = vmul.u32 %v1706_v30, %v1681_v52 }
 0x18a   :  { %15379 = vst [vmem:[#allocation59_spill] sm:$0xff] %v11881_v9  ;;  %v15097_v54 = vxor.u32 2147483648, %v11881_v9  ;;  %v1475_v63 = vsel %vm1473_vm10, %v15096_v6, %v11881_v9  ;;  %v1583_v42 = vsel %vm1581_vm13, %v1582_v23, %v1580_v46  ;;  %v1572_v23 = vadd.s32 %v11798_v35, %v11800_v48 }
 0x18b   :  { %v1685_v4 = vmul.u32 %v1683_v26, %v1681_v52  ;;  %v1686_v0 = vmul.u32 %v1684_v25, %v1681_v52  ;;  %v1687_v32 = vmul.u32 %v1683_v26, %v1682_v41  ;;  %v1584_v57 = vclz %v1583_v42 }
 0x18c   :  { %v1472_v62 = vsel %vm1470_vm3, %v11873_v33, %v15097_v54  ;;  %v1688_v29 = vmul.u32 %v1684_v25, %v1682_v41  ;;  %v1789_v6 = vand.u32 2139095040, %v10731_v12  ;;  %v1709_v54 = vmul.u32 %v1705_v36, %v1682_v41 }
 0x18d   :  { %v1476_v37 = vsel %vm1469_vm5, %v1472_v62, %v1475_v63  ;;  %v1689_v51 = vshll.u32 %v1686_v0, 16  ;;  %v1691_v55 = vshll.u32 %v1687_v32, 16  ;;  %v10261_v26 = vadd.s32 4294967294, %v1584_v57 }
 0x18e   :  { %v1477_v39 = vsel %vm15101_vm12, nan, %v1476_v37  ;;  %v1707_v63 = vmul.u32 %v1705_v36, %v1681_v52  ;;  %v1711_v62 = vshll.u32 %v1708_v28, 16  ;;  %v1690_v37 = vshrl.u32 %v1686_v0, 16 }
 0x18f   :  { %vm1693_vm3 = vc.u32 %v1685_v4, %v1689_v51  ;;  %v1695_v42 = vadd.s32 %v1689_v51, %v1685_v4  ;;  %5181 = vst [vmem:[#allocation7 + $0x38] sm:$0xff] %v1477_v39  ;;  %vm10262_vm10 = vcmp.lt.s32.totalorder %v10261_v26, 0  ;;  %v1710_v33 = vmul.u32 %v1706_v30, %v1682_v41 }
 0x190   :  { %v1694_v25 = vsel %vm1693_vm3, 1, %v15336_v56  ;;  %v1587_v31 = vsel %vm10262_vm10, 0, %v10261_v26  ;;  %v1668_v22 = vsel %vm1664_vm6, %v1648_v38, %v11835_v24  ;;  %v1669_v51 = vsel %vm1667_vm0, %v11845_v47, 2102212464 }
 0x191   :  { %v1696_v10 = vadd.s32 %v1694_v25, %v1688_v29  ;;  %vm1697_vm13 = vc.u32 %v1695_v42, %v1691_v55  ;;  %v1588_v35 = vsub.s32 32, %v1587_v31  ;;  %v1589_v48 = vshll.u32 %v1580_v46, %v1587_v31 }
 0x192   :  { %v1592_v57 = vsub.s32 4294967266, %v1587_v31  ;;  %v1698_v4 = vsel %vm1697_vm13, 1, %v15336_v56  ;;  %v1713_v52 = vshll.u32 %v1709_v54, 16  ;;  %vm1715_vm5 = vc.u32 %v1707_v63, %v1711_v62 }
 0x193   :  { %v1590_v36 = vshrl.u32 %v1572_v23, %v1588_v35  ;;  %v1700_v0 = vadd.s32 %v1698_v4, %v1696_v10  ;;  %v1692_v55 = vshrl.u32 %v1687_v32, 16  ;;  %v1716_v46 = vsel %vm1715_vm5, 1, %v15336_v56 }
 0x194   :  { %v1593_v39 = vadd.s32 127, %v1592_v57  ;;  %v1717_v31 = vadd.s32 %v1711_v62, %v1707_v63  ;;  %v1790_v41 = vshrl.u32 %v1789_v6, 23  ;;  %v1718_v24 = vadd.s32 %v1716_v46, %v1710_v33 }
 0x195   :  { %v1591_v30 = vor.u32 %v1590_v36, %v1589_v48  ;;  %v1701_v26 = vadd.s32 %v1700_v0, %v1690_v37  ;;  %v1670_v47 = vsel %vm1666_vm15, %v11841_v7, %v1669_v51  ;;  %v1712_v38 = vshrl.u32 %v1708_v28, 16 }
 0x196   :  { %v1594_v29 = vshll.u32 %v1593_v39, 23  ;;  %vm1719_vm6 = vc.u32 %v1717_v31, %v1713_v52  ;;  %v10266_v42 = vadd.s32 4294967169, %v1790_v41  ;;  %v1602_v10 = vsub.s32 4, %v11852_v61 }
 0x197   :  { %v1598_v25 = vcvt.s32.f32 %v1591_v30  ;;  %v1720_v32 = vsel %vm1719_vm6, 1, %v15336_v56  ;;  %v1714_v35 = vshrl.u32 %v1709_v54, 16  ;;  %v11917_v48 = vadd.s32 %v1701_v26, %v1692_v55 }
 0x198   :  { %v1595_v23 = vor.u32 4788187, %v1594_v29  ;;  %v1722_v63 = vadd.s32 %v1720_v32, %v1718_v24  ;;  %v1796_v6 = vadd.s32 1, %v10266_v42  ;;  %v11919_v33 = vadd.s32 %v1717_v31, %v1713_v52 }
 0x199   :  { %vm1480_vm0 = vcmp.lt.s32.totalorder %v10727_v11, 0  ;;  %v1671_v7 = vsel %vm1665_vm2, %v1668_v22, %v1670_v47  ;;  %v15380_v54 = vand.u32 2147483647, %v10731_v12  ;;  %v15381_v52 = vand.u32 2147483647, %v10727_v11 }
 0x19a   :  { %v1596_v62 = vand.u32 2147483647, %v1595_v23  ;;  %v1723_v28 = vadd.s32 %v1722_v63, %v1712_v38  ;;  %vm1797_vm15 = vcmp.gt.s32.totalorder %v1796_v6, 0  ;;  %v1603_v57 = vsel %vm1480_vm0, %v1602_v10, %v11852_v61 }
 0x19b   :  { %v1793_v51 = vand.u32 8388607, %v15380_v54  ;;  %v1798_v4 = vsel %vm1797_vm15, %v1796_v6, 0  ;;  %vm1479_vm3 = vcmp.le.f32.partialorder %v15381_v52, 0.7853982  ;;  %v1725_v1 = vmul.u32 %v11860_v20, %v1671_v7 }
 0x19c   :  { %v1599_v37 = vmul.f32 %v1598_v25, %v1596_v62  ;;  %v1724_v36 = vadd.s32 %v1723_v28, %v1714_v35  ;;  %v1800_v39 = vand.u32 31, %v1798_v4  ;;  %vm1727_vm2 = vc.u32 %v11917_v48, %v11919_v33 }
 0x19d   :  { %v11934_v22 = vsel %vm1479_vm3, 0, %v1603_v57  ;;  %v1794_v41 = vor.u32 8388608, %v1793_v51  ;;  %v11945_v26 = vshrl.u32 %v1798_v4, 5  ;;  %v1943_v7 = vand.u32 2139095040, %v10733_v13 }
 0x19e   :  { %v1600_v0 = vxor.u32 2147483648, %v1599_v37  ;;  %v1728_v55 = vadd.s32 1, %v1724_v36  ;;  %v1801_v46 = vsub.s32 32, %v1800_v39  ;;  %v11939_v31 = vand.u32 3, %v11934_v22 }
 0x19f   :  { %v1806_v24 = vshll.u32 %v15330_v44, %v1800_v39  ;;  %v1809_v42 = vshll.u32 %v15331_v59, %v1800_v39  ;;  %v1812_v23 = vshll.u32 %v15332_v53, %v1800_v39  ;;  %v1815_v35 = vshll.u32 %v15333_v49, %v1800_v39 }
 0x1a0   :  { %v1601_v61 = vsel %vm1480_vm0, %v1600_v0, %v1599_v37  ;;  %v1729_v20 = vsel %vm1727_vm2, %v1728_v55, %v1724_v36  ;;  %v1807_v25 = vshrl.u32 %v15331_v59, %v1801_v46  ;;  %v1810_v10 = vshrl.u32 %v15332_v53, %v1801_v46 }
 0x1a1   :  { %v11943_v29 = vsel %vm1479_vm3, %v10727_v11, %v1601_v61  ;;  %v1730_v38 = vadd.s32 %v1729_v20, %v1725_v1  ;;  %v1813_v32 = vshrl.u32 %v15333_v49, %v1801_v46  ;;  %v1803_v28 = vshll.u32 %v15335_v2, %v1800_v39 }
 0x1a2   :  { %v1606_v47 = vmul.f32 %v11943_v29, %v11943_v29  ;;  %v1804_v37 = vshrl.u32 %v15330_v44, %v1801_v46  ;;  %v1816_v57 = vshrl.u32 %v15334_v60, %v1801_v46  ;;  %v11960_v54 = vshll.u32 %v1794_v41, 8 }
 0x1a3   :  { %v1731_v62 = vadd.s32 536870912, %v1730_v38  ;;  %v1814_v52 = vor.u32 %v1813_v32, %v1812_v23  ;;  %vm1627_vm10 = vcmp.eq.s32.totalorder %v11939_v31, 2  ;;  %v11965_v0 = vor.u32 %v1807_v25, %v1806_v24 }
 0x1a4   :  { %v1607_v63 = vmul.f32 -0.001358992, %v1606_v47  ;;  %v1614_v6 = vmul.f32 -0.00019511016, %v1606_v47  ;;  %v1811_v1 = vor.u32 %v1810_v10, %v1809_v42  ;;  %v1817_v55 = vor.u32 %v1816_v57, %v1815_v35 }
 0x1a5   :  { %v11962_v36 = vshrl.u32 %v1731_v62, 30  ;;  %vm1821_vm13 = vcmp.lt.s32.totalorder %v11945_v26, 4  ;;  %vm1818_vm5 = vcmp.lt.s32.totalorder %v11945_v26, 1  ;;  %vm1624_vm6 = vcmp.eq.s32.totalorder %v11939_v31, 0 }
 0x1a6   :  { %v1608_v51 = vadd.f32 0.041655596, %v1607_v63  ;;  %v1615_v4 = vadd.f32 0.008332121, %v1614_v6  ;;  %v1805_v41 = vor.u32 %v1804_v37, %v1803_v28  ;;  %vm1820_vm0 = vcmp.lt.s32.totalorder %v11945_v26, 3 }
 0x1a7   :  { %v1733_v20 = vshll.u32 %v11962_v36, 30  ;;  %v11973_v23 = vand.u32 65535, %v11960_v54  ;;  %v1944_v24 = vshrl.u32 %v1943_v7, 23  ;;  %vm1623_vm15 = vcmp.lt.s32.totalorder %v11939_v31, 2 }
 0x1a8   :  { %v1609_v39 = vmul.f32 %v1608_v51, %v1606_v47  ;;  %v1616_v61 = vmul.f32 %v1615_v4, %v1606_v47  ;;  %v1827_v32 = vsel %vm1821_vm13, %v1814_v52, 920167782  ;;  %vm15111_vm3 = vweird.f32 %v10727_v11 }
 0x1a9   :  { %v1734_v10 = vsub.s32 %v1730_v38, %v1733_v20  ;;  %v1802_v35 = vshrl.u32 %v15335_v2, %v1801_v46  ;;  %vm1819_vm2 = vcmp.lt.s32.totalorder %v11945_v26, 2  ;;  %v1830_v63 = vsel %vm1818_vm5, %v11965_v0, %v1811_v1 }
 0x1aa   :  { %v1610_v25 = vadd.f32 -0.4999988, %v1609_v39  ;;  %v1617_v42 = vadd.f32 -0.16666654, %v1616_v61  ;;  %v1831_v6 = vsel %vm1821_vm13, %v1817_v55, 1326507024  ;;  %v1826_v28 = vsel %vm1818_vm5, %v1805_v41, %v11965_v0 }
 0x1ab   :  { %vm1735_vm12 = vcmp.lt.s32.totalorder %v1734_v10, 0  ;;  %v1736_v38 = vsub.s32 0, %v1734_v10  ;;  %v1828_v46 = vsel %vm1820_vm0, %v1811_v1, %v1827_v32  ;;  %v1832_v37 = vsel %vm1820_vm0, %v1814_v52, %v1831_v6 }
 0x1ac   :  { %v1611_v62 = vmul.f32 %v1610_v25, %v1606_v47  ;;  %v1618_v7 = vmul.f32 %v1617_v42, %v1606_v47  ;;  %v1836_v57 = vshrl.u32 %v11960_v54, 16  ;;  %v1833_v47 = vsel %vm1819_vm2, %v1830_v63, %v1832_v37 }
 0x1ad   :  { %v1737_v55 = vsel %vm1735_vm12, %v1736_v38, %v1734_v10  ;;  %v1726_v39 = vadd.s32 %v11919_v33, %v11917_v48  ;;  %v1837_v20 = vand.u32 65535, %v1833_v47  ;;  %v1838_v25 = vshrl.u32 %v1833_v47, 16 }
 0x1ae   :  { %v11994_v51 = vadd.f32 1.0, %v1611_v62  ;;  %v1619_v4 = vadd.f32 1.0, %v1618_v7  ;;  %v1738_v61 = vclz %v1737_v55  ;;  %v1822_v32 = vsel %vm1818_vm5, %v1802_v35, %v1805_v41 }
 0x1af   :  { %v10269_v6 = vadd.s32 4294967169, %v1944_v24  ;;  %v1829_v63 = vsel %vm1819_vm2, %v1826_v28, %v1828_v46  ;;  %v1840_v48 = vmul.u32 %v1838_v25, %v11973_v23  ;;  %v1823_v41 = vsel %vm1821_vm13, %v1811_v1, 2102212464 }
 0x1b0   :  { %15382 = vst [vmem:[#allocation60_spill] sm:$0xff] %v11994_v51  ;;  %v12001_v42 = vmul.f32 %v1619_v4, %v11943_v29  ;;  %v15102_v52 = vxor.u32 2147483648, %v11994_v51  ;;  %v10264_v62 = vadd.s32 4294967294, %v1738_v61  ;;  %v1841_v24 = vmul.u32 %v1837_v20, %v1836_v57 }
 0x1b1   :  { %v1839_v35 = vmul.u32 %v1837_v20, %v11973_v23  ;;  %v1843_v38 = vshll.u32 %v1840_v48, 16  ;;  %v1859_v37 = vand.u32 65535, %v1829_v63  ;;  %v1842_v4 = vmul.u32 %v1838_v25, %v1836_v57 }
 0x1b2   :  { %15383 = vst [vmem:[#allocation61_spill] sm:$0xff] %v12001_v42  ;;  %v15107_v33 = vxor.u32 2147483648, %v12001_v42  ;;  %v1629_v29 = vsel %vm1627_vm10, %v15102_v52, %v12001_v42  ;;  %vm10265_vm12 = vcmp.lt.s32.totalorder %v10264_v62, 0  ;;  %v1860_v55 = vshrl.u32 %v1829_v63, 16 }
 0x1b3   :  { %v1741_v46 = vsel %vm10265_vm12, 0, %v10264_v62  ;;  %v1824_v7 = vsel %vm1820_vm0, %v11965_v0, %v1823_v41  ;;  %v1845_v30 = vshll.u32 %v1841_v24, 16  ;;  %v1950_v42 = vadd.s32 1, %v10269_v6 }
 0x1b4   :  { %v1626_v28 = vsel %vm1624_vm6, %v11994_v51, %v15107_v33  ;;  %v1742_v61 = vsub.s32 32, %v1741_v46  ;;  %v1743_v1 = vshll.u32 %v1734_v10, %v1741_v46  ;;  %v1746_v52 = vsub.s32 4294967266, %v1741_v46 }
 0x1b5   :  { %v1630_v47 = vsel %vm1623_vm15, %v1626_v28, %v1629_v29  ;;  %vm1847_vm10 = vc.u32 %v1839_v35, %v1843_v38  ;;  %v1861_v25 = vmul.u32 %v1859_v37, %v11973_v23  ;;  %v1849_v62 = vadd.s32 %v1843_v38, %v1839_v35 }
 0x1b6   :  { %v1631_v20 = vsel %vm15111_vm3, nan, %v1630_v47  ;;  %v1744_v9 = vshrl.u32 %v1726_v39, %v1742_v61  ;;  %v1747_v33 = vadd.s32 127, %v1746_v52  ;;  %v1848_v31 = vsel %vm1847_vm10, 1, %v15336_v56 }
 0x1b7   :  { %5182 = vst [vmem:[#allocation7 + $0x40] sm:$0xff] %v1631_v20  ;;  %v1862_v10 = vmul.u32 %v1860_v55, %v11973_v23  ;;  %v1863_v63 = vmul.u32 %v1859_v37, %v1836_v57  ;;  %v1844_v46 = vshrl.u32 %v1840_v48, 16  ;;  %v1850_v47 = vadd.s32 %v1848_v31, %v1842_v4 }
 0x1b8   :  { %v1745_v29 = vor.u32 %v1744_v9, %v1743_v1  ;;  %v1748_v28 = vshll.u32 %v1747_v33, 23  ;;  %vm1851_vm13 = vc.u32 %v1849_v62, %v1845_v30  ;;  %v1864_v0 = vmul.u32 %v1860_v55, %v1836_v57 }
 0x1b9   :  { %v1865_v41 = vshll.u32 %v1862_v10, 16  ;;  %v1867_v6 = vshll.u32 %v1863_v63, 16  ;;  %v1846_v61 = vshrl.u32 %v1841_v24, 16  ;;  %v1852_v11 = vsel %vm1851_vm13, 1, %v15336_v56 }
 0x1ba   :  { %v1749_v39 = vor.u32 4788187, %v1748_v28  ;;  %v1752_v52 = vcvt.s32.f32 %v1745_v29  ;;  %v1854_v20 = vadd.s32 %v1852_v11, %v1850_v47  ;;  %vm1951_vm6 = vcmp.gt.s32.totalorder %v1950_v42, 0 }
 0x1bb   :  { %vm1869_vm5 = vc.u32 %v1861_v25, %v1865_v41  ;;  %v1871_v51 = vadd.s32 %v1865_v41, %v1861_v25  ;;  %v1825_v9 = vsel %vm1819_vm2, %v1822_v32, %v1824_v7  ;;  %v1952_v48 = vsel %vm1951_vm6, %v1950_v42, 0 }
 0x1bc   :  { %v1750_v35 = vand.u32 2147483647, %v1749_v39  ;;  %v1870_v23 = vsel %vm1869_vm5, 1, %v15336_v56  ;;  %v1855_v30 = vadd.s32 %v1854_v20, %v1844_v46  ;;  %v1866_v57 = vshrl.u32 %v1862_v10, 16 }
 0x1bd   :  { %v1872_v33 = vadd.s32 %v1870_v23, %v1864_v0  ;;  %vm1873_vm0 = vc.u32 %v1871_v51, %v1867_v6  ;;  %v12039_v37 = vadd.s32 %v1871_v51, %v1867_v6  ;;  %v1954_v11 = vand.u32 31, %v1952_v48 }
 0x1be   :  { %v1753_v38 = vmul.f32 %v1752_v52, %v1750_v35  ;;  %v1874_v24 = vsel %vm1873_vm0, 1, %v15336_v56  ;;  %vm1634_vm15 = vcmp.lt.s32.totalorder %v10729_v3, 0  ;;  %v12042_v4 = vadd.s32 %v1855_v30, %v1846_v61 }
 0x1bf   :  { %v1868_v55 = vshrl.u32 %v1863_v63, 16  ;;  %v1876_v26 = vadd.s32 %v1874_v24, %v1872_v33  ;;  %v15384_v32 = vand.u32 2147483647, %v10729_v3  ;;  %v15387_v1 = vand.u32 2147483647, %v10733_v13 }
 0x1c0   :  { %v1754_v7 = vxor.u32 2147483648, %v1753_v38  ;;  %v12052_v31 = vsub.s32 32, %v1954_v11  ;;  %v15388_v51 = vsub.s32 4, %v11962_v36  ;;  %v1879_v63 = vmul.u32 %v11960_v54, %v1825_v9 }
 0x1c1   :  { %vm12046_vm2 = vcmp.le.f32.partialorder %v15384_v32, 0.7853982  ;;  %v1947_v25 = vand.u32 8388607, %v15387_v1  ;;  %v1877_v10 = vadd.s32 %v1876_v26, %v1866_v57  ;;  %v12058_v29 = vshrl.u32 %v1952_v48, 5 }
 0x1c2   :  { %v1757_v62 = vsel %vm1634_vm15, %v15388_v51, %v11962_v36  ;;  %v1755_v28 = vsel %vm1634_vm15, %v1754_v7, %v1753_v38  ;;  %vm1881_vm12 = vc.u32 %v12042_v4, %v12039_v37  ;;  %v1957_v46 = vshll.u32 %v15335_v2, %v1954_v11 }
 0x1c3   :  { %v1960_v47 = vshll.u32 %v15330_v44, %v1954_v11  ;;  %v1758_v0 = vsel %vm12046_vm2, %v10729_v3, %v1755_v28  ;;  %v1878_v41 = vadd.s32 %v1877_v10, %v1868_v55  ;;  %v1961_v36 = vshrl.u32 %v15331_v59, %v12052_v31 }
 0x1c4   :  { %v1966_v54 = vshll.u32 %v15332_v53, %v1954_v11  ;;  %v1760_v6 = vmul.f32 %v1758_v0, %v1758_v0  ;;  %v1963_v39 = vshll.u32 %v15331_v59, %v1954_v11  ;;  %v1964_v52 = vshrl.u32 %v15332_v53, %v12052_v31 }
 0x1c5   :  { %v1967_v61 = vshrl.u32 %v15333_v49, %v12052_v31  ;;  %v1882_v20 = vadd.s32 1, %v1878_v41  ;;  %v1958_v35 = vshrl.u32 %v15330_v44, %v12052_v31  ;;  %v1969_v9 = vshll.u32 %v15333_v49, %v1954_v11 }
 0x1c6   :  { %v1970_v23 = vshrl.u32 %v15334_v60, %v12052_v31  ;;  %v12082_v48 = vsel %vm12046_vm2, 0, %v1757_v62  ;;  %v1761_v30 = vmul.f32 -0.001358992, %v1760_v6  ;;  %v1768_v57 = vmul.f32 -0.00019511016, %v1760_v6 }
 0x1c7   :  { %v1948_v33 = vor.u32 8388608, %v1947_v25  ;;  %v1883_v38 = vsel %vm1881_vm12, %v1882_v20, %v1878_v41  ;;  %v12087_v24 = vor.u32 %v1961_v36, %v1960_v47  ;;  %v1968_v55 = vor.u32 %v1967_v61, %v1966_v54 }
 0x1c8   :  { %v1971_v26 = vor.u32 %v1970_v23, %v1969_v9  ;;  %v1762_v32 = vadd.f32 0.041655596, %v1761_v30  ;;  %v1769_v11 = vadd.f32 0.008332121, %v1768_v57  ;;  %v1884_v7 = vadd.s32 %v1883_v38, %v1879_v63 }
 0x1c9   :  { %v12089_v1 = vor.u32 %v1964_v52, %v1963_v39  ;;  %v1776_v42 = vand.u32 3, %v12082_v48  ;;  %v1959_v51 = vor.u32 %v1958_v35, %v1957_v46  ;;  %vm1972_vm10 = vcmp.lt.s32.totalorder %v12058_v29, 1 }
 0x1ca   :  { %vm1975_vm13 = vcmp.lt.s32.totalorder %v12058_v29, 4  ;;  %v1763_v25 = vmul.f32 %v1762_v32, %v1760_v6  ;;  %v1770_v62 = vmul.f32 %v1769_v11, %v1760_v6  ;;  %v1885_v10 = vadd.s32 536870912, %v1884_v7 }
 0x1cb   :  { %vm1974_vm5 = vcmp.lt.s32.totalorder %v12058_v29, 3  ;;  %vm1973_vm6 = vcmp.lt.s32.totalorder %v12058_v29, 2  ;;  %v1981_v28 = vsel %vm1975_vm13, %v1968_v55, 920167782  ;;  %v1985_v63 = vsel %vm1975_vm13, %v1971_v26, 1326507024 }
 0x1cc   :  { %v12100_v47 = vshll.u32 %v1948_v33, 8  ;;  %v1764_v46 = vadd.f32 -0.4999988, %v1763_v25  ;;  %v1771_v41 = vadd.f32 -0.16666654, %v1770_v62  ;;  %v12102_v36 = vshrl.u32 %v1885_v10, 30 }
 0x1cd   :  { %v1984_v54 = vsel %vm1972_vm10, %v12087_v24, %v12089_v1  ;;  %vm1777_vm0 = vcmp.lt.s32.totalorder %v1776_v42, 2  ;;  %v1980_v39 = vsel %vm1972_vm10, %v1959_v51, %v12087_v24  ;;  %v1986_v52 = vsel %vm1974_vm5, %v1968_v55, %v1985_v63 }
 0x1ce   :  { %v1765_v61 = vmul.f32 %v1764_v46, %v1760_v6  ;;  %v1772_v20 = vmul.f32 %v1771_v41, %v1760_v6  ;;  %v1887_v35 = vshll.u32 %v12102_v36, 30  ;;  %v1982_v9 = vsel %vm1974_vm5, %v12089_v1, %v1981_v28 }
 0x1cf   :  { %vm1778_vm15 = vcmp.eq.s32.totalorder %v1776_v42, 0  ;;  %v1987_v23 = vsel %vm1973_vm6, %v1984_v54, %v1986_v52  ;;  %v1989_v30 = vand.u32 65535, %v12100_v47  ;;  %v1990_v57 = vshrl.u32 %v12100_v47, 16 }
 0x1d0   :  { %v12121_v33 = vadd.f32 1.0, %v1765_v61  ;;  %v1773_v38 = vadd.f32 1.0, %v1772_v20  ;;  %vm1781_vm2 = vcmp.eq.s32.totalorder %v1776_v42, 2  ;;  %v1888_v55 = vsub.s32 %v1884_v7, %v1887_v35 }
 0x1d1   :  { %v1956_v6 = vshrl.u32 %v15335_v2, %v12052_v31  ;;  %v1983_v26 = vsel %vm1973_vm6, %v1980_v39, %v1982_v9  ;;  %v1991_v32 = vand.u32 65535, %v1987_v23  ;;  %v1992_v11 = vshrl.u32 %v1987_v23, 16 }
 0x1d2   :  { %15389 = vst [vmem:[#allocation62_spill] sm:$0xff] %v12121_v33  ;;  %v12127_v25 = vmul.f32 %v1773_v38, %v1758_v0  ;;  %v15112_v62 = vxor.u32 2147483648, %v12121_v33  ;;  %vm1889_vm12 = vcmp.lt.s32.totalorder %v1888_v55, 0  ;;  %v1890_v10 = vsub.s32 0, %v1888_v55 }
 0x1d3   :  { %v1993_v28 = vmul.u32 %v1991_v32, %v1989_v30  ;;  %v1994_v63 = vmul.u32 %v1992_v11, %v1989_v30  ;;  %v12130_v46 = vmul.u32 %v1991_v32, %v1990_v57  ;;  %v2013_v41 = vand.u32 65535, %v1983_v26 }
 0x1d4   :  { %15390 = vst [vmem:[#allocation63_spill] sm:$0xff] %v12127_v25  ;;  %v15113_v7 = vxor.u32 2147483648, %v12127_v25  ;;  %v1783_v31 = vsel %vm1781_vm2, %v15112_v62, %v12127_v25  ;;  %v1891_v54 = vsel %vm1889_vm12, %v1890_v10, %v1888_v55  ;;  %v2014_v39 = vshrl.u32 %v1983_v26, 16 }
 0x1d5   :  { %vm15117_vm3 = vweird.f32 %v10729_v3  ;;  %v1892_v0 = vclz %v1891_v54  ;;  %v1996_v52 = vmul.u32 %v1992_v11, %v1990_v57  ;;  %v1997_v61 = vshll.u32 %v1994_v63, 16 }
 0x1d6   :  { %v1780_v20 = vsel %vm1778_vm15, %v12121_v33, %v15113_v7  ;;  %v1880_v35 = vadd.s32 %v12039_v37, %v12042_v4  ;;  %v1999_v9 = vshll.u32 %v12130_v46, 16  ;;  %v2016_v23 = vmul.u32 %v2014_v39, %v1989_v30 }
 0x1d7   :  { %v1784_v38 = vsel %vm1777_vm0, %v1780_v20, %v1783_v31  ;;  %v10267_v32 = vadd.s32 4294967294, %v1892_v0  ;;  %vm2001_vm2 = vc.u32 %v1993_v28, %v1997_v61  ;;  %v2003_v26 = vadd.s32 %v1997_v61, %v1993_v28 }
 0x1d8   :  { %v1785_v11 = vsel %vm15117_vm3, nan, %v1784_v38  ;;  %v1976_v10 = vsel %vm1972_vm10, %v1956_v6, %v1959_v51  ;;  %v2002_v54 = vsel %vm2001_vm2, 1, %v15336_v56  ;;  %v2017_v62 = vmul.u32 %v2013_v41, %v1990_v57 }
 0x1d9   :  { %vm10268_vm15 = vcmp.lt.s32.totalorder %v10267_v32, 0  ;;  %v1977_v37 = vsel %vm1975_vm13, %v12089_v1, 2102212464  ;;  %v2004_v4 = vadd.s32 %v2002_v54, %v1996_v52  ;;  %v2097_v42 = vand.u32 2139095040, %v10735_v14  ;;  %5183 = vst [vmem:[#allocation7 + $0x48] sm:$0xff] %v1785_v11 }
 0x1da   :  { %v1895_v31 = vsel %vm10268_vm15, 0, %v10267_v32  ;;  %vm2005_vm0 = vc.u32 %v2003_v26, %v1999_v9  ;;  %v2015_v28 = vmul.u32 %v2013_v41, %v1989_v30  ;;  %v2019_v0 = vshll.u32 %v2016_v23, 16 }
 0x1db   :  { %v1896_v61 = vsub.s32 32, %v1895_v31  ;;  %v1897_v20 = vshll.u32 %v1888_v55, %v1895_v31  ;;  %v1900_v38 = vsub.s32 4294967266, %v1895_v31  ;;  %v1998_v51 = vshrl.u32 %v1994_v63, 16 }
 0x1dc   :  { %v1978_v6 = vsel %vm1974_vm5, %v12087_v24, %v1977_v37  ;;  %v2006_v7 = vsel %vm2005_vm0, 1, %v15336_v56  ;;  %v2018_v3 = vmul.u32 %v2014_v39, %v1990_v57  ;;  %v2021_v1 = vshll.u32 %v2017_v62, 16 }
 0x1dd   :  { %v1898_v52 = vshrl.u32 %v1880_v35, %v1896_v61  ;;  %v1901_v54 = vadd.s32 127, %v1900_v38  ;;  %v2008_v33 = vadd.s32 %v2006_v7, %v2004_v4  ;;  %v15119_v32 = vand.u32 2147483647, %v10735_v14 }
 0x1de   :  { %v2000_v30 = vshrl.u32 %v12130_v46, 16  ;;  %vm2023_vm10 = vc.u32 %v2015_v28, %v2019_v0  ;;  %v2025_v41 = vadd.s32 %v2019_v0, %v2015_v28  ;;  %v2098_v55 = vshrl.u32 %v2097_v42, 23 }
 0x1df   :  { %v1899_v9 = vor.u32 %v1898_v52, %v1897_v20  ;;  %v1902_v63 = vshll.u32 %v1901_v54, 23  ;;  %v2009_v26 = vadd.s32 %v2008_v33, %v1998_v51  ;;  %v2024_v11 = vsel %vm2023_vm10, 1, %v15336_v56 }
 0x1e0   :  { %v2020_v24 = vshrl.u32 %v2016_v23, 16  ;;  %v2026_v37 = vadd.s32 %v2024_v11, %v2018_v3  ;;  %vm2027_vm13 = vc.u32 %v2025_v41, %v2021_v1  ;;  %v10272_v57 = vadd.s32 4294967169, %v2098_v55 }
 0x1e1   :  { %v1903_v39 = vor.u32 4788187, %v1902_v63  ;;  %v1906_v35 = vcvt.s32.f32 %v1899_v9  ;;  %v1910_v7 = vsub.s32 4, %v12102_v36  ;;  %v2028_v4 = vsel %vm2027_vm13, 1, %v15336_v56 }
 0x1e2   :  { %v2022_v31 = vshrl.u32 %v2017_v62, 16  ;;  %v2030_v46 = vadd.s32 %v2028_v4, %v2026_v37  ;;  %v2104_v61 = vadd.s32 1, %v10272_v57  ;;  %v12163_v42 = vadd.s32 %v2009_v26, %v2000_v30 }
 0x1e3   :  { %v1904_v28 = vand.u32 2147483647, %v1903_v39  ;;  %v12165_v0 = vadd.s32 %v2025_v41, %v2021_v1  ;;  %vm1788_vm5 = vcmp.lt.s32.totalorder %v10731_v12, 0  ;;  %v1979_v3 = vsel %vm1973_vm6, %v1976_v10, %v1978_v6 }
 0x1e4   :  { %v2031_v33 = vadd.s32 %v2030_v46, %v2020_v24  ;;  %vm2105_vm12 = vcmp.gt.s32.totalorder %v2104_v61, 0  ;;  %v1911_v20 = vsel %vm1788_vm5, %v1910_v7, %v12102_v36  ;;  %v2101_v62 = vand.u32 8388607, %v15119_v32 }
 0x1e5   :  { %v1907_v23 = vmul.f32 %v1906_v35, %v1904_v28  ;;  %v2106_v38 = vsel %vm2105_vm12, %v2104_v61, 0  ;;  %v15391_v1 = vand.u32 2147483647, %v10731_v12  ;;  %v2033_v29 = vmul.u32 %v12100_v47, %v1979_v3 }
 0x1e6   :  { %v2032_v51 = vadd.s32 %v2031_v33, %v2022_v31  ;;  %v2108_v52 = vand.u32 31, %v2106_v38  ;;  %vm2035_vm6 = vc.u32 %v12163_v42, %v12165_v0  ;;  %v2102_v55 = vor.u32 8388608, %v2101_v62 }
 0x1e7   :  { %vm1787_vm2 = vcmp.le.f32.partialorder %v15391_v1, 0.7853982  ;;  %v1908_v54 = vxor.u32 2147483648, %v1907_v23  ;;  %v12191_v26 = vshrl.u32 %v2106_v38, 5  ;;  %v2251_v62 = vand.u32 2139095040, %v10737_v15 }
 0x1e8   :  { %v12180_v10 = vsel %vm1787_vm2, 0, %v1911_v20  ;;  %v2036_v6 = vadd.s32 1, %v2032_v51  ;;  %v2109_v30 = vsub.s32 32, %v2108_v52  ;;  %v2114_v11 = vshll.u32 %v15330_v44, %v2108_v52 }
 0x1e9   :  { %v1909_v36 = vsel %vm1788_vm5, %v1908_v54, %v1907_v23  ;;  %v12185_v41 = vand.u32 3, %v12180_v10  ;;  %v2117_v57 = vshll.u32 %v15331_v59, %v2108_v52  ;;  %v2120_v39 = vshll.u32 %v15332_v53, %v2108_v52 }
 0x1ea   :  { %v12189_v63 = vsel %vm1787_vm2, %v10731_v12, %v1909_v36  ;;  %v2037_v47 = vsel %vm2035_vm6, %v2036_v6, %v2032_v51  ;;  %v2115_v35 = vshrl.u32 %v15331_v59, %v2109_v30  ;;  %v2118_v7 = vshrl.u32 %v15332_v53, %v2109_v30 }
 0x1eb   :  { %v1914_v24 = vmul.f32 %v12189_v63, %v12189_v63  ;;  %v2038_v37 = vadd.s32 %v2037_v47, %v2033_v29  ;;  %v2121_v4 = vshrl.u32 %v15333_v49, %v2109_v30  ;;  %v2123_v31 = vshll.u32 %v15333_v49, %v2108_v52 }
 0x1ec   :  { %v12202_v3 = vshll.u32 %v2102_v55, 8  ;;  %v2111_v33 = vshll.u32 %v15335_v2, %v2108_v52  ;;  %v2112_v23 = vshrl.u32 %v15330_v44, %v2109_v30  ;;  %v2124_v20 = vshrl.u32 %v15334_v60, %v2109_v30 }
 0x1ed   :  { %v1915_v46 = vmul.f32 -0.001358992, %v1914_v24  ;;  %v1922_v61 = vmul.f32 -0.00019511016, %v1914_v24  ;;  %v2039_v28 = vadd.s32 536870912, %v2038_v37  ;;  %v2122_v54 = vor.u32 %v2121_v4, %v2120_v39 }
 0x1ee   :  { %vm1935_vm15 = vcmp.eq.s32.totalorder %v12185_v41, 2  ;;  %v12211_v29 = vor.u32 %v2115_v35, %v2114_v11  ;;  %v2119_v6 = vor.u32 %v2118_v7, %v2117_v57  ;;  %v2125_v36 = vor.u32 %v2124_v20, %v2123_v31 }
 0x1ef   :  { %v1916_v38 = vadd.f32 0.041655596, %v1915_v46  ;;  %v1923_v51 = vadd.f32 0.008332121, %v1922_v61  ;;  %v12208_v1 = vshrl.u32 %v2039_v28, 30  ;;  %vm2129_vm0 = vcmp.lt.s32.totalorder %v12191_v26, 4 }
 0x1f0   :  { %vm2126_vm10 = vcmp.lt.s32.totalorder %v12191_v26, 1  ;;  %vm1932_vm13 = vcmp.eq.s32.totalorder %v12185_v41, 0  ;;  %v2113_v46 = vor.u32 %v2112_v23, %v2111_v33  ;;  %vm2128_vm5 = vcmp.lt.s32.totalorder %v12191_v26, 3 }
 0x1f1   :  { %v1917_v52 = vmul.f32 %v1916_v38, %v1914_v24  ;;  %v1924_v55 = vmul.f32 %v1923_v51, %v1914_v24  ;;  %v2041_v47 = vshll.u32 %v12208_v1, 30  ;;  %v12219_v39 = vand.u32 65535, %v12202_v3 }
 0x1f2   :  { %v2252_v11 = vshrl.u32 %v2251_v62, 23  ;;  %vm1931_vm12 = vcmp.lt.s32.totalorder %v12185_v41, 2  ;;  %v2135_v4 = vsel %vm2129_vm0, %v2122_v54, 920167782  ;;  %vm15128_vm2 = vweird.f32 %v10731_v12 }
 0x1f3   :  { %v1918_v35 = vadd.f32 -0.4999988, %v1917_v52  ;;  %v1925_v57 = vadd.f32 -0.16666654, %v1924_v55  ;;  %v2042_v7 = vsub.s32 %v2038_v37, %v2041_v47  ;;  %v2110_v31 = vshrl.u32 %v15335_v2, %v2109_v30 }
 0x1f4   :  { %vm2127_vm6 = vcmp.lt.s32.totalorder %v12191_v26, 2  ;;  %v2138_v61 = vsel %vm2126_vm10, %v12211_v29, %v2119_v6  ;;  %v2139_v28 = vsel %vm2129_vm0, %v2125_v36, 1326507024  ;;  %v2134_v20 = vsel %vm2126_vm10, %v2113_v46, %v12211_v29 }
 0x1f5   :  { %v1919_v33 = vmul.f32 %v1918_v35, %v1914_v24  ;;  %v1926_v23 = vmul.f32 %v1925_v57, %v1914_v24  ;;  %vm2043_vm3 = vcmp.lt.s32.totalorder %v2042_v7, 0  ;;  %v2044_v37 = vsub.s32 0, %v2042_v7 }
 0x1f6   :  { %v2136_v30 = vsel %vm2128_vm5, %v2119_v6, %v2135_v4  ;;  %v2140_v62 = vsel %vm2128_vm5, %v2122_v54, %v2139_v28  ;;  %v2144_v38 = vshrl.u32 %v12202_v3, 16  ;;  %v2034_v55 = vadd.s32 %v12165_v0, %v12163_v42 }
 0x1f7   :  { %v12240_v51 = vadd.f32 1.0, %v1919_v33  ;;  %v1927_v52 = vadd.f32 1.0, %v1926_v23  ;;  %v2045_v36 = vsel %vm2043_vm3, %v2044_v37, %v2042_v7  ;;  %v2141_v24 = vsel %vm2127_vm6, %v2138_v61, %v2140_v62 }
 0x1f8   :  { %v2046_v47 = vclz %v2045_v36  ;;  %v2145_v35 = vand.u32 65535, %v2141_v24  ;;  %v2146_v57 = vshrl.u32 %v2141_v24, 16  ;;  %v2130_v28 = vsel %vm2126_vm10, %v2110_v31, %v2113_v46 }
 0x1f9   :  { %15392 = vst [vmem:[#allocation64_spill] sm:$0xff] %v12240_v51  ;;  %v12247_v4 = vmul.f32 %v1927_v52, %v12189_v63  ;;  %v15118_v54 = vxor.u32 2147483648, %v12240_v51  ;;  %v10275_v33 = vadd.s32 4294967169, %v2252_v11  ;;  %v2137_v61 = vsel %vm2127_vm6, %v2134_v20, %v2136_v30 }
 0x1fa   :  { %v10270_v23 = vadd.s32 4294967294, %v2046_v47  ;;  %v2148_v42 = vmul.u32 %v2146_v57, %v12219_v39  ;;  %v2131_v46 = vsel %vm2129_vm0, %v2119_v6, 2102212464  ;;  %v2149_v11 = vmul.u32 %v2145_v35, %v2144_v38 }
 0x1fb   :  { %15393 = vst [vmem:[#allocation65_spill] sm:$0xff] %v12247_v4  ;;  %v15124_v0 = vxor.u32 2147483648, %v12247_v4  ;;  %v1937_v63 = vsel %vm1935_vm15, %v15118_v54, %v12247_v4  ;;  %v2147_v31 = vmul.u32 %v2145_v35, %v12219_v39  ;;  %v2167_v52 = vand.u32 65535, %v2137_v61 }
 0x1fc   :  { %vm10271_vm3 = vcmp.lt.s32.totalorder %v10270_v23, 0  ;;  %v2151_v62 = vshll.u32 %v2148_v42, 16  ;;  %v2150_v36 = vmul.u32 %v2146_v57, %v2144_v38  ;;  %v2168_v24 = vshrl.u32 %v2137_v61, 16 }
 0x1fd   :  { %v1934_v20 = vsel %vm1932_vm13, %v12240_v51, %v15124_v0  ;;  %v2049_v30 = vsel %vm10271_vm3, 0, %v10270_v23  ;;  %v2132_v37 = vsel %vm2128_vm5, %v12211_v29, %v2131_v46  ;;  %v2153_v9 = vshll.u32 %v2149_v11, 16 }
 0x1fe   :  { %v1938_v47 = vsel %vm1931_vm12, %v1934_v20, %v1937_v63  ;;  %v2050_v54 = vsub.s32 32, %v2049_v30  ;;  %v2051_v6 = vshll.u32 %v2042_v7, %v2049_v30  ;;  %v2054_v32 = vsub.s32 4294967266, %v2049_v30 }
 0x1ff   :  { %v1939_v35 = vsel %vm15128_vm2, nan, %v1938_v47  ;;  %v2258_v4 = vadd.s32 1, %v10275_v33  ;;  %vm2155_vm15 = vc.u32 %v2147_v31, %v2151_v62  ;;  %v2169_v57 = vmul.u32 %v2167_v52, %v12219_v39 }
 0x200   :  { %v2052_v25 = vshrl.u32 %v2034_v55, %v2050_v54  ;;  %v2055_v0 = vadd.s32 127, %v2054_v32  ;;  %5184 = vst [vmem:[#allocation7 + $0x50] sm:$0xff] %v1939_v35  ;;  %v2156_v41 = vsel %vm2155_vm15, 1, %v15336_v56  ;;  %v2157_v23 = vadd.s32 %v2151_v62, %v2147_v31 }
 0x201   :  { %v2170_v7 = vmul.u32 %v2168_v24, %v12219_v39  ;;  %v2171_v61 = vmul.u32 %v2167_v52, %v2144_v38  ;;  %v2152_v30 = vshrl.u32 %v2148_v42, 16  ;;  %v2158_v47 = vadd.s32 %v2156_v41, %v2150_v36 }
 0x202   :  { %v2053_v63 = vor.u32 %v2052_v25, %v2051_v6  ;;  %v2056_v20 = vshll.u32 %v2055_v0, 23  ;;  %vm2159_vm0 = vc.u32 %v2157_v23, %v2153_v9  ;;  %v2172_v29 = vmul.u32 %v2168_v24, %v2144_v38 }
 0x203   :  { %v2173_v46 = vshll.u32 %v2170_v7, 16  ;;  %v2175_v33 = vshll.u32 %v2171_v61, 16  ;;  %v2154_v54 = vshrl.u32 %v2149_v11, 16  ;;  %v2160_v12 = vsel %vm2159_vm0, 1, %v15336_v56 }
 0x204   :  { %v2057_v55 = vor.u32 4788187, %v2056_v20  ;;  %v2060_v32 = vcvt.s32.f32 %v2053_v63  ;;  %v2162_v35 = vadd.s32 %v2160_v12, %v2158_v47  ;;  %vm2259_vm13 = vcmp.gt.s32.totalorder %v2258_v4, 0 }
 0x205   :  { %vm2177_vm10 = vc.u32 %v2169_v57, %v2173_v46  ;;  %v2179_v51 = vadd.s32 %v2173_v46, %v2169_v57  ;;  %v2133_v25 = vsel %vm2127_vm6, %v2130_v28, %v2132_v37  ;;  %v2260_v42 = vsel %vm2259_vm13, %v2258_v4, 0 }
 0x206   :  { %v2058_v31 = vand.u32 2147483647, %v2057_v55  ;;  %v2178_v39 = vsel %vm2177_vm10, 1, %v15336_v56  ;;  %v2163_v9 = vadd.s32 %v2162_v35, %v2152_v30  ;;  %v2174_v38 = vshrl.u32 %v2170_v7, 16 }
 0x207   :  { %v2180_v0 = vadd.s32 %v2178_v39, %v2172_v29  ;;  %vm2181_vm5 = vc.u32 %v2179_v51, %v2175_v33  ;;  %v12285_v52 = vadd.s32 %v2179_v51, %v2175_v33  ;;  %v2262_v12 = vand.u32 31, %v2260_v42 }
 0x208   :  { %v2061_v62 = vmul.f32 %v2060_v32, %v2058_v31  ;;  %v2182_v11 = vsel %vm2181_vm5, 1, %v15336_v56  ;;  %vm1942_vm12 = vcmp.lt.s32.totalorder %v10733_v13, 0  ;;  %v12288_v36 = vadd.s32 %v2163_v9, %v2154_v54 }
 0x209   :  { %v2176_v24 = vshrl.u32 %v2171_v61, 16  ;;  %v2184_v26 = vadd.s32 %v2182_v11, %v2180_v0  ;;  %v15394_v28 = vand.u32 2147483647, %v10733_v13  ;;  %v15397_v6 = vand.u32 2147483647, %v10737_v15 }
 0x20a   :  { %v2062_v37 = vxor.u32 2147483648, %v2061_v62  ;;  %v12298_v41 = vsub.s32 32, %v2262_v12  ;;  %v15398_v51 = vsub.s32 4, %v12208_v1  ;;  %v2187_v61 = vmul.u32 %v12202_v3, %v2133_v25 }
 0x20b   :  { %vm12292_vm6 = vcmp.le.f32.partialorder %v15394_v28, 0.7853982  ;;  %v2255_v57 = vand.u32 8388607, %v15397_v6  ;;  %v2185_v7 = vadd.s32 %v2184_v26, %v2174_v38  ;;  %v12304_v63 = vshrl.u32 %v2260_v42, 5 }
 0x20c   :  { %v2065_v23 = vsel %vm1942_vm12, %v15398_v51, %v12208_v1  ;;  %v2063_v20 = vsel %vm1942_vm12, %v2062_v37, %v2061_v62  ;;  %vm2189_vm3 = vc.u32 %v12288_v36, %v12285_v52  ;;  %v2265_v30 = vshll.u32 %v15335_v2, %v2262_v12 }
 0x20d   :  { %v2268_v47 = vshll.u32 %v15330_v44, %v2262_v12  ;;  %v2066_v29 = vsel %vm12292_vm6, %v10733_v13, %v2063_v20  ;;  %v2186_v46 = vadd.s32 %v2185_v7, %v2176_v24  ;;  %v2269_v1 = vshrl.u32 %v15331_v59, %v12298_v41 }
 0x20e   :  { %v2274_v3 = vshll.u32 %v15332_v53, %v2262_v12  ;;  %v2068_v33 = vmul.f32 %v2066_v29, %v2066_v29  ;;  %v2271_v55 = vshll.u32 %v15331_v59, %v2262_v12  ;;  %v2272_v32 = vshrl.u32 %v15332_v53, %v12298_v41 }
 0x20f   :  { %v2275_v54 = vshrl.u32 %v15333_v49, %v12298_v41  ;;  %v2190_v35 = vadd.s32 1, %v2186_v46  ;;  %v2266_v31 = vshrl.u32 %v15330_v44, %v12298_v41  ;;  %v2277_v25 = vshll.u32 %v15333_v49, %v2262_v12 }
 0x210   :  { %v2278_v39 = vshrl.u32 %v15334_v60, %v12298_v41  ;;  %v12328_v42 = vsel %vm12292_vm6, 0, %v2065_v23  ;;  %v2069_v9 = vmul.f32 -0.001358992, %v2068_v33  ;;  %v2076_v38 = vmul.f32 -0.00019511016, %v2068_v33 }
 0x211   :  { %v2256_v0 = vor.u32 8388608, %v2255_v57  ;;  %v2191_v62 = vsel %vm2189_vm3, %v2190_v35, %v2186_v46  ;;  %v12333_v11 = vor.u32 %v2269_v1, %v2268_v47  ;;  %v2276_v24 = vor.u32 %v2275_v54, %v2274_v3 }
 0x212   :  { %v2279_v26 = vor.u32 %v2278_v39, %v2277_v25  ;;  %v2070_v28 = vadd.f32 0.041655596, %v2069_v9  ;;  %v2077_v12 = vadd.f32 0.008332121, %v2076_v38  ;;  %v2192_v37 = vadd.s32 %v2191_v62, %v2187_v61 }
 0x213   :  { %v12335_v6 = vor.u32 %v2272_v32, %v2271_v55  ;;  %v2084_v4 = vand.u32 3, %v12328_v42  ;;  %v2267_v51 = vor.u32 %v2266_v31, %v2265_v30  ;;  %vm2280_vm15 = vcmp.lt.s32.totalorder %v12304_v63, 1 }
 0x214   :  { %vm2283_vm0 = vcmp.lt.s32.totalorder %v12304_v63, 4  ;;  %v2071_v57 = vmul.f32 %v2070_v28, %v2068_v33  ;;  %v2078_v23 = vmul.f32 %v2077_v12, %v2068_v33  ;;  %v2193_v7 = vadd.s32 536870912, %v2192_v37 }
 0x215   :  { %vm2282_vm10 = vcmp.lt.s32.totalorder %v12304_v63, 3  ;;  %vm2281_vm13 = vcmp.lt.s32.totalorder %v12304_v63, 2  ;;  %v2289_v20 = vsel %vm2283_vm0, %v2276_v24, 920167782  ;;  %v2293_v61 = vsel %vm2283_vm0, %v2279_v26, 1326507024 }
 0x216   :  { %v12346_v47 = vshll.u32 %v2256_v0, 8  ;;  %v2072_v30 = vadd.f32 -0.4999988, %v2071_v57  ;;  %v2079_v46 = vadd.f32 -0.16666654, %v2078_v23  ;;  %v12348_v1 = vshrl.u32 %v2193_v7, 30 }
 0x217   :  { %v2292_v3 = vsel %vm2280_vm15, %v12333_v11, %v12335_v6  ;;  %vm2085_vm5 = vcmp.lt.s32.totalorder %v2084_v4, 2  ;;  %v2288_v55 = vsel %vm2280_vm15, %v2267_v51, %v12333_v11  ;;  %v2294_v32 = vsel %vm2282_vm10, %v2276_v24, %v2293_v61 }
 0x218   :  { %v2073_v54 = vmul.f32 %v2072_v30, %v2068_v33  ;;  %v2080_v35 = vmul.f32 %v2079_v46, %v2068_v33  ;;  %v2195_v31 = vshll.u32 %v12348_v1, 30  ;;  %v2290_v25 = vsel %vm2282_vm10, %v12335_v6, %v2289_v20 }
 0x219   :  { %vm2086_vm12 = vcmp.eq.s32.totalorder %v2084_v4, 0  ;;  %v2295_v39 = vsel %vm2281_vm13, %v2292_v3, %v2294_v32  ;;  %v2297_v9 = vand.u32 65535, %v12346_v47  ;;  %v2298_v38 = vshrl.u32 %v12346_v47, 16 }
 0x21a   :  { %v12367_v0 = vadd.f32 1.0, %v2073_v54  ;;  %v2081_v62 = vadd.f32 1.0, %v2080_v35  ;;  %vm2089_vm6 = vcmp.eq.s32.totalorder %v2084_v4, 2  ;;  %v2196_v24 = vsub.s32 %v2192_v37, %v2195_v31 }
 0x21b   :  { %v2264_v33 = vshrl.u32 %v15335_v2, %v12298_v41  ;;  %v2291_v26 = vsel %vm2281_vm13, %v2288_v55, %v2290_v25  ;;  %v2299_v28 = vand.u32 65535, %v2295_v39  ;;  %v2300_v12 = vshrl.u32 %v2295_v39, 16 }
 0x21c   :  { %15399 = vst [vmem:[#allocation66_spill] sm:$0xff] %v12367_v0  ;;  %v12373_v57 = vmul.f32 %v2081_v62, %v2066_v29  ;;  %v15129_v23 = vxor.u32 2147483648, %v12367_v0  ;;  %vm2197_vm3 = vcmp.lt.s32.totalorder %v2196_v24, 0  ;;  %v2198_v7 = vsub.s32 0, %v2196_v24 }
 0x21d   :  { %v2301_v20 = vmul.u32 %v2299_v28, %v2297_v9  ;;  %v2302_v61 = vmul.u32 %v2300_v12, %v2297_v9  ;;  %v12376_v30 = vmul.u32 %v2299_v28, %v2298_v38  ;;  %v2321_v46 = vand.u32 65535, %v2291_v26 }
 0x21e   :  { %15400 = vst [vmem:[#allocation67_spill] sm:$0xff] %v12373_v57  ;;  %v15130_v37 = vxor.u32 2147483648, %v12373_v57  ;;  %v2091_v41 = vsel %vm2089_vm6, %v15129_v23, %v12373_v57  ;;  %v2199_v3 = vsel %vm2197_vm3, %v2198_v7, %v2196_v24  ;;  %v2322_v55 = vshrl.u32 %v2291_v26, 16 }
 0x21f   :  { %vm15134_vm2 = vweird.f32 %v10733_v13  ;;  %v2200_v29 = vclz %v2199_v3  ;;  %v2304_v32 = vmul.u32 %v2300_v12, %v2298_v38  ;;  %v2305_v54 = vshll.u32 %v2302_v61, 16 }
 0x220   :  { %v2088_v35 = vsel %vm2086_vm12, %v12367_v0, %v15130_v37  ;;  %v2188_v31 = vadd.s32 %v12285_v52, %v12288_v36  ;;  %v2307_v25 = vshll.u32 %v12376_v30, 16  ;;  %v2324_v39 = vmul.u32 %v2322_v55, %v2297_v9 }
 0x221   :  { %v2092_v62 = vsel %vm2085_vm5, %v2088_v35, %v2091_v41  ;;  %v10273_v28 = vadd.s32 4294967294, %v2200_v29  ;;  %vm2309_vm6 = vc.u32 %v2301_v20, %v2305_v54  ;;  %v2311_v26 = vadd.s32 %v2305_v54, %v2301_v20 }
 0x222   :  { %v2093_v12 = vsel %vm15134_vm2, nan, %v2092_v62  ;;  %v2284_v7 = vsel %vm2280_vm15, %v2264_v33, %v2267_v51  ;;  %v2310_v3 = vsel %vm2309_vm6, 1, %v15336_v56  ;;  %v2325_v23 = vmul.u32 %v2321_v46, %v2298_v38 }
 0x223   :  { %vm10274_vm12 = vcmp.lt.s32.totalorder %v10273_v28, 0  ;;  %v2285_v52 = vsel %vm2283_vm0, %v12335_v6, 2102212464  ;;  %v2312_v36 = vadd.s32 %v2310_v3, %v2304_v32  ;;  %v2405_v4 = vand.u32 2139095040, %v10739_v16  ;;  %5185 = vst [vmem:[#allocation7 + $0x58] sm:$0xff] %v2093_v12 }
 0x224   :  { %v2203_v41 = vsel %vm10274_vm12, 0, %v10273_v28  ;;  %vm2313_vm5 = vc.u32 %v2311_v26, %v2307_v25  ;;  %v2323_v20 = vmul.u32 %v2321_v46, %v2297_v9  ;;  %v2327_v29 = vshll.u32 %v2324_v39, 16 }
 0x225   :  { %v2204_v54 = vsub.s32 32, %v2203_v41  ;;  %v2205_v35 = vshll.u32 %v2196_v24, %v2203_v41  ;;  %v2208_v62 = vsub.s32 4294967266, %v2203_v41  ;;  %v2306_v51 = vshrl.u32 %v2302_v61, 16 }
 0x226   :  { %v2286_v33 = vsel %vm2282_vm10, %v12333_v11, %v2285_v52  ;;  %v2314_v37 = vsel %vm2313_vm5, 1, %v15336_v56  ;;  %v2326_v13 = vmul.u32 %v2322_v55, %v2298_v38  ;;  %v2329_v6 = vshll.u32 %v2325_v23, 16 }
 0x227   :  { %v2206_v32 = vshrl.u32 %v2188_v31, %v2204_v54  ;;  %v2209_v3 = vadd.s32 127, %v2208_v62  ;;  %v2316_v0 = vadd.s32 %v2314_v37, %v2312_v36  ;;  %v15136_v28 = vand.u32 2147483647, %v10739_v16 }
 0x228   :  { %v2308_v9 = vshrl.u32 %v12376_v30, 16  ;;  %vm2331_vm15 = vc.u32 %v2323_v20, %v2327_v29  ;;  %v2333_v46 = vadd.s32 %v2327_v29, %v2323_v20  ;;  %v2406_v24 = vshrl.u32 %v2405_v4, 23 }
 0x229   :  { %v2207_v25 = vor.u32 %v2206_v32, %v2205_v35  ;;  %v2210_v61 = vshll.u32 %v2209_v3, 23  ;;  %v2317_v26 = vadd.s32 %v2316_v0, %v2306_v51  ;;  %v2332_v12 = vsel %vm2331_vm15, 1, %v15336_v56 }
 0x22a   :  { %v2328_v11 = vshrl.u32 %v2324_v39, 16  ;;  %v2334_v52 = vadd.s32 %v2332_v12, %v2326_v13  ;;  %vm2335_vm0 = vc.u32 %v2333_v46, %v2329_v6  ;;  %v10278_v38 = vadd.s32 4294967169, %v2406_v24 }
 0x22b   :  { %v2211_v55 = vor.u32 4788187, %v2210_v61  ;;  %v2214_v31 = vcvt.s32.f32 %v2207_v25  ;;  %v2218_v37 = vsub.s32 4, %v12348_v1  ;;  %v2336_v36 = vsel %vm2335_vm0, 1, %v15336_v56 }
 0x22c   :  { %v2330_v41 = vshrl.u32 %v2325_v23, 16  ;;  %v2338_v30 = vadd.s32 %v2336_v36, %v2334_v52  ;;  %v2412_v54 = vadd.s32 1, %v10278_v38  ;;  %v12409_v4 = vadd.s32 %v2317_v26, %v2308_v9 }
 0x22d   :  { %v2212_v20 = vand.u32 2147483647, %v2211_v55  ;;  %v12411_v29 = vadd.s32 %v2333_v46, %v2329_v6  ;;  %vm2096_vm10 = vcmp.lt.s32.totalorder %v10735_v14, 0  ;;  %v2287_v13 = vsel %vm2281_vm13, %v2284_v7, %v2286_v33 }
 0x22e   :  { %v2339_v0 = vadd.s32 %v2338_v30, %v2328_v11  ;;  %vm2413_vm3 = vcmp.gt.s32.totalorder %v2412_v54, 0  ;;  %v2219_v35 = vsel %vm2096_vm10, %v2218_v37, %v12348_v1  ;;  %v2409_v23 = vand.u32 8388607, %v15136_v28 }
 0x22f   :  { %v2215_v39 = vmul.f32 %v2214_v31, %v2212_v20  ;;  %v2414_v62 = vsel %vm2413_vm3, %v2412_v54, 0  ;;  %v15401_v6 = vand.u32 2147483647, %v10735_v14  ;;  %v2341_v63 = vmul.u32 %v12346_v47, %v2287_v13 }
 0x230   :  { %v2340_v51 = vadd.s32 %v2339_v0, %v2330_v41  ;;  %v2416_v32 = vand.u32 31, %v2414_v62  ;;  %vm2343_vm13 = vc.u32 %v12409_v4, %v12411_v29  ;;  %v2410_v24 = vor.u32 8388608, %v2409_v23 }
 0x231   :  { %vm2095_vm6 = vcmp.le.f32.partialorder %v15401_v6, 0.7853982  ;;  %v2216_v3 = vxor.u32 2147483648, %v2215_v39  ;;  %v12437_v26 = vshrl.u32 %v2414_v62, 5  ;;  %v2559_v23 = vand.u32 2139095040, %v10741_v17 }
 0x232   :  { %v12426_v7 = vsel %vm2095_vm6, 0, %v2219_v35  ;;  %v2344_v33 = vadd.s32 1, %v2340_v51  ;;  %v2417_v9 = vsub.s32 32, %v2416_v32  ;;  %v2422_v12 = vshll.u32 %v15330_v44, %v2416_v32 }
 0x233   :  { %v2217_v1 = vsel %vm2096_vm10, %v2216_v3, %v2215_v39  ;;  %v12431_v46 = vand.u32 3, %v12426_v7  ;;  %v2425_v38 = vshll.u32 %v15331_v59, %v2416_v32  ;;  %v2428_v55 = vshll.u32 %v15332_v53, %v2416_v32 }
 0x234   :  { %v12435_v61 = vsel %vm2095_vm6, %v10735_v14, %v2217_v1  ;;  %v2345_v47 = vsel %vm2343_vm13, %v2344_v33, %v2340_v51  ;;  %v2423_v31 = vshrl.u32 %v15331_v59, %v2417_v9  ;;  %v2426_v37 = vshrl.u32 %v15332_v53, %v2417_v9 }
 0x235   :  { %v2222_v11 = vmul.f32 %v12435_v61, %v12435_v61  ;;  %v2346_v52 = vadd.s32 %v2345_v47, %v2341_v63  ;;  %v2429_v36 = vshrl.u32 %v15333_v49, %v2417_v9  ;;  %v2431_v41 = vshll.u32 %v15333_v49, %v2416_v32 }
 0x236   :  { %v12448_v13 = vshll.u32 %v2410_v24, 8  ;;  %v2419_v0 = vshll.u32 %v15335_v2, %v2416_v32  ;;  %v2420_v39 = vshrl.u32 %v15330_v44, %v2417_v9  ;;  %v2432_v35 = vshrl.u32 %v15334_v60, %v2417_v9 }
 0x237   :  { %v2223_v30 = vmul.f32 -0.001358992, %v2222_v11  ;;  %v2230_v54 = vmul.f32 -0.00019511016, %v2222_v11  ;;  %v2347_v20 = vadd.s32 536870912, %v2346_v52  ;;  %v2430_v3 = vor.u32 %v2429_v36, %v2428_v55 }
 0x238   :  { %vm2243_vm12 = vcmp.eq.s32.totalorder %v12431_v46, 2  ;;  %v12457_v63 = vor.u32 %v2423_v31, %v2422_v12  ;;  %v2427_v33 = vor.u32 %v2426_v37, %v2425_v38  ;;  %v2433_v1 = vor.u32 %v2432_v35, %v2431_v41 }
 0x239   :  { %v2224_v62 = vadd.f32 0.041655596, %v2223_v30  ;;  %v2231_v51 = vadd.f32 0.008332121, %v2230_v54  ;;  %v12454_v6 = vshrl.u32 %v2347_v20, 30  ;;  %vm2437_vm5 = vcmp.lt.s32.totalorder %v12437_v26, 4 }
 0x23a   :  { %vm2434_vm15 = vcmp.lt.s32.totalorder %v12437_v26, 1  ;;  %vm2240_vm0 = vcmp.eq.s32.totalorder %v12431_v46, 0  ;;  %v2421_v30 = vor.u32 %v2420_v39, %v2419_v0  ;;  %vm2436_vm10 = vcmp.lt.s32.totalorder %v12437_v26, 3 }
 0x23b   :  { %v2225_v32 = vmul.f32 %v2224_v62, %v2222_v11  ;;  %v2232_v24 = vmul.f32 %v2231_v51, %v2222_v11  ;;  %v2349_v47 = vshll.u32 %v12454_v6, 30  ;;  %v12465_v55 = vand.u32 65535, %v12448_v13 }
 0x23c   :  { %v2560_v12 = vshrl.u32 %v2559_v23, 23  ;;  %vm2239_vm3 = vcmp.lt.s32.totalorder %v12431_v46, 2  ;;  %v2443_v36 = vsel %vm2437_vm5, %v2430_v3, 920167782  ;;  %vm15145_vm6 = vweird.f32 %v10735_v14 }
 0x23d   :  { %v2226_v31 = vadd.f32 -0.4999988, %v2225_v32  ;;  %v2233_v38 = vadd.f32 -0.16666654, %v2232_v24  ;;  %v2350_v37 = vsub.s32 %v2346_v52, %v2349_v47  ;;  %v2418_v41 = vshrl.u32 %v15335_v2, %v2417_v9 }
 0x23e   :  { %vm2435_vm13 = vcmp.lt.s32.totalorder %v12437_v26, 2  ;;  %v2446_v54 = vsel %vm2434_vm15, %v12457_v63, %v2427_v33  ;;  %v2447_v20 = vsel %vm2437_vm5, %v2433_v1, 1326507024  ;;  %v2442_v35 = vsel %vm2434_vm15, %v2421_v30, %v12457_v63 }
 0x23f   :  { %v2227_v0 = vmul.f32 %v2226_v31, %v2222_v11  ;;  %v2234_v39 = vmul.f32 %v2233_v38, %v2222_v11  ;;  %vm2351_vm2 = vcmp.lt.s32.totalorder %v2350_v37, 0  ;;  %v2352_v52 = vsub.s32 0, %v2350_v37 }
 0x240   :  { %v2444_v9 = vsel %vm2436_vm10, %v2427_v33, %v2443_v36  ;;  %v2448_v23 = vsel %vm2436_vm10, %v2430_v3, %v2447_v20  ;;  %v2452_v62 = vshrl.u32 %v12448_v13, 16  ;;  %v2342_v24 = vadd.s32 %v12411_v29, %v12409_v4 }
 0x241   :  { %v12486_v51 = vadd.f32 1.0, %v2227_v0  ;;  %v2235_v32 = vadd.f32 1.0, %v2234_v39  ;;  %v2353_v1 = vsel %vm2351_vm2, %v2352_v52, %v2350_v37  ;;  %v2449_v11 = vsel %vm2435_vm13, %v2446_v54, %v2448_v23 }
 0x242   :  { %v2354_v47 = vclz %v2353_v1  ;;  %v2453_v31 = vand.u32 65535, %v2449_v11  ;;  %v2454_v38 = vshrl.u32 %v2449_v11, 16  ;;  %v2438_v20 = vsel %vm2434_vm15, %v2418_v41, %v2421_v30 }
 0x243   :  { %15402 = vst [vmem:[#allocation68_spill] sm:$0xff] %v12486_v51  ;;  %v12493_v36 = vmul.f32 %v2235_v32, %v12435_v61  ;;  %v15135_v3 = vxor.u32 2147483648, %v12486_v51  ;;  %v10281_v0 = vadd.s32 4294967169, %v2560_v12  ;;  %v2445_v54 = vsel %vm2435_vm13, %v2442_v35, %v2444_v9 }
 0x244   :  { %v10276_v39 = vadd.s32 4294967294, %v2354_v47  ;;  %v2456_v4 = vmul.u32 %v2454_v38, %v12465_v55  ;;  %v2439_v30 = vsel %vm2437_vm5, %v2427_v33, 2102212464  ;;  %v2457_v12 = vmul.u32 %v2453_v31, %v2452_v62 }
 0x245   :  { %15403 = vst [vmem:[#allocation69_spill] sm:$0xff] %v12493_v36  ;;  %v15141_v29 = vxor.u32 2147483648, %v12493_v36  ;;  %v2245_v61 = vsel %vm2243_vm12, %v15135_v3, %v12493_v36  ;;  %v2455_v41 = vmul.u32 %v2453_v31, %v12465_v55  ;;  %v2475_v32 = vand.u32 65535, %v2445_v54 }
 0x246   :  { %vm10277_vm2 = vcmp.lt.s32.totalorder %v10276_v39, 0  ;;  %v2459_v23 = vshll.u32 %v2456_v4, 16  ;;  %v2458_v1 = vmul.u32 %v2454_v38, %v2452_v62  ;;  %v2476_v11 = vshrl.u32 %v2445_v54, 16 }
 0x247   :  { %v2242_v35 = vsel %vm2240_vm0, %v12486_v51, %v15141_v29  ;;  %v2357_v9 = vsel %vm10277_vm2, 0, %v10276_v39  ;;  %v2440_v52 = vsel %vm2436_vm10, %v12457_v63, %v2439_v30  ;;  %v2461_v25 = vshll.u32 %v2457_v12, 16 }
 0x248   :  { %v2246_v47 = vsel %vm2239_vm3, %v2242_v35, %v2245_v61  ;;  %v2358_v3 = vsub.s32 32, %v2357_v9  ;;  %v2359_v33 = vshll.u32 %v2350_v37, %v2357_v9  ;;  %v2362_v28 = vsub.s32 4294967266, %v2357_v9 }
 0x249   :  { %v2247_v31 = vsel %vm15145_vm6, nan, %v2246_v47  ;;  %v2566_v36 = vadd.s32 1, %v10281_v0  ;;  %vm2463_vm12 = vc.u32 %v2455_v41, %v2459_v23  ;;  %v2477_v38 = vmul.u32 %v2475_v32, %v12465_v55 }
 0x24a   :  { %v2360_v57 = vshrl.u32 %v2342_v24, %v2358_v3  ;;  %v2363_v29 = vadd.s32 127, %v2362_v28  ;;  %5186 = vst [vmem:[#allocation7 + $0x60] sm:$0xff] %v2247_v31  ;;  %v2464_v46 = vsel %vm2463_vm12, 1, %v15336_v56  ;;  %v2465_v39 = vadd.s32 %v2459_v23, %v2455_v41 }
 0x24b   :  { %v2478_v37 = vmul.u32 %v2476_v11, %v12465_v55  ;;  %v2479_v54 = vmul.u32 %v2475_v32, %v2452_v62  ;;  %v2460_v9 = vshrl.u32 %v2456_v4, 16  ;;  %v2466_v47 = vadd.s32 %v2464_v46, %v2458_v1 }
 0x24c   :  { %v2361_v61 = vor.u32 %v2360_v57, %v2359_v33  ;;  %v2364_v35 = vshll.u32 %v2363_v29, 23  ;;  %vm2467_vm5 = vc.u32 %v2465_v39, %v2461_v25  ;;  %v2480_v63 = vmul.u32 %v2476_v11, %v2452_v62 }
 0x24d   :  { %v2481_v30 = vshll.u32 %v2478_v37, 16  ;;  %v2483_v0 = vshll.u32 %v2479_v54, 16  ;;  %v2462_v3 = vshrl.u32 %v2457_v12, 16  ;;  %v2468_v14 = vsel %vm2467_vm5, 1, %v15336_v56 }
 0x24e   :  { %v2365_v24 = vor.u32 4788187, %v2364_v35  ;;  %v2368_v28 = vcvt.s32.f32 %v2361_v61  ;;  %v2470_v31 = vadd.s32 %v2468_v14, %v2466_v47  ;;  %vm2567_vm0 = vcmp.gt.s32.totalorder %v2566_v36, 0 }
 0x24f   :  { %vm2485_vm15 = vc.u32 %v2477_v38, %v2481_v30  ;;  %v2487_v51 = vadd.s32 %v2481_v30, %v2477_v38  ;;  %v2441_v57 = vsel %vm2435_vm13, %v2438_v20, %v2440_v52  ;;  %v2568_v4 = vsel %vm2567_vm0, %v2566_v36, 0 }
 0x250   :  { %v2366_v41 = vand.u32 2147483647, %v2365_v24  ;;  %v2486_v55 = vsel %vm2485_vm15, 1, %v15336_v56  ;;  %v2471_v25 = vadd.s32 %v2470_v31, %v2460_v9  ;;  %v2482_v62 = vshrl.u32 %v2478_v37, 16 }
 0x251   :  { %v2488_v29 = vadd.s32 %v2486_v55, %v2480_v63  ;;  %vm2489_vm10 = vc.u32 %v2487_v51, %v2483_v0  ;;  %v12531_v32 = vadd.s32 %v2487_v51, %v2483_v0  ;;  %v2570_v14 = vand.u32 31, %v2568_v4 }
 0x252   :  { %v2369_v23 = vmul.f32 %v2368_v28, %v2366_v41  ;;  %v2490_v12 = vsel %vm2489_vm10, 1, %v15336_v56  ;;  %vm2250_vm3 = vcmp.lt.s32.totalorder %v10737_v15, 0  ;;  %v12534_v1 = vadd.s32 %v2471_v25, %v2462_v3 }
 0x253   :  { %v2484_v11 = vshrl.u32 %v2479_v54, 16  ;;  %v2492_v26 = vadd.s32 %v2490_v12, %v2488_v29  ;;  %v15404_v20 = vand.u32 2147483647, %v10737_v15  ;;  %v15407_v33 = vand.u32 2147483647, %v10741_v17 }
 0x254   :  { %v2370_v52 = vxor.u32 2147483648, %v2369_v23  ;;  %v12544_v46 = vsub.s32 32, %v2570_v14  ;;  %v15408_v51 = vsub.s32 4, %v12454_v6  ;;  %v2495_v54 = vmul.u32 %v12448_v13, %v2441_v57 }
 0x255   :  { %vm12538_vm13 = vcmp.le.f32.partialorder %v15404_v20, 0.7853982  ;;  %v2563_v38 = vand.u32 8388607, %v15407_v33  ;;  %v2493_v37 = vadd.s32 %v2492_v26, %v2482_v62  ;;  %v12550_v61 = vshrl.u32 %v2568_v4, 5 }
 0x256   :  { %v2373_v39 = vsel %vm2250_vm3, %v15408_v51, %v12454_v6  ;;  %v2371_v35 = vsel %vm2250_vm3, %v2370_v52, %v2369_v23  ;;  %vm2497_vm2 = vc.u32 %v12534_v1, %v12531_v32  ;;  %v2573_v9 = vshll.u32 %v15335_v2, %v2570_v14 }
 0x257   :  { %v2576_v47 = vshll.u32 %v15330_v44, %v2570_v14  ;;  %v2374_v63 = vsel %vm12538_vm13, %v10737_v15, %v2371_v35  ;;  %v2494_v30 = vadd.s32 %v2493_v37, %v2484_v11  ;;  %v2577_v6 = vshrl.u32 %v15331_v59, %v12544_v46 }
 0x258   :  { %v2582_v13 = vshll.u32 %v15332_v53, %v2570_v14  ;;  %v2376_v0 = vmul.f32 %v2374_v63, %v2374_v63  ;;  %v2579_v24 = vshll.u32 %v15331_v59, %v2570_v14  ;;  %v2580_v28 = vshrl.u32 %v15332_v53, %v12544_v46 }
 0x259   :  { %v2583_v3 = vshrl.u32 %v15333_v49, %v12544_v46  ;;  %v2498_v31 = vadd.s32 1, %v2494_v30  ;;  %v2574_v41 = vshrl.u32 %v15330_v44, %v12544_v46  ;;  %v2585_v57 = vshll.u32 %v15333_v49, %v2570_v14 }
 0x25a   :  { %v2586_v55 = vshrl.u32 %v15334_v60, %v12544_v46  ;;  %v12574_v4 = vsel %vm12538_vm13, 0, %v2373_v39  ;;  %v2377_v25 = vmul.f32 -0.001358992, %v2376_v0  ;;  %v2384_v62 = vmul.f32 -0.00019511016, %v2376_v0 }
 0x25b   :  { %v2564_v29 = vor.u32 8388608, %v2563_v38  ;;  %v2499_v23 = vsel %vm2497_vm2, %v2498_v31, %v2494_v30  ;;  %v12579_v12 = vor.u32 %v2577_v6, %v2576_v47  ;;  %v2584_v11 = vor.u32 %v2583_v3, %v2582_v13 }
 0x25c   :  { %v2587_v26 = vor.u32 %v2586_v55, %v2585_v57  ;;  %v2378_v20 = vadd.f32 0.041655596, %v2377_v25  ;;  %v2385_v14 = vadd.f32 0.008332121, %v2384_v62  ;;  %v2500_v52 = vadd.s32 %v2499_v23, %v2495_v54 }
 0x25d   :  { %v12581_v33 = vor.u32 %v2580_v28, %v2579_v24  ;;  %v2392_v36 = vand.u32 3, %v12574_v4  ;;  %v2575_v51 = vor.u32 %v2574_v41, %v2573_v9  ;;  %vm2588_vm12 = vcmp.lt.s32.totalorder %v12550_v61, 1 }
 0x25e   :  { %vm2591_vm5 = vcmp.lt.s32.totalorder %v12550_v61, 4  ;;  %v2379_v38 = vmul.f32 %v2378_v20, %v2376_v0  ;;  %v2386_v39 = vmul.f32 %v2385_v14, %v2376_v0  ;;  %v2501_v37 = vadd.s32 536870912, %v2500_v52 }
 0x25f   :  { %vm2590_vm15 = vcmp.lt.s32.totalorder %v12550_v61, 3  ;;  %vm2589_vm0 = vcmp.lt.s32.totalorder %v12550_v61, 2  ;;  %v2597_v35 = vsel %vm2591_vm5, %v2584_v11, 920167782  ;;  %v2601_v54 = vsel %vm2591_vm5, %v2587_v26, 1326507024 }
 0x260   :  { %v12592_v47 = vshll.u32 %v2564_v29, 8  ;;  %v2380_v9 = vadd.f32 -0.4999988, %v2379_v38  ;;  %v2387_v30 = vadd.f32 -0.16666654, %v2386_v39  ;;  %v12594_v6 = vshrl.u32 %v2501_v37, 30 }
 0x261   :  { %v2600_v13 = vsel %vm2588_vm12, %v12579_v12, %v12581_v33  ;;  %vm2393_vm10 = vcmp.lt.s32.totalorder %v2392_v36, 2  ;;  %v2596_v24 = vsel %vm2588_vm12, %v2575_v51, %v12579_v12  ;;  %v2602_v28 = vsel %vm2590_vm15, %v2584_v11, %v2601_v54 }
 0x262   :  { %v2381_v3 = vmul.f32 %v2380_v9, %v2376_v0  ;;  %v2388_v31 = vmul.f32 %v2387_v30, %v2376_v0  ;;  %v2503_v41 = vshll.u32 %v12594_v6, 30  ;;  %v2598_v57 = vsel %vm2590_vm15, %v12581_v33, %v2597_v35 }
 0x263   :  { %vm2394_vm3 = vcmp.eq.s32.totalorder %v2392_v36, 0  ;;  %v2603_v55 = vsel %vm2589_vm0, %v2600_v13, %v2602_v28  ;;  %v2605_v25 = vand.u32 65535, %v12592_v47  ;;  %v2606_v62 = vshrl.u32 %v12592_v47, 16 }
 0x264   :  { %v12613_v29 = vadd.f32 1.0, %v2381_v3  ;;  %v2389_v23 = vadd.f32 1.0, %v2388_v31  ;;  %vm2397_vm13 = vcmp.eq.s32.totalorder %v2392_v36, 2  ;;  %v2504_v11 = vsub.s32 %v2500_v52, %v2503_v41 }
 0x265   :  { %v2572_v0 = vshrl.u32 %v15335_v2, %v12544_v46  ;;  %v2599_v26 = vsel %vm2589_vm0, %v2596_v24, %v2598_v57  ;;  %v2607_v20 = vand.u32 65535, %v2603_v55  ;;  %v2608_v14 = vshrl.u32 %v2603_v55, 16 }
 0x266   :  { %15409 = vst [vmem:[#allocation70_spill] sm:$0xff] %v12613_v29  ;;  %v12619_v38 = vmul.f32 %v2389_v23, %v2374_v63  ;;  %v15146_v39 = vxor.u32 2147483648, %v12613_v29  ;;  %vm2505_vm2 = vcmp.lt.s32.totalorder %v2504_v11, 0  ;;  %v2506_v37 = vsub.s32 0, %v2504_v11 }
 0x267   :  { %v2609_v35 = vmul.u32 %v2607_v20, %v2605_v25  ;;  %v2610_v54 = vmul.u32 %v2608_v14, %v2605_v25  ;;  %v12622_v9 = vmul.u32 %v2607_v20, %v2606_v62  ;;  %v2629_v30 = vand.u32 65535, %v2599_v26 }
 0x268   :  { %15410 = vst [vmem:[#allocation71_spill] sm:$0xff] %v12619_v38  ;;  %v15147_v52 = vxor.u32 2147483648, %v12619_v38  ;;  %v2399_v46 = vsel %vm2397_vm13, %v15146_v39, %v12619_v38  ;;  %v2507_v13 = vsel %vm2505_vm2, %v2506_v37, %v2504_v11  ;;  %v2630_v24 = vshrl.u32 %v2599_v26, 16 }
 0x269   :  { %vm15151_vm6 = vweird.f32 %v10737_v15  ;;  %v2508_v63 = vclz %v2507_v13  ;;  %v2612_v28 = vmul.u32 %v2608_v14, %v2606_v62  ;;  %v2613_v3 = vshll.u32 %v2610_v54, 16 }
 0x26a   :  { %v2396_v31 = vsel %vm2394_vm3, %v12613_v29, %v15147_v52  ;;  %v2496_v41 = vadd.s32 %v12531_v32, %v12534_v1  ;;  %v2615_v57 = vshll.u32 %v12622_v9, 16  ;;  %v2632_v55 = vmul.u32 %v2630_v24, %v2605_v25 }
 0x26b   :  { %v2400_v23 = vsel %vm2393_vm10, %v2396_v31, %v2399_v46  ;;  %v10279_v20 = vadd.s32 4294967294, %v2508_v63  ;;  %vm2617_vm13 = vc.u32 %v2609_v35, %v2613_v3  ;;  %v2619_v26 = vadd.s32 %v2613_v3, %v2609_v35 }
 0x26c   :  { %v2401_v14 = vsel %vm15151_vm6, nan, %v2400_v23  ;;  %v2592_v37 = vsel %vm2588_vm12, %v2572_v0, %v2575_v51  ;;  %v2618_v13 = vsel %vm2617_vm13, 1, %v15336_v56  ;;  %v2633_v39 = vmul.u32 %v2629_v30, %v2606_v62 }
 0x26d   :  { %vm10280_vm3 = vcmp.lt.s32.totalorder %v10279_v20, 0  ;;  %v2593_v32 = vsel %vm2591_vm5, %v12581_v33, 2102212464  ;;  %v2620_v1 = vadd.s32 %v2618_v13, %v2612_v28  ;;  %v2713_v36 = vand.u32 2139095040, %v10743_v18  ;;  %5187 = vst [vmem:[#allocation7 + $0x68] sm:$0xff] %v2401_v14 }
 0x26e   :  { %v2511_v46 = vsel %vm10280_vm3, 0, %v10279_v20  ;;  %vm2621_vm10 = vc.u32 %v2619_v26, %v2615_v57  ;;  %v2631_v35 = vmul.u32 %v2629_v30, %v2605_v25  ;;  %v2635_v63 = vshll.u32 %v2632_v55, 16 }
 0x26f   :  { %v2512_v3 = vsub.s32 32, %v2511_v46  ;;  %v2513_v31 = vshll.u32 %v2504_v11, %v2511_v46  ;;  %v2516_v23 = vsub.s32 4294967266, %v2511_v46  ;;  %v2614_v51 = vshrl.u32 %v2610_v54, 16 }
 0x270   :  { %v2594_v0 = vsel %vm2590_vm15, %v12579_v12, %v2593_v32  ;;  %v2622_v52 = vsel %vm2621_vm10, 1, %v15336_v56  ;;  %v2634_v15 = vmul.u32 %v2630_v24, %v2606_v62  ;;  %v2637_v33 = vshll.u32 %v2633_v39, 16 }
 0x271   :  { %v2514_v28 = vshrl.u32 %v2496_v41, %v2512_v3  ;;  %v2517_v13 = vadd.s32 127, %v2516_v23  ;;  %v2624_v29 = vadd.s32 %v2622_v52, %v2620_v1  ;;  %v15153_v20 = vand.u32 2147483647, %v10743_v18 }
 0x272   :  { %v2616_v25 = vshrl.u32 %v12622_v9, 16  ;;  %vm2639_vm12 = vc.u32 %v2631_v35, %v2635_v63  ;;  %v2641_v30 = vadd.s32 %v2635_v63, %v2631_v35  ;;  %v2714_v11 = vshrl.u32 %v2713_v36, 23 }
 0x273   :  { %v2515_v57 = vor.u32 %v2514_v28, %v2513_v31  ;;  %v2518_v54 = vshll.u32 %v2517_v13, 23  ;;  %v2625_v26 = vadd.s32 %v2624_v29, %v2614_v51  ;;  %v2640_v14 = vsel %vm2639_vm12, 1, %v15336_v56 }
 0x274   :  { %v2636_v12 = vshrl.u32 %v2632_v55, 16  ;;  %v2642_v32 = vadd.s32 %v2640_v14, %v2634_v15  ;;  %vm2643_vm5 = vc.u32 %v2641_v30, %v2637_v33  ;;  %v10284_v62 = vadd.s32 4294967169, %v2714_v11 }
 0x275   :  { %v2519_v24 = vor.u32 4788187, %v2518_v54  ;;  %v2522_v41 = vcvt.s32.f32 %v2515_v57  ;;  %v2526_v52 = vsub.s32 4, %v12594_v6  ;;  %v2644_v1 = vsel %vm2643_vm5, 1, %v15336_v56 }
 0x276   :  { %v2638_v46 = vshrl.u32 %v2633_v39, 16  ;;  %v2646_v9 = vadd.s32 %v2644_v1, %v2642_v32  ;;  %v2720_v3 = vadd.s32 1, %v10284_v62  ;;  %v12655_v36 = vadd.s32 %v2625_v26, %v2616_v25 }
 0x277   :  { %v2520_v35 = vand.u32 2147483647, %v2519_v24  ;;  %v12657_v63 = vadd.s32 %v2641_v30, %v2637_v33  ;;  %vm2404_vm15 = vcmp.lt.s32.totalorder %v10739_v16, 0  ;;  %v2595_v15 = vsel %vm2589_vm0, %v2592_v37, %v2594_v0 }
 0x278   :  { %v2647_v29 = vadd.s32 %v2646_v9, %v2636_v12  ;;  %vm2721_vm2 = vcmp.gt.s32.totalorder %v2720_v3, 0  ;;  %v2527_v31 = vsel %vm2404_vm15, %v2526_v52, %v12594_v6  ;;  %v2717_v39 = vand.u32 8388607, %v15153_v20 }
 0x279   :  { %v2523_v55 = vmul.f32 %v2522_v41, %v2520_v35  ;;  %v2722_v23 = vsel %vm2721_vm2, %v2720_v3, 0  ;;  %v15411_v33 = vand.u32 2147483647, %v10739_v16  ;;  %v2649_v61 = vmul.u32 %v12592_v47, %v2595_v15 }
 0x27a   :  { %v2648_v51 = vadd.s32 %v2647_v29, %v2638_v46  ;;  %v2724_v28 = vand.u32 31, %v2722_v23  ;;  %vm2651_vm0 = vc.u32 %v12655_v36, %v12657_v63  ;;  %v2718_v11 = vor.u32 8388608, %v2717_v39 }
 0x27b   :  { %vm2403_vm13 = vcmp.le.f32.partialorder %v15411_v33, 0.7853982  ;;  %v2524_v13 = vxor.u32 2147483648, %v2523_v55  ;;  %v12683_v26 = vshrl.u32 %v2722_v23, 5  ;;  %v2867_v39 = vand.u32 2139095040, %v10745_v19 }
 0x27c   :  { %v12672_v37 = vsel %vm2403_vm13, 0, %v2527_v31  ;;  %v2652_v0 = vadd.s32 1, %v2648_v51  ;;  %v2725_v25 = vsub.s32 32, %v2724_v28  ;;  %v2730_v14 = vshll.u32 %v15330_v44, %v2724_v28 }
 0x27d   :  { %v2525_v6 = vsel %vm2404_vm15, %v2524_v13, %v2523_v55  ;;  %v12677_v30 = vand.u32 3, %v12672_v37  ;;  %v2733_v62 = vshll.u32 %v15331_v59, %v2724_v28  ;;  %v2736_v24 = vshll.u32 %v15332_v53, %v2724_v28 }
 0x27e   :  { %v12681_v54 = vsel %vm2403_vm13, %v10739_v16, %v2525_v6  ;;  %v2653_v47 = vsel %vm2651_vm0, %v2652_v0, %v2648_v51  ;;  %v2731_v41 = vshrl.u32 %v15331_v59, %v2725_v25  ;;  %v2734_v52 = vshrl.u32 %v15332_v53, %v2725_v25 }
 0x27f   :  { %v2530_v12 = vmul.f32 %v12681_v54, %v12681_v54  ;;  %v2654_v32 = vadd.s32 %v2653_v47, %v2649_v61  ;;  %v2737_v1 = vshrl.u32 %v15333_v49, %v2725_v25  ;;  %v2739_v46 = vshll.u32 %v15333_v49, %v2724_v28 }
 0x280   :  { %v12694_v15 = vshll.u32 %v2718_v11, 8  ;;  %v2727_v29 = vshll.u32 %v15335_v2, %v2724_v28  ;;  %v2728_v55 = vshrl.u32 %v15330_v44, %v2725_v25  ;;  %v2740_v31 = vshrl.u32 %v15334_v60, %v2725_v25 }
 0x281   :  { %v2531_v9 = vmul.f32 -0.001358992, %v2530_v12  ;;  %v2538_v3 = vmul.f32 -0.00019511016, %v2530_v12  ;;  %v2655_v35 = vadd.s32 536870912, %v2654_v32  ;;  %v2738_v13 = vor.u32 %v2737_v1, %v2736_v24 }
 0x282   :  { %vm2551_vm3 = vcmp.eq.s32.totalorder %v12677_v30, 2  ;;  %v12703_v61 = vor.u32 %v2731_v41, %v2730_v14  ;;  %v2735_v0 = vor.u32 %v2734_v52, %v2733_v62  ;;  %v2741_v6 = vor.u32 %v2740_v31, %v2739_v46 }
 0x283   :  { %v2532_v23 = vadd.f32 0.041655596, %v2531_v9  ;;  %v2539_v51 = vadd.f32 0.008332121, %v2538_v3  ;;  %v12700_v33 = vshrl.u32 %v2655_v35, 30  ;;  %vm2745_vm10 = vcmp.lt.s32.totalorder %v12683_v26, 4 }
 0x284   :  { %vm2742_vm12 = vcmp.lt.s32.totalorder %v12683_v26, 1  ;;  %vm2548_vm5 = vcmp.eq.s32.totalorder %v12677_v30, 0  ;;  %v2729_v9 = vor.u32 %v2728_v55, %v2727_v29  ;;  %vm2744_vm15 = vcmp.lt.s32.totalorder %v12683_v26, 3 }
 0x285   :  { %v2533_v28 = vmul.f32 %v2532_v23, %v2530_v12  ;;  %v2540_v11 = vmul.f32 %v2539_v51, %v2530_v12  ;;  %v2657_v47 = vshll.u32 %v12700_v33, 30  ;;  %v12711_v24 = vand.u32 65535, %v12694_v15 }
 0x286   :  { %v2868_v14 = vshrl.u32 %v2867_v39, 23  ;;  %vm2547_vm2 = vcmp.lt.s32.totalorder %v12677_v30, 2  ;;  %v2751_v1 = vsel %vm2745_vm10, %v2738_v13, 920167782  ;;  %vm15162_vm13 = vweird.f32 %v10739_v16 }
 0x287   :  { %v2534_v41 = vadd.f32 -0.4999988, %v2533_v28  ;;  %v2541_v62 = vadd.f32 -0.16666654, %v2540_v11  ;;  %v2658_v52 = vsub.s32 %v2654_v32, %v2657_v47  ;;  %v2726_v46 = vshrl.u32 %v15335_v2, %v2725_v25 }
 0x288   :  { %vm2743_vm0 = vcmp.lt.s32.totalorder %v12683_v26, 2  ;;  %v2754_v3 = vsel %vm2742_vm12, %v12703_v61, %v2735_v0  ;;  %v2755_v35 = vsel %vm2745_vm10, %v2741_v6, 1326507024  ;;  %v2750_v31 = vsel %vm2742_vm12, %v2729_v9, %v12703_v61 }
 0x289   :  { %v2535_v29 = vmul.f32 %v2534_v41, %v2530_v12  ;;  %v2542_v55 = vmul.f32 %v2541_v62, %v2530_v12  ;;  %vm2659_vm6 = vcmp.lt.s32.totalorder %v2658_v52, 0  ;;  %v2660_v32 = vsub.s32 0, %v2658_v52 }
 0x28a   :  { %v2752_v25 = vsel %vm2744_vm15, %v2735_v0, %v2751_v1  ;;  %v2756_v39 = vsel %vm2744_vm15, %v2738_v13, %v2755_v35  ;;  %v2760_v23 = vshrl.u32 %v12694_v15, 16  ;;  %v2650_v11 = vadd.s32 %v12657_v63, %v12655_v36 }
 0x28b   :  { %v12732_v51 = vadd.f32 1.0, %v2535_v29  ;;  %v2543_v28 = vadd.f32 1.0, %v2542_v55  ;;  %v2661_v6 = vsel %vm2659_vm6, %v2660_v32, %v2658_v52  ;;  %v2757_v12 = vsel %vm2743_vm0, %v2754_v3, %v2756_v39 }
 0x28c   :  { %v2662_v47 = vclz %v2661_v6  ;;  %v2761_v41 = vand.u32 65535, %v2757_v12  ;;  %v2762_v62 = vshrl.u32 %v2757_v12, 16  ;;  %v2746_v35 = vsel %vm2742_vm12, %v2726_v46, %v2729_v9 }
 0x28d   :  { %15412 = vst [vmem:[#allocation72_spill] sm:$0xff] %v12732_v51  ;;  %v12739_v1 = vmul.f32 %v2543_v28, %v12681_v54  ;;  %v15152_v13 = vxor.u32 2147483648, %v12732_v51  ;;  %v10287_v29 = vadd.s32 4294967169, %v2868_v14  ;;  %v2753_v3 = vsel %vm2743_vm0, %v2750_v31, %v2752_v25 }
 0x28e   :  { %v10282_v55 = vadd.s32 4294967294, %v2662_v47  ;;  %v2764_v36 = vmul.u32 %v2762_v62, %v12711_v24  ;;  %v2747_v9 = vsel %vm2745_vm10, %v2735_v0, 2102212464  ;;  %v2765_v14 = vmul.u32 %v2761_v41, %v2760_v23 }
 0x28f   :  { %15413 = vst [vmem:[#allocation73_spill] sm:$0xff] %v12739_v1  ;;  %v15158_v63 = vxor.u32 2147483648, %v12739_v1  ;;  %v2553_v54 = vsel %vm2551_vm3, %v15152_v13, %v12739_v1  ;;  %v2763_v46 = vmul.u32 %v2761_v41, %v12711_v24  ;;  %v2783_v28 = vand.u32 65535, %v2753_v3 }
 0x290   :  { %vm10283_vm6 = vcmp.lt.s32.totalorder %v10282_v55, 0  ;;  %v2767_v39 = vshll.u32 %v2764_v36, 16  ;;  %v2766_v6 = vmul.u32 %v2762_v62, %v2760_v23  ;;  %v2784_v12 = vshrl.u32 %v2753_v3, 16 }
 0x291   :  { %v2550_v31 = vsel %vm2548_vm5, %v12732_v51, %v15158_v63  ;;  %v2665_v25 = vsel %vm10283_vm6, 0, %v10282_v55  ;;  %v2748_v32 = vsel %vm2744_vm15, %v12703_v61, %v2747_v9  ;;  %v2769_v57 = vshll.u32 %v2765_v14, 16 }
 0x292   :  { %v2554_v47 = vsel %vm2547_vm2, %v2550_v31, %v2553_v54  ;;  %v2666_v13 = vsub.s32 32, %v2665_v25  ;;  %v2667_v0 = vshll.u32 %v2658_v52, %v2665_v25  ;;  %v2670_v20 = vsub.s32 4294967266, %v2665_v25 }
 0x293   :  { %v2555_v41 = vsel %vm15162_vm13, nan, %v2554_v47  ;;  %v2874_v1 = vadd.s32 1, %v10287_v29  ;;  %vm2771_vm3 = vc.u32 %v2763_v46, %v2767_v39  ;;  %v2785_v62 = vmul.u32 %v2783_v28, %v12711_v24 }
 0x294   :  { %v2668_v38 = vshrl.u32 %v2650_v11, %v2666_v13  ;;  %v2671_v63 = vadd.s32 127, %v2670_v20  ;;  %5188 = vst [vmem:[#allocation7 + $0x70] sm:$0xff] %v2555_v41  ;;  %v2772_v30 = vsel %vm2771_vm3, 1, %v15336_v56  ;;  %v2773_v55 = vadd.s32 %v2767_v39, %v2763_v46 }
 0x295   :  { %v2786_v52 = vmul.u32 %v2784_v12, %v12711_v24  ;;  %v2787_v3 = vmul.u32 %v2783_v28, %v2760_v23  ;;  %v2768_v25 = vshrl.u32 %v2764_v36, 16  ;;  %v2774_v47 = vadd.s32 %v2772_v30, %v2766_v6 }
 0x296   :  { %v2669_v54 = vor.u32 %v2668_v38, %v2667_v0  ;;  %v2672_v31 = vshll.u32 %v2671_v63, 23  ;;  %vm2775_vm10 = vc.u32 %v2773_v55, %v2769_v57  ;;  %v2788_v61 = vmul.u32 %v2784_v12, %v2760_v23 }
 0x297   :  { %v2789_v9 = vshll.u32 %v2786_v52, 16  ;;  %v2791_v29 = vshll.u32 %v2787_v3, 16  ;;  %v2770_v13 = vshrl.u32 %v2765_v14, 16  ;;  %v2776_v16 = vsel %vm2775_vm10, 1, %v15336_v56 }
 0x298   :  { %v2673_v11 = vor.u32 4788187, %v2672_v31  ;;  %v2676_v20 = vcvt.s32.f32 %v2669_v54  ;;  %v2778_v41 = vadd.s32 %v2776_v16, %v2774_v47  ;;  %vm2875_vm5 = vcmp.gt.s32.totalorder %v2874_v1, 0 }
 0x299   :  { %vm2793_vm12 = vc.u32 %v2785_v62, %v2789_v9  ;;  %v2795_v51 = vadd.s32 %v2789_v9, %v2785_v62  ;;  %v2749_v38 = vsel %vm2743_vm0, %v2746_v35, %v2748_v32  ;;  %v2876_v36 = vsel %vm2875_vm5, %v2874_v1, 0 }
 0x29a   :  { %v2674_v46 = vand.u32 2147483647, %v2673_v11  ;;  %v2794_v24 = vsel %vm2793_vm12, 1, %v15336_v56  ;;  %v2779_v57 = vadd.s32 %v2778_v41, %v2768_v25  ;;  %v2790_v23 = vshrl.u32 %v2786_v52, 16 }
 0x29b   :  { %v2796_v63 = vadd.s32 %v2794_v24, %v2788_v61  ;;  %vm2797_vm15 = vc.u32 %v2795_v51, %v2791_v29  ;;  %v12777_v28 = vadd.s32 %v2795_v51, %v2791_v29  ;;  %v2878_v16 = vand.u32 31, %v2876_v36 }
 0x29c   :  { %v2677_v39 = vmul.f32 %v2676_v20, %v2674_v46  ;;  %v2798_v14 = vsel %vm2797_vm15, 1, %v15336_v56  ;;  %vm2558_vm2 = vcmp.lt.s32.totalorder %v10741_v17, 0  ;;  %v12780_v6 = vadd.s32 %v2779_v57, %v2770_v13 }
 0x29d   :  { %v2792_v12 = vshrl.u32 %v2787_v3, 16  ;;  %v2800_v26 = vadd.s32 %v2798_v14, %v2796_v63  ;;  %v15414_v35 = vand.u32 2147483647, %v10741_v17  ;;  %v15417_v0 = vand.u32 2147483647, %v10745_v19 }
 0x29e   :  { %v2678_v32 = vxor.u32 2147483648, %v2677_v39  ;;  %v12790_v30 = vsub.s32 32, %v2878_v16  ;;  %v15418_v51 = vsub.s32 4, %v12700_v33  ;;  %v2803_v3 = vmul.u32 %v12694_v15, %v2749_v38 }
 0x29f   :  { %vm12784_vm0 = vcmp.le.f32.partialorder %v15414_v35, 0.7853982  ;;  %v2871_v62 = vand.u32 8388607, %v15417_v0  ;;  %v2801_v52 = vadd.s32 %v2800_v26, %v2790_v23  ;;  %v12796_v54 = vshrl.u32 %v2876_v36, 5 }
 0x2a0   :  { %v2681_v55 = vsel %vm2558_vm2, %v15418_v51, %v12700_v33  ;;  %v2679_v31 = vsel %vm2558_vm2, %v2678_v32, %v2677_v39  ;;  %vm2805_vm6 = vc.u32 %v12780_v6, %v12777_v28  ;;  %v2881_v25 = vshll.u32 %v15335_v2, %v2878_v16 }
 0x2a1   :  { %v2884_v47 = vshll.u32 %v15330_v44, %v2878_v16  ;;  %v2682_v61 = vsel %vm12784_vm0, %v10741_v17, %v2679_v31  ;;  %v2802_v9 = vadd.s32 %v2801_v52, %v2792_v12  ;;  %v2885_v33 = vshrl.u32 %v15331_v59, %v12790_v30 }
 0x2a2   :  { %v2890_v15 = vshll.u32 %v15332_v53, %v2878_v16  ;;  %v2684_v29 = vmul.f32 %v2682_v61, %v2682_v61  ;;  %v2887_v11 = vshll.u32 %v15331_v59, %v2878_v16  ;;  %v2888_v20 = vshrl.u32 %v15332_v53, %v12790_v30 }
 0x2a3   :  { %v2891_v13 = vshrl.u32 %v15333_v49, %v12790_v30  ;;  %v2806_v41 = vadd.s32 1, %v2802_v9  ;;  %v2882_v46 = vshrl.u32 %v15330_v44, %v12790_v30  ;;  %v2893_v38 = vshll.u32 %v15333_v49, %v2878_v16 }
 0x2a4   :  { %v2894_v24 = vshrl.u32 %v15334_v60, %v12790_v30  ;;  %v12820_v36 = vsel %vm12784_vm0, 0, %v2681_v55  ;;  %v2685_v57 = vmul.f32 -0.001358992, %v2684_v29  ;;  %v2692_v23 = vmul.f32 -0.00019511016, %v2684_v29 }
 0x2a5   :  { %15419 = vst [vmem:[#allocation74_spill] sm:$0xff] %v12820_v36  ;;  %v2872_v63 = vor.u32 8388608, %v2871_v62  ;;  %v2807_v39 = vsel %vm2805_vm6, %v2806_v41, %v2802_v9  ;;  %v12825_v14 = vor.u32 %v2885_v33, %v2884_v47  ;;  %v2892_v12 = vor.u32 %v2891_v13, %v2890_v15 }
 0x2a6   :  { %v2895_v26 = vor.u32 %v2894_v24, %v2893_v38  ;;  %v2686_v35 = vadd.f32 0.041655596, %v2685_v57  ;;  %v2693_v16 = vadd.f32 0.008332121, %v2692_v23  ;;  %v2808_v32 = vadd.s32 %v2807_v39, %v2803_v3 }
 0x2a7   :  { %v12827_v0 = vor.u32 %v2888_v20, %v2887_v11  ;;  %v2700_v1 = vand.u32 3, %v12820_v36  ;;  %v2883_v51 = vor.u32 %v2882_v46, %v2881_v25  ;;  %vm2896_vm3 = vcmp.lt.s32.totalorder %v12796_v54, 1 }
 0x2a8   :  { %vm2899_vm10 = vcmp.lt.s32.totalorder %v12796_v54, 4  ;;  %v2687_v62 = vmul.f32 %v2686_v35, %v2684_v29  ;;  %v2694_v55 = vmul.f32 %v2693_v16, %v2684_v29  ;;  %v2809_v52 = vadd.s32 536870912, %v2808_v32 }
 0x2a9   :  { %vm2898_vm12 = vcmp.lt.s32.totalorder %v12796_v54, 3  ;;  %vm2897_vm5 = vcmp.lt.s32.totalorder %v12796_v54, 2  ;;  %v2905_v31 = vsel %vm2899_vm10, %v2892_v12, 920167782  ;;  %v2909_v3 = vsel %vm2899_vm10, %v2895_v26, 1326507024 }
 0x2aa   :  { %v12838_v47 = vshll.u32 %v2872_v63, 8  ;;  %v2688_v25 = vadd.f32 -0.4999988, %v2687_v62  ;;  %v2695_v9 = vadd.f32 -0.16666654, %v2694_v55  ;;  %v12840_v33 = vshrl.u32 %v2809_v52, 30 }
 0x2ab   :  { %v2908_v15 = vsel %vm2896_vm3, %v12825_v14, %v12827_v0  ;;  %vm2701_vm15 = vcmp.lt.s32.totalorder %v2700_v1, 2  ;;  %v2904_v11 = vsel %vm2896_vm3, %v2883_v51, %v12825_v14  ;;  %v2910_v20 = vsel %vm2898_vm12, %v2892_v12, %v2909_v3 }
 0x2ac   :  { %v2689_v13 = vmul.f32 %v2688_v25, %v2684_v29  ;;  %v2696_v41 = vmul.f32 %v2695_v9, %v2684_v29  ;;  %v2811_v46 = vshll.u32 %v12840_v33, 30  ;;  %v2906_v38 = vsel %vm2898_vm12, %v12827_v0, %v2905_v31 }
 0x2ad   :  { %vm2702_vm2 = vcmp.eq.s32.totalorder %v2700_v1, 0  ;;  %v2911_v24 = vsel %vm2897_vm5, %v2908_v15, %v2910_v20  ;;  %v2913_v57 = vand.u32 65535, %v12838_v47  ;;  %v2914_v23 = vshrl.u32 %v12838_v47, 16 }
 0x2ae   :  { %v12859_v63 = vadd.f32 1.0, %v2689_v13  ;;  %v2697_v39 = vadd.f32 1.0, %v2696_v41  ;;  %vm2705_vm0 = vcmp.eq.s32.totalorder %v2700_v1, 2  ;;  %v2812_v12 = vsub.s32 %v2808_v32, %v2811_v46  ;;  %v15422_v1 = vld [vmem:[#allocation30_spill] sm:$0xff] }
 0x2af   :  { %v2880_v29 = vshrl.u32 %v15335_v2, %v12790_v30  ;;  %v2907_v26 = vsel %vm2897_vm5, %v2904_v11, %v2906_v38  ;;  %v2915_v35 = vand.u32 65535, %v2911_v24  ;;  %v2916_v16 = vshrl.u32 %v2911_v24, 16 }
 0x2b0   :  { %15420 = vst [vmem:[#allocation75_spill] sm:$0xff] %v12859_v63  ;;  %v12865_v62 = vmul.f32 %v2697_v39, %v2682_v61  ;;  %v15163_v55 = vxor.u32 2147483648, %v12859_v63  ;;  %vm2813_vm6 = vcmp.lt.s32.totalorder %v2812_v12, 0  ;;  %v2814_v52 = vsub.s32 0, %v2812_v12 }
 0x2b1   :  { %v2917_v31 = vmul.u32 %v2915_v35, %v2913_v57  ;;  %v2918_v3 = vmul.u32 %v2916_v16, %v2913_v57  ;;  %v12868_v25 = vmul.u32 %v2915_v35, %v2914_v23  ;;  %v2937_v9 = vand.u32 65535, %v2907_v26 }
 0x2b2   :  { %15421 = vst [vmem:[#allocation76_spill] sm:$0xff] %v12865_v62  ;;  %v15164_v32 = vxor.u32 2147483648, %v12865_v62  ;;  %v2707_v30 = vsel %vm2705_vm0, %v15163_v55, %v12865_v62  ;;  %v2815_v15 = vsel %vm2813_vm6, %v2814_v52, %v2812_v12  ;;  %v2938_v11 = vshrl.u32 %v2907_v26, 16 }
 0x2b3   :  { %vm15171_vm13 = vweird.f32 %v10741_v17  ;;  %v2816_v61 = vclz %v2815_v15  ;;  %v2920_v20 = vmul.u32 %v2916_v16, %v2914_v23  ;;  %v2921_v13 = vshll.u32 %v2918_v3, 16 }
 0x2b4   :  { %v2704_v41 = vsel %vm2702_vm2, %v12859_v63, %v15164_v32  ;;  %v2804_v46 = vadd.s32 %v12777_v28, %v12780_v6  ;;  %v2923_v38 = vshll.u32 %v12868_v25, 16  ;;  %v2940_v24 = vmul.u32 %v2938_v11, %v2913_v57 }
 0x2b5   :  { %v2708_v39 = vsel %vm2701_vm15, %v2704_v41, %v2707_v30  ;;  %v10285_v35 = vadd.s32 4294967294, %v2816_v61  ;;  %vm2925_vm0 = vc.u32 %v2917_v31, %v2921_v13  ;;  %v2927_v26 = vadd.s32 %v2921_v13, %v2917_v31 }
 0x2b6   :  { %v2709_v16 = vsel %vm15171_vm13, nan, %v2708_v39  ;;  %v2900_v52 = vsel %vm2896_vm3, %v2880_v29, %v2883_v51  ;;  %v2926_v15 = vsel %vm2925_vm0, 1, %v15336_v56  ;;  %v2941_v55 = vmul.u32 %v2937_v9, %v2914_v23 }
 0x2b7   :  { %vm10286_vm2 = vcmp.lt.s32.totalorder %v10285_v35, 0  ;;  %v2901_v28 = vsel %vm2899_vm10, %v12827_v0, 2102212464  ;;  %v2928_v6 = vadd.s32 %v2926_v15, %v2920_v20  ;;  %v3021_v30 = vand.u32 2139095040, %v15422_v1  ;;  %5189 = vst [vmem:[#allocation7 + $0x78] sm:$0xff] %v2709_v16 }
 0x2b8   :  { %v2819_v61 = vsel %vm10286_vm2, 0, %v10285_v35  ;;  %vm2929_vm15 = vc.u32 %v2927_v26, %v2923_v38  ;;  %v2939_v31 = vmul.u32 %v2937_v9, %v2913_v57  ;;  %v2943_v13 = vshll.u32 %v2940_v24, 16 }
 0x2b9   :  { %v2820_v41 = vsub.s32 32, %v2819_v61  ;;  %v2821_v39 = vshll.u32 %v2812_v12, %v2819_v61  ;;  %v2824_v32 = vsub.s32 4294967266, %v2819_v61  ;;  %v2922_v51 = vshrl.u32 %v2918_v3, 16 }
 0x2ba   :  { %v2902_v29 = vsel %vm2898_vm12, %v12825_v14, %v2901_v28  ;;  %v2930_v17 = vsel %vm2929_vm15, 1, %v15336_v56  ;;  %v2942_v63 = vmul.u32 %v2938_v11, %v2914_v23  ;;  %v2945_v0 = vshll.u32 %v2941_v55, 16 }
 0x2bb   :  { %v2822_v20 = vshrl.u32 %v2804_v46, %v2820_v41  ;;  %v2825_v15 = vadd.s32 127, %v2824_v32  ;;  %v2932_v62 = vadd.s32 %v2930_v17, %v2928_v6  ;;  %v15170_v35 = vand.u32 2147483647, %v15422_v1 }
 0x2bc   :  { %v2924_v57 = vshrl.u32 %v12868_v25, 16  ;;  %vm2947_vm3 = vc.u32 %v2939_v31, %v2943_v13  ;;  %v2949_v9 = vadd.s32 %v2943_v13, %v2939_v31  ;;  %v3022_v12 = vshrl.u32 %v3021_v30, 23 }
 0x2bd   :  { %v2823_v38 = vor.u32 %v2822_v20, %v2821_v39  ;;  %v2826_v3 = vshll.u32 %v2825_v15, 23  ;;  %v2933_v26 = vadd.s32 %v2932_v62, %v2922_v51  ;;  %v2948_v16 = vsel %vm2947_vm3, 1, %v15336_v56 }
 0x2be   :  { %v2944_v14 = vshrl.u32 %v2940_v24, 16  ;;  %v2950_v28 = vadd.s32 %v2948_v16, %v2942_v63  ;;  %vm2951_vm10 = vc.u32 %v2949_v9, %v2945_v0  ;;  %v10290_v23 = vadd.s32 4294967169, %v3022_v12 }
 0x2bf   :  { %v2827_v11 = vor.u32 4788187, %v2826_v3  ;;  %v2830_v46 = vcvt.s32.f32 %v2823_v38  ;;  %v2834_v17 = vsub.s32 4, %v12840_v33  ;;  %v2952_v32 = vsel %vm2951_vm10, 1, %v15336_v56  ;;  %v15425_v38 = vld [vmem:[#allocation31_spill] sm:$0xff] }
 0x2c0   :  { %v2946_v6 = vshrl.u32 %v2941_v55, 16  ;;  %v2954_v25 = vadd.s32 %v2952_v32, %v2950_v28  ;;  %v3028_v61 = vadd.s32 1, %v10290_v23  ;;  %v12901_v30 = vadd.s32 %v2933_v26, %v2924_v57 }
 0x2c1   :  { %v2828_v31 = vand.u32 2147483647, %v2827_v11  ;;  %v12903_v13 = vadd.s32 %v2949_v9, %v2945_v0  ;;  %vm2712_vm12 = vcmp.lt.s32.totalorder %v10743_v18, 0  ;;  %v2903_v63 = vsel %vm2897_vm5, %v2900_v52, %v2902_v29 }
 0x2c2   :  { %v2955_v62 = vadd.s32 %v2954_v25, %v2944_v14  ;;  %vm3029_vm6 = vcmp.gt.s32.totalorder %v3028_v61, 0  ;;  %v2835_v41 = vsel %vm2712_vm12, %v2834_v17, %v12840_v33  ;;  %v3025_v55 = vand.u32 8388607, %v15170_v35 }
 0x2c3   :  { %v2831_v24 = vmul.f32 %v2830_v46, %v2828_v31  ;;  %v3030_v39 = vsel %vm3029_vm6, %v3028_v61, 0  ;;  %v15423_v0 = vand.u32 2147483647, %v10743_v18  ;;  %v2957_v54 = vmul.u32 %v12838_v47, %v2903_v63 }
 0x2c4   :  { %v2956_v51 = vadd.s32 %v2955_v62, %v2946_v6  ;;  %v3032_v20 = vand.u32 31, %v3030_v39  ;;  %vm2959_vm5 = vc.u32 %v12901_v30, %v12903_v13  ;;  %v3026_v12 = vor.u32 8388608, %v3025_v55 }
 0x2c5   :  { %vm2711_vm0 = vcmp.le.f32.partialorder %v15423_v0, 0.7853982  ;;  %v2832_v15 = vxor.u32 2147483648, %v2831_v24  ;;  %v12929_v16 = vshrl.u32 %v3030_v39, 5  ;;  %v3175_v39 = vand.u32 2139095040, %v15425_v38 }
 0x2c6   :  { %v12918_v52 = vsel %vm2711_vm0, 0, %v2835_v41  ;;  %v2960_v29 = vadd.s32 1, %v2956_v51  ;;  %v3033_v57 = vsub.s32 32, %v3032_v20  ;;  %v3038_v14 = vshll.u32 %v15330_v44, %v3032_v20 }
 0x2c7   :  { %15424 = vst [vmem:[#allocation77_spill] sm:$0xff] %v12918_v52  ;;  %v2833_v33 = vsel %vm2712_vm12, %v2832_v15, %v2831_v24  ;;  %v12923_v9 = vand.u32 3, %v12918_v52  ;;  %v3041_v11 = vshll.u32 %v15331_v59, %v3032_v20  ;;  %v3044_v46 = vshll.u32 %v15332_v53, %v3032_v20 }
 0x2c8   :  { %v12927_v26 = vsel %vm2711_vm0, %v10743_v18, %v2833_v33  ;;  %v2961_v47 = vsel %vm2959_vm5, %v2960_v29, %v2956_v51  ;;  %v3039_v17 = vshrl.u32 %v15331_v59, %v3033_v57  ;;  %v3042_v32 = vshrl.u32 %v15332_v53, %v3033_v57 }
 0x2c9   :  { %v2838_v28 = vmul.f32 %v12927_v26, %v12927_v26  ;;  %v2962_v23 = vadd.s32 %v2961_v47, %v2957_v54  ;;  %v3045_v6 = vshrl.u32 %v15333_v49, %v3033_v57  ;;  %v3047_v25 = vshll.u32 %v15333_v49, %v3032_v20 }
 0x2ca   :  { %v12940_v62 = vshll.u32 %v3026_v12, 8  ;;  %v3035_v24 = vshll.u32 %v15335_v2, %v3032_v20  ;;  %v3036_v41 = vshrl.u32 %v15330_v44, %v3033_v57  ;;  %v3048_v55 = vshrl.u32 %v15334_v60, %v3033_v57 }
 0x2cb   :  { %v2839_v61 = vmul.f32 -0.001358992, %v2838_v28  ;;  %v2846_v31 = vmul.f32 -0.00019511016, %v2838_v28  ;;  %v2963_v63 = vadd.s32 536870912, %v2962_v23  ;;  %v3046_v54 = vor.u32 %v3045_v6, %v3044_v46 }
 0x2cc   :  { %vm2859_vm2 = vcmp.eq.s32.totalorder %v12923_v9, 2  ;;  %v12949_v29 = vor.u32 %v3039_v17, %v3038_v14  ;;  %v3043_v33 = vor.u32 %v3042_v32, %v3041_v11  ;;  %v3049_v12 = vor.u32 %v3048_v55, %v3047_v25 }
 0x2cd   :  { %v2840_v51 = vadd.f32 0.041655596, %v2839_v61  ;;  %v2847_v0 = vadd.f32 0.008332121, %v2846_v31  ;;  %v12946_v15 = vshrl.u32 %v2963_v63, 30  ;;  %vm3053_vm15 = vcmp.lt.s32.totalorder %v12929_v16, 4 }
 0x2ce   :  { %vm3050_vm3 = vcmp.lt.s32.totalorder %v12929_v16, 1  ;;  %vm2856_vm10 = vcmp.eq.s32.totalorder %v12923_v9, 0  ;;  %v3037_v61 = vor.u32 %v3036_v41, %v3035_v24  ;;  %vm3052_vm12 = vcmp.lt.s32.totalorder %v12929_v16, 3 }
 0x2cf   :  { %v2841_v20 = vmul.f32 %v2840_v51, %v2838_v28  ;;  %v2848_v47 = vmul.f32 %v2847_v0, %v2838_v28  ;;  %v2965_v35 = vshll.u32 %v12946_v15, 30  ;;  %v12957_v46 = vand.u32 65535, %v12940_v62 }
 0x2d0   :  { %v3176_v14 = vshrl.u32 %v3175_v39, 23  ;;  %vm2855_vm6 = vcmp.lt.s32.totalorder %v12923_v9, 2  ;;  %v3059_v6 = vsel %vm3053_vm15, %v3046_v54, 920167782  ;;  %vm15181_vm0 = vweird.f32 %v10743_v18 }
 0x2d1   :  { %v2842_v17 = vadd.f32 -0.4999988, %v2841_v20  ;;  %v2849_v11 = vadd.f32 -0.16666654, %v2848_v47  ;;  %v2966_v32 = vsub.s32 %v2962_v23, %v2965_v35  ;;  %v3034_v25 = vshrl.u32 %v15335_v2, %v3033_v57 }
 0x2d2   :  { %vm3051_vm5 = vcmp.lt.s32.totalorder %v12929_v16, 2  ;;  %v3062_v31 = vsel %vm3050_vm3, %v12949_v29, %v3043_v33  ;;  %v3063_v63 = vsel %vm3053_vm15, %v3049_v12, 1326507024  ;;  %v3058_v23 = vsel %vm3050_vm3, %v3037_v61, %v12949_v29 }
 0x2d3   :  { %v2843_v24 = vmul.f32 %v2842_v17, %v2838_v28  ;;  %v2850_v41 = vmul.f32 %v2849_v11, %v2838_v28  ;;  %vm2967_vm13 = vcmp.lt.s32.totalorder %v2966_v32, 0  ;;  %v2968_v35 = vsub.s32 0, %v2966_v32 }
 0x2d4   :  { %v3060_v57 = vsel %vm3052_vm12, %v3043_v33, %v3059_v6  ;;  %v3064_v55 = vsel %vm3052_vm12, %v3046_v54, %v3063_v63  ;;  %v3068_v39 = vshrl.u32 %v12940_v62, 16  ;;  %v2958_v20 = vadd.s32 %v12903_v13, %v12901_v30 }
 0x2d5   :  { %v12978_v51 = vadd.f32 1.0, %v2843_v24  ;;  %v2851_v0 = vadd.f32 1.0, %v2850_v41  ;;  %v2969_v12 = vsel %vm2967_vm13, %v2968_v35, %v2966_v32  ;;  %v3065_v28 = vsel %vm3051_vm5, %v3062_v31, %v3064_v55 }
 0x2d6   :  { %v2970_v47 = vclz %v2969_v12  ;;  %v3069_v17 = vand.u32 65535, %v3065_v28  ;;  %v3070_v11 = vshrl.u32 %v3065_v28, 16  ;;  %v3054_v63 = vsel %vm3050_vm3, %v3034_v25, %v3037_v61 }
 0x2d7   :  { %15426 = vst [vmem:[#allocation78_spill] sm:$0xff] %v12978_v51  ;;  %v12985_v6 = vmul.f32 %v2851_v0, %v12927_v26  ;;  %v15172_v54 = vxor.u32 2147483648, %v12978_v51  ;;  %v10293_v24 = vadd.s32 4294967169, %v3176_v14  ;;  %v3061_v31 = vsel %vm3051_vm5, %v3058_v23, %v3060_v57 }
 0x2d8   :  { %v10288_v41 = vadd.s32 4294967294, %v2970_v47  ;;  %v3072_v30 = vmul.u32 %v3070_v11, %v12957_v46  ;;  %v3055_v61 = vsel %vm3053_vm15, %v3043_v33, 2102212464  ;;  %v3073_v14 = vmul.u32 %v3069_v17, %v3068_v39 }
 0x2d9   :  { %15427 = vst [vmem:[#allocation79_spill] sm:$0xff] %v12985_v6  ;;  %v15177_v13 = vxor.u32 2147483648, %v12985_v6  ;;  %v2861_v26 = vsel %vm2859_vm2, %v15172_v54, %v12985_v6  ;;  %v3071_v25 = vmul.u32 %v3069_v17, %v12957_v46  ;;  %v3091_v0 = vand.u32 65535, %v3061_v31 }
 0x2da   :  { %vm10289_vm13 = vcmp.lt.s32.totalorder %v10288_v41, 0  ;;  %v3075_v55 = vshll.u32 %v3072_v30, 16  ;;  %v3074_v12 = vmul.u32 %v3070_v11, %v3068_v39  ;;  %v3092_v28 = vshrl.u32 %v3061_v31, 16 }
 0x2db   :  { %v2858_v23 = vsel %vm2856_vm10, %v12978_v51, %v15177_v13  ;;  %v2973_v57 = vsel %vm10289_vm13, 0, %v10288_v41  ;;  %v3056_v3 = vsel %vm3052_vm12, %v12949_v29, %v3055_v61  ;;  %v3077_v6 = vshll.u32 %v3073_v14, 16 }
 0x2dc   :  { %v2862_v47 = vsel %vm2855_vm6, %v2858_v23, %v2861_v26  ;;  %v2974_v54 = vsub.s32 32, %v2973_v57  ;;  %v2975_v33 = vshll.u32 %v2966_v32, %v2973_v57  ;;  %v2978_v35 = vsub.s32 4294967266, %v2973_v57 }
 0x2dd   :  { %v2863_v17 = vsel %vm15181_vm0, nan, %v2862_v47  ;;  %v3182_v52 = vadd.s32 1, %v10293_v24  ;;  %vm3079_vm2 = vc.u32 %v3071_v25, %v3075_v55  ;;  %v3093_v11 = vmul.u32 %v3091_v0, %v12957_v46 }
 0x2de   :  { %v2976_v36 = vshrl.u32 %v2958_v20, %v2974_v54  ;;  %v2979_v13 = vadd.s32 127, %v2978_v35  ;;  %5190 = vst [vmem:[#allocation7 + $0x80] sm:$0xff] %v2863_v17  ;;  %v3080_v9 = vsel %vm3079_vm2, 1, %v15336_v56  ;;  %v3081_v41 = vadd.s32 %v3075_v55, %v3071_v25 }
 0x2df   :  { %v3094_v32 = vmul.u32 %v3092_v28, %v12957_v46  ;;  %v3095_v31 = vmul.u32 %v3091_v0, %v3068_v39  ;;  %v3076_v57 = vshrl.u32 %v3072_v30, 16  ;;  %v3082_v47 = vadd.s32 %v3080_v9, %v3074_v12 }
 0x2e0   :  { %v2977_v26 = vor.u32 %v2976_v36, %v2975_v33  ;;  %v2980_v23 = vshll.u32 %v2979_v13, 23  ;;  %vm3083_vm15 = vc.u32 %v3081_v41, %v3077_v6  ;;  %v3096_v29 = vmul.u32 %v3092_v28, %v3068_v39 }
 0x2e1   :  { %v3097_v61 = vshll.u32 %v3094_v32, 16  ;;  %v3099_v24 = vshll.u32 %v3095_v31, 16  ;;  %v3078_v35 = vshrl.u32 %v3073_v14, 16  ;;  %v3084_v18 = vsel %vm3083_vm15, 1, %v15336_v56 }
 0x2e2   :  { %v2981_v20 = vor.u32 4788187, %v2980_v23  ;;  %v2984_v54 = vcvt.s32.f32 %v2977_v26  ;;  %v3086_v17 = vadd.s32 %v3084_v18, %v3082_v47  ;;  %vm3183_vm10 = vcmp.gt.s32.totalorder %v3182_v52, 0 }
 0x2e3   :  { %vm3101_vm3 = vc.u32 %v3093_v11, %v3097_v61  ;;  %v3103_v51 = vadd.s32 %v3097_v61, %v3093_v11  ;;  %v3057_v36 = vsel %vm3051_vm5, %v3054_v63, %v3056_v3  ;;  %v3184_v30 = vsel %vm3183_vm10, %v3182_v52, 0 }
 0x2e4   :  { %v2982_v25 = vand.u32 2147483647, %v2981_v20  ;;  %v3102_v46 = vsel %vm3101_vm3, 1, %v15336_v56  ;;  %v3087_v6 = vadd.s32 %v3086_v17, %v3076_v57  ;;  %v3098_v39 = vshrl.u32 %v3094_v32, 16 }
 0x2e5   :  { %v3104_v13 = vadd.s32 %v3102_v46, %v3096_v29  ;;  %vm3105_vm12 = vc.u32 %v3103_v51, %v3099_v24  ;;  %v13023_v0 = vadd.s32 %v3103_v51, %v3099_v24  ;;  %v3186_v18 = vand.u32 31, %v3184_v30 }
 0x2e6   :  { %v2985_v55 = vmul.f32 %v2984_v54, %v2982_v25  ;;  %v3106_v14 = vsel %vm3105_vm12, 1, %v15336_v56  ;;  %vm2866_vm6 = vcmp.lt.s32.totalorder %v10745_v19, 0  ;;  %v13026_v12 = vadd.s32 %v3087_v6, %v3078_v35 }
 0x2e7   :  { %v3100_v28 = vshrl.u32 %v3095_v31, 16  ;;  %v3108_v16 = vadd.s32 %v3106_v14, %v3104_v13  ;;  %v15428_v3 = vand.u32 2147483647, %v10745_v19  ;;  %v15431_v33 = vand.u32 2147483647, %v15425_v38 }
 0x2e8   :  { %v2986_v63 = vxor.u32 2147483648, %v2985_v55  ;;  %v13036_v9 = vsub.s32 32, %v3186_v18  ;;  %v15432_v51 = vsub.s32 4, %v12946_v15  ;;  %v3111_v31 = vmul.u32 %v12940_v62, %v3057_v36 }
 0x2e9   :  { %vm13030_vm5 = vcmp.le.f32.partialorder %v15428_v3, 0.7853982  ;;  %v3179_v11 = vand.u32 8388607, %v15431_v33  ;;  %v3109_v32 = vadd.s32 %v3108_v16, %v3098_v39  ;;  %v13042_v26 = vshrl.u32 %v3184_v30, 5 }
 0x2ea   :  { %v2989_v41 = vsel %vm2866_vm6, %v15432_v51, %v12946_v15  ;;  %v2987_v23 = vsel %vm2866_vm6, %v2986_v63, %v2985_v55  ;;  %vm3113_vm13 = vc.u32 %v13026_v12, %v13023_v0  ;;  %v3189_v57 = vshll.u32 %v15335_v2, %v3186_v18 }
 0x2eb   :  { %v3192_v47 = vshll.u32 %v15330_v44, %v3186_v18  ;;  %v2990_v29 = vsel %vm13030_vm5, %v10745_v19, %v2987_v23  ;;  %v3110_v61 = vadd.s32 %v3109_v32, %v3100_v28  ;;  %v3193_v15 = vshrl.u32 %v15331_v59, %v13036_v9 }
 0x2ec   :  { %v3198_v62 = vshll.u32 %v15332_v53, %v3186_v18  ;;  %v2992_v24 = vmul.f32 %v2990_v29, %v2990_v29  ;;  %v3195_v20 = vshll.u32 %v15331_v59, %v3186_v18  ;;  %v3196_v54 = vshrl.u32 %v15332_v53, %v13036_v9 }
 0x2ed   :  { %v3199_v35 = vshrl.u32 %v15333_v49, %v13036_v9  ;;  %v3114_v17 = vadd.s32 1, %v3110_v61  ;;  %v3190_v25 = vshrl.u32 %v15330_v44, %v13036_v9  ;;  %v3201_v36 = vshll.u32 %v15333_v49, %v3186_v18 }
 0x2ee   :  { %v3202_v46 = vshrl.u32 %v15334_v60, %v13036_v9  ;;  %v13066_v30 = vsel %vm13030_vm5, 0, %v2989_v41  ;;  %v2993_v6 = vmul.f32 -0.001358992, %v2992_v24  ;;  %v3000_v39 = vmul.f32 -0.00019511016, %v2992_v24 }
 0x2ef   :  { %15433 = vst [vmem:[#allocation80_spill] sm:$0xff] %v13066_v30  ;;  %v3180_v13 = vor.u32 8388608, %v3179_v11  ;;  %v3115_v55 = vsel %vm3113_vm13, %v3114_v17, %v3110_v61  ;;  %v13071_v14 = vor.u32 %v3193_v15, %v3192_v47  ;;  %v3200_v28 = vor.u32 %v3199_v35, %v3198_v62 }
 0x2f0   :  { %v3203_v16 = vor.u32 %v3202_v46, %v3201_v36  ;;  %v2994_v3 = vadd.f32 0.041655596, %v2993_v6  ;;  %v3001_v18 = vadd.f32 0.008332121, %v3000_v39  ;;  %v3116_v63 = vadd.s32 %v3115_v55, %v3111_v31 }
 0x2f1   :  { %v13073_v33 = vor.u32 %v3196_v54, %v3195_v20  ;;  %v3008_v52 = vand.u32 3, %v13066_v30  ;;  %v3191_v51 = vor.u32 %v3190_v25, %v3189_v57  ;;  %vm3204_vm2 = vcmp.lt.s32.totalorder %v13042_v26, 1 }
 0x2f2   :  { %vm3207_vm15 = vcmp.lt.s32.totalorder %v13042_v26, 4  ;;  %v2995_v11 = vmul.f32 %v2994_v3, %v2992_v24  ;;  %v3002_v41 = vmul.f32 %v3001_v18, %v2992_v24  ;;  %v3117_v32 = vadd.s32 536870912, %v3116_v63 }
 0x2f3   :  { %vm3206_vm3 = vcmp.lt.s32.totalorder %v13042_v26, 3  ;;  %vm3205_vm10 = vcmp.lt.s32.totalorder %v13042_v26, 2  ;;  %v3213_v23 = vsel %vm3207_vm15, %v3200_v28, 920167782  ;;  %v3217_v31 = vsel %vm3207_vm15, %v3203_v16, 1326507024 }
 0x2f4   :  { %v13084_v47 = vshll.u32 %v3180_v13, 8  ;;  %v2996_v57 = vadd.f32 -0.4999988, %v2995_v11  ;;  %v3003_v61 = vadd.f32 -0.16666654, %v3002_v41  ;;  %v13086_v15 = vshrl.u32 %v3117_v32, 30 }
 0x2f5   :  { %v3216_v62 = vsel %vm3204_vm2, %v13071_v14, %v13073_v33  ;;  %vm3009_vm12 = vcmp.lt.s32.totalorder %v3008_v52, 2  ;;  %v3212_v20 = vsel %vm3204_vm2, %v3191_v51, %v13071_v14  ;;  %v3218_v54 = vsel %vm3206_vm3, %v3200_v28, %v3217_v31 }
 0x2f6   :  { %v2997_v35 = vmul.f32 %v2996_v57, %v2992_v24  ;;  %v3004_v17 = vmul.f32 %v3003_v61, %v2992_v24  ;;  %v3119_v25 = vshll.u32 %v13086_v15, 30  ;;  %v3214_v36 = vsel %vm3206_vm3, %v13073_v33, %v3213_v23 }
 0x2f7   :  { %vm3010_vm6 = vcmp.eq.s32.totalorder %v3008_v52, 0  ;;  %v3219_v46 = vsel %vm3205_vm10, %v3216_v62, %v3218_v54  ;;  %v3221_v6 = vand.u32 65535, %v13084_v47  ;;  %v3222_v39 = vshrl.u32 %v13084_v47, 16 }
 0x2f8   :  { %v13105_v13 = vadd.f32 1.0, %v2997_v35  ;;  %v3005_v55 = vadd.f32 1.0, %v3004_v17  ;;  %vm3013_vm5 = vcmp.eq.s32.totalorder %v3008_v52, 2  ;;  %v3120_v28 = vsub.s32 %v3116_v63, %v3119_v25  ;;  %v15436_v52 = vld [vmem:[#allocation32_spill] sm:$0xff] }
 0x2f9   :  { %v3188_v24 = vshrl.u32 %v15335_v2, %v13036_v9  ;;  %v3215_v16 = vsel %vm3205_vm10, %v3212_v20, %v3214_v36  ;;  %v3223_v3 = vand.u32 65535, %v3219_v46  ;;  %v3224_v18 = vshrl.u32 %v3219_v46, 16 }
 0x2fa   :  { %15434 = vst [vmem:[#allocation81_spill] sm:$0xff] %v13105_v13  ;;  %v13111_v11 = vmul.f32 %v3005_v55, %v2990_v29  ;;  %v15182_v41 = vxor.u32 2147483648, %v13105_v13  ;;  %vm3121_vm13 = vcmp.lt.s32.totalorder %v3120_v28, 0  ;;  %v3122_v32 = vsub.s32 0, %v3120_v28 }
 0x2fb   :  { %v3225_v23 = vmul.u32 %v3223_v3, %v3221_v6  ;;  %v3226_v31 = vmul.u32 %v3224_v18, %v3221_v6  ;;  %v13114_v57 = vmul.u32 %v3223_v3, %v3222_v39  ;;  %v3245_v61 = vand.u32 65535, %v3215_v16 }
 0x2fc   :  { %15435 = vst [vmem:[#allocation82_spill] sm:$0xff] %v13111_v11  ;;  %v15183_v63 = vxor.u32 2147483648, %v13111_v11  ;;  %v3015_v9 = vsel %vm3013_vm5, %v15182_v41, %v13111_v11  ;;  %v3123_v62 = vsel %vm3121_vm13, %v3122_v32, %v3120_v28  ;;  %v3246_v20 = vshrl.u32 %v3215_v16, 16 }
 0x2fd   :  { %vm15190_vm0 = vweird.f32 %v10745_v19  ;;  %v3124_v29 = vclz %v3123_v62  ;;  %v3228_v54 = vmul.u32 %v3224_v18, %v3222_v39  ;;  %v3229_v35 = vshll.u32 %v3226_v31, 16 }
 0x2fe   :  { %v3012_v17 = vsel %vm3010_vm6, %v13105_v13, %v15183_v63  ;;  %v3112_v25 = vadd.s32 %v13023_v0, %v13026_v12  ;;  %v3231_v36 = vshll.u32 %v13114_v57, 16  ;;  %v3248_v46 = vmul.u32 %v3246_v20, %v3221_v6 }
 0x2ff   :  { %v3016_v55 = vsel %vm3009_vm12, %v3012_v17, %v3015_v9  ;;  %v10291_v3 = vadd.s32 4294967294, %v3124_v29  ;;  %vm3233_vm5 = vc.u32 %v3225_v23, %v3229_v35  ;;  %v3235_v16 = vadd.s32 %v3229_v35, %v3225_v23 }
 0x300   :  { %v3017_v18 = vsel %vm15190_vm0, nan, %v3016_v55  ;;  %v3208_v32 = vsel %vm3204_vm2, %v3188_v24, %v3191_v51  ;;  %v3234_v62 = vsel %vm3233_vm5, 1, %v15336_v56  ;;  %v3249_v41 = vmul.u32 %v3245_v61, %v3222_v39 }
 0x301   :  { %vm10292_vm6 = vcmp.lt.s32.totalorder %v10291_v3, 0  ;;  %v3209_v0 = vsel %vm3207_vm15, %v13073_v33, 2102212464  ;;  %v3236_v12 = vadd.s32 %v3234_v62, %v3228_v54  ;;  %v3329_v9 = vand.u32 2139095040, %v15436_v52  ;;  %5191 = vst [vmem:[#allocation7 + $0x88] sm:$0xff] %v3017_v18 }
 0x302   :  { %v3127_v29 = vsel %vm10292_vm6, 0, %v10291_v3  ;;  %vm3237_vm12 = vc.u32 %v3235_v16, %v3231_v36  ;;  %v3247_v23 = vmul.u32 %v3245_v61, %v3221_v6  ;;  %v3251_v35 = vshll.u32 %v3248_v46, 16 }
 0x303   :  { %v3128_v17 = vsub.s32 32, %v3127_v29  ;;  %v3129_v55 = vshll.u32 %v3120_v28, %v3127_v29  ;;  %v3132_v63 = vsub.s32 4294967266, %v3127_v29  ;;  %v3230_v51 = vshrl.u32 %v3226_v31, 16 }
 0x304   :  { %v3210_v24 = vsel %vm3206_vm3, %v13071_v14, %v3209_v0  ;;  %v3238_v19 = vsel %vm3237_vm12, 1, %v15336_v56  ;;  %v3250_v13 = vmul.u32 %v3246_v20, %v3222_v39  ;;  %v3253_v33 = vshll.u32 %v3249_v41, 16 }
 0x305   :  { %v3130_v54 = vshrl.u32 %v3112_v25, %v3128_v17  ;;  %v3133_v62 = vadd.s32 127, %v3132_v63  ;;  %v3240_v11 = vadd.s32 %v3238_v19, %v3236_v12  ;;  %v15189_v3 = vand.u32 2147483647, %v15436_v52 }
 0x306   :  { %v3232_v6 = vshrl.u32 %v13114_v57, 16  ;;  %vm3255_vm2 = vc.u32 %v3247_v23, %v3251_v35  ;;  %v3257_v61 = vadd.s32 %v3251_v35, %v3247_v23  ;;  %v3330_v28 = vshrl.u32 %v3329_v9, 23 }
 0x307   :  { %v3131_v36 = vor.u32 %v3130_v54, %v3129_v55  ;;  %v3134_v31 = vshll.u32 %v3133_v62, 23  ;;  %v3241_v16 = vadd.s32 %v3240_v11, %v3230_v51  ;;  %v3256_v18 = vsel %vm3255_vm2, 1, %v15336_v56 }
 0x308   :  { %v3252_v14 = vshrl.u32 %v3248_v46, 16  ;;  %v3258_v0 = vadd.s32 %v3256_v18, %v3250_v13  ;;  %vm3259_vm15 = vc.u32 %v3257_v61, %v3253_v33  ;;  %v10296_v39 = vadd.s32 4294967169, %v3330_v28 }
 0x309   :  { %v3135_v20 = vor.u32 4788187, %v3134_v31  ;;  %v3138_v25 = vcvt.s32.f32 %v3131_v36  ;;  %v3142_v19 = vsub.s32 4, %v13086_v15  ;;  %v3260_v63 = vsel %vm3259_vm15, 1, %v15336_v56  ;;  %v15439_v36 = vld [vmem:[#allocation33_spill] sm:$0xff] }
 0x30a   :  { %v3254_v12 = vshrl.u32 %v3249_v41, 16  ;;  %v3262_v57 = vadd.s32 %v3260_v63, %v3258_v0  ;;  %v3336_v29 = vadd.s32 1, %v10296_v39  ;;  %v13147_v9 = vadd.s32 %v3241_v16, %v3232_v6 }
 0x30b   :  { %v3136_v23 = vand.u32 2147483647, %v3135_v20  ;;  %v13149_v35 = vadd.s32 %v3257_v61, %v3253_v33  ;;  %vm3020_vm3 = vcmp.lt.s32.totalorder %v15422_v1, 0  ;;  %v3211_v13 = vsel %vm3205_vm10, %v3208_v32, %v3210_v24 }
 0x30c   :  { %v3263_v11 = vadd.s32 %v3262_v57, %v3252_v14  ;;  %vm3337_vm13 = vcmp.gt.s32.totalorder %v3336_v29, 0  ;;  %v3143_v17 = vsel %vm3020_vm3, %v3142_v19, %v13086_v15  ;;  %v3333_v41 = vand.u32 8388607, %v15189_v3 }
 0x30d   :  { %v3139_v46 = vmul.f32 %v3138_v25, %v3136_v23  ;;  %v3338_v55 = vsel %vm3337_vm13, %v3336_v29, 0  ;;  %v15437_v33 = vand.u32 2147483647, %v15422_v1  ;;  %v3265_v26 = vmul.u32 %v13084_v47, %v3211_v13 }
 0x30e   :  { %v3264_v51 = vadd.s32 %v3263_v11, %v3254_v12  ;;  %v3340_v54 = vand.u32 31, %v3338_v55  ;;  %vm3267_vm10 = vc.u32 %v13147_v9, %v13149_v35  ;;  %v3334_v28 = vor.u32 8388608, %v3333_v41 }
 0x30f   :  { %vm3019_vm5 = vcmp.le.f32.partialorder %v15437_v33, 0.7853982  ;;  %v3140_v62 = vxor.u32 2147483648, %v3139_v46  ;;  %v13175_v18 = vshrl.u32 %v3338_v55, 5  ;;  %v3483_v55 = vand.u32 2139095040, %v15439_v36 }
 0x310   :  { %v13164_v32 = vsel %vm3019_vm5, 0, %v3143_v17  ;;  %v3268_v24 = vadd.s32 1, %v3264_v51  ;;  %v3341_v6 = vsub.s32 32, %v3340_v54  ;;  %v3346_v14 = vshll.u32 %v15330_v44, %v3340_v54 }
 0x311   :  { %15438 = vst [vmem:[#allocation83_spill] sm:$0xff] %v13164_v32  ;;  %v3141_v15 = vsel %vm3020_vm3, %v3140_v62, %v3139_v46  ;;  %v13169_v61 = vand.u32 3, %v13164_v32  ;;  %v3349_v20 = vshll.u32 %v15331_v59, %v3340_v54  ;;  %v3352_v25 = vshll.u32 %v15332_v53, %v3340_v54 }
 0x312   :  { %v13173_v16 = vsel %vm3019_vm5, %v15422_v1, %v3141_v15  ;;  %v3269_v47 = vsel %vm3267_vm10, %v3268_v24, %v3264_v51  ;;  %v3347_v19 = vshrl.u32 %v15331_v59, %v3341_v6  ;;  %v3350_v63 = vshrl.u32 %v15332_v53, %v3341_v6 }
 0x313   :  { %v3146_v0 = vmul.f32 %v13173_v16, %v13173_v16  ;;  %v3270_v39 = vadd.s32 %v3269_v47, %v3265_v26  ;;  %v3353_v12 = vshrl.u32 %v15333_v49, %v3341_v6  ;;  %v3355_v57 = vshll.u32 %v15333_v49, %v3340_v54 }
 0x314   :  { %v13186_v11 = vshll.u32 %v3334_v28, 8  ;;  %v3343_v46 = vshll.u32 %v15335_v2, %v3340_v54  ;;  %v3344_v17 = vshrl.u32 %v15330_v44, %v3341_v6  ;;  %v3356_v41 = vshrl.u32 %v15334_v60, %v3341_v6 }
 0x315   :  { %v3147_v29 = vmul.f32 -0.001358992, %v3146_v0  ;;  %v3154_v23 = vmul.f32 -0.00019511016, %v3146_v0  ;;  %v3271_v13 = vadd.s32 536870912, %v3270_v39  ;;  %v3354_v26 = vor.u32 %v3353_v12, %v3352_v25 }
 0x316   :  { %vm3167_vm6 = vcmp.eq.s32.totalorder %v13169_v61, 2  ;;  %v13195_v24 = vor.u32 %v3347_v19, %v3346_v14  ;;  %v3351_v15 = vor.u32 %v3350_v63, %v3349_v20  ;;  %v3357_v28 = vor.u32 %v3356_v41, %v3355_v57 }
 0x317   :  { %v3148_v51 = vadd.f32 0.041655596, %v3147_v29  ;;  %v3155_v33 = vadd.f32 0.008332121, %v3154_v23  ;;  %v13192_v62 = vshrl.u32 %v3271_v13, 30  ;;  %vm3361_vm12 = vcmp.lt.s32.totalorder %v13175_v18, 4 }
 0x318   :  { %vm3358_vm2 = vcmp.lt.s32.totalorder %v13175_v18, 1  ;;  %vm3164_vm15 = vcmp.eq.s32.totalorder %v13169_v61, 0  ;;  %v3345_v29 = vor.u32 %v3344_v17, %v3343_v46  ;;  %vm3360_vm3 = vcmp.lt.s32.totalorder %v13175_v18, 3 }
 0x319   :  { %v3149_v54 = vmul.f32 %v3148_v51, %v3146_v0  ;;  %v3156_v47 = vmul.f32 %v3155_v33, %v3146_v0  ;;  %v3273_v3 = vshll.u32 %v13192_v62, 30  ;;  %v13203_v25 = vand.u32 65535, %v13186_v11 }
 0x31a   :  { %v3484_v14 = vshrl.u32 %v3483_v55, 23  ;;  %vm3163_vm13 = vcmp.lt.s32.totalorder %v13169_v61, 2  ;;  %v3367_v12 = vsel %vm3361_vm12, %v3354_v26, 920167782  ;;  %vm15200_vm5 = vweird.f32 %v15422_v1 }
 0x31b   :  { %v3150_v19 = vadd.f32 -0.4999988, %v3149_v54  ;;  %v3157_v20 = vadd.f32 -0.16666654, %v3156_v47  ;;  %v3274_v63 = vsub.s32 %v3270_v39, %v3273_v3  ;;  %v3342_v57 = vshrl.u32 %v15335_v2, %v3341_v6 }
 0x31c   :  { %vm3359_vm10 = vcmp.lt.s32.totalorder %v13175_v18, 2  ;;  %v3370_v23 = vsel %vm3358_vm2, %v13195_v24, %v3351_v15  ;;  %v3371_v13 = vsel %vm3361_vm12, %v3357_v28, 1326507024  ;;  %v3366_v39 = vsel %vm3358_vm2, %v3345_v29, %v13195_v24 }
 0x31d   :  { %v3151_v46 = vmul.f32 %v3150_v19, %v3146_v0  ;;  %v3158_v17 = vmul.f32 %v3157_v20, %v3146_v0  ;;  %vm3275_vm0 = vcmp.lt.s32.totalorder %v3274_v63, 0  ;;  %v3276_v3 = vsub.s32 0, %v3274_v63 }
 0x31e   :  { %v3368_v6 = vsel %vm3360_vm3, %v3351_v15, %v3367_v12  ;;  %v3372_v41 = vsel %vm3360_vm3, %v3354_v26, %v3371_v13  ;;  %v3376_v55 = vshrl.u32 %v13186_v11, 16  ;;  %v3266_v54 = vadd.s32 %v13149_v35, %v13147_v9 }
 0x31f   :  { %v13224_v51 = vadd.f32 1.0, %v3151_v46  ;;  %v3159_v33 = vadd.f32 1.0, %v3158_v17  ;;  %v3277_v28 = vsel %vm3275_vm0, %v3276_v3, %v3274_v63  ;;  %v3373_v0 = vsel %vm3359_vm10, %v3370_v23, %v3372_v41 }
 0x320   :  { %v3278_v47 = vclz %v3277_v28  ;;  %v3377_v19 = vand.u32 65535, %v3373_v0  ;;  %v3378_v20 = vshrl.u32 %v3373_v0, 16  ;;  %v3362_v13 = vsel %vm3358_vm2, %v3342_v57, %v3345_v29 }
 0x321   :  { %15440 = vst [vmem:[#allocation84_spill] sm:$0xff] %v13224_v51  ;;  %v13231_v12 = vmul.f32 %v3159_v33, %v13173_v16  ;;  %v15191_v26 = vxor.u32 2147483648, %v13224_v51  ;;  %v10299_v46 = vadd.s32 4294967169, %v3484_v14  ;;  %v3369_v23 = vsel %vm3359_vm10, %v3366_v39, %v3368_v6 }
 0x322   :  { %v10294_v17 = vadd.s32 4294967294, %v3278_v47  ;;  %v3380_v9 = vmul.u32 %v3378_v20, %v13203_v25  ;;  %v3363_v29 = vsel %vm3361_vm12, %v3351_v15, 2102212464  ;;  %v3381_v14 = vmul.u32 %v3377_v19, %v3376_v55 }
 0x323   :  { %15441 = vst [vmem:[#allocation85_spill] sm:$0xff] %v13231_v12  ;;  %v15196_v35 = vxor.u32 2147483648, %v13231_v12  ;;  %v3169_v16 = vsel %vm3167_vm6, %v15191_v26, %v13231_v12  ;;  %v3379_v57 = vmul.u32 %v3377_v19, %v13203_v25  ;;  %v3399_v33 = vand.u32 65535, %v3369_v23 }
 0x324   :  { %vm10295_vm0 = vcmp.lt.s32.totalorder %v10294_v17, 0  ;;  %v3383_v41 = vshll.u32 %v3380_v9, 16  ;;  %v3382_v28 = vmul.u32 %v3378_v20, %v3376_v55  ;;  %v3400_v0 = vshrl.u32 %v3369_v23, 16 }
 0x325   :  { %v3166_v39 = vsel %vm3164_vm15, %v13224_v51, %v15196_v35  ;;  %v3281_v6 = vsel %vm10295_vm0, 0, %v10294_v17  ;;  %v3364_v31 = vsel %vm3360_vm3, %v13195_v24, %v3363_v29  ;;  %v3385_v12 = vshll.u32 %v3381_v14, 16 }
 0x326   :  { %v3170_v47 = vsel %vm3163_vm13, %v3166_v39, %v3169_v16  ;;  %v3282_v26 = vsub.s32 32, %v3281_v6  ;;  %v3283_v15 = vshll.u32 %v3274_v63, %v3281_v6  ;;  %v3286_v3 = vsub.s32 4294967266, %v3281_v6 }
 0x327   :  { %v3171_v19 = vsel %vm15200_vm5, nan, %v3170_v47  ;;  %v3490_v32 = vadd.s32 1, %v10299_v46  ;;  %vm3387_vm6 = vc.u32 %v3379_v57, %v3383_v41  ;;  %v3401_v20 = vmul.u32 %v3399_v33, %v13203_v25 }
 0x328   :  { %v3284_v30 = vshrl.u32 %v3266_v54, %v3282_v26  ;;  %v3287_v35 = vadd.s32 127, %v3286_v3  ;;  %5192 = vst [vmem:[#allocation7 + $0x90] sm:$0xff] %v3171_v19  ;;  %v3388_v61 = vsel %vm3387_vm6, 1, %v15336_v56  ;;  %v3389_v17 = vadd.s32 %v3383_v41, %v3379_v57 }
 0x329   :  { %v3402_v63 = vmul.u32 %v3400_v0, %v13203_v25  ;;  %v3403_v23 = vmul.u32 %v3399_v33, %v3376_v55  ;;  %v3384_v6 = vshrl.u32 %v3380_v9, 16  ;;  %v3390_v47 = vadd.s32 %v3388_v61, %v3382_v28 }
 0x32a   :  { %v3285_v16 = vor.u32 %v3284_v30, %v3283_v15  ;;  %v3288_v39 = vshll.u32 %v3287_v35, 23  ;;  %vm3391_vm12 = vc.u32 %v3389_v17, %v3385_v12  ;;  %v3404_v24 = vmul.u32 %v3400_v0, %v3376_v55 }
 0x32b   :  { %v3405_v29 = vshll.u32 %v3402_v63, 16  ;;  %v3407_v46 = vshll.u32 %v3403_v23, 16  ;;  %v3386_v3 = vshrl.u32 %v3381_v14, 16  ;;  %v3392_v1 = vsel %vm3391_vm12, 1, %v15336_v56 }
 0x32c   :  { %v3289_v54 = vor.u32 4788187, %v3288_v39  ;;  %v3292_v26 = vcvt.s32.f32 %v3285_v16  ;;  %v3394_v19 = vadd.s32 %v3392_v1, %v3390_v47  ;;  %vm3491_vm15 = vcmp.gt.s32.totalorder %v3490_v32, 0 }
 0x32d   :  { %vm3409_vm2 = vc.u32 %v3401_v20, %v3405_v29  ;;  %v3411_v51 = vadd.s32 %v3405_v29, %v3401_v20  ;;  %v3365_v30 = vsel %vm3359_vm10, %v3362_v13, %v3364_v31  ;;  %v3492_v9 = vsel %vm3491_vm15, %v3490_v32, 0 }
 0x32e   :  { %v3290_v57 = vand.u32 2147483647, %v3289_v54  ;;  %v3410_v25 = vsel %vm3409_vm2, 1, %v15336_v56  ;;  %v3395_v12 = vadd.s32 %v3394_v19, %v3384_v6  ;;  %v3406_v55 = vshrl.u32 %v3402_v63, 16 }
 0x32f   :  { %v3412_v35 = vadd.s32 %v3410_v25, %v3404_v24  ;;  %vm3413_vm3 = vc.u32 %v3411_v51, %v3407_v46  ;;  %v13269_v33 = vadd.s32 %v3411_v51, %v3407_v46  ;;  %v3494_v1 = vand.u32 31, %v3492_v9 }
 0x330   :  { %v3293_v41 = vmul.f32 %v3292_v26, %v3290_v57  ;;  %v3414_v14 = vsel %vm3413_vm3, 1, %v15336_v56  ;;  %vm3174_vm13 = vcmp.lt.s32.totalorder %v15425_v38, 0  ;;  %v13272_v28 = vadd.s32 %v3395_v12, %v3386_v3 }
 0x331   :  { %v3408_v0 = vshrl.u32 %v3403_v23, 16  ;;  %v3416_v18 = vadd.s32 %v3414_v14, %v3412_v35  ;;  %v15442_v31 = vand.u32 2147483647, %v15425_v38  ;;  %v15445_v15 = vand.u32 2147483647, %v15439_v36 }
 0x332   :  { %v3294_v13 = vxor.u32 2147483648, %v3293_v41  ;;  %v13282_v61 = vsub.s32 32, %v3494_v1  ;;  %v15446_v51 = vsub.s32 4, %v13192_v62  ;;  %v3419_v23 = vmul.u32 %v13186_v11, %v3365_v30 }
 0x333   :  { %vm13276_vm10 = vcmp.le.f32.partialorder %v15442_v31, 0.7853982  ;;  %v3487_v20 = vand.u32 8388607, %v15445_v15  ;;  %v3417_v63 = vadd.s32 %v3416_v18, %v3406_v55  ;;  %v13288_v16 = vshrl.u32 %v3492_v9, 5 }
 0x334   :  { %v3297_v17 = vsel %vm3174_vm13, %v15446_v51, %v13192_v62  ;;  %v3295_v39 = vsel %vm3174_vm13, %v3294_v13, %v3293_v41  ;;  %vm3421_vm0 = vc.u32 %v13272_v28, %v13269_v33  ;;  %v3497_v6 = vshll.u32 %v15335_v2, %v3494_v1 }
 0x335   :  { %v3500_v47 = vshll.u32 %v15330_v44, %v3494_v1  ;;  %v3298_v24 = vsel %vm13276_vm10, %v15425_v38, %v3295_v39  ;;  %v3418_v29 = vadd.s32 %v3417_v63, %v3408_v0  ;;  %v3501_v62 = vshrl.u32 %v15331_v59, %v13282_v61 }
 0x336   :  { %v3506_v11 = vshll.u32 %v15332_v53, %v3494_v1  ;;  %v3300_v46 = vmul.f32 %v3298_v24, %v3298_v24  ;;  %v3503_v54 = vshll.u32 %v15331_v59, %v3494_v1  ;;  %v3504_v26 = vshrl.u32 %v15332_v53, %v13282_v61 }
 0x337   :  { %v3507_v3 = vshrl.u32 %v15333_v49, %v13282_v61  ;;  %v3422_v19 = vadd.s32 1, %v3418_v29  ;;  %v3498_v57 = vshrl.u32 %v15330_v44, %v13282_v61  ;;  %v3509_v30 = vshll.u32 %v15333_v49, %v3494_v1 }
 0x338   :  { %v3510_v25 = vshrl.u32 %v15334_v60, %v13282_v61  ;;  %v13312_v9 = vsel %vm13276_vm10, 0, %v3297_v17  ;;  %v3301_v12 = vmul.f32 -0.001358992, %v3300_v46  ;;  %v3308_v55 = vmul.f32 -0.00019511016, %v3300_v46 }
 0x339   :  { %15447 = vst [vmem:[#allocation86_spill] sm:$0xff] %v13312_v9  ;;  %v3488_v35 = vor.u32 8388608, %v3487_v20  ;;  %v3423_v41 = vsel %vm3421_vm0, %v3422_v19, %v3418_v29  ;;  %v13317_v14 = vor.u32 %v3501_v62, %v3500_v47  ;;  %v3508_v0 = vor.u32 %v3507_v3, %v3506_v11 }
 0x33a   :  { %v3511_v18 = vor.u32 %v3510_v25, %v3509_v30  ;;  %v3302_v31 = vadd.f32 0.041655596, %v3301_v12  ;;  %v3309_v1 = vadd.f32 0.008332121, %v3308_v55  ;;  %v3424_v13 = vadd.s32 %v3423_v41, %v3419_v23 }
 0x33b   :  { %v13319_v15 = vor.u32 %v3504_v26, %v3503_v54  ;;  %v3316_v32 = vand.u32 3, %v13312_v9  ;;  %v3499_v51 = vor.u32 %v3498_v57, %v3497_v6  ;;  %vm3512_vm6 = vcmp.lt.s32.totalorder %v13288_v16, 1 }
 0x33c   :  { %vm3515_vm12 = vcmp.lt.s32.totalorder %v13288_v16, 4  ;;  %v3303_v20 = vmul.f32 %v3302_v31, %v3300_v46  ;;  %v3310_v17 = vmul.f32 %v3309_v1, %v3300_v46  ;;  %v3425_v63 = vadd.s32 536870912, %v3424_v13 }
 0x33d   :  { %vm3514_vm2 = vcmp.lt.s32.totalorder %v13288_v16, 3  ;;  %vm3513_vm15 = vcmp.lt.s32.totalorder %v13288_v16, 2  ;;  %v3521_v39 = vsel %vm3515_vm12, %v3508_v0, 920167782  ;;  %v3525_v23 = vsel %vm3515_vm12, %v3511_v18, 1326507024 }
 0x33e   :  { %v13330_v47 = vshll.u32 %v3488_v35, 8  ;;  %v3304_v6 = vadd.f32 -0.4999988, %v3303_v20  ;;  %v3311_v29 = vadd.f32 -0.16666654, %v3310_v17  ;;  %v13332_v62 = vshrl.u32 %v3425_v63, 30 }
 0x33f   :  { %v3524_v11 = vsel %vm3512_vm6, %v13317_v14, %v13319_v15  ;;  %vm3317_vm3 = vcmp.lt.s32.totalorder %v3316_v32, 2  ;;  %v3520_v54 = vsel %vm3512_vm6, %v3499_v51, %v13317_v14  ;;  %v3526_v26 = vsel %vm3514_vm2, %v3508_v0, %v3525_v23 }
 0x340   :  { %v3305_v3 = vmul.f32 %v3304_v6, %v3300_v46  ;;  %v3312_v19 = vmul.f32 %v3311_v29, %v3300_v46  ;;  %v3427_v57 = vshll.u32 %v13332_v62, 30  ;;  %v3522_v30 = vsel %vm3514_vm2, %v13319_v15, %v3521_v39 }
 0x341   :  { %vm3318_vm13 = vcmp.eq.s32.totalorder %v3316_v32, 0  ;;  %v3527_v25 = vsel %vm3513_vm15, %v3524_v11, %v3526_v26  ;;  %v3529_v12 = vand.u32 65535, %v13330_v47  ;;  %v3530_v55 = vshrl.u32 %v13330_v47, 16 }
 0x342   :  { %v13351_v35 = vadd.f32 1.0, %v3305_v3  ;;  %v3313_v41 = vadd.f32 1.0, %v3312_v19  ;;  %vm3321_vm10 = vcmp.eq.s32.totalorder %v3316_v32, 2  ;;  %v3428_v0 = vsub.s32 %v3424_v13, %v3427_v57  ;;  %v15450_v32 = vld [vmem:[#allocation34_spill] sm:$0xff] }
 0x343   :  { %v3496_v46 = vshrl.u32 %v15335_v2, %v13282_v61  ;;  %v3523_v18 = vsel %vm3513_vm15, %v3520_v54, %v3522_v30  ;;  %v3531_v31 = vand.u32 65535, %v3527_v25  ;;  %v3532_v1 = vshrl.u32 %v3527_v25, 16 }
 0x344   :  { %15448 = vst [vmem:[#allocation87_spill] sm:$0xff] %v13351_v35  ;;  %v13357_v20 = vmul.f32 %v3313_v41, %v3298_v24  ;;  %v15201_v17 = vxor.u32 2147483648, %v13351_v35  ;;  %vm3429_vm0 = vcmp.lt.s32.totalorder %v3428_v0, 0  ;;  %v3430_v63 = vsub.s32 0, %v3428_v0 }
 0x345   :  { %v3533_v39 = vmul.u32 %v3531_v31, %v3529_v12  ;;  %v3534_v23 = vmul.u32 %v3532_v1, %v3529_v12  ;;  %v13360_v6 = vmul.u32 %v3531_v31, %v3530_v55  ;;  %v3553_v29 = vand.u32 65535, %v3523_v18 }
 0x346   :  { %15449 = vst [vmem:[#allocation88_spill] sm:$0xff] %v13357_v20  ;;  %v15202_v13 = vxor.u32 2147483648, %v13357_v20  ;;  %v3323_v61 = vsel %vm3321_vm10, %v15201_v17, %v13357_v20  ;;  %v3431_v11 = vsel %vm3429_vm0, %v3430_v63, %v3428_v0  ;;  %v3554_v54 = vshrl.u32 %v3523_v18, 16 }
 0x347   :  { %vm15209_vm5 = vweird.f32 %v15425_v38  ;;  %v3432_v24 = vclz %v3431_v11  ;;  %v3536_v26 = vmul.u32 %v3532_v1, %v3530_v55  ;;  %v3537_v3 = vshll.u32 %v3534_v23, 16 }
 0x348   :  { %v3320_v19 = vsel %vm3318_vm13, %v13351_v35, %v15202_v13  ;;  %v3420_v57 = vadd.s32 %v13269_v33, %v13272_v28  ;;  %v3539_v30 = vshll.u32 %v13360_v6, 16  ;;  %v3556_v25 = vmul.u32 %v3554_v54, %v3529_v12 }
 0x349   :  { %v3324_v41 = vsel %vm3317_vm3, %v3320_v19, %v3323_v61  ;;  %v10297_v31 = vadd.s32 4294967294, %v3432_v24  ;;  %vm3541_vm10 = vc.u32 %v3533_v39, %v3537_v3  ;;  %v3543_v18 = vadd.s32 %v3537_v3, %v3533_v39 }
 0x34a   :  { %v3325_v1 = vsel %vm15209_vm5, nan, %v3324_v41  ;;  %v3516_v63 = vsel %vm3512_vm6, %v3496_v46, %v3499_v51  ;;  %v3542_v11 = vsel %vm3541_vm10, 1, %v15336_v56  ;;  %v3557_v17 = vmul.u32 %v3553_v29, %v3530_v55 }
 0x34b   :  { %vm10298_vm13 = vcmp.lt.s32.totalorder %v10297_v31, 0  ;;  %v3517_v33 = vsel %vm3515_vm12, %v13319_v15, 2102212464  ;;  %v3544_v28 = vadd.s32 %v3542_v11, %v3536_v26  ;;  %v3637_v61 = vand.u32 2139095040, %v15450_v32  ;;  %5193 = vst [vmem:[#allocation7 + $0x98] sm:$0xff] %v3325_v1 }
 0x34c   :  { %v3435_v24 = vsel %vm10298_vm13, 0, %v10297_v31  ;;  %vm3545_vm3 = vc.u32 %v3543_v18, %v3539_v30  ;;  %v3555_v39 = vmul.u32 %v3553_v29, %v3529_v12  ;;  %v3559_v3 = vshll.u32 %v3556_v25, 16 }
 0x34d   :  { %v3436_v19 = vsub.s32 32, %v3435_v24  ;;  %v3437_v41 = vshll.u32 %v3428_v0, %v3435_v24  ;;  %v3440_v13 = vsub.s32 4294967266, %v3435_v24  ;;  %v3538_v51 = vshrl.u32 %v3534_v23, 16 }
 0x34e   :  { %v3518_v46 = vsel %vm3514_vm2, %v13317_v14, %v3517_v33  ;;  %v3546_v38 = vsel %vm3545_vm3, 1, %v15336_v56  ;;  %v3558_v35 = vmul.u32 %v3554_v54, %v3530_v55  ;;  %v3561_v15 = vshll.u32 %v3557_v17, 16 }
 0x34f   :  { %v3438_v26 = vshrl.u32 %v3420_v57, %v3436_v19  ;;  %v3441_v11 = vadd.s32 127, %v3440_v13  ;;  %v3548_v20 = vadd.s32 %v3546_v38, %v3544_v28  ;;  %v15208_v31 = vand.u32 2147483647, %v15450_v32 }
 0x350   :  { %v3540_v12 = vshrl.u32 %v13360_v6, 16  ;;  %vm3563_vm6 = vc.u32 %v3555_v39, %v3559_v3  ;;  %v3565_v29 = vadd.s32 %v3559_v3, %v3555_v39  ;;  %v3638_v0 = vshrl.u32 %v3637_v61, 23 }
 0x351   :  { %v3439_v30 = vor.u32 %v3438_v26, %v3437_v41  ;;  %v3442_v23 = vshll.u32 %v3441_v11, 23  ;;  %v3549_v18 = vadd.s32 %v3548_v20, %v3538_v51  ;;  %v3564_v1 = vsel %vm3563_vm6, 1, %v15336_v56 }
 0x352   :  { %v3560_v14 = vshrl.u32 %v3556_v25, 16  ;;  %v3566_v33 = vadd.s32 %v3564_v1, %v3558_v35  ;;  %vm3567_vm12 = vc.u32 %v3565_v29, %v3561_v15  ;;  %v10302_v55 = vadd.s32 4294967169, %v3638_v0 }
 0x353   :  { %v3443_v54 = vor.u32 4788187, %v3442_v23  ;;  %v3446_v57 = vcvt.s32.f32 %v3439_v30  ;;  %v3450_v38 = vsub.s32 4, %v13332_v62  ;;  %v3568_v13 = vsel %vm3567_vm12, 1, %v15336_v56  ;;  %v15453_v30 = vld [vmem:[#allocation35_spill] sm:$0xff] }
 0x354   :  { %v3562_v28 = vshrl.u32 %v3557_v17, 16  ;;  %v3570_v6 = vadd.s32 %v3568_v13, %v3566_v33  ;;  %v3644_v24 = vadd.s32 1, %v10302_v55  ;;  %v13393_v61 = vadd.s32 %v3549_v18, %v3540_v12 }
 0x355   :  { %v3444_v39 = vand.u32 2147483647, %v3443_v54  ;;  %v13395_v3 = vadd.s32 %v3565_v29, %v3561_v15  ;;  %vm3328_vm2 = vcmp.lt.s32.totalorder %v15436_v52, 0  ;;  %v3519_v35 = vsel %vm3513_vm15, %v3516_v63, %v3518_v46 }
 0x356   :  { %v3571_v20 = vadd.s32 %v3570_v6, %v3560_v14  ;;  %vm3645_vm0 = vcmp.gt.s32.totalorder %v3644_v24, 0  ;;  %v3451_v19 = vsel %vm3328_vm2, %v3450_v38, %v13332_v62  ;;  %v3641_v17 = vand.u32 8388607, %v15208_v31 }
 0x357   :  { %v3447_v25 = vmul.f32 %v3446_v57, %v3444_v39  ;;  %v3646_v41 = vsel %vm3645_vm0, %v3644_v24, 0  ;;  %v15451_v15 = vand.u32 2147483647, %v15436_v52  ;;  %v3573_v16 = vmul.u32 %v13330_v47, %v3519_v35 }
 0x358   :  { %v3572_v51 = vadd.s32 %v3571_v20, %v3562_v28  ;;  %v3648_v26 = vand.u32 31, %v3646_v41  ;;  %vm3575_vm15 = vc.u32 %v13393_v61, %v13395_v3  ;;  %v3642_v0 = vor.u32 8388608, %v3641_v17 }
 0x359   :  { %vm3327_vm10 = vcmp.le.f32.partialorder %v15451_v15, 0.7853982  ;;  %v3448_v11 = vxor.u32 2147483648, %v3447_v25  ;;  %v13421_v1 = vshrl.u32 %v3646_v41, 5  ;;  %v3791_v41 = vand.u32 2139095040, %v15453_v30 }
 0x35a   :  { %v13410_v63 = vsel %vm3327_vm10, 0, %v3451_v19  ;;  %v3576_v46 = vadd.s32 1, %v3572_v51  ;;  %v3649_v12 = vsub.s32 32, %v3648_v26  ;;  %v3654_v14 = vshll.u32 %v15330_v44, %v3648_v26 }
 0x35b   :  { %15452 = vst [vmem:[#allocation89_spill] sm:$0xff] %v13410_v63  ;;  %v3449_v62 = vsel %vm3328_vm2, %v3448_v11, %v3447_v25  ;;  %v13415_v29 = vand.u32 3, %v13410_v63  ;;  %v3657_v54 = vshll.u32 %v15331_v59, %v3648_v26  ;;  %v3660_v57 = vshll.u32 %v15332_v53, %v3648_v26 }
 0x35c   :  { %v13419_v18 = vsel %vm3327_vm10, %v15436_v52, %v3449_v62  ;;  %v3577_v47 = vsel %vm3575_vm15, %v3576_v46, %v3572_v51  ;;  %v3655_v38 = vshrl.u32 %v15331_v59, %v3649_v12  ;;  %v3658_v13 = vshrl.u32 %v15332_v53, %v3649_v12 }
 0x35d   :  { %v3454_v33 = vmul.f32 %v13419_v18, %v13419_v18  ;;  %v3578_v55 = vadd.s32 %v3577_v47, %v3573_v16  ;;  %v3661_v28 = vshrl.u32 %v15333_v49, %v3649_v12  ;;  %v3663_v6 = vshll.u32 %v15333_v49, %v3648_v26 }
 0x35e   :  { %v13432_v20 = vshll.u32 %v3642_v0, 8  ;;  %v3651_v25 = vshll.u32 %v15335_v2, %v3648_v26  ;;  %v3652_v19 = vshrl.u32 %v15330_v44, %v3649_v12  ;;  %v3664_v17 = vshrl.u32 %v15334_v60, %v3649_v12 }
 0x35f   :  { %v3455_v24 = vmul.f32 -0.001358992, %v3454_v33  ;;  %v3462_v39 = vmul.f32 -0.00019511016, %v3454_v33  ;;  %v3579_v35 = vadd.s32 536870912, %v3578_v55  ;;  %v3662_v16 = vor.u32 %v3661_v28, %v3660_v57 }
 0x360   :  { %vm3475_vm13 = vcmp.eq.s32.totalorder %v13415_v29, 2  ;;  %v13441_v46 = vor.u32 %v3655_v38, %v3654_v14  ;;  %v3659_v62 = vor.u32 %v3658_v13, %v3657_v54  ;;  %v3665_v0 = vor.u32 %v3664_v17, %v3663_v6 }
 0x361   :  { %v3456_v51 = vadd.f32 0.041655596, %v3455_v24  ;;  %v3463_v15 = vadd.f32 0.008332121, %v3462_v39  ;;  %v13438_v11 = vshrl.u32 %v3579_v35, 30  ;;  %vm3669_vm3 = vcmp.lt.s32.totalorder %v13421_v1, 4 }
 0x362   :  { %vm3666_vm6 = vcmp.lt.s32.totalorder %v13421_v1, 1  ;;  %vm3472_vm12 = vcmp.eq.s32.totalorder %v13415_v29, 0  ;;  %v3653_v24 = vor.u32 %v3652_v19, %v3651_v25  ;;  %vm3668_vm2 = vcmp.lt.s32.totalorder %v13421_v1, 3 }
 0x363   :  { %v3457_v26 = vmul.f32 %v3456_v51, %v3454_v33  ;;  %v3464_v47 = vmul.f32 %v3463_v15, %v3454_v33  ;;  %v3581_v31 = vshll.u32 %v13438_v11, 30  ;;  %v13449_v57 = vand.u32 65535, %v13432_v20 }
 0x364   :  { %v3792_v14 = vshrl.u32 %v3791_v41, 23  ;;  %vm3471_vm0 = vcmp.lt.s32.totalorder %v13415_v29, 2  ;;  %v3675_v28 = vsel %vm3669_vm3, %v3662_v16, 920167782  ;;  %vm15219_vm10 = vweird.f32 %v15436_v52 }
 0x365   :  { %v3458_v38 = vadd.f32 -0.4999988, %v3457_v26  ;;  %v3465_v54 = vadd.f32 -0.16666654, %v3464_v47  ;;  %v3582_v13 = vsub.s32 %v3578_v55, %v3581_v31  ;;  %v3650_v6 = vshrl.u32 %v15335_v2, %v3649_v12 }
 0x366   :  { %vm3667_vm15 = vcmp.lt.s32.totalorder %v13421_v1, 2  ;;  %v3678_v39 = vsel %vm3666_vm6, %v13441_v46, %v3659_v62  ;;  %v3679_v35 = vsel %vm3669_vm3, %v3665_v0, 1326507024  ;;  %v3674_v55 = vsel %vm3666_vm6, %v3653_v24, %v13441_v46 }
 0x367   :  { %v3459_v25 = vmul.f32 %v3458_v38, %v3454_v33  ;;  %v3466_v19 = vmul.f32 %v3465_v54, %v3454_v33  ;;  %vm3583_vm5 = vcmp.lt.s32.totalorder %v3582_v13, 0  ;;  %v3584_v31 = vsub.s32 0, %v3582_v13 }
 0x368   :  { %v3676_v12 = vsel %vm3668_vm2, %v3659_v62, %v3675_v28  ;;  %v3680_v17 = vsel %vm3668_vm2, %v3662_v16, %v3679_v35  ;;  %v3684_v41 = vshrl.u32 %v13432_v20, 16  ;;  %v3574_v26 = vadd.s32 %v13395_v3, %v13393_v61 }
 0x369   :  { %v13470_v51 = vadd.f32 1.0, %v3459_v25  ;;  %v3467_v15 = vadd.f32 1.0, %v3466_v19  ;;  %v3585_v0 = vsel %vm3583_vm5, %v3584_v31, %v3582_v13  ;;  %v3681_v33 = vsel %vm3667_vm15, %v3678_v39, %v3680_v17 }
 0x36a   :  { %v3586_v47 = vclz %v3585_v0  ;;  %v3685_v38 = vand.u32 65535, %v3681_v33  ;;  %v3686_v54 = vshrl.u32 %v3681_v33, 16  ;;  %v3670_v35 = vsel %vm3666_vm6, %v3650_v6, %v3653_v24 }
 0x36b   :  { %15454 = vst [vmem:[#allocation90_spill] sm:$0xff] %v13470_v51  ;;  %v13477_v28 = vmul.f32 %v3467_v15, %v13419_v18  ;;  %v15210_v16 = vxor.u32 2147483648, %v13470_v51  ;;  %v10305_v25 = vadd.s32 4294967169, %v3792_v14  ;;  %v3677_v39 = vsel %vm3667_vm15, %v3674_v55, %v3676_v12 }
 0x36c   :  { %v10300_v19 = vadd.s32 4294967294, %v3586_v47  ;;  %v3688_v61 = vmul.u32 %v3686_v54, %v13449_v57  ;;  %v3671_v24 = vsel %vm3669_vm3, %v3659_v62, 2102212464  ;;  %v3689_v14 = vmul.u32 %v3685_v38, %v3684_v41 }
 0x36d   :  { %15455 = vst [vmem:[#allocation91_spill] sm:$0xff] %v13477_v28  ;;  %v15215_v3 = vxor.u32 2147483648, %v13477_v28  ;;  %v3477_v18 = vsel %vm3475_vm13, %v15210_v16, %v13477_v28  ;;  %v3687_v6 = vmul.u32 %v3685_v38, %v13449_v57  ;;  %v3707_v15 = vand.u32 65535, %v3677_v39 }
 0x36e   :  { %vm10301_vm5 = vcmp.lt.s32.totalorder %v10300_v19, 0  ;;  %v3691_v17 = vshll.u32 %v3688_v61, 16  ;;  %v3690_v0 = vmul.u32 %v3686_v54, %v3684_v41  ;;  %v3708_v33 = vshrl.u32 %v3677_v39, 16 }
 0x36f   :  { %v3474_v55 = vsel %vm3472_vm12, %v13470_v51, %v15215_v3  ;;  %v3589_v12 = vsel %vm10301_vm5, 0, %v10300_v19  ;;  %v3672_v23 = vsel %vm3668_vm2, %v13441_v46, %v3671_v24  ;;  %v3693_v28 = vshll.u32 %v3689_v14, 16 }
 0x370   :  { %v3478_v47 = vsel %vm3471_vm0, %v3474_v55, %v3477_v18  ;;  %v3590_v16 = vsub.s32 32, %v3589_v12  ;;  %v3591_v62 = vshll.u32 %v3582_v13, %v3589_v12  ;;  %v3594_v31 = vsub.s32 4294967266, %v3589_v12 }
 0x371   :  { %v3479_v38 = vsel %vm15219_vm10, nan, %v3478_v47  ;;  %v3798_v63 = vadd.s32 1, %v10305_v25  ;;  %vm3695_vm13 = vc.u32 %v3687_v6, %v3691_v17  ;;  %v3709_v54 = vmul.u32 %v3707_v15, %v13449_v57 }
 0x372   :  { %v3592_v9 = vshrl.u32 %v3574_v26, %v3590_v16  ;;  %v3595_v3 = vadd.s32 127, %v3594_v31  ;;  %5194 = vst [vmem:[#allocation7 + $0xa0] sm:$0xff] %v3479_v38  ;;  %v3696_v29 = vsel %vm3695_vm13, 1, %v15336_v56  ;;  %v3697_v19 = vadd.s32 %v3691_v17, %v3687_v6 }
 0x373   :  { %v3710_v13 = vmul.u32 %v3708_v33, %v13449_v57  ;;  %v3711_v39 = vmul.u32 %v3707_v15, %v3684_v41  ;;  %v3692_v12 = vshrl.u32 %v3688_v61, 16  ;;  %v3698_v47 = vadd.s32 %v3696_v29, %v3690_v0 }
 0x374   :  { %v3593_v18 = vor.u32 %v3592_v9, %v3591_v62  ;;  %v3596_v55 = vshll.u32 %v3595_v3, 23  ;;  %vm3699_vm3 = vc.u32 %v3697_v19, %v3693_v28  ;;  %v3712_v46 = vmul.u32 %v3708_v33, %v3684_v41 }
 0x375   :  { %v3713_v24 = vshll.u32 %v3710_v13, 16  ;;  %v3715_v25 = vshll.u32 %v3711_v39, 16  ;;  %v3694_v31 = vshrl.u32 %v3689_v14, 16  ;;  %v3700_v52 = vsel %vm3699_vm3, 1, %v15336_v56 }
 0x376   :  { %v3597_v26 = vor.u32 4788187, %v3596_v55  ;;  %v3600_v16 = vcvt.s32.f32 %v3593_v18  ;;  %v3702_v38 = vadd.s32 %v3700_v52, %v3698_v47  ;;  %vm3799_vm12 = vcmp.gt.s32.totalorder %v3798_v63, 0 }
 0x377   :  { %vm3717_vm6 = vc.u32 %v3709_v54, %v3713_v24  ;;  %v3719_v51 = vadd.s32 %v3713_v24, %v3709_v54  ;;  %v3673_v9 = vsel %vm3667_vm15, %v3670_v35, %v3672_v23  ;;  %v3800_v61 = vsel %vm3799_vm12, %v3798_v63, 0 }
 0x378   :  { %v3598_v6 = vand.u32 2147483647, %v3597_v26  ;;  %v3718_v57 = vsel %vm3717_vm6, 1, %v15336_v56  ;;  %v3703_v28 = vadd.s32 %v3702_v38, %v3692_v12  ;;  %v3714_v41 = vshrl.u32 %v3710_v13, 16 }
 0x379   :  { %v3720_v3 = vadd.s32 %v3718_v57, %v3712_v46  ;;  %vm3721_vm2 = vc.u32 %v3719_v51, %v3715_v25  ;;  %v13515_v15 = vadd.s32 %v3719_v51, %v3715_v25  ;;  %v3802_v52 = vand.u32 31, %v3800_v61 }
 0x37a   :  { %v3601_v17 = vmul.f32 %v3600_v16, %v3598_v6  ;;  %v3722_v14 = vsel %vm3721_vm2, 1, %v15336_v56  ;;  %vm3482_vm0 = vcmp.lt.s32.totalorder %v15439_v36, 0  ;;  %v13518_v0 = vadd.s32 %v3703_v28, %v3694_v31 }
 0x37b   :  { %v3716_v33 = vshrl.u32 %v3711_v39, 16  ;;  %v3724_v1 = vadd.s32 %v3722_v14, %v3720_v3  ;;  %v15456_v23 = vand.u32 2147483647, %v15439_v36  ;;  %v15459_v62 = vand.u32 2147483647, %v15453_v30 }
 0x37c   :  { %v3602_v35 = vxor.u32 2147483648, %v3601_v17  ;;  %v13528_v29 = vsub.s32 32, %v3802_v52  ;;  %v15460_v51 = vsub.s32 4, %v13438_v11  ;;  %v3727_v39 = vmul.u32 %v13432_v20, %v3673_v9 }
 0x37d   :  { %vm13522_vm15 = vcmp.le.f32.partialorder %v15456_v23, 0.7853982  ;;  %v3795_v54 = vand.u32 8388607, %v15459_v62  ;;  %v3725_v13 = vadd.s32 %v3724_v1, %v3714_v41  ;;  %v13534_v18 = vshrl.u32 %v3800_v61, 5 }
 0x37e   :  { %v3605_v19 = vsel %vm3482_vm0, %v15460_v51, %v13438_v11  ;;  %v3603_v55 = vsel %vm3482_vm0, %v3602_v35, %v3601_v17  ;;  %vm3729_vm5 = vc.u32 %v13518_v0, %v13515_v15  ;;  %v3805_v12 = vshll.u32 %v15335_v2, %v3802_v52 }
 0x37f   :  { %v3808_v47 = vshll.u32 %v15330_v44, %v3802_v52  ;;  %v3606_v46 = vsel %vm13522_vm15, %v15439_v36, %v3603_v55  ;;  %v3726_v24 = vadd.s32 %v3725_v13, %v3716_v33  ;;  %v3809_v11 = vshrl.u32 %v15331_v59, %v13528_v29 }
 0x380   :  { %v3814_v20 = vshll.u32 %v15332_v53, %v3802_v52  ;;  %v3608_v25 = vmul.f32 %v3606_v46, %v3606_v46  ;;  %v3811_v26 = vshll.u32 %v15331_v59, %v3802_v52  ;;  %v3812_v16 = vshrl.u32 %v15332_v53, %v13528_v29 }
 0x381   :  { %v3815_v31 = vshrl.u32 %v15333_v49, %v13528_v29  ;;  %v3730_v38 = vadd.s32 1, %v3726_v24  ;;  %v3806_v6 = vshrl.u32 %v15330_v44, %v13528_v29  ;;  %v3817_v9 = vshll.u32 %v15333_v49, %v3802_v52 }
 0x382   :  { %v3818_v57 = vshrl.u32 %v15334_v60, %v13528_v29  ;;  %v13558_v61 = vsel %vm13522_vm15, 0, %v3605_v19  ;;  %v3609_v28 = vmul.f32 -0.001358992, %v3608_v25  ;;  %v3616_v41 = vmul.f32 -0.00019511016, %v3608_v25 }
 0x383   :  { %15461 = vst [vmem:[#allocation92_spill] sm:$0xff] %v13558_v61  ;;  %v3796_v3 = vor.u32 8388608, %v3795_v54  ;;  %v3731_v17 = vsel %vm3729_vm5, %v3730_v38, %v3726_v24  ;;  %v13563_v14 = vor.u32 %v3809_v11, %v3808_v47  ;;  %v3816_v33 = vor.u32 %v3815_v31, %v3814_v20 }
 0x384   :  { %v3819_v1 = vor.u32 %v3818_v57, %v3817_v9  ;;  %v3610_v23 = vadd.f32 0.041655596, %v3609_v28  ;;  %v3617_v52 = vadd.f32 0.008332121, %v3616_v41  ;;  %v3732_v35 = vadd.s32 %v3731_v17, %v3727_v39 }
 0x385   :  { %v13565_v62 = vor.u32 %v3812_v16, %v3811_v26  ;;  %v3624_v63 = vand.u32 3, %v13558_v61  ;;  %v3807_v51 = vor.u32 %v3806_v6, %v3805_v12  ;;  %vm3820_vm13 = vcmp.lt.s32.totalorder %v13534_v18, 1 }
 0x386   :  { %vm3823_vm3 = vcmp.lt.s32.totalorder %v13534_v18, 4  ;;  %v3611_v54 = vmul.f32 %v3610_v23, %v3608_v25  ;;  %v3618_v19 = vmul.f32 %v3617_v52, %v3608_v25  ;;  %v3733_v13 = vadd.s32 536870912, %v3732_v35 }
 0x387   :  { %vm3822_vm6 = vcmp.lt.s32.totalorder %v13534_v18, 3  ;;  %vm3821_vm12 = vcmp.lt.s32.totalorder %v13534_v18, 2  ;;  %v3829_v55 = vsel %vm3823_vm3, %v3816_v33, 920167782  ;;  %v3833_v39 = vsel %vm3823_vm3, %v3819_v1, 1326507024 }
 0x388   :  { %v13576_v47 = vshll.u32 %v3796_v3, 8  ;;  %v3612_v12 = vadd.f32 -0.4999988, %v3611_v54  ;;  %v3619_v24 = vadd.f32 -0.16666654, %v3618_v19  ;;  %v13578_v11 = vshrl.u32 %v3733_v13, 30 }
 0x389   :  { %v3832_v20 = vsel %vm3820_vm13, %v13563_v14, %v13565_v62  ;;  %vm3625_vm2 = vcmp.lt.s32.totalorder %v3624_v63, 2  ;;  %v3828_v26 = vsel %vm3820_vm13, %v3807_v51, %v13563_v14  ;;  %v3834_v16 = vsel %vm3822_vm6, %v3816_v33, %v3833_v39 }
 0x38a   :  { %v3613_v31 = vmul.f32 %v3612_v12, %v3608_v25  ;;  %v3620_v38 = vmul.f32 %v3619_v24, %v3608_v25  ;;  %v3735_v6 = vshll.u32 %v13578_v11, 30  ;;  %v3830_v9 = vsel %vm3822_vm6, %v13565_v62, %v3829_v55 }
 0x38b   :  { %vm3626_vm0 = vcmp.eq.s32.totalorder %v3624_v63, 0  ;;  %v3835_v57 = vsel %vm3821_vm12, %v3832_v20, %v3834_v16  ;;  %v3837_v28 = vand.u32 65535, %v13576_v47  ;;  %v3838_v41 = vshrl.u32 %v13576_v47, 16 }
 0x38c   :  { %v13597_v3 = vadd.f32 1.0, %v3613_v31  ;;  %v3621_v17 = vadd.f32 1.0, %v3620_v38  ;;  %vm3629_vm15 = vcmp.eq.s32.totalorder %v3624_v63, 2  ;;  %v3736_v33 = vsub.s32 %v3732_v35, %v3735_v6  ;;  %v15464_v63 = vld [vmem:[#allocation36_spill] sm:$0xff] }
 0x38d   :  { %v3804_v25 = vshrl.u32 %v15335_v2, %v13528_v29  ;;  %v3831_v1 = vsel %vm3821_vm12, %v3828_v26, %v3830_v9  ;;  %v3839_v23 = vand.u32 65535, %v3835_v57  ;;  %v3840_v52 = vshrl.u32 %v3835_v57, 16 }
 0x38e   :  { %15462 = vst [vmem:[#allocation93_spill] sm:$0xff] %v13597_v3  ;;  %v13603_v54 = vmul.f32 %v3621_v17, %v3606_v46  ;;  %v15220_v19 = vxor.u32 2147483648, %v13597_v3  ;;  %vm3737_vm5 = vcmp.lt.s32.totalorder %v3736_v33, 0  ;;  %v3738_v13 = vsub.s32 0, %v3736_v33 }
 0x38f   :  { %v3841_v55 = vmul.u32 %v3839_v23, %v3837_v28  ;;  %v3842_v39 = vmul.u32 %v3840_v52, %v3837_v28  ;;  %v13606_v12 = vmul.u32 %v3839_v23, %v3838_v41  ;;  %v3861_v24 = vand.u32 65535, %v3831_v1 }
 0x390   :  { %15463 = vst [vmem:[#allocation94_spill] sm:$0xff] %v13603_v54  ;;  %v15221_v35 = vxor.u32 2147483648, %v13603_v54  ;;  %v3631_v29 = vsel %vm3629_vm15, %v15220_v19, %v13603_v54  ;;  %v3739_v20 = vsel %vm3737_vm5, %v3738_v13, %v3736_v33  ;;  %v3862_v26 = vshrl.u32 %v3831_v1, 16 }
 0x391   :  { %vm15228_vm10 = vweird.f32 %v15439_v36  ;;  %v3740_v46 = vclz %v3739_v20  ;;  %v3844_v16 = vmul.u32 %v3840_v52, %v3838_v41  ;;  %v3845_v31 = vshll.u32 %v3842_v39, 16 }
 0x392   :  { %v3628_v38 = vsel %vm3626_vm0, %v13597_v3, %v15221_v35  ;;  %v3728_v6 = vadd.s32 %v13515_v15, %v13518_v0  ;;  %v3847_v9 = vshll.u32 %v13606_v12, 16  ;;  %v3864_v57 = vmul.u32 %v3862_v26, %v3837_v28 }
 0x393   :  { %v3632_v17 = vsel %vm3625_vm2, %v3628_v38, %v3631_v29  ;;  %v10303_v23 = vadd.s32 4294967294, %v3740_v46  ;;  %vm3849_vm15 = vc.u32 %v3841_v55, %v3845_v31  ;;  %v3851_v1 = vadd.s32 %v3845_v31, %v3841_v55 }
 0x394   :  { %v3633_v52 = vsel %vm15228_vm10, nan, %v3632_v17  ;;  %v3824_v13 = vsel %vm3820_vm13, %v3804_v25, %v3807_v51  ;;  %v3850_v20 = vsel %vm3849_vm15, 1, %v15336_v56  ;;  %v3865_v19 = vmul.u32 %v3861_v24, %v3838_v41 }
 0x395   :  { %vm10304_vm0 = vcmp.lt.s32.totalorder %v10303_v23, 0  ;;  %v3825_v15 = vsel %vm3823_vm3, %v13565_v62, 2102212464  ;;  %v3852_v0 = vadd.s32 %v3850_v20, %v3844_v16  ;;  %v3945_v29 = vand.u32 2139095040, %v15464_v63  ;;  %5195 = vst [vmem:[#allocation7 + $0xa8] sm:$0xff] %v3633_v52 }
 0x396   :  { %v3743_v46 = vsel %vm10304_vm0, 0, %v10303_v23  ;;  %vm3853_vm2 = vc.u32 %v3851_v1, %v3847_v9  ;;  %v3863_v55 = vmul.u32 %v3861_v24, %v3837_v28  ;;  %v3867_v31 = vshll.u32 %v3864_v57, 16 }
 0x397   :  { %v3744_v38 = vsub.s32 32, %v3743_v46  ;;  %v3745_v17 = vshll.u32 %v3736_v33, %v3743_v46  ;;  %v3748_v35 = vsub.s32 4294967266, %v3743_v46  ;;  %v3846_v51 = vshrl.u32 %v3842_v39, 16 }
 0x398   :  { %v3826_v25 = vsel %vm3822_vm6, %v13563_v14, %v3825_v15  ;;  %v3854_v36 = vsel %vm3853_vm2, 1, %v15336_v56  ;;  %v3866_v3 = vmul.u32 %v3862_v26, %v3838_v41  ;;  %v3869_v62 = vshll.u32 %v3865_v19, 16 }
 0x399   :  { %v3746_v16 = vshrl.u32 %v3728_v6, %v3744_v38  ;;  %v3749_v20 = vadd.s32 127, %v3748_v35  ;;  %v3856_v54 = vadd.s32 %v3854_v36, %v3852_v0  ;;  %v15227_v23 = vand.u32 2147483647, %v15464_v63 }
 0x39a   :  { %v3848_v28 = vshrl.u32 %v13606_v12, 16  ;;  %vm3871_vm13 = vc.u32 %v3863_v55, %v3867_v31  ;;  %v3873_v24 = vadd.s32 %v3867_v31, %v3863_v55  ;;  %v3946_v33 = vshrl.u32 %v3945_v29, 23 }
 0x39b   :  { %v3747_v9 = vor.u32 %v3746_v16, %v3745_v17  ;;  %v3750_v39 = vshll.u32 %v3749_v20, 23  ;;  %v3857_v1 = vadd.s32 %v3856_v54, %v3846_v51  ;;  %v3872_v52 = vsel %vm3871_vm13, 1, %v15336_v56 }
 0x39c   :  { %v3868_v14 = vshrl.u32 %v3864_v57, 16  ;;  %v3874_v15 = vadd.s32 %v3872_v52, %v3866_v3  ;;  %vm3875_vm3 = vc.u32 %v3873_v24, %v3869_v62  ;;  %v10308_v41 = vadd.s32 4294967169, %v3946_v33 }
 0x39d   :  { %v3751_v26 = vor.u32 4788187, %v3750_v39  ;;  %v3754_v6 = vcvt.s32.f32 %v3747_v9  ;;  %v3758_v36 = vsub.s32 4, %v13578_v11  ;;  %v3876_v35 = vsel %vm3875_vm3, 1, %v15336_v56  ;;  %v15467_v9 = vld [vmem:[#allocation37_spill] sm:$0xff] }
 0x39e   :  { %v3870_v0 = vshrl.u32 %v3865_v19, 16  ;;  %v3878_v12 = vadd.s32 %v3876_v35, %v3874_v15  ;;  %v3952_v46 = vadd.s32 1, %v10308_v41  ;;  %v13639_v29 = vadd.s32 %v3857_v1, %v3848_v28 }
 0x39f   :  { %v3752_v55 = vand.u32 2147483647, %v3751_v26  ;;  %v13641_v31 = vadd.s32 %v3873_v24, %v3869_v62  ;;  %vm3636_vm6 = vcmp.lt.s32.totalorder %v15450_v32, 0  ;;  %v3827_v3 = vsel %vm3821_vm12, %v3824_v13, %v3826_v25 }
 0x3a0   :  { %v3879_v54 = vadd.s32 %v3878_v12, %v3868_v14  ;;  %vm3953_vm5 = vcmp.gt.s32.totalorder %v3952_v46, 0  ;;  %v3759_v38 = vsel %vm3636_vm6, %v3758_v36, %v13578_v11  ;;  %v3949_v19 = vand.u32 8388607, %v15227_v23 }
 0x3a1   :  { %v3755_v57 = vmul.f32 %v3754_v6, %v3752_v55  ;;  %v3954_v17 = vsel %vm3953_vm5, %v3952_v46, 0  ;;  %v15465_v62 = vand.u32 2147483647, %v15450_v32  ;;  %v3881_v18 = vmul.u32 %v13576_v47, %v3827_v3 }
 0x3a2   :  { %v3880_v51 = vadd.s32 %v3879_v54, %v3870_v0  ;;  %v3956_v16 = vand.u32 31, %v3954_v17  ;;  %vm3883_vm12 = vc.u32 %v13639_v29, %v13641_v31  ;;  %v3950_v33 = vor.u32 8388608, %v3949_v19 }
 0x3a3   :  { %vm3635_vm15 = vcmp.le.f32.partialorder %v15465_v62, 0.7853982  ;;  %v3756_v20 = vxor.u32 2147483648, %v3755_v57  ;;  %v13667_v52 = vshrl.u32 %v3954_v17, 5  ;;  %v4099_v17 = vand.u32 2139095040, %v15467_v9 }
 0x3a4   :  { %v13656_v13 = vsel %vm3635_vm15, 0, %v3759_v38  ;;  %v3884_v25 = vadd.s32 1, %v3880_v51  ;;  %v3957_v28 = vsub.s32 32, %v3956_v16  ;;  %v3962_v14 = vshll.u32 %v15330_v44, %v3956_v16 }
 0x3a5   :  { %15466 = vst [vmem:[#allocation95_spill] sm:$0xff] %v13656_v13  ;;  %v3757_v11 = vsel %vm3636_vm6, %v3756_v20, %v3755_v57  ;;  %v13661_v24 = vand.u32 3, %v13656_v13  ;;  %v3965_v26 = vshll.u32 %v15331_v59, %v3956_v16  ;;  %v3968_v6 = vshll.u32 %v15332_v53, %v3956_v16 }
 0x3a6   :  { %v13665_v1 = vsel %vm3635_vm15, %v15450_v32, %v3757_v11  ;;  %v3885_v47 = vsel %vm3883_vm12, %v3884_v25, %v3880_v51  ;;  %v3963_v36 = vshrl.u32 %v15331_v59, %v3957_v28  ;;  %v3966_v35 = vshrl.u32 %v15332_v53, %v3957_v28 }
 0x3a7   :  { %v3762_v15 = vmul.f32 %v13665_v1, %v13665_v1  ;;  %v3886_v41 = vadd.s32 %v3885_v47, %v3881_v18  ;;  %v3969_v0 = vshrl.u32 %v15333_v49, %v3957_v28  ;;  %v3971_v12 = vshll.u32 %v15333_v49, %v3956_v16 }
 0x3a8   :  { %v13678_v54 = vshll.u32 %v3950_v33, 8  ;;  %v3959_v57 = vshll.u32 %v15335_v2, %v3956_v16  ;;  %v3960_v38 = vshrl.u32 %v15330_v44, %v3957_v28  ;;  %v3972_v19 = vshrl.u32 %v15334_v60, %v3957_v28 }
 0x3a9   :  { %v3763_v46 = vmul.f32 -0.001358992, %v3762_v15  ;;  %v3770_v55 = vmul.f32 -0.00019511016, %v3762_v15  ;;  %v3887_v3 = vadd.s32 536870912, %v3886_v41  ;;  %v3970_v18 = vor.u32 %v3969_v0, %v3968_v6 }
 0x3aa   :  { %vm3783_vm0 = vcmp.eq.s32.totalorder %v13661_v24, 2  ;;  %v13687_v25 = vor.u32 %v3963_v36, %v3962_v14  ;;  %v3967_v11 = vor.u32 %v3966_v35, %v3965_v26  ;;  %v3973_v33 = vor.u32 %v3972_v19, %v3971_v12 }
 0x3ab   :  { %v3764_v51 = vadd.f32 0.041655596, %v3763_v46  ;;  %v3771_v62 = vadd.f32 0.008332121, %v3770_v55  ;;  %v13684_v20 = vshrl.u32 %v3887_v3, 30  ;;  %vm3977_vm2 = vcmp.lt.s32.totalorder %v13667_v52, 4 }
 0x3ac   :  { %vm3974_vm13 = vcmp.lt.s32.totalorder %v13667_v52, 1  ;;  %vm3780_vm3 = vcmp.eq.s32.totalorder %v13661_v24, 0  ;;  %v3961_v46 = vor.u32 %v3960_v38, %v3959_v57  ;;  %vm3976_vm6 = vcmp.lt.s32.totalorder %v13667_v52, 3 }
 0x3ad   :  { %v3765_v16 = vmul.f32 %v3764_v51, %v3762_v15  ;;  %v3772_v47 = vmul.f32 %v3771_v62, %v3762_v15  ;;  %v3889_v23 = vshll.u32 %v13684_v20, 30  ;;  %v13695_v6 = vand.u32 65535, %v13678_v54 }
 0x3ae   :  { %v4100_v14 = vshrl.u32 %v4099_v17, 23  ;;  %vm3779_vm5 = vcmp.lt.s32.totalorder %v13661_v24, 2  ;;  %v3983_v0 = vsel %vm3977_vm2, %v3970_v18, 920167782  ;;  %vm15238_vm15 = vweird.f32 %v15450_v32 }
 0x3af   :  { %v3766_v36 = vadd.f32 -0.4999988, %v3765_v16  ;;  %v3773_v26 = vadd.f32 -0.16666654, %v3772_v47  ;;  %v3890_v35 = vsub.s32 %v3886_v41, %v3889_v23  ;;  %v3958_v12 = vshrl.u32 %v15335_v2, %v3957_v28 }
 0x3b0   :  { %vm3975_vm12 = vcmp.lt.s32.totalorder %v13667_v52, 2  ;;  %v3986_v55 = vsel %vm3974_vm13, %v13687_v25, %v3967_v11  ;;  %v3987_v3 = vsel %vm3977_vm2, %v3973_v33, 1326507024  ;;  %v3982_v41 = vsel %vm3974_vm13, %v3961_v46, %v13687_v25 }
 0x3b1   :  { %v3767_v57 = vmul.f32 %v3766_v36, %v3762_v15  ;;  %v3774_v38 = vmul.f32 %v3773_v26, %v3762_v15  ;;  %vm3891_vm10 = vcmp.lt.s32.totalorder %v3890_v35, 0  ;;  %v3892_v23 = vsub.s32 0, %v3890_v35 }
 0x3b2   :  { %v3984_v28 = vsel %vm3976_vm6, %v3967_v11, %v3983_v0  ;;  %v3988_v19 = vsel %vm3976_vm6, %v3970_v18, %v3987_v3  ;;  %v3992_v17 = vshrl.u32 %v13678_v54, 16  ;;  %v3882_v16 = vadd.s32 %v13641_v31, %v13639_v29 }
 0x3b3   :  { %v13716_v51 = vadd.f32 1.0, %v3767_v57  ;;  %v3775_v62 = vadd.f32 1.0, %v3774_v38  ;;  %v3893_v33 = vsel %vm3891_vm10, %v3892_v23, %v3890_v35  ;;  %v3989_v15 = vsel %vm3975_vm12, %v3986_v55, %v3988_v19 }
 0x3b4   :  { %v3894_v47 = vclz %v3893_v33  ;;  %v3993_v36 = vand.u32 65535, %v3989_v15  ;;  %v3994_v26 = vshrl.u32 %v3989_v15, 16  ;;  %v3978_v3 = vsel %vm3974_vm13, %v3958_v12, %v3961_v46 }
 0x3b5   :  { %15468 = vst [vmem:[#allocation96_spill] sm:$0xff] %v13716_v51  ;;  %v13723_v0 = vmul.f32 %v3775_v62, %v13665_v1  ;;  %v15229_v18 = vxor.u32 2147483648, %v13716_v51  ;;  %v10311_v57 = vadd.s32 4294967169, %v4100_v14  ;;  %v3985_v55 = vsel %vm3975_vm12, %v3982_v41, %v3984_v28 }
 0x3b6   :  { %v10306_v38 = vadd.s32 4294967294, %v3894_v47  ;;  %v3996_v29 = vmul.u32 %v3994_v26, %v13695_v6  ;;  %v3979_v46 = vsel %vm3977_vm2, %v3967_v11, 2102212464  ;;  %v3997_v14 = vmul.u32 %v3993_v36, %v3992_v17 }
 0x3b7   :  { %15469 = vst [vmem:[#allocation97_spill] sm:$0xff] %v13723_v0  ;;  %v15234_v31 = vxor.u32 2147483648, %v13723_v0  ;;  %v3785_v1 = vsel %vm3783_vm0, %v15229_v18, %v13723_v0  ;;  %v3995_v12 = vmul.u32 %v3993_v36, %v13695_v6  ;;  %v4015_v62 = vand.u32 65535, %v3985_v55 }
 0x3b8   :  { %vm10307_vm10 = vcmp.lt.s32.totalorder %v10306_v38, 0  ;;  %v3999_v19 = vshll.u32 %v3996_v29, 16  ;;  %v3998_v33 = vmul.u32 %v3994_v26, %v3992_v17  ;;  %v4016_v15 = vshrl.u32 %v3985_v55, 16 }
 0x3b9   :  { %v3782_v41 = vsel %vm3780_vm3, %v13716_v51, %v15234_v31  ;;  %v3897_v28 = vsel %vm10307_vm10, 0, %v10306_v38  ;;  %v3980_v39 = vsel %vm3976_vm6, %v13687_v25, %v3979_v46  ;;  %v4001_v0 = vshll.u32 %v3997_v14, 16 }
 0x3ba   :  { %v3786_v47 = vsel %vm3779_vm5, %v3782_v41, %v3785_v1  ;;  %v3898_v18 = vsub.s32 32, %v3897_v28  ;;  %v3899_v11 = vshll.u32 %v3890_v35, %v3897_v28  ;;  %v3902_v23 = vsub.s32 4294967266, %v3897_v28 }
 0x3bb   :  { %v3787_v36 = vsel %vm15238_vm15, nan, %v3786_v47  ;;  %v4106_v13 = vadd.s32 1, %v10311_v57  ;;  %vm4003_vm0 = vc.u32 %v3995_v12, %v3999_v19  ;;  %v4017_v26 = vmul.u32 %v4015_v62, %v13695_v6 }
 0x3bc   :  { %v3900_v61 = vshrl.u32 %v3882_v16, %v3898_v18  ;;  %v3903_v31 = vadd.s32 127, %v3902_v23  ;;  %5196 = vst [vmem:[#allocation7 + $0xb0] sm:$0xff] %v3787_v36  ;;  %v4004_v24 = vsel %vm4003_vm0, 1, %v15336_v56  ;;  %v4005_v38 = vadd.s32 %v3999_v19, %v3995_v12 }
 0x3bd   :  { %v4018_v35 = vmul.u32 %v4016_v15, %v13695_v6  ;;  %v4019_v55 = vmul.u32 %v4015_v62, %v3992_v17  ;;  %v4000_v28 = vshrl.u32 %v3996_v29, 16  ;;  %v4006_v47 = vadd.s32 %v4004_v24, %v3998_v33 }
 0x3be   :  { %v3901_v1 = vor.u32 %v3900_v61, %v3899_v11  ;;  %v3904_v41 = vshll.u32 %v3903_v31, 23  ;;  %vm4007_vm2 = vc.u32 %v4005_v38, %v4001_v0  ;;  %v4020_v25 = vmul.u32 %v4016_v15, %v3992_v17 }
 0x3bf   :  { %v4021_v46 = vshll.u32 %v4018_v35, 16  ;;  %v4023_v57 = vshll.u32 %v4019_v55, 16  ;;  %v4002_v23 = vshrl.u32 %v3997_v14, 16  ;;  %v4008_v32 = vsel %vm4007_vm2, 1, %v15336_v56 }
 0x3c0   :  { %v3905_v16 = vor.u32 4788187, %v3904_v41  ;;  %v3908_v18 = vcvt.s32.f32 %v3901_v1  ;;  %v4010_v36 = vadd.s32 %v4008_v32, %v4006_v47  ;;  %vm4107_vm3 = vcmp.gt.s32.totalorder %v4106_v13, 0 }
 0x3c1   :  { %vm4025_vm13 = vc.u32 %v4017_v26, %v4021_v46  ;;  %v4027_v51 = vadd.s32 %v4021_v46, %v4017_v26  ;;  %v3981_v61 = vsel %vm3975_vm12, %v3978_v3, %v3980_v39  ;;  %v4108_v29 = vsel %vm4107_vm3, %v4106_v13, 0 }
 0x3c2   :  { %v3906_v12 = vand.u32 2147483647, %v3905_v16  ;;  %v4026_v6 = vsel %vm4025_vm13, 1, %v15336_v56  ;;  %v4011_v0 = vadd.s32 %v4010_v36, %v4000_v28  ;;  %v4022_v17 = vshrl.u32 %v4018_v35, 16 }
 0x3c3   :  { %v4028_v31 = vadd.s32 %v4026_v6, %v4020_v25  ;;  %vm4029_vm6 = vc.u32 %v4027_v51, %v4023_v57  ;;  %v13761_v62 = vadd.s32 %v4027_v51, %v4023_v57  ;;  %v4110_v32 = vand.u32 31, %v4108_v29 }
 0x3c4   :  { %v3909_v19 = vmul.f32 %v3908_v18, %v3906_v12  ;;  %v4030_v14 = vsel %vm4029_vm6, 1, %v15336_v56  ;;  %vm3790_vm5 = vcmp.lt.s32.totalorder %v15453_v30, 0  ;;  %v13764_v33 = vadd.s32 %v4011_v0, %v4002_v23 }
 0x3c5   :  { %v4024_v15 = vshrl.u32 %v4019_v55, 16  ;;  %v4032_v52 = vadd.s32 %v4030_v14, %v4028_v31  ;;  %v15470_v39 = vand.u32 2147483647, %v15453_v30  ;;  %v15473_v11 = vand.u32 2147483647, %v15467_v9 }
 0x3c6   :  { %v3910_v3 = vxor.u32 2147483648, %v3909_v19  ;;  %v13774_v24 = vsub.s32 32, %v4110_v32  ;;  %v15474_v51 = vsub.s32 4, %v13684_v20  ;;  %v4035_v55 = vmul.u32 %v13678_v54, %v3981_v61 }
 0x3c7   :  { %vm13768_vm12 = vcmp.le.f32.partialorder %v15470_v39, 0.7853982  ;;  %v4103_v26 = vand.u32 8388607, %v15473_v11  ;;  %v4033_v35 = vadd.s32 %v4032_v52, %v4022_v17  ;;  %v13780_v1 = vshrl.u32 %v4108_v29, 5 }
 0x3c8   :  { %v3913_v38 = vsel %vm3790_vm5, %v15474_v51, %v13684_v20  ;;  %v3911_v41 = vsel %vm3790_vm5, %v3910_v3, %v3909_v19  ;;  %vm4037_vm10 = vc.u32 %v13764_v33, %v13761_v62  ;;  %v4113_v28 = vshll.u32 %v15335_v2, %v4110_v32 }
 0x3c9   :  { %v4116_v47 = vshll.u32 %v15330_v44, %v4110_v32  ;;  %v3914_v25 = vsel %vm13768_vm12, %v15453_v30, %v3911_v41  ;;  %v4034_v46 = vadd.s32 %v4033_v35, %v4024_v15  ;;  %v4117_v20 = vshrl.u32 %v15331_v59, %v13774_v24 }
 0x3ca   :  { %v4122_v54 = vshll.u32 %v15332_v53, %v4110_v32  ;;  %v3916_v57 = vmul.f32 %v3914_v25, %v3914_v25  ;;  %v4119_v16 = vshll.u32 %v15331_v59, %v4110_v32  ;;  %v4120_v18 = vshrl.u32 %v15332_v53, %v13774_v24 }
 0x3cb   :  { %v4123_v23 = vshrl.u32 %v15333_v49, %v13774_v24  ;;  %v4038_v36 = vadd.s32 1, %v4034_v46  ;;  %v4114_v12 = vshrl.u32 %v15330_v44, %v13774_v24  ;;  %v4125_v61 = vshll.u32 %v15333_v49, %v4110_v32 }
 0x3cc   :  { %v4126_v6 = vshrl.u32 %v15334_v60, %v13774_v24  ;;  %v13804_v29 = vsel %vm13768_vm12, 0, %v3913_v38  ;;  %v3917_v0 = vmul.f32 -0.001358992, %v3916_v57  ;;  %v3924_v17 = vmul.f32 -0.00019511016, %v3916_v57 }
 0x3cd   :  { %15475 = vst [vmem:[#allocation98_spill] sm:$0xff] %v13804_v29  ;;  %v4104_v31 = vor.u32 8388608, %v4103_v26  ;;  %v4039_v19 = vsel %vm4037_vm10, %v4038_v36, %v4034_v46  ;;  %v13809_v14 = vor.u32 %v4117_v20, %v4116_v47  ;;  %v4124_v15 = vor.u32 %v4123_v23, %v4122_v54 }
 0x3ce   :  { %v4127_v52 = vor.u32 %v4126_v6, %v4125_v61  ;;  %v3918_v39 = vadd.f32 0.041655596, %v3917_v0  ;;  %v3925_v32 = vadd.f32 0.008332121, %v3924_v17  ;;  %v4040_v3 = vadd.s32 %v4039_v19, %v4035_v55 }
 0x3cf   :  { %v13811_v11 = vor.u32 %v4120_v18, %v4119_v16  ;;  %v3932_v13 = vand.u32 3, %v13804_v29  ;;  %v4115_v51 = vor.u32 %v4114_v12, %v4113_v28  ;;  %vm4128_vm0 = vcmp.lt.s32.totalorder %v13780_v1, 1 }
 0x3d0   :  { %vm4131_vm2 = vcmp.lt.s32.totalorder %v13780_v1, 4  ;;  %v3919_v26 = vmul.f32 %v3918_v39, %v3916_v57  ;;  %v3926_v38 = vmul.f32 %v3925_v32, %v3916_v57  ;;  %v4041_v35 = vadd.s32 536870912, %v4040_v3 }
 0x3d1   :  { %vm4130_vm13 = vcmp.lt.s32.totalorder %v13780_v1, 3  ;;  %vm4129_vm3 = vcmp.lt.s32.totalorder %v13780_v1, 2  ;;  %v4137_v41 = vsel %vm4131_vm2, %v4124_v15, 920167782  ;;  %v4141_v55 = vsel %vm4131_vm2, %v4127_v52, 1326507024 }
 0x3d2   :  { %v13822_v47 = vshll.u32 %v4104_v31, 8  ;;  %v3920_v28 = vadd.f32 -0.4999988, %v3919_v26  ;;  %v3927_v46 = vadd.f32 -0.16666654, %v3926_v38  ;;  %v13824_v20 = vshrl.u32 %v4041_v35, 30 }
 0x3d3   :  { %v4140_v54 = vsel %vm4128_vm0, %v13809_v14, %v13811_v11  ;;  %vm3933_vm6 = vcmp.lt.s32.totalorder %v3932_v13, 2  ;;  %v4136_v16 = vsel %vm4128_vm0, %v4115_v51, %v13809_v14  ;;  %v4142_v18 = vsel %vm4130_vm13, %v4124_v15, %v4141_v55 }
 0x3d4   :  { %v3921_v23 = vmul.f32 %v3920_v28, %v3916_v57  ;;  %v3928_v36 = vmul.f32 %v3927_v46, %v3916_v57  ;;  %v4043_v12 = vshll.u32 %v13824_v20, 30  ;;  %v4138_v61 = vsel %vm4130_vm13, %v13811_v11, %v4137_v41 }
 0x3d5   :  { %vm3934_vm5 = vcmp.eq.s32.totalorder %v3932_v13, 0  ;;  %v4143_v6 = vsel %vm4129_vm3, %v4140_v54, %v4142_v18  ;;  %v4145_v0 = vand.u32 65535, %v13822_v47  ;;  %v4146_v17 = vshrl.u32 %v13822_v47, 16 }
 0x3d6   :  { %v13843_v31 = vadd.f32 1.0, %v3921_v23  ;;  %v3929_v19 = vadd.f32 1.0, %v3928_v36  ;;  %vm3937_vm12 = vcmp.eq.s32.totalorder %v3932_v13, 2  ;;  %v4044_v15 = vsub.s32 %v4040_v3, %v4043_v12  ;;  %v15478_v13 = vld [vmem:[#allocation38_spill] sm:$0xff] }
 0x3d7   :  { %v4112_v57 = vshrl.u32 %v15335_v2, %v13774_v24  ;;  %v4139_v52 = vsel %vm4129_vm3, %v4136_v16, %v4138_v61  ;;  %v4147_v39 = vand.u32 65535, %v4143_v6  ;;  %v4148_v32 = vshrl.u32 %v4143_v6, 16 }
 0x3d8   :  { %15476 = vst [vmem:[#allocation99_spill] sm:$0xff] %v13843_v31  ;;  %v13849_v26 = vmul.f32 %v3929_v19, %v3914_v25  ;;  %v15239_v38 = vxor.u32 2147483648, %v13843_v31  ;;  %vm4045_vm10 = vcmp.lt.s32.totalorder %v4044_v15, 0  ;;  %v4046_v35 = vsub.s32 0, %v4044_v15 }
 0x3d9   :  { %v4149_v41 = vmul.u32 %v4147_v39, %v4145_v0  ;;  %v4150_v55 = vmul.u32 %v4148_v32, %v4145_v0  ;;  %v13852_v28 = vmul.u32 %v4147_v39, %v4146_v17  ;;  %v4169_v46 = vand.u32 65535, %v4139_v52 }
 0x3da   :  { %15477 = vst [vmem:[#allocation100_spill] sm:$0xff] %v13849_v26  ;;  %v15240_v3 = vxor.u32 2147483648, %v13849_v26  ;;  %v3939_v24 = vsel %vm3937_vm12, %v15239_v38, %v13849_v26  ;;  %v4047_v54 = vsel %vm4045_vm10, %v4046_v35, %v4044_v15  ;;  %v4170_v16 = vshrl.u32 %v4139_v52, 16 }
 0x3db   :  { %vm15247_vm15 = vweird.f32 %v15453_v30  ;;  %v4048_v25 = vclz %v4047_v54  ;;  %v4152_v18 = vmul.u32 %v4148_v32, %v4146_v17  ;;  %v4153_v23 = vshll.u32 %v4150_v55, 16 }
 0x3dc   :  { %v3936_v36 = vsel %vm3934_vm5, %v13843_v31, %v15240_v3  ;;  %v4036_v12 = vadd.s32 %v13761_v62, %v13764_v33  ;;  %v4155_v61 = vshll.u32 %v13852_v28, 16  ;;  %v4172_v6 = vmul.u32 %v4170_v16, %v4145_v0 }
 0x3dd   :  { %v3940_v19 = vsel %vm3933_vm6, %v3936_v36, %v3939_v24  ;;  %v10309_v39 = vadd.s32 4294967294, %v4048_v25  ;;  %vm4157_vm12 = vc.u32 %v4149_v41, %v4153_v23  ;;  %v4159_v52 = vadd.s32 %v4153_v23, %v4149_v41 }
 0x3de   :  { %v3941_v32 = vsel %vm15247_vm15, nan, %v3940_v19  ;;  %v4132_v35 = vsel %vm4128_vm0, %v4112_v57, %v4115_v51  ;;  %v4158_v54 = vsel %vm4157_vm12, 1, %v15336_v56  ;;  %v4173_v38 = vmul.u32 %v4169_v46, %v4146_v17 }
 0x3df   :  { %vm10310_vm5 = vcmp.lt.s32.totalorder %v10309_v39, 0  ;;  %v4133_v62 = vsel %vm4131_vm2, %v13811_v11, 2102212464  ;;  %v4160_v33 = vadd.s32 %v4158_v54, %v4152_v18  ;;  %v4253_v24 = vand.u32 2139095040, %v15478_v13  ;;  %5197 = vst [vmem:[#allocation7 + $0xb8] sm:$0xff] %v3941_v32 }
 0x3e0   :  { %v4051_v25 = vsel %vm10310_vm5, 0, %v10309_v39  ;;  %vm4161_vm6 = vc.u32 %v4159_v52, %v4155_v61  ;;  %v4171_v41 = vmul.u32 %v4169_v46, %v4145_v0  ;;  %v4175_v23 = vshll.u32 %v4172_v6, 16 }
 0x3e1   :  { %v4052_v36 = vsub.s32 32, %v4051_v25  ;;  %v4053_v19 = vshll.u32 %v4044_v15, %v4051_v25  ;;  %v4056_v3 = vsub.s32 4294967266, %v4051_v25  ;;  %v4154_v51 = vshrl.u32 %v4150_v55, 16 }
 0x3e2   :  { %v4134_v57 = vsel %vm4130_vm13, %v13809_v14, %v4133_v62  ;;  %v4162_v30 = vsel %vm4161_vm6, 1, %v15336_v56  ;;  %v4174_v31 = vmul.u32 %v4170_v16, %v4146_v17  ;;  %v4177_v11 = vshll.u32 %v4173_v38, 16 }
 0x3e3   :  { %v4054_v18 = vshrl.u32 %v4036_v12, %v4052_v36  ;;  %v4057_v54 = vadd.s32 127, %v4056_v3  ;;  %v4164_v26 = vadd.s32 %v4162_v30, %v4160_v33  ;;  %v15246_v39 = vand.u32 2147483647, %v15478_v13 }
 0x3e4   :  { %v4156_v0 = vshrl.u32 %v13852_v28, 16  ;;  %vm4179_vm0 = vc.u32 %v4171_v41, %v4175_v23  ;;  %v4181_v46 = vadd.s32 %v4175_v23, %v4171_v41  ;;  %v4254_v15 = vshrl.u32 %v4253_v24, 23 }
 0x3e5   :  { %v4055_v61 = vor.u32 %v4054_v18, %v4053_v19  ;;  %v4058_v55 = vshll.u32 %v4057_v54, 23  ;;  %v4165_v52 = vadd.s32 %v4164_v26, %v4154_v51  ;;  %v4180_v32 = vsel %vm4179_vm0, 1, %v15336_v56 }
 0x3e6   :  { %v4176_v14 = vshrl.u32 %v4172_v6, 16  ;;  %v4182_v62 = vadd.s32 %v4180_v32, %v4174_v31  ;;  %vm4183_vm2 = vc.u32 %v4181_v46, %v4177_v11  ;;  %v10314_v17 = vadd.s32 4294967169, %v4254_v15 }
 0x3e7   :  { %v4059_v16 = vor.u32 4788187, %v4058_v55  ;;  %v4062_v12 = vcvt.s32.f32 %v4055_v61  ;;  %v4066_v30 = vsub.s32 4, %v13824_v20  ;;  %v4184_v3 = vsel %vm4183_vm2, 1, %v15336_v56  ;;  %v15481_v61 = vld [vmem:[#allocation39_spill] sm:$0xff] }
 0x3e8   :  { %v4178_v33 = vshrl.u32 %v4173_v38, 16  ;;  %v4186_v28 = vadd.s32 %v4184_v3, %v4182_v62  ;;  %v4260_v25 = vadd.s32 1, %v10314_v17  ;;  %v13885_v24 = vadd.s32 %v4165_v52, %v4156_v0 }
 0x3e9   :  { %v4060_v41 = vand.u32 2147483647, %v4059_v16  ;;  %v13887_v23 = vadd.s32 %v4181_v46, %v4177_v11  ;;  %vm3944_vm13 = vcmp.lt.s32.totalorder %v15464_v63, 0  ;;  %v4135_v31 = vsel %vm4129_vm3, %v4132_v35, %v4134_v57 }
 0x3ea   :  { %v4187_v26 = vadd.s32 %v4186_v28, %v4176_v14  ;;  %vm4261_vm10 = vcmp.gt.s32.totalorder %v4260_v25, 0  ;;  %v4067_v36 = vsel %vm3944_vm13, %v4066_v30, %v13824_v20  ;;  %v4257_v38 = vand.u32 8388607, %v15246_v39 }
 0x3eb   :  { %v4063_v6 = vmul.f32 %v4062_v12, %v4060_v41  ;;  %v4262_v19 = vsel %vm4261_vm10, %v4260_v25, 0  ;;  %v15479_v11 = vand.u32 2147483647, %v15464_v63  ;;  %v4189_v1 = vmul.u32 %v13822_v47, %v4135_v31 }
 0x3ec   :  { %v4188_v51 = vadd.s32 %v4187_v26, %v4178_v33  ;;  %v4264_v18 = vand.u32 31, %v4262_v19  ;;  %vm4191_vm3 = vc.u32 %v13885_v24, %v13887_v23  ;;  %v4258_v15 = vor.u32 8388608, %v4257_v38 }
 0x3ed   :  { %vm3943_vm12 = vcmp.le.f32.partialorder %v15479_v11, 0.7853982  ;;  %v4064_v54 = vxor.u32 2147483648, %v4063_v6  ;;  %v13913_v32 = vshrl.u32 %v4262_v19, 5  ;;  %v4407_v19 = vand.u32 2139095040, %v15481_v61 }
 0x3ee   :  { %v13902_v35 = vsel %vm3943_vm12, 0, %v4067_v36  ;;  %v4192_v57 = vadd.s32 1, %v4188_v51  ;;  %v4265_v0 = vsub.s32 32, %v4264_v18  ;;  %v4270_v14 = vshll.u32 %v15330_v44, %v4264_v18 }
 0x3ef   :  { %15480 = vst [vmem:[#allocation101_spill] sm:$0xff] %v13902_v35  ;;  %v4065_v20 = vsel %vm3944_vm13, %v4064_v54, %v4063_v6  ;;  %v13907_v46 = vand.u32 3, %v13902_v35  ;;  %v4273_v16 = vshll.u32 %v15331_v59, %v4264_v18  ;;  %v4276_v12 = vshll.u32 %v15332_v53, %v4264_v18 }
 0x3f0   :  { %v13911_v52 = vsel %vm3943_vm12, %v15464_v63, %v4065_v20  ;;  %v4193_v47 = vsel %vm4191_vm3, %v4192_v57, %v4188_v51  ;;  %v4271_v30 = vshrl.u32 %v15331_v59, %v4265_v0  ;;  %v4274_v3 = vshrl.u32 %v15332_v53, %v4265_v0 }
 0x3f1   :  { %v4070_v62 = vmul.f32 %v13911_v52, %v13911_v52  ;;  %v4194_v17 = vadd.s32 %v4193_v47, %v4189_v1  ;;  %v4277_v33 = vshrl.u32 %v15333_v49, %v4265_v0  ;;  %v4279_v28 = vshll.u32 %v15333_v49, %v4264_v18 }
 0x3f2   :  { %v13924_v26 = vshll.u32 %v4258_v15, 8  ;;  %v4267_v6 = vshll.u32 %v15335_v2, %v4264_v18  ;;  %v4268_v36 = vshrl.u32 %v15330_v44, %v4265_v0  ;;  %v4280_v38 = vshrl.u32 %v15334_v60, %v4265_v0 }
 0x3f3   :  { %v4071_v25 = vmul.f32 -0.001358992, %v4070_v62  ;;  %v4078_v41 = vmul.f32 -0.00019511016, %v4070_v62  ;;  %v4195_v31 = vadd.s32 536870912, %v4194_v17  ;;  %v4278_v1 = vor.u32 %v4277_v33, %v4276_v12 }
 0x3f4   :  { %vm4091_vm5 = vcmp.eq.s32.totalorder %v13907_v46, 2  ;;  %v13933_v57 = vor.u32 %v4271_v30, %v4270_v14  ;;  %v4275_v20 = vor.u32 %v4274_v3, %v4273_v16  ;;  %v4281_v15 = vor.u32 %v4280_v38, %v4279_v28 }
 0x3f5   :  { %v4072_v51 = vadd.f32 0.041655596, %v4071_v25  ;;  %v4079_v11 = vadd.f32 0.008332121, %v4078_v41  ;;  %v13930_v54 = vshrl.u32 %v4195_v31, 30  ;;  %vm4285_vm6 = vcmp.lt.s32.totalorder %v13913_v32, 4 }
 0x3f6   :  { %vm4282_vm0 = vcmp.lt.s32.totalorder %v13913_v32, 1  ;;  %vm4088_vm2 = vcmp.eq.s32.totalorder %v13907_v46, 0  ;;  %v4269_v25 = vor.u32 %v4268_v36, %v4267_v6  ;;  %vm4284_vm13 = vcmp.lt.s32.totalorder %v13913_v32, 3 }
 0x3f7   :  { %v4073_v18 = vmul.f32 %v4072_v51, %v4070_v62  ;;  %v4080_v47 = vmul.f32 %v4079_v11, %v4070_v62  ;;  %v4197_v39 = vshll.u32 %v13930_v54, 30  ;;  %v13941_v12 = vand.u32 65535, %v13924_v26 }
 0x3f8   :  { %v4408_v14 = vshrl.u32 %v4407_v19, 23  ;;  %vm4087_vm10 = vcmp.lt.s32.totalorder %v13907_v46, 2  ;;  %v4291_v33 = vsel %vm4285_vm6, %v4278_v1, 920167782  ;;  %vm15257_vm12 = vweird.f32 %v15464_v63 }
 0x3f9   :  { %v4074_v30 = vadd.f32 -0.4999988, %v4073_v18  ;;  %v4081_v16 = vadd.f32 -0.16666654, %v4080_v47  ;;  %v4198_v3 = vsub.s32 %v4194_v17, %v4197_v39  ;;  %v4266_v28 = vshrl.u32 %v15335_v2, %v4265_v0 }
 0x3fa   :  { %vm4283_vm3 = vcmp.lt.s32.totalorder %v13913_v32, 2  ;;  %v4294_v41 = vsel %vm4282_vm0, %v13933_v57, %v4275_v20  ;;  %v4295_v31 = vsel %vm4285_vm6, %v4281_v15, 1326507024  ;;  %v4290_v17 = vsel %vm4282_vm0, %v4269_v25, %v13933_v57 }
 0x3fb   :  { %v4075_v6 = vmul.f32 %v4074_v30, %v4070_v62  ;;  %v4082_v36 = vmul.f32 %v4081_v16, %v4070_v62  ;;  %vm4199_vm15 = vcmp.lt.s32.totalorder %v4198_v3, 0  ;;  %v4200_v39 = vsub.s32 0, %v4198_v3 }
 0x3fc   :  { %v4292_v0 = vsel %vm4284_vm13, %v4275_v20, %v4291_v33  ;;  %v4296_v38 = vsel %vm4284_vm13, %v4278_v1, %v4295_v31  ;;  %v4300_v19 = vshrl.u32 %v13924_v26, 16  ;;  %v4190_v18 = vadd.s32 %v13887_v23, %v13885_v24 }
 0x3fd   :  { %v13962_v51 = vadd.f32 1.0, %v4075_v6  ;;  %v4083_v11 = vadd.f32 1.0, %v4082_v36  ;;  %v4201_v15 = vsel %vm4199_vm15, %v4200_v39, %v4198_v3  ;;  %v4297_v62 = vsel %vm4283_vm3, %v4294_v41, %v4296_v38 }
 0x3fe   :  { %v4202_v47 = vclz %v4201_v15  ;;  %v4301_v30 = vand.u32 65535, %v4297_v62  ;;  %v4302_v16 = vshrl.u32 %v4297_v62, 16  ;;  %v4286_v31 = vsel %vm4282_vm0, %v4266_v28, %v4269_v25 }
 0x3ff   :  { %15482 = vst [vmem:[#allocation102_spill] sm:$0xff] %v13962_v51  ;;  %v13969_v33 = vmul.f32 %v4083_v11, %v13911_v52  ;;  %v15248_v1 = vxor.u32 2147483648, %v13962_v51  ;;  %v10317_v6 = vadd.s32 4294967169, %v4408_v14  ;;  %v4293_v41 = vsel %vm4283_vm3, %v4290_v17, %v4292_v0 }
 0x400   :  { %v10312_v36 = vadd.s32 4294967294, %v4202_v47  ;;  %v4304_v24 = vmul.u32 %v4302_v16, %v13941_v12  ;;  %v4287_v25 = vsel %vm4285_vm6, %v4275_v20, 2102212464  ;;  %v4305_v14 = vmul.u32 %v4301_v30, %v4300_v19 }
 0x401   :  { %15483 = vst [vmem:[#allocation103_spill] sm:$0xff] %v13969_v33  ;;  %v15253_v23 = vxor.u32 2147483648, %v13969_v33  ;;  %v4093_v52 = vsel %vm4091_vm5, %v15248_v1, %v13969_v33  ;;  %v4303_v28 = vmul.u32 %v4301_v30, %v13941_v12  ;;  %v4323_v11 = vand.u32 65535, %v4293_v41 }
 0x402   :  { %vm10313_vm15 = vcmp.lt.s32.totalorder %v10312_v36, 0  ;;  %v4307_v38 = vshll.u32 %v4304_v24, 16  ;;  %v4306_v15 = vmul.u32 %v4302_v16, %v4300_v19  ;;  %v4324_v62 = vshrl.u32 %v4293_v41, 16 }
 0x403   :  { %v4090_v17 = vsel %vm4088_vm2, %v13962_v51, %v15253_v23  ;;  %v4205_v0 = vsel %vm10313_vm15, 0, %v10312_v36  ;;  %v4288_v55 = vsel %vm4284_vm13, %v13933_v57, %v4287_v25  ;;  %v4309_v33 = vshll.u32 %v4305_v14, 16 }
 0x404   :  { %v4094_v47 = vsel %vm4087_vm10, %v4090_v17, %v4093_v52  ;;  %v4206_v1 = vsub.s32 32, %v4205_v0  ;;  %v4207_v20 = vshll.u32 %v4198_v3, %v4205_v0  ;;  %v4210_v39 = vsub.s32 4294967266, %v4205_v0 }
 0x405   :  { %v4095_v30 = vsel %vm15257_vm12, nan, %v4094_v47  ;;  %v4414_v35 = vadd.s32 1, %v10317_v6  ;;  %vm4311_vm5 = vc.u32 %v4303_v28, %v4307_v38  ;;  %v4325_v16 = vmul.u32 %v4323_v11, %v13941_v12 }
 0x406   :  { %v4208_v29 = vshrl.u32 %v4190_v18, %v4206_v1  ;;  %v4211_v23 = vadd.s32 127, %v4210_v39  ;;  %5198 = vst [vmem:[#allocation7 + $0xc0] sm:$0xff] %v4095_v30  ;;  %v4312_v46 = vsel %vm4311_vm5, 1, %v15336_v56  ;;  %v4313_v36 = vadd.s32 %v4307_v38, %v4303_v28 }
 0x407   :  { %v4326_v3 = vmul.u32 %v4324_v62, %v13941_v12  ;;  %v4327_v41 = vmul.u32 %v4323_v11, %v4300_v19  ;;  %v4308_v0 = vshrl.u32 %v4304_v24, 16  ;;  %v4314_v47 = vadd.s32 %v4312_v46, %v4306_v15 }
 0x408   :  { %v4209_v52 = vor.u32 %v4208_v29, %v4207_v20  ;;  %v4212_v17 = vshll.u32 %v4211_v23, 23  ;;  %vm4315_vm6 = vc.u32 %v4313_v36, %v4309_v33  ;;  %v4328_v57 = vmul.u32 %v4324_v62, %v4300_v19 }
 0x409   :  { %v4329_v25 = vshll.u32 %v4326_v3, 16  ;;  %v4331_v6 = vshll.u32 %v4327_v41, 16  ;;  %v4310_v39 = vshrl.u32 %v4305_v14, 16  ;;  %v4316_v63 = vsel %vm4315_vm6, 1, %v15336_v56 }
 0x40a   :  { %v4213_v18 = vor.u32 4788187, %v4212_v17  ;;  %v4216_v1 = vcvt.s32.f32 %v4209_v52  ;;  %v4318_v30 = vadd.s32 %v4316_v63, %v4314_v47  ;;  %vm4415_vm2 = vcmp.gt.s32.totalorder %v4414_v35, 0 }
 0x40b   :  { %vm4333_vm0 = vc.u32 %v4325_v16, %v4329_v25  ;;  %v4335_v51 = vadd.s32 %v4329_v25, %v4325_v16  ;;  %v4289_v29 = vsel %vm4283_vm3, %v4286_v31, %v4288_v55  ;;  %v4416_v24 = vsel %vm4415_vm2, %v4414_v35, 0 }
 0x40c   :  { %v4214_v28 = vand.u32 2147483647, %v4213_v18  ;;  %v4334_v12 = vsel %vm4333_vm0, 1, %v15336_v56  ;;  %v4319_v33 = vadd.s32 %v4318_v30, %v4308_v0  ;;  %v4330_v19 = vshrl.u32 %v4326_v3, 16 }
 0x40d   :  { %v4336_v23 = vadd.s32 %v4334_v12, %v4328_v57  ;;  %vm4337_vm13 = vc.u32 %v4335_v51, %v4331_v6  ;;  %v14007_v11 = vadd.s32 %v4335_v51, %v4331_v6  ;;  %v4418_v63 = vand.u32 31, %v4416_v24 }
 0x40e   :  { %v4217_v38 = vmul.f32 %v4216_v1, %v4214_v28  ;;  %v4338_v14 = vsel %vm4337_vm13, 1, %v15336_v56  ;;  %vm4098_vm10 = vcmp.lt.s32.totalorder %v15467_v9, 0  ;;  %v14010_v15 = vadd.s32 %v4319_v33, %v4310_v39 }
 0x40f   :  { %v4332_v62 = vshrl.u32 %v4327_v41, 16  ;;  %v4340_v32 = vadd.s32 %v4338_v14, %v4336_v23  ;;  %v15484_v55 = vand.u32 2147483647, %v15467_v9  ;;  %v15487_v20 = vand.u32 2147483647, %v15481_v61 }
 0x410   :  { %v4218_v31 = vxor.u32 2147483648, %v4217_v38  ;;  %v14020_v46 = vsub.s32 32, %v4418_v63  ;;  %v15488_v51 = vsub.s32 4, %v13930_v54  ;;  %v4343_v41 = vmul.u32 %v13924_v26, %v4289_v29 }
 0x411   :  { %vm14014_vm3 = vcmp.le.f32.partialorder %v15484_v55, 0.7853982  ;;  %v4411_v16 = vand.u32 8388607, %v15487_v20  ;;  %v4341_v3 = vadd.s32 %v4340_v32, %v4330_v19  ;;  %v14026_v52 = vshrl.u32 %v4416_v24, 5 }
 0x412   :  { %v4221_v36 = vsel %vm4098_vm10, %v15488_v51, %v13930_v54  ;;  %v4219_v17 = vsel %vm4098_vm10, %v4218_v31, %v4217_v38  ;;  %vm4345_vm15 = vc.u32 %v14010_v15, %v14007_v11  ;;  %v4421_v0 = vshll.u32 %v15335_v2, %v4418_v63 }
 0x413   :  { %v4424_v47 = vshll.u32 %v15330_v44, %v4418_v63  ;;  %v4222_v57 = vsel %vm14014_vm3, %v15467_v9, %v4219_v17  ;;  %v4342_v25 = vadd.s32 %v4341_v3, %v4332_v62  ;;  %v4425_v54 = vshrl.u32 %v15331_v59, %v14020_v46 }
 0x414   :  { %v4430_v26 = vshll.u32 %v15332_v53, %v4418_v63  ;;  %v4224_v6 = vmul.f32 %v4222_v57, %v4222_v57  ;;  %v4427_v18 = vshll.u32 %v15331_v59, %v4418_v63  ;;  %v4428_v1 = vshrl.u32 %v15332_v53, %v14020_v46 }
 0x415   :  { %v4431_v39 = vshrl.u32 %v15333_v49, %v14020_v46  ;;  %v4346_v30 = vadd.s32 1, %v4342_v25  ;;  %v4422_v28 = vshrl.u32 %v15330_v44, %v14020_v46  ;;  %v4433_v29 = vshll.u32 %v15333_v49, %v4418_v63 }
 0x416   :  { %v4434_v12 = vshrl.u32 %v15334_v60, %v14020_v46  ;;  %v14050_v24 = vsel %vm14014_vm3, 0, %v4221_v36  ;;  %v4225_v33 = vmul.f32 -0.001358992, %v4224_v6  ;;  %v4232_v19 = vmul.f32 -0.00019511016, %v4224_v6 }
 0x417   :  { %15489 = vst [vmem:[#allocation104_spill] sm:$0xff] %v14050_v24  ;;  %v4412_v23 = vor.u32 8388608, %v4411_v16  ;;  %v4347_v38 = vsel %vm4345_vm15, %v4346_v30, %v4342_v25  ;;  %v14055_v14 = vor.u32 %v4425_v54, %v4424_v47  ;;  %v4432_v62 = vor.u32 %v4431_v39, %v4430_v26 }
 0x418   :  { %v4435_v32 = vor.u32 %v4434_v12, %v4433_v29  ;;  %v4226_v55 = vadd.f32 0.041655596, %v4225_v33  ;;  %v4233_v63 = vadd.f32 0.008332121, %v4232_v19  ;;  %v4348_v31 = vadd.s32 %v4347_v38, %v4343_v41 }
 0x419   :  { %v14057_v20 = vor.u32 %v4428_v1, %v4427_v18  ;;  %v4240_v35 = vand.u32 3, %v14050_v24  ;;  %v4423_v51 = vor.u32 %v4422_v28, %v4421_v0  ;;  %vm4436_vm5 = vcmp.lt.s32.totalorder %v14026_v52, 1 }
 0x41a   :  { %vm4439_vm6 = vcmp.lt.s32.totalorder %v14026_v52, 4  ;;  %v4227_v16 = vmul.f32 %v4226_v55, %v4224_v6  ;;  %v4234_v36 = vmul.f32 %v4233_v63, %v4224_v6  ;;  %v4349_v3 = vadd.s32 536870912, %v4348_v31 }
 0x41b   :  { %vm4438_vm0 = vcmp.lt.s32.totalorder %v14026_v52, 3  ;;  %vm4437_vm2 = vcmp.lt.s32.totalorder %v14026_v52, 2  ;;  %v4445_v17 = vsel %vm4439_vm6, %v4432_v62, 920167782  ;;  %v4449_v41 = vsel %vm4439_vm6, %v4435_v32, 1326507024 }
 0x41c   :  { %v14068_v47 = vshll.u32 %v4412_v23, 8  ;;  %v4228_v0 = vadd.f32 -0.4999988, %v4227_v16  ;;  %v4235_v25 = vadd.f32 -0.16666654, %v4234_v36  ;;  %v14070_v54 = vshrl.u32 %v4349_v3, 30 }
 0x41d   :  { %v4448_v26 = vsel %vm4436_vm5, %v14055_v14, %v14057_v20  ;;  %vm4241_vm13 = vcmp.lt.s32.totalorder %v4240_v35, 2  ;;  %v4444_v18 = vsel %vm4436_vm5, %v4423_v51, %v14055_v14  ;;  %v4450_v1 = vsel %vm4438_vm0, %v4432_v62, %v4449_v41 }
 0x41e   :  { %v4229_v39 = vmul.f32 %v4228_v0, %v4224_v6  ;;  %v4236_v30 = vmul.f32 %v4235_v25, %v4224_v6  ;;  %v4351_v28 = vshll.u32 %v14070_v54, 30  ;;  %v4446_v29 = vsel %vm4438_vm0, %v14057_v20, %v4445_v17 }
 0x41f   :  { %vm4242_vm10 = vcmp.eq.s32.totalorder %v4240_v35, 0  ;;  %v4451_v12 = vsel %vm4437_vm2, %v4448_v26, %v4450_v1  ;;  %v4453_v33 = vand.u32 65535, %v14068_v47  ;;  %v4454_v19 = vshrl.u32 %v14068_v47, 16 }
 0x420   :  { %v14089_v23 = vadd.f32 1.0, %v4229_v39  ;;  %v4237_v38 = vadd.f32 1.0, %v4236_v30  ;;  %vm4245_vm3 = vcmp.eq.s32.totalorder %v4240_v35, 2  ;;  %v4352_v62 = vsub.s32 %v4348_v31, %v4351_v28  ;;  %v15492_v35 = vld [vmem:[#allocation40_spill] sm:$0xff] }
 0x421   :  { %v4420_v6 = vshrl.u32 %v15335_v2, %v14020_v46  ;;  %v4447_v32 = vsel %vm4437_vm2, %v4444_v18, %v4446_v29  ;;  %v4455_v55 = vand.u32 65535, %v4451_v12  ;;  %v4456_v63 = vshrl.u32 %v4451_v12, 16 }
 0x422   :  { %15490 = vst [vmem:[#allocation105_spill] sm:$0xff] %v14089_v23  ;;  %v14095_v16 = vmul.f32 %v4237_v38, %v4222_v57  ;;  %v15258_v36 = vxor.u32 2147483648, %v14089_v23  ;;  %vm4353_vm15 = vcmp.lt.s32.totalorder %v4352_v62, 0  ;;  %v4354_v3 = vsub.s32 0, %v4352_v62 }
 0x423   :  { %v4457_v17 = vmul.u32 %v4455_v55, %v4453_v33  ;;  %v4458_v41 = vmul.u32 %v4456_v63, %v4453_v33  ;;  %v14098_v0 = vmul.u32 %v4455_v55, %v4454_v19  ;;  %v4477_v25 = vand.u32 65535, %v4447_v32 }
 0x424   :  { %15491 = vst [vmem:[#allocation106_spill] sm:$0xff] %v14095_v16  ;;  %v15259_v31 = vxor.u32 2147483648, %v14095_v16  ;;  %v4247_v46 = vsel %vm4245_vm3, %v15258_v36, %v14095_v16  ;;  %v4355_v26 = vsel %vm4353_vm15, %v4354_v3, %v4352_v62  ;;  %v4478_v18 = vshrl.u32 %v4447_v32, 16 }
 0x425   :  { %vm15266_vm12 = vweird.f32 %v15467_v9  ;;  %v4356_v57 = vclz %v4355_v26  ;;  %v4460_v1 = vmul.u32 %v4456_v63, %v4454_v19  ;;  %v4461_v39 = vshll.u32 %v4458_v41, 16 }
 0x426   :  { %v4244_v30 = vsel %vm4242_vm10, %v14089_v23, %v15259_v31  ;;  %v4344_v28 = vadd.s32 %v14007_v11, %v14010_v15  ;;  %v4463_v29 = vshll.u32 %v14098_v0, 16  ;;  %v4480_v12 = vmul.u32 %v4478_v18, %v4453_v33 }
 0x427   :  { %v4248_v38 = vsel %vm4241_vm13, %v4244_v30, %v4247_v46  ;;  %v10315_v55 = vadd.s32 4294967294, %v4356_v57  ;;  %vm4465_vm3 = vc.u32 %v4457_v17, %v4461_v39  ;;  %v4467_v32 = vadd.s32 %v4461_v39, %v4457_v17 }
 0x428   :  { %v4249_v63 = vsel %vm15266_vm12, nan, %v4248_v38  ;;  %v4440_v3 = vsel %vm4436_vm5, %v4420_v6, %v4423_v51  ;;  %v4466_v26 = vsel %vm4465_vm3, 1, %v15336_v56  ;;  %v4481_v36 = vmul.u32 %v4477_v25, %v4454_v19 }
 0x429   :  { %vm10316_vm10 = vcmp.lt.s32.totalorder %v10315_v55, 0  ;;  %v4441_v11 = vsel %vm4439_vm6, %v14057_v20, 2102212464  ;;  %v4468_v15 = vadd.s32 %v4466_v26, %v4460_v1  ;;  %v4561_v46 = vand.u32 2139095040, %v15492_v35  ;;  %5199 = vst [vmem:[#allocation7 + $0xc8] sm:$0xff] %v4249_v63 }
 0x42a   :  { %v4359_v57 = vsel %vm10316_vm10, 0, %v10315_v55  ;;  %vm4469_vm13 = vc.u32 %v4467_v32, %v4463_v29  ;;  %v4479_v17 = vmul.u32 %v4477_v25, %v4453_v33  ;;  %v4483_v39 = vshll.u32 %v4480_v12, 16 }
 0x42b   :  { %v4360_v30 = vsub.s32 32, %v4359_v57  ;;  %v4361_v38 = vshll.u32 %v4352_v62, %v4359_v57  ;;  %v4364_v31 = vsub.s32 4294967266, %v4359_v57  ;;  %v4462_v51 = vshrl.u32 %v4458_v41, 16 }
 0x42c   :  { %v4442_v6 = vsel %vm4438_vm0, %v14055_v14, %v4441_v11  ;;  %v4470_v9 = vsel %vm4469_vm13, 1, %v15336_v56  ;;  %v4482_v23 = vmul.u32 %v4478_v18, %v4454_v19  ;;  %v4485_v20 = vshll.u32 %v4481_v36, 16 }
 0x42d   :  { %v4362_v1 = vshrl.u32 %v4344_v28, %v4360_v30  ;;  %v4365_v26 = vadd.s32 127, %v4364_v31  ;;  %v4472_v16 = vadd.s32 %v4470_v9, %v4468_v15  ;;  %v15265_v55 = vand.u32 2147483647, %v15492_v35 }
 0x42e   :  { %v4464_v33 = vshrl.u32 %v14098_v0, 16  ;;  %vm4487_vm5 = vc.u32 %v4479_v17, %v4483_v39  ;;  %v4489_v25 = vadd.s32 %v4483_v39, %v4479_v17  ;;  %v4562_v62 = vshrl.u32 %v4561_v46, 23 }
 0x42f   :  { %v4363_v29 = vor.u32 %v4362_v1, %v4361_v38  ;;  %v4366_v41 = vshll.u32 %v4365_v26, 23  ;;  %v4473_v32 = vadd.s32 %v4472_v16, %v4462_v51  ;;  %v4488_v63 = vsel %vm4487_vm5, 1, %v15336_v56 }
 0x430   :  { %v4484_v14 = vshrl.u32 %v4480_v12, 16  ;;  %v4490_v11 = vadd.s32 %v4488_v63, %v4482_v23  ;;  %vm4491_vm6 = vc.u32 %v4489_v25, %v4485_v20  ;;  %v10320_v19 = vadd.s32 4294967169, %v4562_v62 }
 0x431   :  { %v4367_v18 = vor.u32 4788187, %v4366_v41  ;;  %v4370_v28 = vcvt.s32.f32 %v4363_v29  ;;  %v4374_v9 = vsub.s32 4, %v14070_v54  ;;  %v4492_v31 = vsel %vm4491_vm6, 1, %v15336_v56  ;;  %v15495_v29 = vld [vmem:[#allocation41_spill] sm:$0xff] }
 0x432   :  { %v4486_v15 = vshrl.u32 %v4481_v36, 16  ;;  %v4494_v0 = vadd.s32 %v4492_v31, %v4490_v11  ;;  %v4568_v57 = vadd.s32 1, %v10320_v19  ;;  %v14131_v46 = vadd.s32 %v4473_v32, %v4464_v33 }
 0x433   :  { %v4368_v17 = vand.u32 2147483647, %v4367_v18  ;;  %v14133_v39 = vadd.s32 %v4489_v25, %v4485_v20  ;;  %vm4252_vm0 = vcmp.lt.s32.totalorder %v15478_v13, 0  ;;  %v4443_v23 = vsel %vm4437_vm2, %v4440_v3, %v4442_v6 }
 0x434   :  { %v4495_v16 = vadd.s32 %v4494_v0, %v4484_v14  ;;  %vm4569_vm15 = vcmp.gt.s32.totalorder %v4568_v57, 0  ;;  %v4375_v30 = vsel %vm4252_vm0, %v4374_v9, %v14070_v54  ;;  %v4565_v36 = vand.u32 8388607, %v15265_v55 }
 0x435   :  { %v4371_v12 = vmul.f32 %v4370_v28, %v4368_v17  ;;  %v4570_v38 = vsel %vm4569_vm15, %v4568_v57, 0  ;;  %v15493_v20 = vand.u32 2147483647, %v15478_v13  ;;  %v4497_v52 = vmul.u32 %v14068_v47, %v4443_v23 }
 0x436   :  { %v4496_v51 = vadd.s32 %v4495_v16, %v4486_v15  ;;  %v4572_v1 = vand.u32 31, %v4570_v38  ;;  %vm4499_vm2 = vc.u32 %v14131_v46, %v14133_v39  ;;  %v4566_v62 = vor.u32 8388608, %v4565_v36 }
 0x437   :  { %vm4251_vm3 = vcmp.le.f32.partialorder %v15493_v20, 0.7853982  ;;  %v4372_v26 = vxor.u32 2147483648, %v4371_v12  ;;  %v14159_v63 = vshrl.u32 %v4570_v38, 5  ;;  %v4715_v38 = vand.u32 2139095040, %v15495_v29 }
 0x438   :  { %v14148_v3 = vsel %vm4251_vm3, 0, %v4375_v30  ;;  %v4500_v6 = vadd.s32 1, %v4496_v51  ;;  %v4573_v33 = vsub.s32 32, %v4572_v1  ;;  %v4578_v14 = vshll.u32 %v15330_v44, %v4572_v1 }
 0x439   :  { %15494 = vst [vmem:[#allocation107_spill] sm:$0xff] %v14148_v3  ;;  %v4373_v54 = vsel %vm4252_vm0, %v4372_v26, %v4371_v12  ;;  %v14153_v25 = vand.u32 3, %v14148_v3  ;;  %v4581_v18 = vshll.u32 %v15331_v59, %v4572_v1  ;;  %v4584_v28 = vshll.u32 %v15332_v53, %v4572_v1 }
 0x43a   :  { %v14157_v32 = vsel %vm4251_vm3, %v15478_v13, %v4373_v54  ;;  %v4501_v47 = vsel %vm4499_vm2, %v4500_v6, %v4496_v51  ;;  %v4579_v9 = vshrl.u32 %v15331_v59, %v4573_v33  ;;  %v4582_v31 = vshrl.u32 %v15332_v53, %v4573_v33 }
 0x43b   :  { %v4378_v11 = vmul.f32 %v14157_v32, %v14157_v32  ;;  %v4502_v19 = vadd.s32 %v4501_v47, %v4497_v52  ;;  %v4585_v15 = vshrl.u32 %v15333_v49, %v4573_v33  ;;  %v4587_v0 = vshll.u32 %v15333_v49, %v4572_v1 }
 0x43c   :  { %v14170_v16 = vshll.u32 %v4566_v62, 8  ;;  %v4575_v12 = vshll.u32 %v15335_v2, %v4572_v1  ;;  %v4576_v30 = vshrl.u32 %v15330_v44, %v4573_v33  ;;  %v4588_v36 = vshrl.u32 %v15334_v60, %v4573_v33 }
 0x43d   :  { %v4379_v57 = vmul.f32 -0.001358992, %v4378_v11  ;;  %v4386_v17 = vmul.f32 -0.00019511016, %v4378_v11  ;;  %v4503_v23 = vadd.s32 536870912, %v4502_v19  ;;  %v4586_v52 = vor.u32 %v4585_v15, %v4584_v28 }
 0x43e   :  { %vm4399_vm10 = vcmp.eq.s32.totalorder %v14153_v25, 2  ;;  %v14179_v6 = vor.u32 %v4579_v9, %v4578_v14  ;;  %v4583_v54 = vor.u32 %v4582_v31, %v4581_v18  ;;  %v4589_v62 = vor.u32 %v4588_v36, %v4587_v0 }
 0x43f   :  { %v4380_v51 = vadd.f32 0.041655596, %v4379_v57  ;;  %v4387_v20 = vadd.f32 0.008332121, %v4386_v17  ;;  %v14176_v26 = vshrl.u32 %v4503_v23, 30  ;;  %vm4593_vm13 = vcmp.lt.s32.totalorder %v14159_v63, 4 }
 0x440   :  { %vm4590_vm5 = vcmp.lt.s32.totalorder %v14159_v63, 1  ;;  %vm4396_vm6 = vcmp.eq.s32.totalorder %v14153_v25, 0  ;;  %v4577_v57 = vor.u32 %v4576_v30, %v4575_v12  ;;  %vm4592_vm0 = vcmp.lt.s32.totalorder %v14159_v63, 3 }
 0x441   :  { %v4381_v1 = vmul.f32 %v4380_v51, %v4378_v11  ;;  %v4388_v47 = vmul.f32 %v4387_v20, %v4378_v11  ;;  %v4505_v55 = vshll.u32 %v14176_v26, 30  ;;  %v14187_v28 = vand.u32 65535, %v14170_v16 }
 0x442   :  { %v4716_v14 = vshrl.u32 %v4715_v38, 23  ;;  %vm4395_vm15 = vcmp.lt.s32.totalorder %v14153_v25, 2  ;;  %v4599_v15 = vsel %vm4593_vm13, %v4586_v52, 920167782  ;;  %vm15276_vm3 = vweird.f32 %v15478_v13 }
 0x443   :  { %v4382_v9 = vadd.f32 -0.4999988, %v4381_v1  ;;  %v4389_v18 = vadd.f32 -0.16666654, %v4388_v47  ;;  %v4506_v31 = vsub.s32 %v4502_v19, %v4505_v55  ;;  %v4574_v0 = vshrl.u32 %v15335_v2, %v4573_v33 }
 0x444   :  { %vm4591_vm2 = vcmp.lt.s32.totalorder %v14159_v63, 2  ;;  %v4602_v17 = vsel %vm4590_vm5, %v14179_v6, %v4583_v54  ;;  %v4603_v23 = vsel %vm4593_vm13, %v4589_v62, 1326507024  ;;  %v4598_v19 = vsel %vm4590_vm5, %v4577_v57, %v14179_v6 }
 0x445   :  { %v4383_v12 = vmul.f32 %v4382_v9, %v4378_v11  ;;  %v4390_v30 = vmul.f32 %v4389_v18, %v4378_v11  ;;  %vm4507_vm12 = vcmp.lt.s32.totalorder %v4506_v31, 0  ;;  %v4508_v55 = vsub.s32 0, %v4506_v31 }
 0x446   :  { %v4600_v33 = vsel %vm4592_vm0, %v4583_v54, %v4599_v15  ;;  %v4604_v36 = vsel %vm4592_vm0, %v4586_v52, %v4603_v23  ;;  %v4608_v38 = vshrl.u32 %v14170_v16, 16  ;;  %v4498_v1 = vadd.s32 %v14133_v39, %v14131_v46 }
 0x447   :  { %v14208_v51 = vadd.f32 1.0, %v4383_v12  ;;  %v4391_v20 = vadd.f32 1.0, %v4390_v30  ;;  %v4509_v62 = vsel %vm4507_vm12, %v4508_v55, %v4506_v31  ;;  %v4605_v11 = vsel %vm4591_vm2, %v4602_v17, %v4604_v36 }
 0x448   :  { %v4510_v47 = vclz %v4509_v62  ;;  %v4609_v9 = vand.u32 65535, %v4605_v11  ;;  %v4610_v18 = vshrl.u32 %v4605_v11, 16  ;;  %v4594_v23 = vsel %vm4590_vm5, %v4574_v0, %v4577_v57 }
 0x449   :  { %15496 = vst [vmem:[#allocation41_spill] sm:$0xff] %v14208_v51  ;;  %v14215_v15 = vmul.f32 %v4391_v20, %v14157_v32  ;;  %v15267_v52 = vxor.u32 2147483648, %v14208_v51  ;;  %v10323_v12 = vadd.s32 4294967169, %v4716_v14  ;;  %v4601_v17 = vsel %vm4591_vm2, %v4598_v19, %v4600_v33 }
 0x44a   :  { %v10318_v30 = vadd.s32 4294967294, %v4510_v47  ;;  %v4612_v46 = vmul.u32 %v4610_v18, %v14187_v28  ;;  %v4595_v57 = vsel %vm4593_vm13, %v4583_v54, 2102212464  ;;  %v4613_v14 = vmul.u32 %v4609_v9, %v4608_v38 }
 0x44b   :  { %15497 = vst [vmem:[#allocation108_spill] sm:$0xff] %v14215_v15  ;;  %v15272_v39 = vxor.u32 2147483648, %v14215_v15  ;;  %v4401_v32 = vsel %vm4399_vm10, %v15267_v52, %v14215_v15  ;;  %v4611_v0 = vmul.u32 %v4609_v9, %v14187_v28  ;;  %v4631_v20 = vand.u32 65535, %v4601_v17 }
 0x44c   :  { %vm10319_vm12 = vcmp.lt.s32.totalorder %v10318_v30, 0  ;;  %v4615_v36 = vshll.u32 %v4612_v46, 16  ;;  %v4614_v62 = vmul.u32 %v4610_v18, %v4608_v38  ;;  %v4632_v11 = vshrl.u32 %v4601_v17, 16 }
 0x44d   :  { %v4398_v19 = vsel %vm4396_vm6, %v14208_v51, %v15272_v39  ;;  %v4513_v33 = vsel %vm10319_vm12, 0, %v10318_v30  ;;  %v4596_v41 = vsel %vm4592_vm0, %v14179_v6, %v4595_v57  ;;  %v4617_v15 = vshll.u32 %v4613_v14, 16 }
 0x44e   :  { %v4402_v47 = vsel %vm4395_vm15, %v4398_v19, %v4401_v32  ;;  %v4514_v52 = vsub.s32 32, %v4513_v33  ;;  %v4515_v54 = vshll.u32 %v4506_v31, %v4513_v33  ;;  %v4518_v55 = vsub.s32 4294967266, %v4513_v33 }
 0x44f   :  { %v4403_v9 = vsel %vm15276_vm3, nan, %v4402_v47  ;;  %v4722_v3 = vadd.s32 1, %v10323_v12  ;;  %vm4619_vm10 = vc.u32 %v4611_v0, %v4615_v36  ;;  %v4633_v18 = vmul.u32 %v4631_v20, %v14187_v28 }
 0x450   :  { %v4516_v24 = vshrl.u32 %v4498_v1, %v4514_v52  ;;  %v4519_v39 = vadd.s32 127, %v4518_v55  ;;  %5200 = vst [vmem:[#allocation7 + $0xd0] sm:$0xff] %v4403_v9  ;;  %v4620_v25 = vsel %vm4619_vm10, 1, %v15336_v56  ;;  %v4621_v30 = vadd.s32 %v4615_v36, %v4611_v0 }
 0x451   :  { %v4634_v31 = vmul.u32 %v4632_v11, %v14187_v28  ;;  %v4635_v17 = vmul.u32 %v4631_v20, %v4608_v38  ;;  %v4616_v33 = vshrl.u32 %v4612_v46, 16  ;;  %v4622_v47 = vadd.s32 %v4620_v25, %v4614_v62 }
 0x452   :  { %v4517_v32 = vor.u32 %v4516_v24, %v4515_v54  ;;  %v4520_v19 = vshll.u32 %v4519_v39, 23  ;;  %vm4623_vm13 = vc.u32 %v4621_v30, %v4617_v15  ;;  %v4636_v6 = vmul.u32 %v4632_v11, %v4608_v38 }
 0x453   :  { %v4637_v57 = vshll.u32 %v4634_v31, 16  ;;  %v4639_v12 = vshll.u32 %v4635_v17, 16  ;;  %v4618_v55 = vshrl.u32 %v4613_v14, 16  ;;  %v4624_v13 = vsel %vm4623_vm13, 1, %v15336_v56 }
 0x454   :  { %v4521_v1 = vor.u32 4788187, %v4520_v19  ;;  %v4524_v52 = vcvt.s32.f32 %v4517_v32  ;;  %v4626_v9 = vadd.s32 %v4624_v13, %v4622_v47  ;;  %vm4723_vm6 = vcmp.gt.s32.totalorder %v4722_v3, 0 }
 0x455   :  { %vm4641_vm5 = vc.u32 %v4633_v18, %v4637_v57  ;;  %v4643_v51 = vadd.s32 %v4637_v57, %v4633_v18  ;;  %v4597_v24 = vsel %vm4591_vm2, %v4594_v23, %v4596_v41  ;;  %v4724_v46 = vsel %vm4723_vm6, %v4722_v3, 0 }
 0x456   :  { %v4522_v0 = vand.u32 2147483647, %v4521_v1  ;;  %v4642_v28 = vsel %vm4641_vm5, 1, %v15336_v56  ;;  %v4627_v15 = vadd.s32 %v4626_v9, %v4616_v33  ;;  %v4638_v38 = vshrl.u32 %v4634_v31, 16 }
 0x457   :  { %v4644_v39 = vadd.s32 %v4642_v28, %v4636_v6  ;;  %vm4645_vm0 = vc.u32 %v4643_v51, %v4639_v12  ;;  %v14253_v20 = vadd.s32 %v4643_v51, %v4639_v12  ;;  %v4726_v13 = vand.u32 31, %v4724_v46 }
 0x458   :  { %v4525_v36 = vmul.f32 %v4524_v52, %v4522_v0  ;;  %v4646_v14 = vsel %vm4645_vm0, 1, %v15336_v56  ;;  %vm4406_vm15 = vcmp.lt.s32.totalorder %v15481_v61, 0  ;;  %v14256_v62 = vadd.s32 %v4627_v15, %v4618_v55 }
 0x459   :  { %v4640_v11 = vshrl.u32 %v4635_v17, 16  ;;  %v4648_v63 = vadd.s32 %v4646_v14, %v4644_v39  ;;  %v15498_v41 = vand.u32 2147483647, %v15481_v61  ;;  %v15501_v54 = vand.u32 2147483647, %v15495_v29 }
 0x45a   :  { %v4526_v23 = vxor.u32 2147483648, %v4525_v36  ;;  %v14266_v25 = vsub.s32 32, %v4726_v13  ;;  %v15502_v51 = vsub.s32 4, %v14176_v26  ;;  %v4651_v17 = vmul.u32 %v14170_v16, %v4597_v24 }
 0x45b   :  { %vm14260_vm2 = vcmp.le.f32.partialorder %v15498_v41, 0.7853982  ;;  %v4719_v18 = vand.u32 8388607, %v15501_v54  ;;  %v4649_v31 = vadd.s32 %v4648_v63, %v4638_v38  ;;  %v14272_v32 = vshrl.u32 %v4724_v46, 5 }
 0x45c   :  { %v4529_v30 = vsel %vm4406_vm15, %v15502_v51, %v14176_v26  ;;  %v4527_v19 = vsel %vm4406_vm15, %v4526_v23, %v4525_v36  ;;  %vm4653_vm12 = vc.u32 %v14256_v62, %v14253_v20  ;;  %v4729_v33 = vshll.u32 %v15335_v2, %v4726_v13 }
 0x45d   :  { %v4732_v47 = vshll.u32 %v15330_v44, %v4726_v13  ;;  %v4530_v6 = vsel %vm14260_vm2, %v15481_v61, %v4527_v19  ;;  %v4650_v57 = vadd.s32 %v4649_v31, %v4640_v11  ;;  %v4733_v26 = vshrl.u32 %v15331_v59, %v14266_v25 }
 0x45e   :  { %v4738_v16 = vshll.u32 %v15332_v53, %v4726_v13  ;;  %v4532_v12 = vmul.f32 %v4530_v6, %v4530_v6  ;;  %v4735_v1 = vshll.u32 %v15331_v59, %v4726_v13  ;;  %v4736_v52 = vshrl.u32 %v15332_v53, %v14266_v25 }
 0x45f   :  { %v4739_v55 = vshrl.u32 %v15333_v49, %v14266_v25  ;;  %v4654_v9 = vadd.s32 1, %v4650_v57  ;;  %v4730_v0 = vshrl.u32 %v15330_v44, %v14266_v25  ;;  %v4741_v24 = vshll.u32 %v15333_v49, %v4726_v13 }
 0x460   :  { %v4742_v28 = vshrl.u32 %v15334_v60, %v14266_v25  ;;  %v14296_v46 = vsel %vm14260_vm2, 0, %v4529_v30  ;;  %v4533_v15 = vmul.f32 -0.001358992, %v4532_v12  ;;  %v4540_v38 = vmul.f32 -0.00019511016, %v4532_v12 }
 0x461   :  { %15503 = vst [vmem:[#allocation109_spill] sm:$0xff] %v14296_v46  ;;  %v4720_v39 = vor.u32 8388608, %v4719_v18  ;;  %v4655_v36 = vsel %vm4653_vm12, %v4654_v9, %v4650_v57  ;;  %v14301_v14 = vor.u32 %v4733_v26, %v4732_v47  ;;  %v4740_v11 = vor.u32 %v4739_v55, %v4738_v16 }
 0x462   :  { %v4743_v63 = vor.u32 %v4742_v28, %v4741_v24  ;;  %v4534_v41 = vadd.f32 0.041655596, %v4533_v15  ;;  %v4541_v13 = vadd.f32 0.008332121, %v4540_v38  ;;  %v4656_v23 = vadd.s32 %v4655_v36, %v4651_v17 }
 0x463   :  { %v14303_v54 = vor.u32 %v4736_v52, %v4735_v1  ;;  %v4548_v3 = vand.u32 3, %v14296_v46  ;;  %v4731_v51 = vor.u32 %v4730_v0, %v4729_v33  ;;  %vm4744_vm10 = vcmp.lt.s32.totalorder %v14272_v32, 1 }
 0x464   :  { %vm4747_vm13 = vcmp.lt.s32.totalorder %v14272_v32, 4  ;;  %v4535_v18 = vmul.f32 %v4534_v41, %v4532_v12  ;;  %v4542_v30 = vmul.f32 %v4541_v13, %v4532_v12  ;;  %v4657_v31 = vadd.s32 536870912, %v4656_v23 }
 0x465   :  { %vm4746_vm5 = vcmp.lt.s32.totalorder %v14272_v32, 3  ;;  %vm4745_vm6 = vcmp.lt.s32.totalorder %v14272_v32, 2  ;;  %v4753_v19 = vsel %vm4747_vm13, %v4740_v11, 920167782  ;;  %v4757_v17 = vsel %vm4747_vm13, %v4743_v63, 1326507024 }
 0x466   :  { %v14314_v47 = vshll.u32 %v4720_v39, 8  ;;  %v4536_v33 = vadd.f32 -0.4999988, %v4535_v18  ;;  %v4543_v57 = vadd.f32 -0.16666654, %v4542_v30  ;;  %v14316_v26 = vshrl.u32 %v4657_v31, 30 }
 0x467   :  { %v4756_v16 = vsel %vm4744_vm10, %v14301_v14, %v14303_v54  ;;  %vm4549_vm0 = vcmp.lt.s32.totalorder %v4548_v3, 2  ;;  %v4752_v1 = vsel %vm4744_vm10, %v4731_v51, %v14301_v14  ;;  %v4758_v52 = vsel %vm4746_vm5, %v4740_v11, %v4757_v17 }
 0x468   :  { %v4537_v55 = vmul.f32 %v4536_v33, %v4532_v12  ;;  %v4544_v9 = vmul.f32 %v4543_v57, %v4532_v12  ;;  %v4659_v0 = vshll.u32 %v14316_v26, 30  ;;  %v4754_v24 = vsel %vm4746_vm5, %v14303_v54, %v4753_v19 }
 0x469   :  { %vm4550_vm15 = vcmp.eq.s32.totalorder %v4548_v3, 0  ;;  %v4759_v28 = vsel %vm4745_vm6, %v4756_v16, %v4758_v52  ;;  %v4761_v15 = vand.u32 65535, %v14314_v47  ;;  %v4762_v38 = vshrl.u32 %v14314_v47, 16 }
 0x46a   :  { %v14335_v39 = vadd.f32 1.0, %v4537_v55  ;;  %v4545_v36 = vadd.f32 1.0, %v4544_v9  ;;  %vm4553_vm2 = vcmp.eq.s32.totalorder %v4548_v3, 2  ;;  %v4660_v11 = vsub.s32 %v4656_v23, %v4659_v0  ;;  %v15506_v3 = vld [vmem:[#allocation42_spill] sm:$0xff] }
 0x46b   :  { %v4728_v12 = vshrl.u32 %v15335_v2, %v14266_v25  ;;  %v4755_v63 = vsel %vm4745_vm6, %v4752_v1, %v4754_v24  ;;  %v4763_v41 = vand.u32 65535, %v4759_v28  ;;  %v4764_v13 = vshrl.u32 %v4759_v28, 16 }
 0x46c   :  { %15504 = vst [vmem:[#allocation110_spill] sm:$0xff] %v14335_v39  ;;  %v14341_v18 = vmul.f32 %v4545_v36, %v4530_v6  ;;  %v15277_v30 = vxor.u32 2147483648, %v14335_v39  ;;  %vm4661_vm12 = vcmp.lt.s32.totalorder %v4660_v11, 0  ;;  %v4662_v31 = vsub.s32 0, %v4660_v11 }
 0x46d   :  { %v4765_v19 = vmul.u32 %v4763_v41, %v4761_v15  ;;  %v4766_v17 = vmul.u32 %v4764_v13, %v4761_v15  ;;  %v14344_v33 = vmul.u32 %v4763_v41, %v4762_v38  ;;  %v4785_v57 = vand.u32 65535, %v4755_v63 }
 0x46e   :  { %15505 = vst [vmem:[#allocation111_spill] sm:$0xff] %v14341_v18  ;;  %v15278_v23 = vxor.u32 2147483648, %v14341_v18  ;;  %v4555_v25 = vsel %vm4553_vm2, %v15277_v30, %v14341_v18  ;;  %v4663_v16 = vsel %vm4661_vm12, %v4662_v31, %v4660_v11  ;;  %v4786_v1 = vshrl.u32 %v4755_v63, 16 }
 0x46f   :  { %vm15285_vm3 = vweird.f32 %v15481_v61  ;;  %v4664_v6 = vclz %v4663_v16  ;;  %v4768_v52 = vmul.u32 %v4764_v13, %v4762_v38  ;;  %v4769_v55 = vshll.u32 %v4766_v17, 16 }
 0x470   :  { %v4552_v9 = vsel %vm4550_vm15, %v14335_v39, %v15278_v23  ;;  %v4652_v0 = vadd.s32 %v14253_v20, %v14256_v62  ;;  %v4771_v24 = vshll.u32 %v14344_v33, 16  ;;  %v4788_v28 = vmul.u32 %v4786_v1, %v4761_v15 }
 0x471   :  { %v4556_v36 = vsel %vm4549_vm0, %v4552_v9, %v4555_v25  ;;  %v10321_v41 = vadd.s32 4294967294, %v4664_v6  ;;  %vm4773_vm2 = vc.u32 %v4765_v19, %v4769_v55  ;;  %v4775_v63 = vadd.s32 %v4769_v55, %v4765_v19 }
 0x472   :  { %v4557_v13 = vsel %vm15285_vm3, nan, %v4556_v36  ;;  %v4748_v31 = vsel %vm4744_vm10, %v4728_v12, %v4731_v51  ;;  %v4774_v16 = vsel %vm4773_vm2, 1, %v15336_v56  ;;  %v4789_v30 = vmul.u32 %v4785_v57, %v4762_v38 }
 0x473   :  { %vm10322_vm15 = vcmp.lt.s32.totalorder %v10321_v41, 0  ;;  %v4749_v20 = vsel %vm4747_vm13, %v14303_v54, 2102212464  ;;  %v4776_v62 = vadd.s32 %v4774_v16, %v4768_v52  ;;  %v4869_v25 = vand.u32 2139095040, %v15506_v3  ;;  %5201 = vst [vmem:[#allocation7 + $0xd8] sm:$0xff] %v4557_v13 }
 0x474   :  { %v4667_v6 = vsel %vm10322_vm15, 0, %v10321_v41  ;;  %vm4777_vm0 = vc.u32 %v4775_v63, %v4771_v24  ;;  %v4787_v19 = vmul.u32 %v4785_v57, %v4761_v15  ;;  %v4791_v55 = vshll.u32 %v4788_v28, 16 }
 0x475   :  { %v4668_v9 = vsub.s32 32, %v4667_v6  ;;  %v4669_v36 = vshll.u32 %v4660_v11, %v4667_v6  ;;  %v4672_v23 = vsub.s32 4294967266, %v4667_v6  ;;  %v4770_v51 = vshrl.u32 %v4766_v17, 16 }
 0x476   :  { %v4750_v12 = vsel %vm4746_vm5, %v14301_v14, %v4749_v20  ;;  %v4778_v61 = vsel %vm4777_vm0, 1, %v15336_v56  ;;  %v4790_v39 = vmul.u32 %v4786_v1, %v4762_v38  ;;  %v4793_v54 = vshll.u32 %v4789_v30, 16 }
 0x477   :  { %v4670_v52 = vshrl.u32 %v4652_v0, %v4668_v9  ;;  %v4673_v16 = vadd.s32 127, %v4672_v23  ;;  %v4780_v18 = vadd.s32 %v4778_v61, %v4776_v62  ;;  %v15284_v41 = vand.u32 2147483647, %v15506_v3 }
 0x478   :  { %v4772_v15 = vshrl.u32 %v14344_v33, 16  ;;  %vm4795_vm10 = vc.u32 %v4787_v19, %v4791_v55  ;;  %v4797_v57 = vadd.s32 %v4791_v55, %v4787_v19  ;;  %v4870_v11 = vshrl.u32 %v4869_v25, 23 }
 0x479   :  { %v4671_v24 = vor.u32 %v4670_v52, %v4669_v36  ;;  %v4674_v17 = vshll.u32 %v4673_v16, 23  ;;  %v4781_v63 = vadd.s32 %v4780_v18, %v4770_v51  ;;  %v4796_v13 = vsel %vm4795_vm10, 1, %v15336_v56 }
 0x47a   :  { %v4792_v14 = vshrl.u32 %v4788_v28, 16  ;;  %v4798_v20 = vadd.s32 %v4796_v13, %v4790_v39  ;;  %vm4799_vm13 = vc.u32 %v4797_v57, %v4793_v54  ;;  %v10326_v38 = vadd.s32 4294967169, %v4870_v11 }
 0x47b   :  { %v4675_v1 = vor.u32 4788187, %v4674_v17  ;;  %v4678_v0 = vcvt.s32.f32 %v4671_v24  ;;  %v4682_v61 = vsub.s32 4, %v14316_v26  ;;  %v4800_v23 = vsel %vm4799_vm13, 1, %v15336_v56  ;;  %v15509_v24 = vld [vmem:[#allocation43_spill] sm:$0xff] }
 0x47c   :  { %v4794_v62 = vshrl.u32 %v4789_v30, 16  ;;  %v4802_v33 = vadd.s32 %v4800_v23, %v4798_v20  ;;  %v4876_v6 = vadd.s32 1, %v10326_v38  ;;  %v14377_v25 = vadd.s32 %v4781_v63, %v4772_v15 }
 0x47d   :  { %v4676_v19 = vand.u32 2147483647, %v4675_v1  ;;  %v14379_v55 = vadd.s32 %v4797_v57, %v4793_v54  ;;  %vm4560_vm5 = vcmp.lt.s32.totalorder %v15492_v35, 0  ;;  %v4751_v39 = vsel %vm4745_vm6, %v4748_v31, %v4750_v12 }
 0x47e   :  { %v4803_v18 = vadd.s32 %v4802_v33, %v4792_v14  ;;  %vm4877_vm12 = vcmp.gt.s32.totalorder %v4876_v6, 0  ;;  %v4683_v9 = vsel %vm4560_vm5, %v4682_v61, %v14316_v26  ;;  %v4873_v30 = vand.u32 8388607, %v15284_v41 }
 0x47f   :  { %v4679_v28 = vmul.f32 %v4678_v0, %v4676_v19  ;;  %v4878_v36 = vsel %vm4877_vm12, %v4876_v6, 0  ;;  %v15507_v54 = vand.u32 2147483647, %v15492_v35  ;;  %v4805_v32 = vmul.u32 %v14314_v47, %v4751_v39 }
 0x480   :  { %v4804_v51 = vadd.s32 %v4803_v18, %v4794_v62  ;;  %v4880_v52 = vand.u32 31, %v4878_v36  ;;  %vm4807_vm6 = vc.u32 %v14377_v25, %v14379_v55  ;;  %v4874_v11 = vor.u32 8388608, %v4873_v30 }
 0x481   :  { %vm4559_vm2 = vcmp.le.f32.partialorder %v15507_v54, 0.7853982  ;;  %v4680_v16 = vxor.u32 2147483648, %v4679_v28  ;;  %v14405_v13 = vshrl.u32 %v4878_v36, 5  ;;  %v5023_v36 = vand.u32 2139095040, %v15509_v24 }
 0x482   :  { %v14394_v31 = vsel %vm4559_vm2, 0, %v4683_v9  ;;  %v4808_v12 = vadd.s32 1, %v4804_v51  ;;  %v4881_v15 = vsub.s32 32, %v4880_v52  ;;  %v4886_v14 = vshll.u32 %v15330_v44, %v4880_v52 }
 0x483   :  { %15508 = vst [vmem:[#allocation42_spill] sm:$0xff] %v14394_v31  ;;  %v4681_v26 = vsel %vm4560_vm5, %v4680_v16, %v4679_v28  ;;  %v14399_v57 = vand.u32 3, %v14394_v31  ;;  %v4889_v1 = vshll.u32 %v15331_v59, %v4880_v52  ;;  %v4892_v0 = vshll.u32 %v15332_v53, %v4880_v52 }
 0x484   :  { %v14403_v63 = vsel %vm4559_vm2, %v15492_v35, %v4681_v26  ;;  %v4809_v47 = vsel %vm4807_vm6, %v4808_v12, %v4804_v51  ;;  %v4887_v61 = vshrl.u32 %v15331_v59, %v4881_v15  ;;  %v4890_v23 = vshrl.u32 %v15332_v53, %v4881_v15 }
 0x485   :  { %v4686_v20 = vmul.f32 %v14403_v63, %v14403_v63  ;;  %v4810_v38 = vadd.s32 %v4809_v47, %v4805_v32  ;;  %v4893_v62 = vshrl.u32 %v15333_v49, %v4881_v15  ;;  %v4895_v33 = vshll.u32 %v15333_v49, %v4880_v52 }
 0x486   :  { %v14416_v18 = vshll.u32 %v4874_v11, 8  ;;  %v4883_v28 = vshll.u32 %v15335_v2, %v4880_v52  ;;  %v4884_v9 = vshrl.u32 %v15330_v44, %v4881_v15  ;;  %v4896_v30 = vshrl.u32 %v15334_v60, %v4881_v15 }
 0x487   :  { %v4687_v6 = vmul.f32 -0.001358992, %v4686_v20  ;;  %v4694_v19 = vmul.f32 -0.00019511016, %v4686_v20  ;;  %v4811_v39 = vadd.s32 536870912, %v4810_v38  ;;  %v4894_v32 = vor.u32 %v4893_v62, %v4892_v0 }
 0x488   :  { %vm4707_vm15 = vcmp.eq.s32.totalorder %v14399_v57, 2  ;;  %v14425_v12 = vor.u32 %v4887_v61, %v4886_v14  ;;  %v4891_v26 = vor.u32 %v4890_v23, %v4889_v1  ;;  %v4897_v11 = vor.u32 %v4896_v30, %v4895_v33 }
 0x489   :  { %v4688_v51 = vadd.f32 0.041655596, %v4687_v6  ;;  %v4695_v54 = vadd.f32 0.008332121, %v4694_v19  ;;  %v14422_v16 = vshrl.u32 %v4811_v39, 30  ;;  %vm4901_vm0 = vcmp.lt.s32.totalorder %v14405_v13, 4 }
 0x48a   :  { %vm4898_vm10 = vcmp.lt.s32.totalorder %v14405_v13, 1  ;;  %vm4704_vm13 = vcmp.eq.s32.totalorder %v14399_v57, 0  ;;  %v4885_v6 = vor.u32 %v4884_v9, %v4883_v28  ;;  %vm4900_vm5 = vcmp.lt.s32.totalorder %v14405_v13, 3 }
 0x48b   :  { %v4689_v52 = vmul.f32 %v4688_v51, %v4686_v20  ;;  %v4696_v47 = vmul.f32 %v4695_v54, %v4686_v20  ;;  %v4813_v41 = vshll.u32 %v14422_v16, 30  ;;  %v14433_v0 = vand.u32 65535, %v14416_v18 }
 0x48c   :  { %v5024_v14 = vshrl.u32 %v5023_v36, 23  ;;  %vm4703_vm12 = vcmp.lt.s32.totalorder %v14399_v57, 2  ;;  %v4907_v62 = vsel %vm4901_vm0, %v4894_v32, 920167782  ;;  %vm15295_vm2 = vweird.f32 %v15492_v35 }
 0x48d   :  { %v4690_v61 = vadd.f32 -0.4999988, %v4689_v52  ;;  %v4697_v1 = vadd.f32 -0.16666654, %v4696_v47  ;;  %v4814_v23 = vsub.s32 %v4810_v38, %v4813_v41  ;;  %v4882_v33 = vshrl.u32 %v15335_v2, %v4881_v15 }
 0x48e   :  { %vm4899_vm6 = vcmp.lt.s32.totalorder %v14405_v13, 2  ;;  %v4910_v19 = vsel %vm4898_vm10, %v14425_v12, %v4891_v26  ;;  %v4911_v39 = vsel %vm4901_vm0, %v4897_v11, 1326507024  ;;  %v4906_v38 = vsel %vm4898_vm10, %v4885_v6, %v14425_v12 }
 0x48f   :  { %v4691_v28 = vmul.f32 %v4690_v61, %v4686_v20  ;;  %v4698_v9 = vmul.f32 %v4697_v1, %v4686_v20  ;;  %vm4815_vm3 = vcmp.lt.s32.totalorder %v4814_v23, 0  ;;  %v4816_v41 = vsub.s32 0, %v4814_v23 }
 0x490   :  { %v4908_v15 = vsel %vm4900_vm5, %v4891_v26, %v4907_v62  ;;  %v4912_v30 = vsel %vm4900_vm5, %v4894_v32, %v4911_v39  ;;  %v4916_v36 = vshrl.u32 %v14416_v18, 16  ;;  %v4806_v52 = vadd.s32 %v14379_v55, %v14377_v25 }
 0x491   :  { %v14454_v51 = vadd.f32 1.0, %v4691_v28  ;;  %v4699_v54 = vadd.f32 1.0, %v4698_v9  ;;  %v4817_v11 = vsel %vm4815_vm3, %v4816_v41, %v4814_v23  ;;  %v4913_v20 = vsel %vm4899_vm6, %v4910_v19, %v4912_v30 }
 0x492   :  { %v4818_v47 = vclz %v4817_v11  ;;  %v4917_v61 = vand.u32 65535, %v4913_v20  ;;  %v4918_v1 = vshrl.u32 %v4913_v20, 16  ;;  %v4902_v39 = vsel %vm4898_vm10, %v4882_v33, %v4885_v6 }
 0x493   :  { %15510 = vst [vmem:[#allocation43_spill] sm:$0xff] %v14454_v51  ;;  %v14461_v62 = vmul.f32 %v4699_v54, %v14403_v63  ;;  %v15286_v32 = vxor.u32 2147483648, %v14454_v51  ;;  %v10329_v28 = vadd.s32 4294967169, %v5024_v14  ;;  %v4909_v19 = vsel %vm4899_vm6, %v4906_v38, %v4908_v15 }
 0x494   :  { %v10324_v9 = vadd.s32 4294967294, %v4818_v47  ;;  %v4920_v25 = vmul.u32 %v4918_v1, %v14433_v0  ;;  %v4903_v6 = vsel %vm4901_vm0, %v4891_v26, 2102212464  ;;  %v4921_v14 = vmul.u32 %v4917_v61, %v4916_v36 }
 0x495   :  { %15511 = vst [vmem:[#allocation112_spill] sm:$0xff] %v14461_v62  ;;  %v15291_v55 = vxor.u32 2147483648, %v14461_v62  ;;  %v4709_v63 = vsel %vm4707_vm15, %v15286_v32, %v14461_v62  ;;  %v4919_v33 = vmul.u32 %v4917_v61, %v14433_v0  ;;  %v4939_v54 = vand.u32 65535, %v4909_v19 }
 0x496   :  { %vm10325_vm3 = vcmp.lt.s32.totalorder %v10324_v9, 0  ;;  %v4923_v30 = vshll.u32 %v4920_v25, 16  ;;  %v4922_v11 = vmul.u32 %v4918_v1, %v4916_v36  ;;  %v4940_v20 = vshrl.u32 %v4909_v19, 16 }
 0x497   :  { %v4706_v38 = vsel %vm4704_vm13, %v14454_v51, %v15291_v55  ;;  %v4821_v15 = vsel %vm10325_vm3, 0, %v10324_v9  ;;  %v4904_v17 = vsel %vm4900_vm5, %v14425_v12, %v4903_v6  ;;  %v4925_v62 = vshll.u32 %v4921_v14, 16 }
 0x498   :  { %v4710_v47 = vsel %vm4703_vm12, %v4706_v38, %v4709_v63  ;;  %v4822_v32 = vsub.s32 32, %v4821_v15  ;;  %v4823_v26 = vshll.u32 %v4814_v23, %v4821_v15  ;;  %v4826_v41 = vsub.s32 4294967266, %v4821_v15 }
 0x499   :  { %v4711_v61 = vsel %vm15295_vm2, nan, %v4710_v47  ;;  %v5030_v31 = vadd.s32 1, %v10329_v28  ;;  %vm4927_vm15 = vc.u32 %v4919_v33, %v4923_v30  ;;  %v4941_v1 = vmul.u32 %v4939_v54, %v14433_v0 }
 0x49a   :  { %v4824_v46 = vshrl.u32 %v4806_v52, %v4822_v32  ;;  %v4827_v55 = vadd.s32 127, %v4826_v41  ;;  %5202 = vst [vmem:[#allocation7 + $0xe0] sm:$0xff] %v4711_v61  ;;  %v4928_v57 = vsel %vm4927_vm15, 1, %v15336_v56  ;;  %v4929_v9 = vadd.s32 %v4923_v30, %v4919_v33 }
 0x49b   :  { %v4942_v23 = vmul.u32 %v4940_v20, %v14433_v0  ;;  %v4943_v19 = vmul.u32 %v4939_v54, %v4916_v36  ;;  %v4924_v15 = vshrl.u32 %v4920_v25, 16  ;;  %v4930_v47 = vadd.s32 %v4928_v57, %v4922_v11 }
 0x49c   :  { %v4825_v63 = vor.u32 %v4824_v46, %v4823_v26  ;;  %v4828_v38 = vshll.u32 %v4827_v55, 23  ;;  %vm4931_vm0 = vc.u32 %v4929_v9, %v4925_v62  ;;  %v4944_v12 = vmul.u32 %v4940_v20, %v4916_v36 }
 0x49d   :  { %v4945_v6 = vshll.u32 %v4942_v23, 16  ;;  %v4947_v28 = vshll.u32 %v4943_v19, 16  ;;  %v4926_v41 = vshrl.u32 %v4921_v14, 16  ;;  %v4932_v35 = vsel %vm4931_vm0, 1, %v15336_v56 }
 0x49e   :  { %v4829_v52 = vor.u32 4788187, %v4828_v38  ;;  %v4832_v32 = vcvt.s32.f32 %v4825_v63  ;;  %v4934_v61 = vadd.s32 %v4932_v35, %v4930_v47  ;;  %vm5031_vm13 = vcmp.gt.s32.totalorder %v5030_v31, 0 }
 0x49f   :  { %vm4949_vm10 = vc.u32 %v4941_v1, %v4945_v6  ;;  %v4951_v51 = vadd.s32 %v4945_v6, %v4941_v1  ;;  %v4905_v46 = vsel %vm4899_vm6, %v4902_v39, %v4904_v17  ;;  %v5032_v25 = vsel %vm5031_vm13, %v5030_v31, 0 }
 0x4a0   :  { %v4830_v33 = vand.u32 2147483647, %v4829_v52  ;;  %v4950_v0 = vsel %vm4949_vm10, 1, %v15336_v56  ;;  %v4935_v62 = vadd.s32 %v4934_v61, %v4924_v15  ;;  %v4946_v36 = vshrl.u32 %v4942_v23, 16 }
 0x4a1   :  { %v4952_v55 = vadd.s32 %v4950_v0, %v4944_v12  ;;  %vm4953_vm5 = vc.u32 %v4951_v51, %v4947_v28  ;;  %v14499_v54 = vadd.s32 %v4951_v51, %v4947_v28  ;;  %v5034_v35 = vand.u32 31, %v5032_v25 }
 0x4a2   :  { %v4833_v30 = vmul.f32 %v4832_v32, %v4830_v33  ;;  %v4954_v14 = vsel %vm4953_vm5, 1, %v15336_v56  ;;  %vm4714_vm12 = vcmp.lt.s32.totalorder %v15495_v29, 0  ;;  %v14502_v11 = vadd.s32 %v4935_v62, %v4926_v41 }
 0x4a3   :  { %v4948_v20 = vshrl.u32 %v4943_v19, 16  ;;  %v4956_v13 = vadd.s32 %v4954_v14, %v4952_v55  ;;  %v15512_v17 = vand.u32 2147483647, %v15495_v29  ;;  %v15515_v26 = vand.u32 2147483647, %v15509_v24 }
 0x4a4   :  { %v4834_v39 = vxor.u32 2147483648, %v4833_v30  ;;  %v14512_v57 = vsub.s32 32, %v5034_v35  ;;  %v15516_v51 = vsub.s32 4, %v14422_v16  ;;  %v4959_v19 = vmul.u32 %v14416_v18, %v4905_v46 }
 0x4a5   :  { %vm14506_vm6 = vcmp.le.f32.partialorder %v15512_v17, 0.7853982  ;;  %v5027_v1 = vand.u32 8388607, %v15515_v26  ;;  %v4957_v23 = vadd.s32 %v4956_v13, %v4946_v36  ;;  %v14518_v63 = vshrl.u32 %v5032_v25, 5 }
 0x4a6   :  { %v4837_v9 = vsel %vm4714_vm12, %v15516_v51, %v14422_v16  ;;  %v4835_v38 = vsel %vm4714_vm12, %v4834_v39, %v4833_v30  ;;  %vm4961_vm3 = vc.u32 %v14502_v11, %v14499_v54  ;;  %v5037_v15 = vshll.u32 %v15335_v2, %v5034_v35 }
 0x4a7   :  { %v5040_v47 = vshll.u32 %v15330_v44, %v5034_v35  ;;  %v4838_v12 = vsel %vm14506_vm6, %v15495_v29, %v4835_v38  ;;  %v4958_v6 = vadd.s32 %v4957_v23, %v4948_v20  ;;  %v5041_v16 = vshrl.u32 %v15331_v59, %v14512_v57 }
 0x4a8   :  { %v5046_v18 = vshll.u32 %v15332_v53, %v5034_v35  ;;  %v4840_v28 = vmul.f32 %v4838_v12, %v4838_v12  ;;  %v5043_v52 = vshll.u32 %v15331_v59, %v5034_v35  ;;  %v5044_v32 = vshrl.u32 %v15332_v53, %v14512_v57 }
 0x4a9   :  { %v5047_v41 = vshrl.u32 %v15333_v49, %v14512_v57  ;;  %v4962_v61 = vadd.s32 1, %v4958_v6  ;;  %v5038_v33 = vshrl.u32 %v15330_v44, %v14512_v57  ;;  %v5049_v46 = vshll.u32 %v15333_v49, %v5034_v35 }
 0x4aa   :  { %v5050_v0 = vshrl.u32 %v15334_v60, %v14512_v57  ;;  %v14542_v25 = vsel %vm14506_vm6, 0, %v4837_v9  ;;  %v4841_v59 = vmul.f32 -0.001358992, %v4840_v28  ;;  %v4848_v62 = vmul.f32 -0.00019511016, %v4840_v28 }
 0x4ab   :  { %v5028_v36 = vor.u32 8388608, %v5027_v1  ;;  %v4963_v53 = vsel %vm4961_vm3, %v4962_v61, %v4958_v6  ;;  %v14547_v55 = vor.u32 %v5041_v16, %v5040_v47  ;;  %v5048_v30 = vor.u32 %v5047_v41, %v5046_v18 }
 0x4ac   :  { %v5051_v44 = vor.u32 %v5050_v0, %v5049_v46  ;;  %v4842_v14 = vadd.f32 0.041655596, %v4841_v59  ;;  %v4849_v49 = vadd.f32 0.008332121, %v4848_v62  ;;  %v4964_v35 = vadd.s32 %v4963_v53, %v4959_v19 }
 0x4ad   :  { %v14549_v20 = vor.u32 %v5044_v32, %v5043_v52  ;;  %v4856_v60 = vand.u32 3, %v14542_v25  ;;  %v14552_v13 = vor.u32 %v5038_v33, %v5037_v15  ;;  %vm5052_vm15 = vcmp.lt.s32.totalorder %v14518_v63, 1 }
 0x4ae   :  { %vm5055_vm0 = vcmp.lt.s32.totalorder %v14518_v63, 4  ;;  %v4843_v17 = vmul.f32 %v4842_v14, %v4840_v28  ;;  %v4850_v31 = vmul.f32 %v4849_v49, %v4840_v28  ;;  %v4965_v39 = vadd.s32 536870912, %v4964_v35 }
 0x4af   :  { %vm5054_vm10 = vcmp.lt.s32.totalorder %v14518_v63, 3  ;;  %vm5053_vm13 = vcmp.lt.s32.totalorder %v14518_v63, 2  ;;  %v5061_v26 = vsel %vm5055_vm0, %v5048_v30, 920167782  ;;  %v5065_v1 = vsel %vm5055_vm0, %v5051_v44, 1326507024 }
 0x4b0   :  { %v14562_v51 = vshll.u32 %v5028_v36, 8  ;;  %v4844_v9 = vadd.f32 -0.4999988, %v4843_v17  ;;  %v4851_v23 = vadd.f32 -0.16666654, %v4850_v31  ;;  %v14564_v19 = vshrl.u32 %v4965_v39, 30 }
 0x4b1   :  { %v5064_v38 = vsel %vm5052_vm15, %v14547_v55, %v14549_v20  ;;  %v5060_v15 = vsel %vm5052_vm15, %v14552_v13, %v14547_v55  ;;  %v5066_v47 = vsel %vm5054_vm10, %v5048_v30, %v5065_v1  ;;  %v5062_v52 = vsel %vm5054_vm10, %v14549_v20, %v5061_v26 }
 0x4b2   :  { %v4845_v6 = vmul.f32 %v4844_v9, %v4840_v28  ;;  %v4852_v16 = vmul.f32 %v4851_v23, %v4840_v28  ;;  %v4967_v18 = vshll.u32 %v14564_v19, 30  ;;  %vm4857_vm5 = vcmp.lt.s32.totalorder %v4856_v60, 2 }
 0x4b3   :  { %v5067_v32 = vsel %vm5053_vm13, %v5064_v38, %v5066_v47  ;;  %v5069_v41 = vand.u32 65535, %v14562_v51  ;;  %v5070_v61 = vshrl.u32 %v14562_v51, 16  ;;  %vm4858_vm12 = vcmp.eq.s32.totalorder %v4856_v60, 0 }
 0x4b4   :  { %v14584_v33 = vadd.f32 1.0, %v4845_v6  ;;  %v4853_v46 = vadd.f32 1.0, %v4852_v16  ;;  %v4968_v0 = vsub.s32 %v4964_v35, %v4967_v18  ;;  %vm4861_vm6 = vcmp.eq.s32.totalorder %v4856_v60, 2 }
 0x4b5   :  { %v5063_v28 = vsel %vm5053_vm13, %v5060_v15, %v5062_v52  ;;  %v5071_v59 = vand.u32 65535, %v5067_v32  ;;  %v5072_v62 = vshrl.u32 %v5067_v32, 16  ;;  %vm4855_vm2 = vweird.f32 %v15495_v29 }
 0x4b6   :  { %v14588_v36 = vmul.f32 %v4853_v46, %v4838_v12  ;;  %v15297_v53 = vxor.u32 2147483648, %v14584_v33  ;;  %vm4969_vm3 = vcmp.lt.s32.totalorder %v4968_v0, 0  ;;  %v4970_v30 = vsub.s32 0, %v4968_v0 }
 0x4b7   :  { %v5073_v44 = vmul.u32 %v5071_v59, %v5069_v41  ;;  %v5074_v14 = vmul.u32 %v5072_v62, %v5069_v41  ;;  %v5075_v49 = vmul.u32 %v5071_v59, %v5070_v61  ;;  %v5093_v17 = vand.u32 65535, %v5063_v28 }
 0x4b8   :  { %v4859_v31 = vxor.u32 2147483648, %v14588_v36  ;;  %v4863_v35 = vsel %vm4861_vm6, %v15297_v53, %v14588_v36  ;;  %v4971_v39 = vsel %vm4969_vm3, %v4970_v30, %v4968_v0  ;;  %v5094_v26 = vshrl.u32 %v5063_v28, 16 }
 0x4b9   :  { %v4972_v12 = vclz %v4971_v39  ;;  %v5076_v1 = vmul.u32 %v5072_v62, %v5070_v61  ;;  %v5077_v9 = vshll.u32 %v5074_v14, 16  ;;  %v5079_v38 = vshll.u32 %v5075_v49, 16 }
 0x4ba   :  { %v4860_v23 = vsel %vm4858_vm12, %v14584_v33, %v4859_v31  ;;  %v5096_v15 = vmul.u32 %v5094_v26, %v5069_v41  ;;  %v5097_v32 = vmul.u32 %v5093_v17, %v5070_v61  ;;  %v4960_v46 = vadd.s32 %v14499_v54, %v14502_v11 }
 0x4bb   :  { %v4864_v47 = vsel %vm4857_vm5, %v4860_v23, %v4863_v35  ;;  %v10327_v6 = vadd.s32 4294967294, %v4972_v12  ;;  %vm5081_vm4 = vc.u32 %v5073_v44, %v5077_v9  ;;  %v5083_v16 = vadd.s32 %v5077_v9, %v5073_v44 }
 0x4bc   :  { %v4865_v18 = vsel %vm4855_vm2, nan, %v4864_v47  ;;  %v5082_v52 = vsel %vm5081_vm4, 1, %v15336_v56  ;;  %v5095_v62 = vmul.u32 %v5093_v17, %v5069_v41  ;;  %v5099_v60 = vshll.u32 %v5096_v15, 16 }
 0x4bd   :  { %vm10328_vm6 = vcmp.lt.s32.totalorder %v10327_v6, 0  ;;  %v5084_v28 = vadd.s32 %v5082_v52, %v5076_v1  ;;  %5203 = vst [vmem:[#allocation7 + $0xe8] sm:$0xff] %v4865_v18  ;;  %vm5085_vm12 = vc.u32 %v5083_v16, %v5079_v38  ;;  %v5078_v44 = vshrl.u32 %v5074_v14, 16 }
 0x4be   :  { %v4975_v59 = vsel %vm10328_vm6, 0, %v10327_v6  ;;  %v5036_v12 = vshrl.u32 %v15335_v2, %v14512_v57  ;;  %v5086_v9 = vsel %vm5085_vm12, 1, %v15336_v56  ;;  %v5098_v23 = vmul.u32 %v5094_v26, %v5070_v61 }
 0x4bf   :  { %v4976_v30 = vsub.s32 32, %v4975_v59  ;;  %v4977_v35 = vshll.u32 %v4968_v0, %v4975_v59  ;;  %v4980_v39 = vsub.s32 4294967266, %v4975_v59  ;;  %v5101_v47 = vshll.u32 %v5097_v32, 16 }
 0x4c0   :  { %v5088_v11 = vadd.s32 %v5086_v9, %v5084_v28  ;;  %v5057_v1 = vsel %vm5055_vm0, %v14549_v20, 2102212464  ;;  %v5080_v41 = vshrl.u32 %v5075_v49, 16  ;;  %vm5103_vm4 = vc.u32 %v5095_v62, %v5099_v60 }
 0x4c1   :  { %v4978_v53 = vshrl.u32 %v4960_v46, %v4976_v30  ;;  %v4981_v54 = vadd.s32 127, %v4980_v39  ;;  %v5105_v17 = vadd.s32 %v5099_v60, %v5095_v62  ;;  %v5104_v6 = vsel %vm5103_vm4, 1, %v15336_v56 }
 0x4c2   :  { %v5089_v14 = vadd.s32 %v5088_v11, %v5078_v44  ;;  %v5056_v2 = vsel %vm5052_vm15, %v5036_v12, %v14552_v13  ;;  %v5100_v57 = vshrl.u32 %v5096_v15, 16  ;;  %v5106_v61 = vadd.s32 %v5104_v6, %v5098_v23 }
 0x4c3   :  { %v4979_v0 = vor.u32 %v4978_v53, %v4977_v35  ;;  %v4982_v38 = vshll.u32 %v4981_v54, 23  ;;  %vm5107_vm5 = vc.u32 %v5105_v17, %v5101_v47  ;;  %v5058_v20 = vsel %vm5054_vm10, %v14547_v55, %v5057_v1 }
 0x4c4   :  { %v5108_v49 = vsel %vm5107_vm5, 1, %v15336_v56  ;;  %v5102_v53 = vshrl.u32 %v5097_v32, 16  ;;  %v5090_v46 = vadd.s32 %v5089_v14, %v5080_v41  ;;  %v5109_v28 = vadd.s32 %v5105_v17, %v5101_v47 }
 0x4c5   :  { %v4983_v26 = vor.u32 4788187, %v4982_v38  ;;  %v4986_v16 = vcvt.s32.f32 %v4979_v0  ;;  %v5110_v18 = vadd.s32 %v5108_v49, %v5106_v61  ;;  %v5059_v59 = vsel %vm5053_vm13, %v5056_v2, %v5058_v20 }
 0x4c6   :  { %vm4868_vm15 = vcmp.lt.s32.totalorder %v15506_v3, 0  ;;  %v15517_v60 = vand.u32 2147483647, %v15506_v3  ;;  %v5113_v55 = vmul.u32 %v14562_v51, %v5059_v59  ;;  %vm5115_vm10 = vc.u32 %v5090_v46, %v5109_v28 }
 0x4c7   :  { %v4984_v52 = vand.u32 2147483647, %v4983_v26  ;;  %v5111_v13 = vadd.s32 %v5110_v18, %v5100_v57  ;;  %v4990_v9 = vsub.s32 4, %v14564_v19  ;;  %vm5022_vm6 = vcmp.lt.s32.totalorder %v15509_v24, 0 }
 0x4c8   :  { %vm14625_vm0 = vcmp.le.f32.partialorder %v15517_v60, 0.7853982  ;;  %v15550_v60 = vxor.u32 2147483648, %v11619_v45 }
 0x4c9   :  { %v4987_v15 = vmul.f32 %v4986_v16, %v4984_v52  ;;  %v5112_v62 = vadd.s32 %v5111_v13, %v5102_v53  ;;  %v4991_v41 = vsel %vm4868_vm15, %v4990_v9, %v14564_v19 }
 0x4ca   :  { %v14641_v14 = vsel %vm14625_vm0, 0, %v4991_v41 }
 0x4cb   :  { %v4988_v56 = vxor.u32 2147483648, %v4987_v15  ;;  %v5116_v32 = vadd.s32 1, %v5112_v62  ;;  %v5010_v61 = vand.u32 3, %v14641_v14 }
 0x4cd   :  { %v4989_v63 = vsel %vm4868_vm15, %v4988_v56, %v4987_v15  ;;  %v5117_v39 = vsel %vm5115_vm10, %v5116_v32, %v5112_v62  ;;  %vm5015_vm3 = vcmp.eq.s32.totalorder %v5010_v61, 2  ;;  %vm5011_vm12 = vcmp.lt.s32.totalorder %v5010_v61, 2  ;;  %v15523_v32 = vld [vmem:[#allocation45_spill] sm:$0xff] }
 0x4ce   :  { %v4992_v35 = vsel %vm14625_vm0, %v15506_v3, %v4989_v63  ;;  %v5118_v12 = vadd.s32 %v5117_v39, %v5113_v55  ;;  %vm5012_vm4 = vcmp.eq.s32.totalorder %v5010_v61, 0  ;;  %v15520_v62 = vand.u32 2147483647, %v15509_v24 }
 0x4cf   :  { %v4994_v44 = vmul.f32 %v4992_v35, %v4992_v35  ;;  %v5350_v63 = vadd.s32 3, %v15523_v32  ;;  %vm15298_vm15 = vweird.f32 %v15506_v3  ;;  %v5114_v39 = vadd.s32 %v5109_v28, %v5090_v46 }
 0x4d0   :  { %v5119_v54 = vadd.s32 536870912, %v5118_v12  ;;  %vm14654_vm5 = vcmp.le.f32.partialorder %v15520_v62, 0.7853982 }
 0x4d1   :  { %v4995_v23 = vmul.f32 -0.001358992, %v4994_v44  ;;  %v5002_v47 = vmul.f32 -0.00019511016, %v4994_v44 }
 0x4d2   :  { %v5120_v51 = vshrl.u32 %v5119_v54, 30 }
 0x4d3   :  { %v4996_v11 = vadd.f32 0.041655596, %v4995_v23  ;;  %v5003_v1 = vadd.f32 0.008332121, %v5002_v47  ;;  %v5351_v23 = vand.u32 3, %v5350_v63 }
 0x4d4   :  { %v5121_v38 = vshll.u32 %v5120_v51, 30  ;;  %v5144_v26 = vsub.s32 4, %v5120_v51 }
 0x4d5   :  { %v4997_v17 = vmul.f32 %v4996_v11, %v4994_v44  ;;  %v5004_v0 = vmul.f32 %v5003_v1, %v4994_v44  ;;  %vm5352_vm10 = vcmp.lt.s32.totalorder %v5351_v23, 2 }
 0x4d6   :  { %v5122_v57 = vsub.s32 %v5118_v12, %v5121_v38  ;;  %v5145_v15 = vsel %vm5022_vm6, %v5144_v26, %v5120_v51  ;;  %v5660_v51 = vadd.s32 3, %v11211_v27  ;;  %v15526_v26 = vld [vmem:[#allocation47_spill] sm:$0xff] }
 0x4d7   :  { %v4998_v6 = vadd.f32 -0.4999988, %v4997_v17  ;;  %v5005_v2 = vadd.f32 -0.16666654, %v5004_v0  ;;  %v15524_v0 = vxor.u32 2147483648, %v11034_v21  ;;  %v15527_v27 = vxor.u32 2147483648, %v15526_v26 }
 0x4d8   :  { %vm5123_vm13 = vcmp.lt.s32.totalorder %v5122_v57, 0  ;;  %v5124_v49 = vsub.s32 0, %v5122_v57 }
 0x4d9   :  { %v4999_v16 = vmul.f32 %v4998_v6, %v4994_v44  ;;  %v5006_v20 = vmul.f32 %v5005_v2, %v4994_v44  ;;  %v14667_v44 = vsel %vm14654_vm5, 0, %v5145_v15 }
 0x4da   :  { %v5125_v18 = vsel %vm5123_vm13, %v5124_v49, %v5122_v57  ;;  %v14676_v28 = vand.u32 3, %v14667_v44  ;;  %vm5353_vm13 = vcmp.eq.s32.totalorder %v5351_v23, 0 }
 0x4db   :  { %v14644_v53 = vadd.f32 1.0, %v4999_v16  ;;  %v5007_v19 = vadd.f32 1.0, %v5006_v20  ;;  %v5126_v52 = vclz %v5125_v18  ;;  %v5355_v38 = vsel %vm5353_vm13, %v11028_v40, %v15524_v0  ;;  %v15528_v16 = vld [vmem:[#allocation46_spill] sm:$0xff] }
 0x4dc   :  { %v5815_v18 = vadd.s32 3, %v11300_v5 }
 0x4dd   :  { %v14647_v59 = vmul.f32 %v5007_v19, %v4992_v35  ;;  %v5016_v13 = vxor.u32 2147483648, %v14644_v53  ;;  %v10330_v30 = vadd.s32 4294967294, %v5126_v52  ;;  %v5505_v35 = vadd.s32 3, %v11075_v58 }
 0x4de   :  { %v5661_v19 = vand.u32 3, %v5660_v51 }
 0x4df   :  { %v5013_v56 = vxor.u32 2147483648, %v14647_v59  ;;  %v5017_v55 = vsel %vm5015_vm3, %v5016_v13, %v14647_v59  ;;  %vm10331_vm0 = vcmp.lt.s32.totalorder %v10330_v30, 0  ;;  %v5506_v47 = vand.u32 3, %v5505_v35 }
 0x4e0   :  { %v5129_v9 = vsel %vm10331_vm0, 0, %v10330_v30  ;;  %vm5356_vm3 = vcmp.eq.s32.totalorder %v5351_v23, 2  ;;  %vm5662_vm13 = vcmp.lt.s32.totalorder %v5661_v19, 2 }
 0x4e1   :  { %v5014_v12 = vsel %vm5012_vm4, %v14644_v53, %v5013_v56  ;;  %v5130_v11 = vsub.s32 32, %v5129_v9  ;;  %v5131_v1 = vshll.u32 %v5122_v57, %v5129_v9  ;;  %v5134_v58 = vsub.s32 4294967266, %v5129_v9 }
 0x4e2   :  { %v5018_v54 = vsel %vm5011_vm12, %v5014_v12, %v5017_v55  ;;  %vm5507_vm12 = vcmp.lt.s32.totalorder %v5506_v47, 2  ;;  %vm5508_vm4 = vcmp.eq.s32.totalorder %v5506_v47, 0  ;;  %v15525_v57 = vxor.u32 2147483648, %v11028_v40  ;;  %v15534_v12 = vld [vmem:[#allocation48_spill] sm:$0xff] }
 0x4e3   :  { %v5019_v46 = vsel %vm15298_vm15, nan, %v5018_v54  ;;  %v5132_v41 = vshrl.u32 %v5114_v39, %v5130_v11  ;;  %v5135_v17 = vadd.s32 127, %v5134_v58  ;;  %v5510_v20 = vsel %vm5508_vm4, %v15528_v16, %v15527_v27  ;;  %v15532_v39 = vld [vmem:[#allocation49_spill] sm:$0xff]  ;;  %v15541_v27 = vld [vmem:[#allocation50_spill] sm:$0xff] }
 0x4e4   :  { %5204 = vst [vmem:[#allocation7 + $0xf0] sm:$0xff] %v5019_v46  ;;  %v5358_v61 = vsel %vm5356_vm3, %v15525_v57, %v11034_v21  ;;  %vm5511_vm0 = vcmp.eq.s32.totalorder %v5506_v47, 2  ;;  %v15530_v55 = vxor.u32 2147483648, %v15528_v16  ;;  %vm5663_vm3 = vcmp.eq.s32.totalorder %v5661_v19, 0  ;;  %v15537_v46 = vld [vmem:[#allocation55_spill] sm:$0xff] }
 0x4e5   :  { %v5133_v6 = vor.u32 %v5132_v41, %v5131_v1  ;;  %v5136_v2 = vshll.u32 %v5135_v17, 23  ;;  %v5359_v49 = vsel %vm5352_vm10, %v5355_v38, %v5358_v61  ;;  %vm5666_vm15 = vcmp.eq.s32.totalorder %v5661_v19, 2  ;;  %v15536_v1 = vld [vmem:[#allocation52_spill] sm:$0xff]  ;;  %v15539_v61 = vld [vmem:[#allocation51_spill] sm:$0xff] }
 0x4e6   :  { %v5360_v30 = vsel %vm389_vm8, nan, %v5359_v49  ;;  %v5513_v32 = vsel %vm5511_vm0, %v15530_v55, %v15526_v26  ;;  %v15533_v5 = vxor.u32 2147483648, %v15532_v39  ;;  %v15535_v23 = vxor.u32 2147483648, %v15534_v12 }
 0x4e7   :  { %v5137_v52 = vor.u32 4788187, %v5136_v2  ;;  %v5140_v15 = vcvt.s32.f32 %v5133_v6  ;;  %v5514_v40 = vsel %vm5507_vm12, %v5510_v20, %v5513_v32  ;;  %10166 = vst [vmem:[#allocation8] sm:$0xff] %v5360_v30  ;;  %v5816_v11 = vand.u32 3, %v5815_v18  ;;  %v15546_v30 = vld [vmem:[#allocation53_spill] sm:$0xff] }
 0x4e8   :  { %v5515_v35 = vsel %vm543_vm14, nan, %v5514_v40  ;;  %v5665_v9 = vsel %vm5663_vm3, %v15534_v12, %v15533_v5  ;;  %v5668_v47 = vsel %vm5666_vm15, %v15535_v23, %v15532_v39  ;;  %v5970_v58 = vadd.s32 3, %v15536_v1 }
 0x4e9   :  { %v5138_v21 = vand.u32 2147483647, %v5137_v52  ;;  %v5669_v54 = vsel %vm5662_vm13, %v5665_v9, %v5668_v47  ;;  %v6125_v51 = vadd.s32 3, %v15537_v46  ;;  %10167 = vst [vmem:[#allocation8 + $0x8] sm:$0xff] %v5515_v35  ;;  %v6280_v38 = vadd.s32 3, %v11677_v34 }
 0x4ea   :  { %v5670_v0 = vsel %vm697_vm7, nan, %v5669_v54  ;;  %v6435_v6 = vadd.s32 3, %v11833_v50  ;;  %vm5817_vm8 = vcmp.lt.s32.totalorder %v5816_v11, 2  ;;  %vm5818_vm14 = vcmp.eq.s32.totalorder %v5816_v11, 0 }
 0x4eb   :  { %v5141_v41 = vmul.f32 %v5140_v15, %v5138_v21  ;;  %vm5821_vm10 = vcmp.eq.s32.totalorder %v5816_v11, 2  ;;  %v5971_v2 = vand.u32 3, %v5970_v58  ;;  %10168 = vst [vmem:[#allocation8 + $0x10] sm:$0xff] %v5670_v0  ;;  %v15540_v26 = vxor.u32 2147483648, %v15539_v61  ;;  %v15544_v15 = vld [vmem:[#allocation54_spill] sm:$0xff] }
 0x4ec   :  { %v15542_v20 = vxor.u32 2147483648, %v15541_v27  ;;  %v6126_v19 = vand.u32 3, %v6125_v51  ;;  %v15545_v62 = vxor.u32 2147483648, %v15544_v15  ;;  %v15547_v32 = vxor.u32 2147483648, %v15546_v30 }
 0x4ed   :  { %v5142_v57 = vxor.u32 2147483648, %v5141_v41  ;;  %v5820_v16 = vsel %vm5818_vm14, %v15541_v27, %v15540_v26  ;;  %vm5972_vm7 = vcmp.lt.s32.totalorder %v5971_v2, 2  ;;  %vm5973_vm15 = vcmp.eq.s32.totalorder %v5971_v2, 0  ;;  %v15557_v27 = vld [vmem:[#allocation59_spill] sm:$0xff] }
 0x4ee   :  { %v5823_v49 = vsel %vm5821_vm10, %v15542_v20, %v15539_v61  ;;  %vm5976_vm12 = vcmp.eq.s32.totalorder %v5971_v2, 2  ;;  %v5975_v55 = vsel %vm5973_vm15, %v15546_v30, %v15545_v62  ;;  %vm6127_vm4 = vcmp.lt.s32.totalorder %v6126_v19, 2  ;;  %v15555_v61 = vld [vmem:[#allocation18_spill] sm:$0xff] }
 0x4ef   :  { %v5824_v18 = vsel %vm5817_vm8, %v5820_v16, %v5823_v49  ;;  %v5143_v34 = vsel %vm5022_vm6, %v5142_v57, %v5141_v41  ;;  %v5978_v40 = vsel %vm5976_vm12, %v15547_v32, %v15544_v15  ;;  %vm6128_vm0 = vcmp.eq.s32.totalorder %v6126_v19, 0  ;;  %v15559_v20 = vld [vmem:[#allocation58_spill] sm:$0xff]  ;;  %v15561_v32 = vld [vmem:[#allocation19_spill] sm:$0xff] }
 0x4f0   :  { %v5825_v52 = vsel %vm851_vm11, nan, %v5824_v18  ;;  %v14727_v21 = vsel %vm14654_vm5, %v15509_v24, %v5143_v34  ;;  %v5979_v63 = vsel %vm5972_vm7, %v5975_v55, %v5978_v40  ;;  %v15549_v12 = vxor.u32 2147483648, %v11621_v43 }
 0x4f1   :  { %10169 = vst [vmem:[#allocation8 + $0x18] sm:$0xff] %v5825_v52  ;;  %v5148_v35 = vmul.f32 %v14727_v21, %v14727_v21  ;;  %v5980_v5 = vsel %vm1005_vm1, nan, %v5979_v63  ;;  %vm6131_vm11 = vcmp.eq.s32.totalorder %v6126_v19, 2  ;;  %v6281_v47 = vand.u32 3, %v6280_v38  ;;  %v15553_v38 = vld [vmem:[#allocation56_spill] sm:$0xff] }
 0x4f2   :  { %v6130_v9 = vsel %vm6128_vm0, %v11619_v45, %v15549_v12  ;;  %v6133_v23 = vsel %vm6131_vm11, %v15550_v60, %v11621_v43  ;;  %v6436_v54 = vand.u32 3, %v6435_v6  ;;  %v6590_v11 = vadd.s32 3, %v11934_v22  ;;  %10170 = vst [vmem:[#allocation8 + $0x20] sm:$0xff] %v5980_v5  ;;  %v15551_v45 = vld [vmem:[#allocation57_spill] sm:$0xff]  ;;  %v15565_v12 = vld [vmem:[#allocation60_spill] sm:$0xff] }
 0x4f3   :  { %v5149_v1 = vmul.f32 -0.001358992, %v5148_v35  ;;  %v5156_v58 = vmul.f32 -0.00019511016, %v5148_v35  ;;  %v6134_v46 = vsel %vm6127_vm4, %v6130_v9, %v6133_v23  ;;  %v6745_v51 = vadd.s32 3, %v12082_v48 }
 0x4f4   :  { %v6135_v41 = vsel %vm1159_vm9, nan, %v6134_v46  ;;  %vm6282_vm1 = vcmp.lt.s32.totalorder %v6281_v47, 2  ;;  %vm6283_vm6 = vcmp.eq.s32.totalorder %v6281_v47, 0  ;;  %vm6286_vm5 = vcmp.eq.s32.totalorder %v6281_v47, 2  ;;  %v15571_v46 = vld [vmem:[#allocation62_spill] sm:$0xff] }
 0x4f5   :  { %v5150_v17 = vadd.f32 0.041655596, %v5149_v1  ;;  %v5157_v0 = vadd.f32 0.008332121, %v5156_v58  ;;  %v15552_v43 = vxor.u32 2147483648, %v15551_v45  ;;  %v15554_v22 = vxor.u32 2147483648, %v15553_v38 }
 0x4f6   :  { %10171 = vst [vmem:[#allocation8 + $0x28] sm:$0xff] %v6135_v41  ;;  %vm5169_vm13 = vcmp.eq.s32.totalorder %v14676_v28, 2  ;;  %vm6437_vm3 = vcmp.lt.s32.totalorder %v6436_v54, 2  ;;  %vm6438_vm8 = vcmp.eq.s32.totalorder %v6436_v54, 0  ;;  %vm6441_vm9 = vcmp.eq.s32.totalorder %v6436_v54, 2 }
 0x4f7   :  { %v6285_v6 = vsel %vm6283_vm6, %v15553_v38, %v15552_v43  ;;  %v6288_v2 = vsel %vm6286_vm5, %v15554_v22, %v15551_v45  ;;  %v5151_v8 = vmul.f32 %v5150_v17, %v5148_v35  ;;  %v5158_v57 = vmul.f32 %v5157_v0, %v5148_v35 }
 0x4f8   :  { %v6289_v48 = vsel %vm6282_vm1, %v6285_v6, %v6288_v2  ;;  %vm15556_vm14 = vweird.f32 %v15555_v61  ;;  %v15558_v16 = vxor.u32 2147483648, %v15557_v27  ;;  %vm5166_vm10 = vcmp.eq.s32.totalorder %v14676_v28, 0  ;;  %v15577_v61 = vld [vmem:[#allocation64_spill] sm:$0xff] }
 0x4f9   :  { %v6290_v26 = vsel %vm15556_vm14, nan, %v6289_v48  ;;  %v15560_v19 = vxor.u32 2147483648, %v15559_v20  ;;  %v6591_v34 = vand.u32 3, %v6590_v11  ;;  %v6746_v50 = vand.u32 3, %v6745_v51  ;;  %v15567_v11 = vld [vmem:[#allocation20_spill] sm:$0xff]  ;;  %v15573_v48 = vld [vmem:[#allocation21_spill] sm:$0xff] }
 0x4fa   :  { %v6440_v49 = vsel %vm6438_vm8, %v15559_v20, %v15558_v16  ;;  %v6900_v52 = vadd.s32 3, %v12180_v10  ;;  %10172 = vst [vmem:[#allocation8 + $0x30] sm:$0xff] %v6290_v26  ;;  %v5152_v15 = vadd.f32 -0.4999988, %v5151_v8  ;;  %v5159_v62 = vadd.f32 -0.16666654, %v5158_v57 }
 0x4fb   :  { %v6443_v18 = vsel %vm6441_vm9, %v15560_v19, %v15557_v27  ;;  %vm5165_vm7 = vcmp.lt.s32.totalorder %v14676_v28, 2  ;;  %v7055_v55 = vadd.s32 3, %v12328_v42  ;;  %vm5163_vm15 = vweird.f32 %v15509_v24  ;;  %v15563_v10 = vld [vmem:[#allocation61_spill] sm:$0xff]  ;;  %v15579_v19 = vld [vmem:[#allocation22_spill] sm:$0xff] }
 0x4fc   :  { %v6444_v30 = vsel %vm6437_vm3, %v6440_v49, %v6443_v18  ;;  %vm15562_vm12 = vweird.f32 %v15561_v32  ;;  %vm6592_vm4 = vcmp.lt.s32.totalorder %v6591_v34, 2  ;;  %vm6593_vm0 = vcmp.eq.s32.totalorder %v6591_v34, 0  ;;  %v15588_v28 = vld [vmem:[#allocation69_spill] sm:$0xff] }
 0x4fd   :  { %v6445_v40 = vsel %vm15562_vm12, nan, %v6444_v30  ;;  %vm6596_vm11 = vcmp.eq.s32.totalorder %v6591_v34, 2  ;;  %v5153_v63 = vmul.f32 %v5152_v15, %v5148_v35  ;;  %v5160_v39 = vmul.f32 %v5159_v62, %v5148_v35  ;;  %v15569_v35 = vld [vmem:[#allocation63_spill] sm:$0xff] }
 0x4fe   :  { %v15564_v5 = vxor.u32 2147483648, %v15563_v10  ;;  %v15566_v60 = vxor.u32 2147483648, %v15565_v12  ;;  %10173 = vst [vmem:[#allocation8 + $0x38] sm:$0xff] %v6445_v40  ;;  %vm6747_vm1 = vcmp.lt.s32.totalorder %v6746_v50, 2  ;;  %vm6748_vm6 = vcmp.eq.s32.totalorder %v6746_v50, 0  ;;  %v15581_v34 = vld [vmem:[#allocation67_spill] sm:$0xff] }
 0x4ff   :  { %vm6751_vm5 = vcmp.eq.s32.totalorder %v6746_v50, 2  ;;  %v14772_v47 = vadd.f32 1.0, %v5153_v63  ;;  %v5161_v54 = vadd.f32 1.0, %v5160_v39  ;;  %vm15568_vm3 = vweird.f32 %v15567_v11 }
 0x500   :  { %v6595_v9 = vsel %vm6593_vm0, %v15565_v12, %v15564_v5  ;;  %v6598_v23 = vsel %vm6596_vm11, %v15566_v60, %v15563_v10  ;;  %v15570_v58 = vxor.u32 2147483648, %v15569_v35  ;;  %v15572_v41 = vxor.u32 2147483648, %v15571_v46  ;;  %v15585_v10 = vld [vmem:[#allocation23_spill] sm:$0xff] }
 0x501   :  { %v6599_v42 = vsel %vm6592_vm4, %v6595_v9, %v6598_v23  ;;  %v6901_v0 = vand.u32 3, %v6900_v52  ;;  %v7056_v45 = vand.u32 3, %v7055_v55  ;;  %v7210_v43 = vadd.s32 3, %v12426_v7  ;;  %v15583_v52 = vld [vmem:[#allocation66_spill] sm:$0xff] }
 0x502   :  { %v6600_v1 = vsel %vm15568_vm3, nan, %v6599_v42  ;;  %v6750_v51 = vsel %vm6748_vm6, %v15571_v46, %v15570_v58  ;;  %v6753_v17 = vsel %vm6751_vm5, %v15572_v41, %v15569_v35  ;;  %v14784_v38 = vmul.f32 %v5161_v54, %v14727_v21  ;;  %v15575_v21 = vld [vmem:[#allocation65_spill] sm:$0xff]  ;;  %v15587_v9 = vld [vmem:[#allocation74_spill] sm:$0xff]  ;;  %v15590_v42 = vld [vmem:[#allocation68_spill] sm:$0xff] }
 0x503   :  { %10174 = vst [vmem:[#allocation8 + $0x40] sm:$0xff] %v6600_v1  ;;  %v5170_v6 = vxor.u32 2147483648, %v14772_v47  ;;  %v6754_v22 = vsel %vm6747_vm1, %v6750_v51, %v6753_v17  ;;  %v7365_v2 = vadd.s32 3, %v12574_v4  ;;  %vm15574_vm8 = vweird.f32 %v15573_v48  ;;  %v15592_v35 = vld [vmem:[#allocation71_spill] sm:$0xff]  ;;  %v15594_v46 = vld [vmem:[#allocation70_spill] sm:$0xff]  ;;  %v15598_v48 = vld [vmem:[#allocation77_spill] sm:$0xff] }
 0x504   :  { %v6755_v8 = vsel %vm15574_vm8, nan, %v6754_v22  ;;  %vm6902_vm9 = vcmp.lt.s32.totalorder %v6901_v0, 2  ;;  %vm6903_vm14 = vcmp.eq.s32.totalorder %v6901_v0, 0  ;;  %vm6906_vm12 = vcmp.eq.s32.totalorder %v6901_v0, 2 }
 0x505   :  { %v5167_v7 = vxor.u32 2147483648, %v14784_v38  ;;  %v5171_v4 = vsel %vm5169_vm13, %v5170_v6, %v14784_v38  ;;  %v15576_v57 = vxor.u32 2147483648, %v15575_v21  ;;  %v15578_v27 = vxor.u32 2147483648, %v15577_v61  ;;  %10175 = vst [vmem:[#allocation8 + $0x48] sm:$0xff] %v6755_v8 }
 0x506   :  { %vm7057_vm4 = vcmp.lt.s32.totalorder %v7056_v45, 2  ;;  %vm7058_vm0 = vcmp.eq.s32.totalorder %v7056_v45, 0  ;;  %vm7061_vm11 = vcmp.eq.s32.totalorder %v7056_v45, 2  ;;  %vm15580_vm13 = vweird.f32 %v15579_v19  ;;  %v15596_v45 = vld [vmem:[#allocation24_spill] sm:$0xff] }
 0x507   :  { %v6905_v26 = vsel %vm6903_vm14, %v15577_v61, %v15576_v57  ;;  %v6908_v16 = vsel %vm6906_vm12, %v15578_v27, %v15575_v21  ;;  %v5168_v49 = vsel %vm5166_vm10, %v14772_v47, %v5167_v7  ;;  %v15582_v50 = vxor.u32 2147483648, %v15581_v34  ;;  %v15601_v57 = vld [vmem:[#allocation73_spill] sm:$0xff]  ;;  %v15605_v19 = vld [vmem:[#allocation76_spill] sm:$0xff] }
 0x508   :  { %v6909_v20 = vsel %vm6902_vm9, %v6905_v26, %v6908_v16  ;;  %v15584_v62 = vxor.u32 2147483648, %v15583_v52  ;;  %v5172_v55 = vsel %vm5165_vm7, %v5168_v49, %v5171_v4  ;;  %v7211_v40 = vand.u32 3, %v7210_v43  ;;  %v15599_v4 = vld [vmem:[#allocation25_spill] sm:$0xff]  ;;  %v15603_v26 = vld [vmem:[#allocation72_spill] sm:$0xff] }
 0x509   :  { %v6910_v18 = vsel %vm15580_vm13, nan, %v6909_v20  ;;  %v7060_v15 = vsel %vm7058_vm0, %v15583_v52, %v15582_v50  ;;  %v7366_v63 = vand.u32 3, %v7365_v2  ;;  %v5173_v39 = vsel %vm5163_vm15, nan, %v5172_v55 }
 0x50a   :  { %v7063_v30 = vsel %vm7061_vm11, %v15584_v62, %v15581_v34  ;;  %10176 = vst [vmem:[#allocation8 + $0x50] sm:$0xff] %v6910_v18  ;;  %vm15586_vm10 = vweird.f32 %v15585_v10  ;;  %v7520_v12 = vadd.s32 3, %v12672_v37  ;;  %v7675_v60 = vadd.s32 3, %v15587_v9  ;;  %v15607_v34 = vld [vmem:[#allocation75_spill] sm:$0xff] }
 0x50b   :  { %v7064_v32 = vsel %vm7057_vm4, %v7060_v15, %v7063_v30  ;;  %5205 = vst [vmem:[#allocation7 + $0xf8] sm:$0xff] %v5173_v39  ;;  %vm7212_vm1 = vcmp.lt.s32.totalorder %v7211_v40, 2  ;;  %vm7213_vm6 = vcmp.eq.s32.totalorder %v7211_v40, 0  ;;  %vm7216_vm5 = vcmp.eq.s32.totalorder %v7211_v40, 2  ;;  %v15608_v15 = vld [vmem:[#allocation26_spill] sm:$0xff]  ;;  %v15615_v9 = vld [vmem:[#allocation79_spill] sm:$0xff] }
 0x50c   :  { %v7065_v5 = vsel %vm15586_vm10, nan, %v7064_v32  ;;  %vm7367_vm3 = vcmp.lt.s32.totalorder %v7366_v63, 2  ;;  %v15589_v23 = vxor.u32 2147483648, %v15588_v28  ;;  %v15591_v11 = vxor.u32 2147483648, %v15590_v42  ;;  %10210 = dma.vmem_to_hbm [thread:$0]  %s10203_s1, 4096, %s10205_s24, [#allocation4], %s10557_s2, %s10557_s2, %s10558_s25  }
 0x50d   :  { %vm7368_vm7 = vcmp.eq.s32.totalorder %v7366_v63, 0  ;;  %vm7371_vm8 = vcmp.eq.s32.totalorder %v7366_v63, 2  ;;  %10177 = vst [vmem:[#allocation8 + $0x58] sm:$0xff] %v7065_v5  ;;  %v15593_v58 = vxor.u32 2147483648, %v15592_v35  ;;  %v15595_v41 = vxor.u32 2147483648, %v15594_v46  ;;  %v15611_v32 = vld [vmem:[#allocation80_spill] sm:$0xff] }
 0x50e   :  { %v7215_v54 = vsel %vm7213_vm6, %v15590_v42, %v15589_v23  ;;  %v7218_v1 = vsel %vm7216_vm5, %v15591_v11, %v15588_v28  ;;  %v7521_v0 = vand.u32 3, %v7520_v12  ;;  %vm15597_vm9 = vweird.f32 %v15596_v45  ;;  %v15612_v63 = vld [vmem:[#allocation83_spill] sm:$0xff]  ;;  %v15617_v28 = vld [vmem:[#allocation78_spill] sm:$0xff] }
 0x50f   :  { %v7219_v37 = vsel %vm7212_vm1, %v7215_v54, %v7218_v1  ;;  %v7370_v51 = vsel %vm7368_vm7, %v15594_v46, %v15593_v58  ;;  %v7373_v17 = vsel %vm7371_vm8, %v15595_v41, %v15592_v35  ;;  %v7676_v2 = vand.u32 3, %v7675_v60  ;;  %v15613_v5 = vld [vmem:[#allocation27_spill] sm:$0xff]  ;;  %v15619_v35 = vld [vmem:[#allocation86_spill] sm:$0xff]  ;;  %v15620_v46 = vld [vmem:[#allocation89_spill] sm:$0xff] }
 0x510   :  { %v7220_v43 = vsel %vm15597_vm9, nan, %v7219_v37  ;;  %v7374_v22 = vsel %vm7367_vm3, %v7370_v51, %v7373_v17  ;;  %v7830_v8 = vadd.s32 3, %v15598_v48  ;;  %vm15600_vm14 = vweird.f32 %v15599_v4  ;;  %v15621_v41 = vld [vmem:[#allocation28_spill] sm:$0xff]  ;;  %v15627_v4 = vld [vmem:[#allocation85_spill] sm:$0xff] }
 0x511   :  { %v7375_v21 = vsel %vm15600_vm14, nan, %v7374_v22  ;;  %vm7522_vm12 = vcmp.lt.s32.totalorder %v7521_v0, 2  ;;  %vm7523_vm4 = vcmp.eq.s32.totalorder %v7521_v0, 0  ;;  %vm7526_vm0 = vcmp.eq.s32.totalorder %v7521_v0, 2  ;;  %10178 = vst [vmem:[#allocation8 + $0x60] sm:$0xff] %v7220_v43  ;;  %v15623_v0 = vld [vmem:[#allocation82_spill] sm:$0xff] }
 0x512   :  { %v15602_v61 = vxor.u32 2147483648, %v15601_v57  ;;  %v15604_v16 = vxor.u32 2147483648, %v15603_v26  ;;  %vm7677_vm11 = vcmp.lt.s32.totalorder %v7676_v2, 2  ;;  %vm7678_vm13 = vcmp.eq.s32.totalorder %v7676_v2, 0  ;;  %10179 = vst [vmem:[#allocation8 + $0x68] sm:$0xff] %v7375_v21  ;;  %v15625_v43 = vld [vmem:[#allocation81_spill] sm:$0xff] }
 0x513   :  { %v15606_v18 = vxor.u32 2147483648, %v15605_v19  ;;  %vm7681_vm10 = vcmp.eq.s32.totalorder %v7676_v2, 2  ;;  %v7831_v52 = vand.u32 3, %v7830_v8  ;;  %vm15609_vm1 = vweird.f32 %v15608_v15 }
 0x514   :  { %v7525_v27 = vsel %vm7523_vm4, %v15603_v26, %v15602_v61  ;;  %v7528_v20 = vsel %vm7526_vm0, %v15604_v16, %v15601_v57  ;;  %v15610_v30 = vxor.u32 2147483648, %v15607_v34  ;;  %v7985_v40 = vadd.s32 3, %v15611_v32  ;;  %v15629_v57 = vld [vmem:[#allocation84_spill] sm:$0xff] }
 0x515   :  { %v7529_v49 = vsel %vm7522_vm12, %v7525_v27, %v7528_v20  ;;  %v7680_v50 = vsel %vm7678_vm13, %v15607_v34, %v15606_v18  ;;  %v8140_v39 = vadd.s32 3, %v15612_v63  ;;  %vm7832_vm6 = vcmp.lt.s32.totalorder %v7831_v52, 2  ;;  %v15630_v27 = vld [vmem:[#allocation29_spill] sm:$0xff]  ;;  %v15633_v18 = vld [vmem:[#allocation92_spill] sm:$0xff] }
 0x516   :  { %v7530_v62 = vsel %vm15609_vm1, nan, %v7529_v49  ;;  %v7683_v55 = vsel %vm7681_vm10, %v15610_v30, %v15605_v19  ;;  %vm7833_vm5 = vcmp.eq.s32.totalorder %v7831_v52, 0  ;;  %vm7836_vm3 = vcmp.eq.s32.totalorder %v7831_v52, 2  ;;  %v15634_v52 = vld [vmem:[#allocation30_spill] sm:$0xff] }
 0x517   :  { %v7684_v10 = vsel %vm7677_vm11, %v7680_v50, %v7683_v55  ;;  %10180 = vst [vmem:[#allocation8 + $0x70] sm:$0xff] %v7530_v62  ;;  %vm15614_vm7 = vweird.f32 %v15613_v5  ;;  %v15616_v60 = vxor.u32 2147483648, %v15615_v9  ;;  %v15618_v42 = vxor.u32 2147483648, %v15617_v28  ;;  %v15636_v62 = vld [vmem:[#allocation88_spill] sm:$0xff]  ;;  %v15638_v55 = vld [vmem:[#allocation87_spill] sm:$0xff] }
 0x518   :  { %v7685_v12 = vsel %vm15614_vm7, nan, %v7684_v10  ;;  %v7986_v11 = vand.u32 3, %v7985_v40  ;;  %v8141_v37 = vand.u32 3, %v8140_v39  ;;  %v8295_v58 = vadd.s32 3, %v15619_v35  ;;  %v15640_v5 = vld [vmem:[#allocation31_spill] sm:$0xff]  ;;  %v15647_v35 = vld [vmem:[#allocation32_spill] sm:$0xff] }
 0x519   :  { %v7835_v23 = vsel %vm7833_vm5, %v15617_v28, %v15616_v60  ;;  %v7838_v54 = vsel %vm7836_vm3, %v15618_v42, %v15615_v9  ;;  %v8450_v51 = vadd.s32 3, %v15620_v46  ;;  %10181 = vst [vmem:[#allocation8 + $0x78] sm:$0xff] %v7685_v12  ;;  %vm15622_vm8 = vweird.f32 %v15621_v41  ;;  %v15642_v9 = vld [vmem:[#allocation91_spill] sm:$0xff]  ;;  %v15644_v28 = vld [vmem:[#allocation90_spill] sm:$0xff]  ;;  %v15651_v41 = vld [vmem:[#allocation93_spill] sm:$0xff] }
 0x51a   :  { %v7839_v1 = vsel %vm7832_vm6, %v7835_v23, %v7838_v54  ;;  %vm7987_vm9 = vcmp.lt.s32.totalorder %v7986_v11, 2  ;;  %vm7988_vm14 = vcmp.eq.s32.totalorder %v7986_v11, 0  ;;  %vm7991_vm12 = vcmp.eq.s32.totalorder %v7986_v11, 2  ;;  %v15646_v11 = vld [vmem:[#allocation95_spill] sm:$0xff]  ;;  %v15649_v46 = vld [vmem:[#allocation94_spill] sm:$0xff] }
 0x51b   :  { %v7840_v17 = vsel %vm15622_vm8, nan, %v7839_v1  ;;  %v15624_v45 = vxor.u32 2147483648, %v15623_v0  ;;  %v15626_v2 = vxor.u32 2147483648, %v15625_v43  ;;  %vm8142_vm4 = vcmp.lt.s32.totalorder %v8141_v37, 2 }
 0x51c   :  { %vm8143_vm0 = vcmp.eq.s32.totalorder %v8141_v37, 0  ;;  %10182 = vst [vmem:[#allocation8 + $0x80] sm:$0xff] %v7840_v17  ;;  %v15628_v21 = vxor.u32 2147483648, %v15627_v4  ;;  %vm8146_vm11 = vcmp.eq.s32.totalorder %v8141_v37, 2  ;;  %v8296_v26 = vand.u32 3, %v8295_v58 }
 0x51d   :  { %v7990_v22 = vsel %vm7988_vm14, %v15625_v43, %v15624_v45  ;;  %v7993_v48 = vsel %vm7991_vm12, %v15626_v2, %v15623_v0  ;;  %vm15631_vm13 = vweird.f32 %v15630_v27  ;;  %v15632_v20 = vxor.u32 2147483648, %v15629_v57  ;;  %v15653_v2 = vld [vmem:[#allocation98_spill] sm:$0xff]  ;;  %v15658_v27 = vld [vmem:[#allocation97_spill] sm:$0xff] }
 0x51e   :  { %v7994_v8 = vsel %vm7987_vm9, %v7990_v22, %v7993_v48  ;;  %v8145_v61 = vsel %vm8143_vm0, %v15629_v57, %v15628_v21  ;;  %v8451_v19 = vand.u32 3, %v8450_v51  ;;  %v8605_v34 = vadd.s32 3, %v15633_v18  ;;  %v15655_v21 = vld [vmem:[#allocation104_spill] sm:$0xff] }
 0x51f   :  { %v7995_v16 = vsel %vm15631_vm13, nan, %v7994_v8  ;;  %v8148_v49 = vsel %vm8146_vm11, %v15632_v20, %v15627_v4  ;;  %vm8297_vm10 = vcmp.lt.s32.totalorder %v8296_v26, 2  ;;  %vm8298_vm1 = vcmp.eq.s32.totalorder %v8296_v26, 0  ;;  %v15654_v8 = vld [vmem:[#allocation101_spill] sm:$0xff]  ;;  %v15660_v20 = vld [vmem:[#allocation96_spill] sm:$0xff] }
 0x520   :  { %v8149_v50 = vsel %vm8142_vm4, %v8145_v61, %v8148_v49  ;;  %vm8301_vm6 = vcmp.eq.s32.totalorder %v8296_v26, 2  ;;  %10183 = vst [vmem:[#allocation8 + $0x88] sm:$0xff] %v7995_v16  ;;  %vm15635_vm5 = vweird.f32 %v15634_v52  ;;  %v15637_v30 = vxor.u32 2147483648, %v15636_v62  ;;  %v15656_v61 = vld [vmem:[#allocation33_spill] sm:$0xff] }
 0x521   :  { %v8150_v15 = vsel %vm15635_vm5, nan, %v8149_v50  ;;  %v15639_v40 = vxor.u32 2147483648, %v15638_v55  ;;  %vm8452_vm3 = vcmp.lt.s32.totalorder %v8451_v19, 2  ;;  %vm8453_vm7 = vcmp.eq.s32.totalorder %v8451_v19, 0 }
 0x522   :  { %v8300_v32 = vsel %vm8298_vm1, %v15638_v55, %v15637_v30  ;;  %vm8456_vm8 = vcmp.eq.s32.totalorder %v8451_v19, 2  ;;  %v8606_v10 = vand.u32 3, %v8605_v34  ;;  %10184 = vst [vmem:[#allocation8 + $0x90] sm:$0xff] %v8150_v15  ;;  %vm15641_vm9 = vweird.f32 %v15640_v5  ;;  %v15663_v55 = vld [vmem:[#allocation109_spill] sm:$0xff]  ;;  %v15668_v5 = vld [vmem:[#allocation99_spill] sm:$0xff] }
 0x523   :  { %v8303_v63 = vsel %vm8301_vm6, %v15639_v40, %v15636_v62  ;;  %v15643_v60 = vxor.u32 2147483648, %v15642_v9  ;;  %v15645_v42 = vxor.u32 2147483648, %v15644_v28  ;;  %v8760_v1 = vadd.s32 3, %v15646_v11  ;;  %v15662_v62 = vld [vmem:[#allocation107_spill] sm:$0xff]  ;;  %v15664_v40 = vld [vmem:[#allocation34_spill] sm:$0xff] }
 0x524   :  { %v8304_v39 = vsel %vm8297_vm10, %v8300_v32, %v8303_v63  ;;  %vm8607_vm14 = vcmp.lt.s32.totalorder %v8606_v10, 2  ;;  %vm8608_vm12 = vcmp.eq.s32.totalorder %v8606_v10, 0  ;;  %vm8611_vm4 = vcmp.eq.s32.totalorder %v8606_v10, 2 }
 0x525   :  { %v8305_v12 = vsel %vm15641_vm9, nan, %v8304_v39  ;;  %v8455_v23 = vsel %vm8453_vm7, %v15644_v28, %v15643_v60  ;;  %v8458_v54 = vsel %vm8456_vm8, %v15645_v42, %v15642_v9  ;;  %vm15648_vm0 = vweird.f32 %v15647_v35  ;;  %v15666_v39 = vld [vmem:[#allocation100_spill] sm:$0xff] }
 0x526   :  { %v8459_v37 = vsel %vm8452_vm3, %v8455_v23, %v8458_v54  ;;  %10185 = vst [vmem:[#allocation8 + $0x98] sm:$0xff] %v8305_v12  ;;  %v15650_v51 = vxor.u32 2147483648, %v15649_v46  ;;  %v15652_v0 = vxor.u32 2147483648, %v15651_v41  ;;  %v8761_v43 = vand.u32 3, %v8760_v1  ;;  %v15670_v23 = vld [vmem:[#allocation103_spill] sm:$0xff]  ;;  %v15672_v54 = vld [vmem:[#allocation102_spill] sm:$0xff] }
 0x527   :  { %v8460_v58 = vsel %vm15648_vm0, nan, %v8459_v37  ;;  %v8915_v48 = vadd.s32 3, %v15653_v2  ;;  %v9070_v4 = vadd.s32 3, %v15654_v8  ;;  %v9225_v57 = vadd.s32 3, %v15655_v21  ;;  %v15673_v1 = vld [vmem:[#allocation35_spill] sm:$0xff]  ;;  %v15680_v2 = vld [vmem:[#allocation36_spill] sm:$0xff] }
 0x528   :  { %v8610_v17 = vsel %vm8608_vm12, %v15651_v41, %v15650_v51  ;;  %v8613_v45 = vsel %vm8611_vm4, %v15652_v0, %v15649_v46  ;;  %10186 = vst [vmem:[#allocation8 + $0xa0] sm:$0xff] %v8460_v58  ;;  %vm15657_vm11 = vweird.f32 %v15656_v61  ;;  %vm8762_vm13 = vcmp.lt.s32.totalorder %v8761_v43, 2  ;;  %v15676_v51 = vld [vmem:[#allocation106_spill] sm:$0xff]  ;;  %v15683_v61 = vld [vmem:[#allocation37_spill] sm:$0xff] }
 0x529   :  { %v8614_v22 = vsel %vm8607_vm14, %v8610_v17, %v8613_v45  ;;  %vm8763_vm10 = vcmp.eq.s32.totalorder %v8761_v43, 0  ;;  %vm8766_vm1 = vcmp.eq.s32.totalorder %v8761_v43, 2  ;;  %v15659_v16 = vxor.u32 2147483648, %v15658_v27  ;;  %v15678_v17 = vld [vmem:[#allocation105_spill] sm:$0xff]  ;;  %v15682_v21 = vld [vmem:[#allocation42_spill] sm:$0xff] }
 0x52a   :  { %v8615_v26 = vsel %vm15657_vm11, nan, %v8614_v22  ;;  %v15661_v19 = vxor.u32 2147483648, %v15660_v20  ;;  %v8916_v34 = vand.u32 3, %v8915_v48  ;;  %v9071_v50 = vand.u32 3, %v9070_v4 }
 0x52b   :  { %v8765_v49 = vsel %vm8763_vm10, %v15660_v20, %v15659_v16  ;;  %10187 = vst [vmem:[#allocation8 + $0xa8] sm:$0xff] %v8615_v26  ;;  %v9226_v15 = vand.u32 3, %v9225_v57  ;;  %v9380_v30 = vadd.s32 3, %v15662_v62  ;;  %v9535_v32 = vadd.s32 3, %v15663_v55  ;;  %v15687_v20 = vld [vmem:[#allocation41_spill] sm:$0xff]  ;;  %v15692_v55 = vld [vmem:[#allocation38_spill] sm:$0xff] }
 0x52c   :  { %v8768_v18 = vsel %vm8766_vm1, %v15661_v19, %v15658_v27  ;;  %vm15665_vm6 = vweird.f32 %v15664_v40  ;;  %vm8917_vm5 = vcmp.lt.s32.totalorder %v8916_v34, 2  ;;  %vm8918_vm3 = vcmp.eq.s32.totalorder %v8916_v34, 0  ;;  %v15685_v27 = vld [vmem:[#allocation108_spill] sm:$0xff] }
 0x52d   :  { %v8769_v52 = vsel %vm8762_vm13, %v8765_v49, %v8768_v18  ;;  %vm8921_vm7 = vcmp.eq.s32.totalorder %v8916_v34, 2  ;;  %v15667_v10 = vxor.u32 2147483648, %v15666_v39  ;;  %v15669_v9 = vxor.u32 2147483648, %v15668_v5 }
 0x52e   :  { %v8770_v63 = vsel %vm15665_vm6, nan, %v8769_v52  ;;  %vm9072_vm8 = vcmp.lt.s32.totalorder %v9071_v50, 2  ;;  %vm9073_vm9 = vcmp.eq.s32.totalorder %v9071_v50, 0  ;;  %v15671_v42 = vxor.u32 2147483648, %v15670_v23 }
 0x52f   :  { %v8920_v12 = vsel %vm8918_vm3, %v15668_v5, %v15667_v10  ;;  %v8923_v60 = vsel %vm8921_vm7, %v15669_v9, %v15666_v39  ;;  %10188 = vst [vmem:[#allocation8 + $0xb0] sm:$0xff] %v8770_v63  ;;  %vm9076_vm14 = vcmp.eq.s32.totalorder %v9071_v50, 2  ;;  %vm9227_vm12 = vcmp.lt.s32.totalorder %v9226_v15, 2  ;;  %v15689_v50 = vld [vmem:[#allocation111_spill] sm:$0xff] }
 0x530   :  { %v8924_v28 = vsel %vm8917_vm5, %v8920_v12, %v8923_v60  ;;  %v9075_v11 = vsel %vm9073_vm9, %v15672_v54, %v15671_v42  ;;  %vm15674_vm4 = vweird.f32 %v15673_v1  ;;  %v15675_v35 = vxor.u32 2147483648, %v15672_v54  ;;  %v15695_v12 = vld [vmem:[#allocation39_spill] sm:$0xff]  ;;  %v15697_v60 = vld [vmem:[#allocation112_spill] sm:$0xff] }
 0x531   :  { %v8925_v37 = vsel %vm15674_vm4, nan, %v8924_v28  ;;  %vm9228_vm0 = vcmp.eq.s32.totalorder %v9226_v15, 0  ;;  %vm9231_vm11 = vcmp.eq.s32.totalorder %v9226_v15, 2  ;;  %v15677_v41 = vxor.u32 2147483648, %v15676_v51  ;;  %v15691_v15 = vld [vmem:[#allocation110_spill] sm:$0xff] }
 0x532   :  { %v9078_v58 = vsel %vm9076_vm14, %v15675_v35, %v15670_v23  ;;  %v15679_v45 = vxor.u32 2147483648, %v15678_v17  ;;  %v9381_v22 = vand.u32 3, %v9380_v30  ;;  %10189 = vst [vmem:[#allocation8 + $0xb8] sm:$0xff] %v8925_v37  ;;  %vm15681_vm13 = vweird.f32 %v15680_v2  ;;  %v15699_v23 = vld [vmem:[#allocation43_spill] sm:$0xff]  ;;  %v15701_v35 = vld [vmem:[#allocation40_spill] sm:$0xff] }
 0x533   :  { %v9079_v46 = vsel %vm9072_vm8, %v9075_v11, %v9078_v58  ;;  %v9230_v0 = vsel %vm9228_vm0, %v15678_v17, %v15677_v41  ;;  %v9536_v4 = vand.u32 3, %v9535_v32  ;;  %v9690_v57 = vadd.s32 3, %v15682_v21 }
 0x534   :  { %v9233_v43 = vsel %vm9231_vm11, %v15679_v45, %v15676_v51  ;;  %v9080_v48 = vsel %vm15681_vm13, nan, %v9079_v46  ;;  %vm15684_vm10 = vweird.f32 %v15683_v61  ;;  %vm9382_vm1 = vcmp.lt.s32.totalorder %v9381_v22, 2 }
 0x535   :  { %v9234_v8 = vsel %vm9227_vm12, %v9230_v0, %v9233_v43  ;;  %vm9383_vm6 = vcmp.eq.s32.totalorder %v9381_v22, 0  ;;  %vm9386_vm5 = vcmp.eq.s32.totalorder %v9381_v22, 2  ;;  %10190 = vst [vmem:[#allocation8 + $0xc0] sm:$0xff] %v9080_v48  ;;  %v15686_v16 = vxor.u32 2147483648, %v15685_v27 }
 0x536   :  { %v9235_v26 = vsel %vm15684_vm10, nan, %v9234_v8  ;;  %v15688_v19 = vxor.u32 2147483648, %v15687_v20  ;;  %vm9537_vm3 = vcmp.lt.s32.totalorder %v9536_v4, 2  ;;  %vm9538_vm7 = vcmp.eq.s32.totalorder %v9536_v4, 0 }
 0x537   :  { %v9385_v49 = vsel %vm9383_vm6, %v15687_v20, %v15686_v16  ;;  %10191 = vst [vmem:[#allocation8 + $0xc8] sm:$0xff] %v9235_v26  ;;  %v15690_v52 = vxor.u32 2147483648, %v15689_v50  ;;  %vm9541_vm8 = vcmp.eq.s32.totalorder %v9536_v4, 2  ;;  %v9691_v30 = vand.u32 3, %v9690_v57 }
 0x538   :  { %v9388_v18 = vsel %vm9386_vm5, %v15688_v19, %v15685_v27  ;;  %vm15693_vm9 = vweird.f32 %v15692_v55  ;;  %v15694_v40 = vxor.u32 2147483648, %v15691_v15  ;;  %v9845_v39 = vadd.s32 3, %v14542_v25 }
 0x539   :  { %v9389_v34 = vsel %vm9382_vm1, %v9385_v49, %v9388_v18  ;;  %v9540_v62 = vsel %vm9538_vm7, %v15691_v15, %v15690_v52  ;;  %v10000_v10 = vadd.s32 3, %v14641_v14  ;;  %vm9692_vm14 = vcmp.lt.s32.totalorder %v9691_v30, 2 }
 0x53a   :  { %v9390_v32 = vsel %vm15693_vm9, nan, %v9389_v34  ;;  %v9543_v63 = vsel %vm9541_vm8, %v15694_v40, %v15689_v50  ;;  %vm9693_vm12 = vcmp.eq.s32.totalorder %v9691_v30, 0  ;;  %vm9696_vm4 = vcmp.eq.s32.totalorder %v9691_v30, 2 }
 0x53b   :  { %v9544_v5 = vsel %vm9537_vm3, %v9540_v62, %v9543_v63  ;;  %10192 = vst [vmem:[#allocation8 + $0xd0] sm:$0xff] %v9390_v32  ;;  %vm15696_vm0 = vweird.f32 %v15695_v12  ;;  %v15698_v28 = vxor.u32 2147483648, %v15697_v60  ;;  %v15700_v54 = vxor.u32 2147483648, %v15699_v23 }
 0x53c   :  { %v9545_v9 = vsel %vm15696_vm0, nan, %v9544_v5  ;;  %v9846_v1 = vand.u32 3, %v9845_v39  ;;  %v10001_v37 = vand.u32 3, %v10000_v10  ;;  %v10155_v14 = vadd.s32 3, %v14667_v44 }
 0x53d   :  { %v9695_v42 = vsel %vm9693_vm12, %v15699_v23, %v15698_v28  ;;  %v9698_v11 = vsel %vm9696_vm4, %v15700_v54, %v15697_v60  ;;  %10193 = vst [vmem:[#allocation8 + $0xd8] sm:$0xff] %v9545_v9  ;;  %vm15702_vm11 = vweird.f32 %v15701_v35  ;;  %v15703_v51 = vxor.u32 2147483648, %v14584_v33 }
 0x53e   :  { %v9699_v25 = vsel %vm9692_vm14, %v9695_v42, %v9698_v11  ;;  %vm9847_vm13 = vcmp.lt.s32.totalorder %v9846_v1, 2  ;;  %vm9848_vm10 = vcmp.eq.s32.totalorder %v9846_v1, 0  ;;  %vm9851_vm1 = vcmp.eq.s32.totalorder %v9846_v1, 2 }
 0x53f   :  { %v9700_v58 = vsel %vm15702_vm11, nan, %v9699_v25  ;;  %v9850_v46 = vsel %vm9848_vm10, %v14584_v33, %v4859_v31  ;;  %v9853_v41 = vsel %vm9851_vm1, %v15703_v51, %v14588_v36  ;;  %vm10002_vm6 = vcmp.lt.s32.totalorder %v10001_v37, 2 }
 0x540   :  { %vm10003_vm5 = vcmp.eq.s32.totalorder %v10001_v37, 0  ;;  %10194 = vst [vmem:[#allocation8 + $0xe0] sm:$0xff] %v9700_v58  ;;  %v9854_v17 = vsel %vm9847_vm13, %v9850_v46, %v9853_v41  ;;  %vm10006_vm3 = vcmp.eq.s32.totalorder %v10001_v37, 2  ;;  %v10156_v0 = vand.u32 3, %v10155_v14 }
 0x541   :  { %v10005_v44 = vsel %vm10003_vm5, %v14644_v53, %v5013_v56  ;;  %v9855_v45 = vsel %vm4855_vm2, nan, %v9854_v17  ;;  %v10008_v31 = vsel %vm10006_vm3, %v5016_v13, %v14647_v59  ;;  %vm15704_vm14 = vweird.f32 %v15506_v3 }
 0x542   :  { %v10009_v33 = vsel %vm10002_vm6, %v10005_v44, %v10008_v31  ;;  %vm10157_vm7 = vcmp.lt.s32.totalorder %v10156_v0, 2  ;;  %vm10158_vm8 = vcmp.eq.s32.totalorder %v10156_v0, 0  ;;  %vm10161_vm9 = vcmp.eq.s32.totalorder %v10156_v0, 2  ;;  %10195 = vst [vmem:[#allocation8 + $0xe8] sm:$0xff] %v9855_v45 }
 0x543   :  { %v10010_v36 = vsel %vm15704_vm14, nan, %v10009_v33  ;;  %v10160_v29 = vsel %vm10158_vm8, %v14772_v47, %v5167_v7  ;;  %v10163_v53 = vsel %vm10161_vm9, %v5170_v6, %v14784_v38 }
 0x544   :  { %v10164_v59 = vsel %vm10157_vm7, %v10160_v29, %v10163_v53  ;;  %10196 = vst [vmem:[#allocation8 + $0xf0] sm:$0xff] %v10010_v36 }
 0x545   :  { %v10165_v13 = vsel %vm5163_vm15, nan, %v10164_v59 }
 0x546   :  { %10197 = vst [vmem:[#allocation8 + $0xf8] sm:$0xff] %v10165_v13 }
 0x547   :  { %10223 = dma.vmem_to_hbm [thread:$0]  %s10216_s27, 4096, %s10218_s30, [#allocation9], %s10557_s2, %s10557_s2, %s10558_s25  }
 0x548   :  { %10543 = dma.done.wait [#allocation4], 4096  }
 0x549   :  { %10544 = vsyncadd [#allocation4], 4294963200 }
 0x54a   :  { %10545 = dma.done.wait [#allocation9], 4096  }
 0x54b   :  { %10546 = vsyncadd [#allocation9], 4294963200 }
 0x54c   :  { %10232 = vsyncpa [#allocation3], 1 }
 0x54d   :  { %10233 = vsyncpa [#allocation6], 1 }
 0x54e   :  { %10234 = vsyncpa [#allocation4], 1 }
 0x54f   :  { %10235 = vsyncpa [#allocation9], 1 }

</bundles_post_ra>
